<compile_context>
chip_gen: v7x
topology: tpu7x:2x2x1
jax: 0.10.0
libtpu: 0.0.40
codegen_flags: <defaults>
</compile_context>

<pallas_src>
import functools

import jax
import jax.numpy as jnp
from jax.experimental import pallas as pl
from jax.experimental.pallas import tpu as pltpu

EPS = 1e-5          # nn.BatchNorm2d default
LANE = 128          # channel padding target (lane-dense tiles)
N_LAYERS = 6


def _round_up(x, m):
    return ((x + m - 1) // m) * m


def _vmem_spec():
    return pl.BlockSpec(memory_space=pltpu.MemorySpace.VMEM)


# ----------------------------- Pallas kernels ------------------------------

def conv0_pool_kernel(taps_ref, w0_ref, o_ref, *, sp):
    """conv0 (Cin=1) + ReLU + AvgPool2d((3,4)) for one example.

    taps: (1, 9, 12*sp) f32  tap k; last axis ordered (pool phase p, padded row r)
    w0:   (9, Cp)       bf16
    o:    (1, sp, Cp)   f32  pooled conv0 output, zero-padded spatial row layout
    """
    # HBM layout is lane-dense (spatial on lanes); transpose in-kernel so the
    # matmul LHS is (M, 9) with K on lanes.  bf16 operands -> MXU fast path.
    slab = jnp.transpose(taps_ref[0], (1, 0)).astype(jnp.bfloat16)    # (12*sp, 9)
    y = jnp.dot(slab, w0_ref[...], preferred_element_type=jnp.float32)
    y = jnp.maximum(y, 0.0)
    # AvgPool2d((3,4)): the 12 pool phases are contiguous, sp-aligned row slabs.
    acc = y[0:sp, :]
    for p in range(1, 12):
        acc = acc + y[p * sp:(p + 1) * sp, :]
    o_ref[0] = acc * (1.0 / 12.0)


def fused_res_kernel(x0_ref, w_ref, mask_ref, feat_ref, xpad_ref, old_ref, *,
                     batch, ho, wo, wp, sp, q, n_layers):
    """6 x [3x3 conv + ReLU (+ residual) + BatchNorm] + final spatial mean.

    x0:   (Np, Cp) f32       pooled conv0 output, Np = batch*sp, padded row layout
    w:    (6, 3, 3*Cp, Cp) bf16   conv weights grouped by dh; row = (dw+1)*Cp + cin
    mask: (Np, 1) f32        1.0 at real spatial positions, 0.0 at halo/pad rows
    feat: (batch, Cp) f32    per-example spatial mean of the last BN output
    xpad: VMEM (Np + 2q, Cp) bf16 scratch (current activation + global halo)
    old:  VMEM (Np, Cp) f32  pre-BN residual carry (torch `old_x`)
    """
    Np = batch * sp
    Cp = x0_ref.shape[1]
    inv_n = 1.0 / (batch * ho * wo)             # real-position count for BN stats

    # Zero only the halo extension; the interior is fully overwritten (review #9).
    xpad_ref[0:q, :] = jnp.zeros((q, Cp), jnp.bfloat16)
    xpad_ref[q + Np:q + Np + q, :] = jnp.zeros((q, Cp), jnp.bfloat16)
    xpad_ref[q:q + Np, :] = x0_ref[...].astype(jnp.bfloat16)
    old_ref[...] = x0_ref[...]

    maskf = mask_ref[...]                       # (Np, 1), hoisted

    x_cur = None
    for layer in range(n_layers):
        # 3 accumulating K = 3*Cp dots (group by dh) -> only a (Np, 3*Cp) bf16
        # slab is live at any point; taps are plain shifted row slices (halos 0).
        acc = None
        for g, dh in enumerate((-1, 0, 1)):
            base = q + dh * wp
            slab = jnp.concatenate(
                [xpad_ref[base - 1:base - 1 + Np, :],
                 xpad_ref[base:base + Np, :],
                 xpad_ref[base + 1:base + 1 + Np, :]], axis=1)        # (Np, 3Cp)
            part = jnp.dot(slab, w_ref[layer, g],
                           preferred_element_type=jnp.float32)
            acc = part if acc is None else acc + part

        y = jnp.maximum(acc, 0.0) * maskf       # ReLU; halo/pad rows forced to 0

        if (layer + 1) % 2 == 0:                # torch: i > 0 and i % 2 == 0
            y = y + old_ref[...]
            old_ref[...] = y                    # residual carry is PRE-BN

        # BatchNorm2d(affine=False), training batch stats, f32, var clamped >= 0.
        mean = jnp.sum(y, axis=0, keepdims=True) * inv_n
        mean_sq = jnp.sum(y * y, axis=0, keepdims=True) * inv_n
        var = jnp.maximum(mean_sq - mean * mean, 0.0)
        x_cur = ((y - mean) * jax.lax.rsqrt(var + EPS)) * maskf   # re-zero halos

        if layer < n_layers - 1:
            xpad_ref[q:q + Np, :] = x_cur.astype(jnp.bfloat16)

    # x.view(B, C, -1).mean(2): halo rows are zero, so one aligned reshape + sum.
    feat = x_cur.reshape(batch, sp, Cp).sum(axis=1) * (1.0 / (ho * wo))
    feat_ref[...] = feat


# ------------------------------ pallas_call wrappers ------------------------

def _call_conv0_pool(taps, w0, sp, cp):
    b = taps.shape[0]
    m = taps.shape[2]
    kern = functools.partial(conv0_pool_kernel, sp=sp)
    return pl.pallas_call(
        kern,
        out_shape=jax.ShapeDtypeStruct((b, sp, cp), jnp.float32),
        grid=(b,),
        in_specs=[pl.BlockSpec((1, 9, m), lambda i: (i, 0, 0)),
                  pl.BlockSpec((9, cp), lambda i: (0, 0))],
        out_specs=pl.BlockSpec((1, sp, cp), lambda i: (i, 0, 0)),
        compiler_params=pltpu.CompilerParams(
            dimension_semantics=("parallel",),
            vmem_limit_bytes=32 * 1024 * 1024),
    )(taps, w0)


def _call_fused(x0_flat, w_stack, maskf, *, batch, ho, wo, wp, sp):
    n_rows, cp = x0_flat.shape
    q = _round_up(wp + 1, 8)                    # aligned global halo extension
    kern = functools.partial(fused_res_kernel, batch=batch, ho=ho, wo=wo,
                             wp=wp, sp=sp, q=q, n_layers=w_stack.shape[0])
    return pl.pallas_call(
        kern,
        out_shape=jax.ShapeDtypeStruct((batch, cp), jnp.float32),
        in_specs=[_vmem_spec(), _vmem_spec(), _vmem_spec()],
        out_specs=_vmem_spec(),
        scratch_shapes=[pltpu.VMEM((n_rows + 2 * q, cp), jnp.bfloat16),
                        pltpu.VMEM((n_rows, cp), jnp.float32)],
        # 40 MiB: ample for these shapes, leaves headroom under v7x's 64 MiB.
        compiler_params=pltpu.CompilerParams(vmem_limit_bytes=40 * 1024 * 1024),
    )(x0_flat, w_stack, maskf)


# ----------------------------------- params ---------------------------------

def init_params(hidden_size, key):
    """Deterministic synthetic logical weights (shapes match Res8.__init__)."""
    c = hidden_size
    keys = jax.random.split(key, 7)
    w0 = 0.1 * jax.random.normal(keys[0], (3, 3, 1, c), jnp.float32)
    ws = [0.1 * jax.random.normal(keys[i + 1], (3, 3, c, c), jnp.float32)
          for i in range(N_LAYERS)]
    return {"w0": w0, "ws": ws}


def pack_params(params):
    """Pad channels to a lane-dense width, group taps by dh, store bf16."""
    c = params["w0"].shape[-1]
    cp = max(LANE, _round_up(c, LANE))
    w0k = jnp.pad(params["w0"].reshape(9, c),
                  ((0, 0), (0, cp - c))).astype(jnp.bfloat16)          # (9, Cp)
    wsk = []
    for w in params["ws"]:                                             # (3,3,C,C)
        wpad = jnp.pad(w, ((0, 0), (0, 0), (0, cp - c), (0, cp - c)))
        wsk.append(wpad.reshape(3, 3 * cp, cp))    # [dh][(dw+1)*Cp + cin, cout]
    return {"w0": w0k, "ws": jnp.stack(wsk, axis=0).astype(jnp.bfloat16)}


# ---------------------------- host-side glue (tiny) --------------------------

def _build_conv0_taps(x, ho, wo, wp, sp):
    """x: (B, H, W) 1-channel input -> (B, 9, 12*sp) f32, lane-dense.

    Last axis ordered (pool phase p = kh2*4 + kw2, padded spatial row r); halo
    and alignment-pad rows carry zeros, so the pooled conv0 output lands directly
    in the residual stage's zero-padded row layout.
    """
    b, _, _ = x.shape
    hc, wc = 3 * ho, 4 * wo
    xp = jnp.pad(x, ((0, 0), (1, 1), (1, 1)))
    taps = []
    for kh in range(3):
        for kw in range(3):
            t = xp[:, kh:kh + hc, kw:kw + wc]                          # (B,hc,wc)
            t = t.reshape(b, ho, 3, wo, 4)
            t = jnp.transpose(t, (0, 2, 4, 1, 3))                      # (B,3,4,ho,wo)
            t = jnp.pad(t, ((0, 0), (0, 0), (0, 0), (1, 1), (1, 1)))   # halos
            t = t.reshape(b, 12, (ho + 2) * (wo + 2))
            t = jnp.pad(t, ((0, 0), (0, 0), (0, sp - (ho + 2) * (wo + 2))))
            taps.append(t)                                             # (B,12,sp)
    return jnp.stack(taps, axis=1).reshape(b, 9, 12 * sp)


def _interior_mask(batch, ho, wo, wp, sp):
    r = jnp.arange(sp, dtype=jnp.int32)
    hp, wq = r // wp, r % wp
    m = ((hp >= 1) & (hp <= ho) & (wq >= 1) & (wq <= wo)).astype(jnp.float32)
    return jnp.tile(m, (batch,))[:, None]                              # (B*sp, 1)


# ----------------------------------- forward --------------------------------

def res8_forward(packed, audio_signal, length=None, *, out_channels):
    """audio_signal: (B, T, F) float32.  Returns ((B, 1, C), length)."""
    b, t, fd = audio_signal.shape
    cp = packed["w0"].shape[1]
    # torch: unsqueeze(1).permute(0,1,3,2) -> NCHW (B,1,F,T); channels-last here.
    x = jnp.transpose(audio_signal, (0, 2, 1)).astype(jnp.float32)     # (B, F, T)
    h, w = fd, t
    ho, wo = h // 3, w // 4
    wp = wo + 2                                  # padded row width
    sp = _round_up((ho + 2) * wp, 8)             # padded rows per example

    taps = _build_conv0_taps(x, ho, wo, wp, sp)          # (B, 9, 12*sp)
    x0 = _call_conv0_pool(taps, packed["w0"], sp, cp)    # (B, sp, Cp)
    maskf = _interior_mask(b, ho, wo, wp, sp)            # (B*sp, 1)
    feats = _call_fused(x0.reshape(b * sp, cp), packed["ws"], maskf,
                        batch=b, ho=ho, wo=wo, wp=wp, sp=sp)           # (B, Cp)
    return feats[:, :out_channels][:, None, :], length


# ------------------------- pure-JAX reference (check) ------------------------

def _ref_forward(params, audio):
    b, t, fd = audio.shape
    c = params["w0"].shape[-1]
    x = jnp.transpose(audio, (0, 2, 1))[..., None].astype(jnp.float32)

    def conv(xin, w):
        return jax.lax.conv_general_dilated(
            xin, w, (1, 1), ((1, 1), (1, 1)),
            dimension_numbers=("NHWC", "HWIO", "NHWC"))

    y = jax.nn.relu(conv(x, params["w0"]))
    h, w = fd, t
    ho, wo = h // 3, w // 4
    y = y[:, :3 * ho, :4 * wo, :].reshape(b, ho, 3, wo, 4, c).mean(axis=(2, 4))
    old, xc = y, y
    for i in range(1, N_LAYERS + 1):
        yi = jax.nn.relu(conv(xc, params["ws"][i - 1]))
        if i % 2 == 0:
            yi = yi + old
            old = yi
        m = yi.mean(axis=(0, 1, 2), keepdims=True)
        v = ((yi - m) ** 2).mean(axis=(0, 1, 2), keepdims=True)
        xc = (yi - m) * jax.lax.rsqrt(v + EPS)
    return xc.reshape(b, ho * wo, c).mean(axis=1)[:, None, :]


if __name__ == "__main__":
    key = jax.random.PRNGKey(0)
    kp, kx = jax.random.split(key)

    hidden_size = 32
    B, T, Fd = 2, 16, 12                     # pool -> (4, 4) spatial

    params = init_params(hidden_size, kp)    # logical f32 weights (reference)
    packed = pack_params(params)             # padded, grouped, bf16 kernel weights
    audio = jax.random.normal(kx, (B, T, Fd), jnp.float32)

    fwd = jax.jit(functools.partial(res8_forward, out_channels=hidden_size))
    out, length = fwd(packed, audio)
    out = jax.block_until_ready(out)

    assert out.shape == (B, 1, hidden_size), out.shape
    ref = _ref_forward(params, audio)
    # Tolerance sized for bf16 MXU operands (f32 accumulation) across 7 matmuls.
    err = float(jnp.max(jnp.abs(out - ref)))
    assert bool(jnp.allclose(out, ref, atol=3e-2, rtol=3e-2)), err

    print("KERNEL_OK")
</pallas_src>

<mosaic_0001>
module attributes {stable_mosaic.version = 11 : i64} {
  func.func @conv0_pool_kernel(%arg0: i32, %arg1: memref<1x9x480xf32, #tpu.memory_space<vmem>>, %arg2: memref<9x128xbf16, #tpu.memory_space<vmem>>, %arg3: memref<1x40x128xf32, #tpu.memory_space<vmem>>) attributes {dimension_semantics = [#tpu.dimension_semantics<parallel>], iteration_bounds = array<i64: 2>, scalar_prefetch = 0 : i64, scratch_operands = 0 : i64, tpu.core_type = #tpu.core_type<tc>, window_params = [{transform_indices = @transform_0, window_bounds = array<i64: 1, 9, 480>}, {pipeline_mode = #tpu.pipeline_mode<synchronous>, transform_indices = @transform_1, window_bounds = array<i64: 9, 128>}, {transform_indices = @transform_2, window_bounds = array<i64: 1, 40, 128>}]} {
    %c0 = arith.constant 0 : index
    %c0_0 = arith.constant 0 : index
    %c0_1 = arith.constant 0 : index
    %0 = vector.load %arg1[%c0, %c0_0, %c0_1] : memref<1x9x480xf32, #tpu.memory_space<vmem>>, vector<1x9x480xf32>
    %1 = vector.shape_cast %0 : vector<1x9x480xf32> to vector<9x480xf32>
    %2 = tpu.transpose %1, [1, 0] : vector<9x480xf32> -> vector<480x9xf32>
    %3 = arith.truncf %2 : vector<480x9xf32> to vector<480x9xbf16>
    %c0_2 = arith.constant 0 : index
    %c0_3 = arith.constant 0 : index
    %4 = vector.load %arg2[%c0_2, %c0_3] : memref<9x128xbf16, #tpu.memory_space<vmem>>, vector<9x128xbf16>
    %cst = arith.constant dense<0.000000e+00> : vector<480x128xf32>
    %5 = tpu.matmul %3, %4, %cst {dimension_numbers = #tpu.dot_dimension_numbers<[1], [0], [0], [1], [0, 0, 1, 1], [], []>} : vector<480x9xbf16>, vector<9x128xbf16>, vector<480x128xf32> -> vector<480x128xf32>
    %cst_4 = arith.constant 0.000000e+00 : f32
    %6 = vector.broadcast %cst_4 : f32 to vector<480x128xf32>
    %7 = arith.maximumf %5, %6 : vector<480x128xf32>
    %8 = vector.extract_strided_slice %7 {offsets = [0, 0], sizes = [40, 128], strides = [1, 1]} : vector<480x128xf32> to vector<40x128xf32>
    %9 = vector.extract_strided_slice %7 {offsets = [40, 0], sizes = [40, 128], strides = [1, 1]} : vector<480x128xf32> to vector<40x128xf32>
    %10 = arith.addf %8, %9 : vector<40x128xf32>
    %11 = vector.extract_strided_slice %7 {offsets = [80, 0], sizes = [40, 128], strides = [1, 1]} : vector<480x128xf32> to vector<40x128xf32>
    %12 = arith.addf %10, %11 : vector<40x128xf32>
    %13 = vector.extract_strided_slice %7 {offsets = [120, 0], sizes = [40, 128], strides = [1, 1]} : vector<480x128xf32> to vector<40x128xf32>
    %14 = arith.addf %12, %13 : vector<40x128xf32>
    %15 = vector.extract_strided_slice %7 {offsets = [160, 0], sizes = [40, 128], strides = [1, 1]} : vector<480x128xf32> to vector<40x128xf32>
    %16 = arith.addf %14, %15 : vector<40x128xf32>
    %17 = vector.extract_strided_slice %7 {offsets = [200, 0], sizes = [40, 128], strides = [1, 1]} : vector<480x128xf32> to vector<40x128xf32>
    %18 = arith.addf %16, %17 : vector<40x128xf32>
    %19 = vector.extract_strided_slice %7 {offsets = [240, 0], sizes = [40, 128], strides = [1, 1]} : vector<480x128xf32> to vector<40x128xf32>
    %20 = arith.addf %18, %19 : vector<40x128xf32>
    %21 = vector.extract_strided_slice %7 {offsets = [280, 0], sizes = [40, 128], strides = [1, 1]} : vector<480x128xf32> to vector<40x128xf32>
    %22 = arith.addf %20, %21 : vector<40x128xf32>
    %23 = vector.extract_strided_slice %7 {offsets = [320, 0], sizes = [40, 128], strides = [1, 1]} : vector<480x128xf32> to vector<40x128xf32>
    %24 = arith.addf %22, %23 : vector<40x128xf32>
    %25 = vector.extract_strided_slice %7 {offsets = [360, 0], sizes = [40, 128], strides = [1, 1]} : vector<480x128xf32> to vector<40x128xf32>
    %26 = arith.addf %24, %25 : vector<40x128xf32>
    %27 = vector.extract_strided_slice %7 {offsets = [400, 0], sizes = [40, 128], strides = [1, 1]} : vector<480x128xf32> to vector<40x128xf32>
    %28 = arith.addf %26, %27 : vector<40x128xf32>
    %29 = vector.extract_strided_slice %7 {offsets = [440, 0], sizes = [40, 128], strides = [1, 1]} : vector<480x128xf32> to vector<40x128xf32>
    %30 = arith.addf %28, %29 : vector<40x128xf32>
    %cst_5 = arith.constant 0.0833333358 : f32
    %31 = vector.broadcast %cst_5 : f32 to vector<40x128xf32>
    %32 = arith.mulf %30, %31 : vector<40x128xf32>
    %c0_6 = arith.constant 0 : index
    %c0_7 = arith.constant 0 : index
    %c0_8 = arith.constant 0 : index
    %33 = vector.load %arg3[%c0_6, %c0_7, %c0_8] : memref<1x40x128xf32, #tpu.memory_space<vmem>>, vector<1x40x128xf32>
    %34 = vector.shape_cast %33 : vector<1x40x128xf32> to vector<40x128xf32>
    %35 = vector.shape_cast %32 : vector<40x128xf32> to vector<1x40x128xf32>
    tpu.vector_store %arg3[%c0_6, %c0_7, %c0_8], %35 {strides = array<i32>} : memref<1x40x128xf32, #tpu.memory_space<vmem>>, vector<1x40x128xf32>,
    return
  }
  func.func @transform_0(%arg0: i32) -> (i32, i32, i32) {
    %c0_i32 = arith.constant 0 : i32
    %c0_i32_0 = arith.constant 0 : i32
    %c0_i32_1 = arith.constant 0 : i32
    return %arg0, %c0_i32, %c0_i32_0 : i32, i32, i32
  }
  func.func @transform_1(%arg0: i32) -> (i32, i32) {
    %c0_i32 = arith.constant 0 : i32
    %c0_i32_0 = arith.constant 0 : i32
    %c0_i32_1 = arith.constant 0 : i32
    return %c0_i32, %c0_i32_0 : i32, i32
  }
  func.func @transform_2(%arg0: i32) -> (i32, i32, i32) {
    %c0_i32 = arith.constant 0 : i32
    %c0_i32_0 = arith.constant 0 : i32
    %c0_i32_1 = arith.constant 0 : i32
    return %arg0, %c0_i32, %c0_i32_0 : i32, i32, i32
  }
}

module attributes {stable_mosaic.version = 11 : i64} {
  func.func @fused_res_kernel(%arg0: memref<80x128xf32, #tpu.memory_space<vmem>>, %arg1: memref<6x3x384x128xbf16, #tpu.memory_space<vmem>>, %arg2: memref<80x1xf32, #tpu.memory_space<vmem>>, %arg3: memref<2x128xf32, #tpu.memory_space<vmem>>, %arg4: memref<96x128xbf16, #tpu.memory_space<vmem>>, %arg5: memref<80x128xf32, #tpu.memory_space<vmem>>) attributes {dimension_semantics = [], scalar_prefetch = 0 : i64, scratch_operands = 2 : i64, tpu.core_type = #tpu.core_type<tc>} {
    %cst = arith.constant 0.000000e+00 : bf16
    %0 = vector.broadcast %cst : bf16 to vector<8x128xbf16>
    %c0 = arith.constant 0 : index
    %c0_0 = arith.constant 0 : index
    %1 = vector.load %arg4[%c0, %c0_0] : memref<96x128xbf16, #tpu.memory_space<vmem>>, vector<8x128xbf16>
    tpu.vector_store %arg4[%c0, %c0_0], %0 {strides = array<i32>} : memref<96x128xbf16, #tpu.memory_space<vmem>>, vector<8x128xbf16>,
    %cst_1 = arith.constant 0.000000e+00 : bf16
    %2 = vector.broadcast %cst_1 : bf16 to vector<8x128xbf16>
    %c88 = arith.constant 88 : index
    %c0_2 = arith.constant 0 : index
    %3 = vector.load %arg4[%c88, %c0_2] : memref<96x128xbf16, #tpu.memory_space<vmem>>, vector<8x128xbf16>
    tpu.vector_store %arg4[%c88, %c0_2], %2 {strides = array<i32>} : memref<96x128xbf16, #tpu.memory_space<vmem>>, vector<8x128xbf16>,
    %c0_3 = arith.constant 0 : index
    %c0_4 = arith.constant 0 : index
    %4 = vector.load %arg0[%c0_3, %c0_4] : memref<80x128xf32, #tpu.memory_space<vmem>>, vector<80x128xf32>
    %5 = arith.truncf %4 : vector<80x128xf32> to vector<80x128xbf16>
    %c8 = arith.constant 8 : index
    %c0_5 = arith.constant 0 : index
    %6 = vector.load %arg4[%c8, %c0_5] : memref<96x128xbf16, #tpu.memory_space<vmem>>, vector<80x128xbf16>
    tpu.vector_store %arg4[%c8, %c0_5], %5 {strides = array<i32>} : memref<96x128xbf16, #tpu.memory_space<vmem>>, vector<80x128xbf16>,
    %c0_6 = arith.constant 0 : index
    %c0_7 = arith.constant 0 : index
    %7 = vector.load %arg0[%c0_6, %c0_7] : memref<80x128xf32, #tpu.memory_space<vmem>>, vector<80x128xf32>
    %c0_8 = arith.constant 0 : index
    %c0_9 = arith.constant 0 : index
    %8 = vector.load %arg5[%c0_8, %c0_9] : memref<80x128xf32, #tpu.memory_space<vmem>>, vector<80x128xf32>
    tpu.vector_store %arg5[%c0_8, %c0_9], %7 {strides = array<i32>} : memref<80x128xf32, #tpu.memory_space<vmem>>, vector<80x128xf32>,
    %c0_10 = arith.constant 0 : index
    %c0_11 = arith.constant 0 : index
    %9 = vector.load %arg2[%c0_10, %c0_11] : memref<80x1xf32, #tpu.memory_space<vmem>>, vector<80x1xf32>
    %c1 = arith.constant 1 : index
    %c0_12 = arith.constant 0 : index
    %10 = vector.load %arg4[%c1, %c0_12] : memref<96x128xbf16, #tpu.memory_space<vmem>>, vector<80x128xbf16>
    %c2 = arith.constant 2 : index
    %c0_13 = arith.constant 0 : index
    %11 = vector.load %arg4[%c2, %c0_13] : memref<96x128xbf16, #tpu.memory_space<vmem>>, vector<80x128xbf16>
    %c3 = arith.constant 3 : index
    %c0_14 = arith.constant 0 : index
    %12 = vector.load %arg4[%c3, %c0_14] : memref<96x128xbf16, #tpu.memory_space<vmem>>, vector<80x128xbf16>
    %13 = tpu.concatenate %10, %11, %12 in 1 : vector<80x128xbf16>, vector<80x128xbf16>, vector<80x128xbf16> -> vector<80x384xbf16>
    %c0_15 = arith.constant 0 : index
    %c0_16 = arith.constant 0 : index
    %c0_17 = arith.constant 0 : index
    %c0_18 = arith.constant 0 : index
    %14 = vector.load %arg1[%c0_15, %c0_16, %c0_17, %c0_18] : memref<6x3x384x128xbf16, #tpu.memory_space<vmem>>, vector<1x1x384x128xbf16>
    %15 = vector.shape_cast %14 : vector<1x1x384x128xbf16> to vector<384x128xbf16>
    %cst_19 = arith.constant dense<0.000000e+00> : vector<80x128xf32>
    %16 = tpu.matmul %13, %15, %cst_19 {dimension_numbers = #tpu.dot_dimension_numbers<[1], [0], [0], [1], [0, 0, 1, 1], [], []>} : vector<80x384xbf16>, vector<384x128xbf16>, vector<80x128xf32> -> vector<80x128xf32>
    %c7 = arith.constant 7 : index
    %c0_20 = arith.constant 0 : index
    %17 = vector.load %arg4[%c7, %c0_20] : memref<96x128xbf16, #tpu.memory_space<vmem>>, vector<80x128xbf16>
    %c8_21 = arith.constant 8 : index
    %c0_22 = arith.constant 0 : index
    %18 = vector.load %arg4[%c8_21, %c0_22] : memref<96x128xbf16, #tpu.memory_space<vmem>>, vector<80x128xbf16>
    %c9 = arith.constant 9 : index
    %c0_23 = arith.constant 0 : index
    %19 = vector.load %arg4[%c9, %c0_23] : memref<96x128xbf16, #tpu.memory_space<vmem>>, vector<80x128xbf16>
    %20 = tpu.concatenate %17, %18, %19 in 1 : vector<80x128xbf16>, vector<80x128xbf16>, vector<80x128xbf16> -> vector<80x384xbf16>
    %c0_24 = arith.constant 0 : index
    %c1_25 = arith.constant 1 : index
    %c0_26 = arith.constant 0 : index
    %c0_27 = arith.constant 0 : index
    %21 = vector.load %arg1[%c0_24, %c1_25, %c0_26, %c0_27] : memref<6x3x384x128xbf16, #tpu.memory_space<vmem>>, vector<1x1x384x128xbf16>
    %22 = vector.shape_cast %21 : vector<1x1x384x128xbf16> to vector<384x128xbf16>
    %cst_28 = arith.constant dense<0.000000e+00> : vector<80x128xf32>
    %23 = tpu.matmul %20, %22, %cst_28 {dimension_numbers = #tpu.dot_dimension_numbers<[1], [0], [0], [1], [0, 0, 1, 1], [], []>} : vector<80x384xbf16>, vector<384x128xbf16>, vector<80x128xf32> -> vector<80x128xf32>
    %24 = arith.addf %16, %23 : vector<80x128xf32>
    %c13 = arith.constant 13 : index
    %c0_29 = arith.constant 0 : index
    %25 = vector.load %arg4[%c13, %c0_29] : memref<96x128xbf16, #tpu.memory_space<vmem>>, vector<80x128xbf16>
    %c14 = arith.constant 14 : index
    %c0_30 = arith.constant 0 : index
    %26 = vector.load %arg4[%c14, %c0_30] : memref<96x128xbf16, #tpu.memory_space<vmem>>, vector<80x128xbf16>
    %c15 = arith.constant 15 : index
    %c0_31 = arith.constant 0 : index
    %27 = vector.load %arg4[%c15, %c0_31] : memref<96x128xbf16, #tpu.memory_space<vmem>>, vector<80x128xbf16>
    %28 = tpu.concatenate %25, %26, %27 in 1 : vector<80x128xbf16>, vector<80x128xbf16>, vector<80x128xbf16> -> vector<80x384xbf16>
    %c0_32 = arith.constant 0 : index
    %c2_33 = arith.constant 2 : index
    %c0_34 = arith.constant 0 : index
    %c0_35 = arith.constant 0 : index
    %29 = vector.load %arg1[%c0_32, %c2_33, %c0_34, %c0_35] : memref<6x3x384x128xbf16, #tpu.memory_space<vmem>>, vector<1x1x384x128xbf16>
    %30 = vector.shape_cast %29 : vector<1x1x384x128xbf16> to vector<384x128xbf16>
    %cst_36 = arith.constant dense<0.000000e+00> : vector<80x128xf32>
    %31 = tpu.matmul %28, %30, %cst_36 {dimension_numbers = #tpu.dot_dimension_numbers<[1], [0], [0], [1], [0, 0, 1, 1], [], []>} : vector<80x384xbf16>, vector<384x128xbf16>, vector<80x128xf32> -> vector<80x128xf32>
    %32 = arith.addf %24, %31 : vector<80x128xf32>
    %cst_37 = arith.constant 0.000000e+00 : f32
    %33 = vector.broadcast %cst_37 : f32 to vector<80x128xf32>
    %34 = arith.maximumf %32, %33 : vector<80x128xf32>
    %35 = vector.broadcast %9 : vector<80x1xf32> to vector<80x128xf32>
    %36 = arith.mulf %34, %35 : vector<80x128xf32>
    %cst_38 = arith.constant dense<0.000000e+00> : vector<128xf32>
    %37 = vector.multi_reduction <add>, %36, %cst_38 [0] : vector<80x128xf32> to vector<128xf32>
    %38 = vector.shape_cast %37 : vector<128xf32> to vector<1x128xf32>
    %cst_39 = arith.constant 3.125000e-02 : f32
    %39 = vector.broadcast %cst_39 : f32 to vector<1x128xf32>
    %40 = arith.mulf %38, %39 : vector<1x128xf32>
    %41 = arith.mulf %36, %36 : vector<80x128xf32>
    %cst_40 = arith.constant dense<0.000000e+00> : vector<128xf32>
    %42 = vector.multi_reduction <add>, %41, %cst_40 [0] : vector<80x128xf32> to vector<128xf32>
    %43 = vector.shape_cast %42 : vector<128xf32> to vector<1x128xf32>
    %cst_41 = arith.constant 3.125000e-02 : f32
    %44 = vector.broadcast %cst_41 : f32 to vector<1x128xf32>
    %45 = arith.mulf %43, %44 : vector<1x128xf32>
    %46 = arith.mulf %40, %40 : vector<1x128xf32>
    %47 = arith.subf %45, %46 : vector<1x128xf32>
    %cst_42 = arith.constant 0.000000e+00 : f32
    %48 = vector.broadcast %cst_42 : f32 to vector<1x128xf32>
    %49 = arith.maximumf %47, %48 : vector<1x128xf32>
    %50 = vector.broadcast %40 : vector<1x128xf32> to vector<80x128xf32>
    %51 = arith.subf %36, %50 : vector<80x128xf32>
    %cst_43 = arith.constant 9.99999974E-6 : f32
    %52 = vector.broadcast %cst_43 : f32 to vector<1x128xf32>
    %53 = arith.addf %49, %52 : vector<1x128xf32>
    %54 = math.rsqrt %53 : vector<1x128xf32>
    %55 = vector.broadcast %54 : vector<1x128xf32> to vector<80x128xf32>
    %56 = arith.mulf %51, %55 : vector<80x128xf32>
    %57 = vector.broadcast %9 : vector<80x1xf32> to vector<80x128xf32>
    %58 = arith.mulf %56, %57 : vector<80x128xf32>
    %59 = arith.truncf %58 : vector<80x128xf32> to vector<80x128xbf16>
    %c8_44 = arith.constant 8 : index
    %c0_45 = arith.constant 0 : index
    %60 = vector.load %arg4[%c8_44, %c0_45] : memref<96x128xbf16, #tpu.memory_space<vmem>>, vector<80x128xbf16>
    tpu.vector_store %arg4[%c8_44, %c0_45], %59 {strides = array<i32>} : memref<96x128xbf16, #tpu.memory_space<vmem>>, vector<80x128xbf16>,
    %c1_46 = arith.constant 1 : index
    %c0_47 = arith.constant 0 : index
    %61 = vector.load %arg4[%c1_46, %c0_47] : memref<96x128xbf16, #tpu.memory_space<vmem>>, vector<80x128xbf16>
    %c2_48 = arith.constant 2 : index
    %c0_49 = arith.constant 0 : index
    %62 = vector.load %arg4[%c2_48, %c0_49] : memref<96x128xbf16, #tpu.memory_space<vmem>>, vector<80x128xbf16>
    %c3_50 = arith.constant 3 : index
    %c0_51 = arith.constant 0 : index
    %63 = vector.load %arg4[%c3_50, %c0_51] : memref<96x128xbf16, #tpu.memory_space<vmem>>, vector<80x128xbf16>
    %64 = tpu.concatenate %61, %62, %63 in 1 : vector<80x128xbf16>, vector<80x128xbf16>, vector<80x128xbf16> -> vector<80x384xbf16>
    %c1_52 = arith.constant 1 : index
    %c0_53 = arith.constant 0 : index
    %c0_54 = arith.constant 0 : index
    %c0_55 = arith.constant 0 : index
    %65 = vector.load %arg1[%c1_52, %c0_53, %c0_54, %c0_55] : memref<6x3x384x128xbf16, #tpu.memory_space<vmem>>, vector<1x1x384x128xbf16>
    %66 = vector.shape_cast %65 : vector<1x1x384x128xbf16> to vector<384x128xbf16>
    %cst_56 = arith.constant dense<0.000000e+00> : vector<80x128xf32>
    %67 = tpu.matmul %64, %66, %cst_56 {dimension_numbers = #tpu.dot_dimension_numbers<[1], [0], [0], [1], [0, 0, 1, 1], [], []>} : vector<80x384xbf16>, vector<384x128xbf16>, vector<80x128xf32> -> vector<80x128xf32>
    %c7_57 = arith.constant 7 : index
    %c0_58 = arith.constant 0 : index
    %68 = vector.load %arg4[%c7_57, %c0_58] : memref<96x128xbf16, #tpu.memory_space<vmem>>, vector<80x128xbf16>
    %c8_59 = arith.constant 8 : index
    %c0_60 = arith.constant 0 : index
    %69 = vector.load %arg4[%c8_59, %c0_60] : memref<96x128xbf16, #tpu.memory_space<vmem>>, vector<80x128xbf16>
    %c9_61 = arith.constant 9 : index
    %c0_62 = arith.constant 0 : index
    %70 = vector.load %arg4[%c9_61, %c0_62] : memref<96x128xbf16, #tpu.memory_space<vmem>>, vector<80x128xbf16>
    %71 = tpu.concatenate %68, %69, %70 in 1 : vector<80x128xbf16>, vector<80x128xbf16>, vector<80x128xbf16> -> vector<80x384xbf16>
    %c1_63 = arith.constant 1 : index
    %c1_64 = arith.constant 1 : index
    %c0_65 = arith.constant 0 : index
    %c0_66 = arith.constant 0 : index
    %72 = vector.load %arg1[%c1_63, %c1_64, %c0_65, %c0_66] : memref<6x3x384x128xbf16, #tpu.memory_space<vmem>>, vector<1x1x384x128xbf16>
    %73 = vector.shape_cast %72 : vector<1x1x384x128xbf16> to vector<384x128xbf16>
    %cst_67 = arith.constant dense<0.000000e+00> : vector<80x128xf32>
    %74 = tpu.matmul %71, %73, %cst_67 {dimension_numbers = #tpu.dot_dimension_numbers<[1], [0], [0], [1], [0, 0, 1, 1], [], []>} : vector<80x384xbf16>, vector<384x128xbf16>, vector<80x128xf32> -> vector<80x128xf32>
    %75 = arith.addf %67, %74 : vector<80x128xf32>
    %c13_68 = arith.constant 13 : index
    %c0_69 = arith.constant 0 : index
    %76 = vector.load %arg4[%c13_68, %c0_69] : memref<96x128xbf16, #tpu.memory_space<vmem>>, vector<80x128xbf16>
    %c14_70 = arith.constant 14 : index
    %c0_71 = arith.constant 0 : index
    %77 = vector.load %arg4[%c14_70, %c0_71] : memref<96x128xbf16, #tpu.memory_space<vmem>>, vector<80x128xbf16>
    %c15_72 = arith.constant 15 : index
    %c0_73 = arith.constant 0 : index
    %78 = vector.load %arg4[%c15_72, %c0_73] : memref<96x128xbf16, #tpu.memory_space<vmem>>, vector<80x128xbf16>
    %79 = tpu.concatenate %76, %77, %78 in 1 : vector<80x128xbf16>, vector<80x128xbf16>, vector<80x128xbf16> -> vector<80x384xbf16>
    %c1_74 = arith.constant 1 : index
    %c2_75 = arith.constant 2 : index
    %c0_76 = arith.constant 0 : index
    %c0_77 = arith.constant 0 : index
    %80 = vector.load %arg1[%c1_74, %c2_75, %c0_76, %c0_77] : memref<6x3x384x128xbf16, #tpu.memory_space<vmem>>, vector<1x1x384x128xbf16>
    %81 = vector.shape_cast %80 : vector<1x1x384x128xbf16> to vector<384x128xbf16>
    %cst_78 = arith.constant dense<0.000000e+00> : vector<80x128xf32>
    %82 = tpu.matmul %79, %81, %cst_78 {dimension_numbers = #tpu.dot_dimension_numbers<[1], [0], [0], [1], [0, 0, 1, 1], [], []>} : vector<80x384xbf16>, vector<384x128xbf16>, vector<80x128xf32> -> vector<80x128xf32>
    %83 = arith.addf %75, %82 : vector<80x128xf32>
    %cst_79 = arith.constant 0.000000e+00 : f32
    %84 = vector.broadcast %cst_79 : f32 to vector<80x128xf32>
    %85 = arith.maximumf %83, %84 : vector<80x128xf32>
    %86 = vector.broadcast %9 : vector<80x1xf32> to vector<80x128xf32>
    %87 = arith.mulf %85, %86 : vector<80x128xf32>
    %c0_80 = arith.constant 0 : index
    %c0_81 = arith.constant 0 : index
    %88 = vector.load %arg5[%c0_80, %c0_81] : memref<80x128xf32, #tpu.memory_space<vmem>>, vector<80x128xf32>
    %89 = arith.addf %87, %88 : vector<80x128xf32>
    %c0_82 = arith.constant 0 : index
    %c0_83 = arith.constant 0 : index
    %90 = vector.load %arg5[%c0_82, %c0_83] : memref<80x128xf32, #tpu.memory_space<vmem>>, vector<80x128xf32>
    tpu.vector_store %arg5[%c0_82, %c0_83], %89 {strides = array<i32>} : memref<80x128xf32, #tpu.memory_space<vmem>>, vector<80x128xf32>,
    %cst_84 = arith.constant dense<0.000000e+00> : vector<128xf32>
    %91 = vector.multi_reduction <add>, %89, %cst_84 [0] : vector<80x128xf32> to vector<128xf32>
    %92 = vector.shape_cast %91 : vector<128xf32> to vector<1x128xf32>
    %cst_85 = arith.constant 3.125000e-02 : f32
    %93 = vector.broadcast %cst_85 : f32 to vector<1x128xf32>
    %94 = arith.mulf %92, %93 : vector<1x128xf32>
    %95 = arith.mulf %89, %89 : vector<80x128xf32>
    %cst_86 = arith.constant dense<0.000000e+00> : vector<128xf32>
    %96 = vector.multi_reduction <add>, %95, %cst_86 [0] : vector<80x128xf32> to vector<128xf32>
    %97 = vector.shape_cast %96 : vector<128xf32> to vector<1x128xf32>
    %cst_87 = arith.constant 3.125000e-02 : f32
    %98 = vector.broadcast %cst_87 : f32 to vector<1x128xf32>
    %99 = arith.mulf %97, %98 : vector<1x128xf32>
    %100 = arith.mulf %94, %94 : vector<1x128xf32>
    %101 = arith.subf %99, %100 : vector<1x128xf32>
    %cst_88 = arith.constant 0.000000e+00 : f32
    %102 = vector.broadcast %cst_88 : f32 to vector<1x128xf32>
    %103 = arith.maximumf %101, %102 : vector<1x128xf32>
    %104 = vector.broadcast %94 : vector<1x128xf32> to vector<80x128xf32>
    %105 = arith.subf %89, %104 : vector<80x128xf32>
    %cst_89 = arith.constant 9.99999974E-6 : f32
    %106 = vector.broadcast %cst_89 : f32 to vector<1x128xf32>
    %107 = arith.addf %103, %106 : vector<1x128xf32>
    %108 = math.rsqrt %107 : vector<1x128xf32>
    %109 = vector.broadcast %108 : vector<1x128xf32> to vector<80x128xf32>
    %110 = arith.mulf %105, %109 : vector<80x128xf32>
    %111 = vector.broadcast %9 : vector<80x1xf32> to vector<80x128xf32>
    %112 = arith.mulf %110, %111 : vector<80x128xf32>
    %113 = arith.truncf %112 : vector<80x128xf32> to vector<80x128xbf16>
    %c8_90 = arith.constant 8 : index
    %c0_91 = arith.constant 0 : index
    %114 = vector.load %arg4[%c8_90, %c0_91] : memref<96x128xbf16, #tpu.memory_space<vmem>>, vector<80x128xbf16>
    tpu.vector_store %arg4[%c8_90, %c0_91], %113 {strides = array<i32>} : memref<96x128xbf16, #tpu.memory_space<vmem>>, vector<80x128xbf16>,
    %c1_92 = arith.constant 1 : index
    %c0_93 = arith.constant 0 : index
    %115 = vector.load %arg4[%c1_92, %c0_93] : memref<96x128xbf16, #tpu.memory_space<vmem>>, vector<80x128xbf16>
    %c2_94 = arith.constant 2 : index
    %c0_95 = arith.constant 0 : index
    %116 = vector.load %arg4[%c2_94, %c0_95] : memref<96x128xbf16, #tpu.memory_space<vmem>>, vector<80x128xbf16>
    %c3_96 = arith.constant 3 : index
    %c0_97 = arith.constant 0 : index
    %117 = vector.load %arg4[%c3_96, %c0_97] : memref<96x128xbf16, #tpu.memory_space<vmem>>, vector<80x128xbf16>
    %118 = tpu.concatenate %115, %116, %117 in 1 : vector<80x128xbf16>, vector<80x128xbf16>, vector<80x128xbf16> -> vector<80x384xbf16>
    %c2_98 = arith.constant 2 : index
    %c0_99 = arith.constant 0 : index
    %c0_100 = arith.constant 0 : index
    %c0_101 = arith.constant 0 : index
    %119 = vector.load %arg1[%c2_98, %c0_99, %c0_100, %c0_101] : memref<6x3x384x128xbf16, #tpu.memory_space<vmem>>, vector<1x1x384x128xbf16>
    %120 = vector.shape_cast %119 : vector<1x1x384x128xbf16> to vector<384x128xbf16>
    %cst_102 = arith.constant dense<0.000000e+00> : vector<80x128xf32>
    %121 = tpu.matmul %118, %120, %cst_102 {dimension_numbers = #tpu.dot_dimension_numbers<[1], [0], [0], [1], [0, 0, 1, 1], [], []>} : vector<80x384xbf16>, vector<384x128xbf16>, vector<80x128xf32> -> vector<80x128xf32>
    %c7_103 = arith.constant 7 : index
    %c0_104 = arith.constant 0 : index
    %122 = vector.load %arg4[%c7_103, %c0_104] : memref<96x128xbf16, #tpu.memory_space<vmem>>, vector<80x128xbf16>
    %c8_105 = arith.constant 8 : index
    %c0_106 = arith.constant 0 : index
    %123 = vector.load %arg4[%c8_105, %c0_106] : memref<96x128xbf16, #tpu.memory_space<vmem>>, vector<80x128xbf16>
    %c9_107 = arith.constant 9 : index
    %c0_108 = arith.constant 0 : index
    %124 = vector.load %arg4[%c9_107, %c0_108] : memref<96x128xbf16, #tpu.memory_space<vmem>>, vector<80x128xbf16>
    %125 = tpu.concatenate %122, %123, %124 in 1 : vector<80x128xbf16>, vector<80x128xbf16>, vector<80x128xbf16> -> vector<80x384xbf16>
    %c2_109 = arith.constant 2 : index
    %c1_110 = arith.constant 1 : index
    %c0_111 = arith.constant 0 : index
    %c0_112 = arith.constant 0 : index
    %126 = vector.load %arg1[%c2_109, %c1_110, %c0_111, %c0_112] : memref<6x3x384x128xbf16, #tpu.memory_space<vmem>>, vector<1x1x384x128xbf16>
    %127 = vector.shape_cast %126 : vector<1x1x384x128xbf16> to vector<384x128xbf16>
    %cst_113 = arith.constant dense<0.000000e+00> : vector<80x128xf32>
    %128 = tpu.matmul %125, %127, %cst_113 {dimension_numbers = #tpu.dot_dimension_numbers<[1], [0], [0], [1], [0, 0, 1, 1], [], []>} : vector<80x384xbf16>, vector<384x128xbf16>, vector<80x128xf32> -> vector<80x128xf32>
    %129 = arith.addf %121, %128 : vector<80x128xf32>
    %c13_114 = arith.constant 13 : index
    %c0_115 = arith.constant 0 : index
    %130 = vector.load %arg4[%c13_114, %c0_115] : memref<96x128xbf16, #tpu.memory_space<vmem>>, vector<80x128xbf16>
    %c14_116 = arith.constant 14 : index
    %c0_117 = arith.constant 0 : index
    %131 = vector.load %arg4[%c14_116, %c0_117] : memref<96x128xbf16, #tpu.memory_space<vmem>>, vector<80x128xbf16>
    %c15_118 = arith.constant 15 : index
    %c0_119 = arith.constant 0 : index
    %132 = vector.load %arg4[%c15_118, %c0_119] : memref<96x128xbf16, #tpu.memory_space<vmem>>, vector<80x128xbf16>
    %133 = tpu.concatenate %130, %131, %132 in 1 : vector<80x128xbf16>, vector<80x128xbf16>, vector<80x128xbf16> -> vector<80x384xbf16>
    %c2_120 = arith.constant 2 : index
    %c2_121 = arith.constant 2 : index
    %c0_122 = arith.constant 0 : index
    %c0_123 = arith.constant 0 : index
    %134 = vector.load %arg1[%c2_120, %c2_121, %c0_122, %c0_123] : memref<6x3x384x128xbf16, #tpu.memory_space<vmem>>, vector<1x1x384x128xbf16>
    %135 = vector.shape_cast %134 : vector<1x1x384x128xbf16> to vector<384x128xbf16>
    %cst_124 = arith.constant dense<0.000000e+00> : vector<80x128xf32>
    %136 = tpu.matmul %133, %135, %cst_124 {dimension_numbers = #tpu.dot_dimension_numbers<[1], [0], [0], [1], [0, 0, 1, 1], [], []>} : vector<80x384xbf16>, vector<384x128xbf16>, vector<80x128xf32> -> vector<80x128xf32>
    %137 = arith.addf %129, %136 : vector<80x128xf32>
    %cst_125 = arith.constant 0.000000e+00 : f32
    %138 = vector.broadcast %cst_125 : f32 to vector<80x128xf32>
    %139 = arith.maximumf %137, %138 : vector<80x128xf32>
    %140 = vector.broadcast %9 : vector<80x1xf32> to vector<80x128xf32>
    %141 = arith.mulf %139, %140 : vector<80x128xf32>
    %cst_126 = arith.constant dense<0.000000e+00> : vector<128xf32>
    %142 = vector.multi_reduction <add>, %141, %cst_126 [0] : vector<80x128xf32> to vector<128xf32>
    %143 = vector.shape_cast %142 : vector<128xf32> to vector<1x128xf32>
    %cst_127 = arith.constant 3.125000e-02 : f32
    %144 = vector.broadcast %cst_127 : f32 to vector<1x128xf32>
    %145 = arith.mulf %143, %144 : vector<1x128xf32>
    %146 = arith.mulf %141, %141 : vector<80x128xf32>
    %cst_128 = arith.constant dense<0.000000e+00> : vector<128xf32>
    %147 = vector.multi_reduction <add>, %146, %cst_128 [0] : vector<80x128xf32> to vector<128xf32>
    %148 = vector.shape_cast %147 : vector<128xf32> to vector<1x128xf32>
    %cst_129 = arith.constant 3.125000e-02 : f32
    %149 = vector.broadcast %cst_129 : f32 to vector<1x128xf32>
    %150 = arith.mulf %148, %149 : vector<1x128xf32>
    %151 = arith.mulf %145, %145 : vector<1x128xf32>
    %152 = arith.subf %150, %151 : vector<1x128xf32>
    %cst_130 = arith.constant 0.000000e+00 : f32
    %153 = vector.broadcast %cst_130 : f32 to vector<1x128xf32>
    %154 = arith.maximumf %152, %153 : vector<1x128xf32>
    %155 = vector.broadcast %145 : vector<1x128xf32> to vector<80x128xf32>
    %156 = arith.subf %141, %155 : vector<80x128xf32>
    %cst_131 = arith.constant 9.99999974E-6 : f32
    %157 = vector.broadcast %cst_131 : f32 to vector<1x128xf32>
    %158 = arith.addf %154, %157 : vector<1x128xf32>
    %159 = math.rsqrt %158 : vector<1x128xf32>
    %160 = vector.broadcast %159 : vector<1x128xf32> to vector<80x128xf32>
    %161 = arith.mulf %156, %160 : vector<80x128xf32>
    %162 = vector.broadcast %9 : vector<80x1xf32> to vector<80x128xf32>
    %163 = arith.mulf %161, %162 : vector<80x128xf32>
    %164 = arith.truncf %163 : vector<80x128xf32> to vector<80x128xbf16>
    %c8_132 = arith.constant 8 : index
    %c0_133 = arith.constant 0 : index
    %165 = vector.load %arg4[%c8_132, %c0_133] : memref<96x128xbf16, #tpu.memory_space<vmem>>, vector<80x128xbf16>
    tpu.vector_store %arg4[%c8_132, %c0_133], %164 {strides = array<i32>} : memref<96x128xbf16, #tpu.memory_space<vmem>>, vector<80x128xbf16>,
    %c1_134 = arith.constant 1 : index
    %c0_135 = arith.constant 0 : index
    %166 = vector.load %arg4[%c1_134, %c0_135] : memref<96x128xbf16, #tpu.memory_space<vmem>>, vector<80x128xbf16>
    %c2_136 = arith.constant 2 : index
    %c0_137 = arith.constant 0 : index
    %167 = vector.load %arg4[%c2_136, %c0_137] : memref<96x128xbf16, #tpu.memory_space<vmem>>, vector<80x128xbf16>
    %c3_138 = arith.constant 3 : index
    %c0_139 = arith.constant 0 : index
    %168 = vector.load %arg4[%c3_138, %c0_139] : memref<96x128xbf16, #tpu.memory_space<vmem>>, vector<80x128xbf16>
    %169 = tpu.concatenate %166, %167, %168 in 1 : vector<80x128xbf16>, vector<80x128xbf16>, vector<80x128xbf16> -> vector<80x384xbf16>
    %c3_140 = arith.constant 3 : index
    %c0_141 = arith.constant 0 : index
    %c0_142 = arith.constant 0 : index
    %c0_143 = arith.constant 0 : index
    %170 = vector.load %arg1[%c3_140, %c0_141, %c0_142, %c0_143] : memref<6x3x384x128xbf16, #tpu.memory_space<vmem>>, vector<1x1x384x128xbf16>
    %171 = vector.shape_cast %170 : vector<1x1x384x128xbf16> to vector<384x128xbf16>
    %cst_144 = arith.constant dense<0.000000e+00> : vector<80x128xf32>
    %172 = tpu.matmul %169, %171, %cst_144 {dimension_numbers = #tpu.dot_dimension_numbers<[1], [0], [0], [1], [0, 0, 1, 1], [], []>} : vector<80x384xbf16>, vector<384x128xbf16>, vector<80x128xf32> -> vector<80x128xf32>
    %c7_145 = arith.constant 7 : index
    %c0_146 = arith.constant 0 : index
    %173 = vector.load %arg4[%c7_145, %c0_146] : memref<96x128xbf16, #tpu.memory_space<vmem>>, vector<80x128xbf16>
    %c8_147 = arith.constant 8 : index
    %c0_148 = arith.constant 0 : index
    %174 = vector.load %arg4[%c8_147, %c0_148] : memref<96x128xbf16, #tpu.memory_space<vmem>>, vector<80x128xbf16>
    %c9_149 = arith.constant 9 : index
    %c0_150 = arith.constant 0 : index
    %175 = vector.load %arg4[%c9_149, %c0_150] : memref<96x128xbf16, #tpu.memory_space<vmem>>, vector<80x128xbf16>
    %176 = tpu.concatenate %173, %174, %175 in 1 : vector<80x128xbf16>, vector<80x128xbf16>, vector<80x128xbf16> -> vector<80x384xbf16>
    %c3_151 = arith.constant 3 : index
    %c1_152 = arith.constant 1 : index
    %c0_153 = arith.constant 0 : index
    %c0_154 = arith.constant 0 : index
    %177 = vector.load %arg1[%c3_151, %c1_152, %c0_153, %c0_154] : memref<6x3x384x128xbf16, #tpu.memory_space<vmem>>, vector<1x1x384x128xbf16>
    %178 = vector.shape_cast %177 : vector<1x1x384x128xbf16> to vector<384x128xbf16>
    %cst_155 = arith.constant dense<0.000000e+00> : vector<80x128xf32>
    %179 = tpu.matmul %176, %178, %cst_155 {dimension_numbers = #tpu.dot_dimension_numbers<[1], [0], [0], [1], [0, 0, 1, 1], [], []>} : vector<80x384xbf16>, vector<384x128xbf16>, vector<80x128xf32> -> vector<80x128xf32>
    %180 = arith.addf %172, %179 : vector<80x128xf32>
    %c13_156 = arith.constant 13 : index
    %c0_157 = arith.constant 0 : index
    %181 = vector.load %arg4[%c13_156, %c0_157] : memref<96x128xbf16, #tpu.memory_space<vmem>>, vector<80x128xbf16>
    %c14_158 = arith.constant 14 : index
    %c0_159 = arith.constant 0 : index
    %182 = vector.load %arg4[%c14_158, %c0_159] : memref<96x128xbf16, #tpu.memory_space<vmem>>, vector<80x128xbf16>
    %c15_160 = arith.constant 15 : index
    %c0_161 = arith.constant 0 : index
    %183 = vector.load %arg4[%c15_160, %c0_161] : memref<96x128xbf16, #tpu.memory_space<vmem>>, vector<80x128xbf16>
    %184 = tpu.concatenate %181, %182, %183 in 1 : vector<80x128xbf16>, vector<80x128xbf16>, vector<80x128xbf16> -> vector<80x384xbf16>
    %c3_162 = arith.constant 3 : index
    %c2_163 = arith.constant 2 : index
    %c0_164 = arith.constant 0 : index
    %c0_165 = arith.constant 0 : index
    %185 = vector.load %arg1[%c3_162, %c2_163, %c0_164, %c0_165] : memref<6x3x384x128xbf16, #tpu.memory_space<vmem>>, vector<1x1x384x128xbf16>
    %186 = vector.shape_cast %185 : vector<1x1x384x128xbf16> to vector<384x128xbf16>
    %cst_166 = arith.constant dense<0.000000e+00> : vector<80x128xf32>
    %187 = tpu.matmul %184, %186, %cst_166 {dimension_numbers = #tpu.dot_dimension_numbers<[1], [0], [0], [1], [0, 0, 1, 1], [], []>} : vector<80x384xbf16>, vector<384x128xbf16>, vector<80x128xf32> -> vector<80x128xf32>
    %188 = arith.addf %180, %187 : vector<80x128xf32>
    %cst_167 = arith.constant 0.000000e+00 : f32
    %189 = vector.broadcast %cst_167 : f32 to vector<80x128xf32>
    %190 = arith.maximumf %188, %189 : vector<80x128xf32>
    %191 = vector.broadcast %9 : vector<80x1xf32> to vector<80x128xf32>
    %192 = arith.mulf %190, %191 : vector<80x128xf32>
    %c0_168 = arith.constant 0 : index
    %c0_169 = arith.constant 0 : index
    %193 = vector.load %arg5[%c0_168, %c0_169] : memref<80x128xf32, #tpu.memory_space<vmem>>, vector<80x128xf32>
    %194 = arith.addf %192, %193 : vector<80x128xf32>
    %c0_170 = arith.constant 0 : index
    %c0_171 = arith.constant 0 : index
    %195 = vector.load %arg5[%c0_170, %c0_171] : memref<80x128xf32, #tpu.memory_space<vmem>>, vector<80x128xf32>
    tpu.vector_store %arg5[%c0_170, %c0_171], %194 {strides = array<i32>} : memref<80x128xf32, #tpu.memory_space<vmem>>, vector<80x128xf32>,
    %cst_172 = arith.constant dense<0.000000e+00> : vector<128xf32>
    %196 = vector.multi_reduction <add>, %194, %cst_172 [0] : vector<80x128xf32> to vector<128xf32>
    %197 = vector.shape_cast %196 : vector<128xf32> to vector<1x128xf32>
    %cst_173 = arith.constant 3.125000e-02 : f32
    %198 = vector.broadcast %cst_173 : f32 to vector<1x128xf32>
    %199 = arith.mulf %197, %198 : vector<1x128xf32>
    %200 = arith.mulf %194, %194 : vector<80x128xf32>
    %cst_174 = arith.constant dense<0.000000e+00> : vector<128xf32>
    %201 = vector.multi_reduction <add>, %200, %cst_174 [0] : vector<80x128xf32> to vector<128xf32>
    %202 = vector.shape_cast %201 : vector<128xf32> to vector<1x128xf32>
    %cst_175 = arith.constant 3.125000e-02 : f32
    %203 = vector.broadcast %cst_175 : f32 to vector<1x128xf32>
    %204 = arith.mulf %202, %203 : vector<1x128xf32>
    %205 = arith.mulf %199, %199 : vector<1x128xf32>
    %206 = arith.subf %204, %205 : vector<1x128xf32>
    %cst_176 = arith.constant 0.000000e+00 : f32
    %207 = vector.broadcast %cst_176 : f32 to vector<1x128xf32>
    %208 = arith.maximumf %206, %207 : vector<1x128xf32>
    %209 = vector.broadcast %199 : vector<1x128xf32> to vector<80x128xf32>
    %210 = arith.subf %194, %209 : vector<80x128xf32>
    %cst_177 = arith.constant 9.99999974E-6 : f32
    %211 = vector.broadcast %cst_177 : f32 to vector<1x128xf32>
    %212 = arith.addf %208, %211 : vector<1x128xf32>
    %213 = math.rsqrt %212 : vector<1x128xf32>
    %214 = vector.broadcast %213 : vector<1x128xf32> to vector<80x128xf32>
    %215 = arith.mulf %210, %214 : vector<80x128xf32>
    %216 = vector.broadcast %9 : vector<80x1xf32> to vector<80x128xf32>
    %217 = arith.mulf %215, %216 : vector<80x128xf32>
    %218 = arith.truncf %217 : vector<80x128xf32> to vector<80x128xbf16>
    %c8_178 = arith.constant 8 : index
    %c0_179 = arith.constant 0 : index
    %219 = vector.load %arg4[%c8_178, %c0_179] : memref<96x128xbf16, #tpu.memory_space<vmem>>, vector<80x128xbf16>
    tpu.vector_store %arg4[%c8_178, %c0_179], %218 {strides = array<i32>} : memref<96x128xbf16, #tpu.memory_space<vmem>>, vector<80x128xbf16>,
    %c1_180 = arith.constant 1 : index
    %c0_181 = arith.constant 0 : index
    %220 = vector.load %arg4[%c1_180, %c0_181] : memref<96x128xbf16, #tpu.memory_space<vmem>>, vector<80x128xbf16>
    %c2_182 = arith.constant 2 : index
    %c0_183 = arith.constant 0 : index
    %221 = vector.load %arg4[%c2_182, %c0_183] : memref<96x128xbf16, #tpu.memory_space<vmem>>, vector<80x128xbf16>
    %c3_184 = arith.constant 3 : index
    %c0_185 = arith.constant 0 : index
    %222 = vector.load %arg4[%c3_184, %c0_185] : memref<96x128xbf16, #tpu.memory_space<vmem>>, vector<80x128xbf16>
    %223 = tpu.concatenate %220, %221, %222 in 1 : vector<80x128xbf16>, vector<80x128xbf16>, vector<80x128xbf16> -> vector<80x384xbf16>
    %c4 = arith.constant 4 : index
    %c0_186 = arith.constant 0 : index
    %c0_187 = arith.constant 0 : index
    %c0_188 = arith.constant 0 : index
    %224 = vector.load %arg1[%c4, %c0_186, %c0_187, %c0_188] : memref<6x3x384x128xbf16, #tpu.memory_space<vmem>>, vector<1x1x384x128xbf16>
    %225 = vector.shape_cast %224 : vector<1x1x384x128xbf16> to vector<384x128xbf16>
    %cst_189 = arith.constant dense<0.000000e+00> : vector<80x128xf32>
    %226 = tpu.matmul %223, %225, %cst_189 {dimension_numbers = #tpu.dot_dimension_numbers<[1], [0], [0], [1], [0, 0, 1, 1], [], []>} : vector<80x384xbf16>, vector<384x128xbf16>, vector<80x128xf32> -> vector<80x128xf32>
    %c7_190 = arith.constant 7 : index
    %c0_191 = arith.constant 0 : index
    %227 = vector.load %arg4[%c7_190, %c0_191] : memref<96x128xbf16, #tpu.memory_space<vmem>>, vector<80x128xbf16>
    %c8_192 = arith.constant 8 : index
    %c0_193 = arith.constant 0 : index
    %228 = vector.load %arg4[%c8_192, %c0_193] : memref<96x128xbf16, #tpu.memory_space<vmem>>, vector<80x128xbf16>
    %c9_194 = arith.constant 9 : index
    %c0_195 = arith.constant 0 : index
    %229 = vector.load %arg4[%c9_194, %c0_195] : memref<96x128xbf16, #tpu.memory_space<vmem>>, vector<80x128xbf16>
    %230 = tpu.concatenate %227, %228, %229 in 1 : vector<80x128xbf16>, vector<80x128xbf16>, vector<80x128xbf16> -> vector<80x384xbf16>
    %c4_196 = arith.constant 4 : index
    %c1_197 = arith.constant 1 : index
    %c0_198 = arith.constant 0 : index
    %c0_199 = arith.constant 0 : index
    %231 = vector.load %arg1[%c4_196, %c1_197, %c0_198, %c0_199] : memref<6x3x384x128xbf16, #tpu.memory_space<vmem>>, vector<1x1x384x128xbf16>
    %232 = vector.shape_cast %231 : vector<1x1x384x128xbf16> to vector<384x128xbf16>
    %cst_200 = arith.constant dense<0.000000e+00> : vector<80x128xf32>
    %233 = tpu.matmul %230, %232, %cst_200 {dimension_numbers = #tpu.dot_dimension_numbers<[1], [0], [0], [1], [0, 0, 1, 1], [], []>} : vector<80x384xbf16>, vector<384x128xbf16>, vector<80x128xf32> -> vector<80x128xf32>
    %234 = arith.addf %226, %233 : vector<80x128xf32>
    %c13_201 = arith.constant 13 : index
    %c0_202 = arith.constant 0 : index
    %235 = vector.load %arg4[%c13_201, %c0_202] : memref<96x128xbf16, #tpu.memory_space<vmem>>, vector<80x128xbf16>
    %c14_203 = arith.constant 14 : index
    %c0_204 = arith.constant 0 : index
    %236 = vector.load %arg4[%c14_203, %c0_204] : memref<96x128xbf16, #tpu.memory_space<vmem>>, vector<80x128xbf16>
    %c15_205 = arith.constant 15 : index
    %c0_206 = arith.constant 0 : index
    %237 = vector.load %arg4[%c15_205, %c0_206] : memref<96x128xbf16, #tpu.memory_space<vmem>>, vector<80x128xbf16>
    %238 = tpu.concatenate %235, %236, %237 in 1 : vector<80x128xbf16>, vector<80x128xbf16>, vector<80x128xbf16> -> vector<80x384xbf16>
    %c4_207 = arith.constant 4 : index
    %c2_208 = arith.constant 2 : index
    %c0_209 = arith.constant 0 : index
    %c0_210 = arith.constant 0 : index
    %239 = vector.load %arg1[%c4_207, %c2_208, %c0_209, %c0_210] : memref<6x3x384x128xbf16, #tpu.memory_space<vmem>>, vector<1x1x384x128xbf16>
    %240 = vector.shape_cast %239 : vector<1x1x384x128xbf16> to vector<384x128xbf16>
    %cst_211 = arith.constant dense<0.000000e+00> : vector<80x128xf32>
    %241 = tpu.matmul %238, %240, %cst_211 {dimension_numbers = #tpu.dot_dimension_numbers<[1], [0], [0], [1], [0, 0, 1, 1], [], []>} : vector<80x384xbf16>, vector<384x128xbf16>, vector<80x128xf32> -> vector<80x128xf32>
    %242 = arith.addf %234, %241 : vector<80x128xf32>
    %cst_212 = arith.constant 0.000000e+00 : f32
    %243 = vector.broadcast %cst_212 : f32 to vector<80x128xf32>
    %244 = arith.maximumf %242, %243 : vector<80x128xf32>
    %245 = vector.broadcast %9 : vector<80x1xf32> to vector<80x128xf32>
    %246 = arith.mulf %244, %245 : vector<80x128xf32>
    %cst_213 = arith.constant dense<0.000000e+00> : vector<128xf32>
    %247 = vector.multi_reduction <add>, %246, %cst_213 [0] : vector<80x128xf32> to vector<128xf32>
    %248 = vector.shape_cast %247 : vector<128xf32> to vector<1x128xf32>
    %cst_214 = arith.constant 3.125000e-02 : f32
    %249 = vector.broadcast %cst_214 : f32 to vector<1x128xf32>
    %250 = arith.mulf %248, %249 : vector<1x128xf32>
    %251 = arith.mulf %246, %246 : vector<80x128xf32>
    %cst_215 = arith.constant dense<0.000000e+00> : vector<128xf32>
    %252 = vector.multi_reduction <add>, %251, %cst_215 [0] : vector<80x128xf32> to vector<128xf32>
    %253 = vector.shape_cast %252 : vector<128xf32> to vector<1x128xf32>
    %cst_216 = arith.constant 3.125000e-02 : f32
    %254 = vector.broadcast %cst_216 : f32 to vector<1x128xf32>
    %255 = arith.mulf %253, %254 : vector<1x128xf32>
    %256 = arith.mulf %250, %250 : vector<1x128xf32>
    %257 = arith.subf %255, %256 : vector<1x128xf32>
    %cst_217 = arith.constant 0.000000e+00 : f32
    %258 = vector.broadcast %cst_217 : f32 to vector<1x128xf32>
    %259 = arith.maximumf %257, %258 : vector<1x128xf32>
    %260 = vector.broadcast %250 : vector<1x128xf32> to vector<80x128xf32>
    %261 = arith.subf %246, %260 : vector<80x128xf32>
    %cst_218 = arith.constant 9.99999974E-6 : f32
    %262 = vector.broadcast %cst_218 : f32 to vector<1x128xf32>
    %263 = arith.addf %259, %262 : vector<1x128xf32>
    %264 = math.rsqrt %263 : vector<1x128xf32>
    %265 = vector.broadcast %264 : vector<1x128xf32> to vector<80x128xf32>
    %266 = arith.mulf %261, %265 : vector<80x128xf32>
    %267 = vector.broadcast %9 : vector<80x1xf32> to vector<80x128xf32>
    %268 = arith.mulf %266, %267 : vector<80x128xf32>
    %269 = arith.truncf %268 : vector<80x128xf32> to vector<80x128xbf16>
    %c8_219 = arith.constant 8 : index
    %c0_220 = arith.constant 0 : index
    %270 = vector.load %arg4[%c8_219, %c0_220] : memref<96x128xbf16, #tpu.memory_space<vmem>>, vector<80x128xbf16>
    tpu.vector_store %arg4[%c8_219, %c0_220], %269 {strides = array<i32>} : memref<96x128xbf16, #tpu.memory_space<vmem>>, vector<80x128xbf16>,
    %c1_221 = arith.constant 1 : index
    %c0_222 = arith.constant 0 : index
    %271 = vector.load %arg4[%c1_221, %c0_222] : memref<96x128xbf16, #tpu.memory_space<vmem>>, vector<80x128xbf16>
    %c2_223 = arith.constant 2 : index
    %c0_224 = arith.constant 0 : index
    %272 = vector.load %arg4[%c2_223, %c0_224] : memref<96x128xbf16, #tpu.memory_space<vmem>>, vector<80x128xbf16>
    %c3_225 = arith.constant 3 : index
    %c0_226 = arith.constant 0 : index
    %273 = vector.load %arg4[%c3_225, %c0_226] : memref<96x128xbf16, #tpu.memory_space<vmem>>, vector<80x128xbf16>
    %274 = tpu.concatenate %271, %272, %273 in 1 : vector<80x128xbf16>, vector<80x128xbf16>, vector<80x128xbf16> -> vector<80x384xbf16>
    %c5 = arith.constant 5 : index
    %c0_227 = arith.constant 0 : index
    %c0_228 = arith.constant 0 : index
    %c0_229 = arith.constant 0 : index
    %275 = vector.load %arg1[%c5, %c0_227, %c0_228, %c0_229] : memref<6x3x384x128xbf16, #tpu.memory_space<vmem>>, vector<1x1x384x128xbf16>
    %276 = vector.shape_cast %275 : vector<1x1x384x128xbf16> to vector<384x128xbf16>
    %cst_230 = arith.constant dense<0.000000e+00> : vector<80x128xf32>
    %277 = tpu.matmul %274, %276, %cst_230 {dimension_numbers = #tpu.dot_dimension_numbers<[1], [0], [0], [1], [0, 0, 1, 1], [], []>} : vector<80x384xbf16>, vector<384x128xbf16>, vector<80x128xf32> -> vector<80x128xf32>
    %c7_231 = arith.constant 7 : index
    %c0_232 = arith.constant 0 : index
    %278 = vector.load %arg4[%c7_231, %c0_232] : memref<96x128xbf16, #tpu.memory_space<vmem>>, vector<80x128xbf16>
    %c8_233 = arith.constant 8 : index
    %c0_234 = arith.constant 0 : index
    %279 = vector.load %arg4[%c8_233, %c0_234] : memref<96x128xbf16, #tpu.memory_space<vmem>>, vector<80x128xbf16>
    %c9_235 = arith.constant 9 : index
    %c0_236 = arith.constant 0 : index
    %280 = vector.load %arg4[%c9_235, %c0_236] : memref<96x128xbf16, #tpu.memory_space<vmem>>, vector<80x128xbf16>
    %281 = tpu.concatenate %278, %279, %280 in 1 : vector<80x128xbf16>, vector<80x128xbf16>, vector<80x128xbf16> -> vector<80x384xbf16>
    %c5_237 = arith.constant 5 : index
    %c1_238 = arith.constant 1 : index
    %c0_239 = arith.constant 0 : index
    %c0_240 = arith.constant 0 : index
    %282 = vector.load %arg1[%c5_237, %c1_238, %c0_239, %c0_240] : memref<6x3x384x128xbf16, #tpu.memory_space<vmem>>, vector<1x1x384x128xbf16>
    %283 = vector.shape_cast %282 : vector<1x1x384x128xbf16> to vector<384x128xbf16>
    %cst_241 = arith.constant dense<0.000000e+00> : vector<80x128xf32>
    %284 = tpu.matmul %281, %283, %cst_241 {dimension_numbers = #tpu.dot_dimension_numbers<[1], [0], [0], [1], [0, 0, 1, 1], [], []>} : vector<80x384xbf16>, vector<384x128xbf16>, vector<80x128xf32> -> vector<80x128xf32>
    %285 = arith.addf %277, %284 : vector<80x128xf32>
    %c13_242 = arith.constant 13 : index
    %c0_243 = arith.constant 0 : index
    %286 = vector.load %arg4[%c13_242, %c0_243] : memref<96x128xbf16, #tpu.memory_space<vmem>>, vector<80x128xbf16>
    %c14_244 = arith.constant 14 : index
    %c0_245 = arith.constant 0 : index
    %287 = vector.load %arg4[%c14_244, %c0_245] : memref<96x128xbf16, #tpu.memory_space<vmem>>, vector<80x128xbf16>
    %c15_246 = arith.constant 15 : index
    %c0_247 = arith.constant 0 : index
    %288 = vector.load %arg4[%c15_246, %c0_247] : memref<96x128xbf16, #tpu.memory_space<vmem>>, vector<80x128xbf16>
    %289 = tpu.concatenate %286, %287, %288 in 1 : vector<80x128xbf16>, vector<80x128xbf16>, vector<80x128xbf16> -> vector<80x384xbf16>
    %c5_248 = arith.constant 5 : index
    %c2_249 = arith.constant 2 : index
    %c0_250 = arith.constant 0 : index
    %c0_251 = arith.constant 0 : index
    %290 = vector.load %arg1[%c5_248, %c2_249, %c0_250, %c0_251] : memref<6x3x384x128xbf16, #tpu.memory_space<vmem>>, vector<1x1x384x128xbf16>
    %291 = vector.shape_cast %290 : vector<1x1x384x128xbf16> to vector<384x128xbf16>
    %cst_252 = arith.constant dense<0.000000e+00> : vector<80x128xf32>
    %292 = tpu.matmul %289, %291, %cst_252 {dimension_numbers = #tpu.dot_dimension_numbers<[1], [0], [0], [1], [0, 0, 1, 1], [], []>} : vector<80x384xbf16>, vector<384x128xbf16>, vector<80x128xf32> -> vector<80x128xf32>
    %293 = arith.addf %285, %292 : vector<80x128xf32>
    %cst_253 = arith.constant 0.000000e+00 : f32
    %294 = vector.broadcast %cst_253 : f32 to vector<80x128xf32>
    %295 = arith.maximumf %293, %294 : vector<80x128xf32>
    %296 = vector.broadcast %9 : vector<80x1xf32> to vector<80x128xf32>
    %297 = arith.mulf %295, %296 : vector<80x128xf32>
    %c0_254 = arith.constant 0 : index
    %c0_255 = arith.constant 0 : index
    %298 = vector.load %arg5[%c0_254, %c0_255] : memref<80x128xf32, #tpu.memory_space<vmem>>, vector<80x128xf32>
    %299 = arith.addf %297, %298 : vector<80x128xf32>
    %c0_256 = arith.constant 0 : index
    %c0_257 = arith.constant 0 : index
    %300 = vector.load %arg5[%c0_256, %c0_257] : memref<80x128xf32, #tpu.memory_space<vmem>>, vector<80x128xf32>
    tpu.vector_store %arg5[%c0_256, %c0_257], %299 {strides = array<i32>} : memref<80x128xf32, #tpu.memory_space<vmem>>, vector<80x128xf32>,
    %cst_258 = arith.constant dense<0.000000e+00> : vector<128xf32>
    %301 = vector.multi_reduction <add>, %299, %cst_258 [0] : vector<80x128xf32> to vector<128xf32>
    %302 = vector.shape_cast %301 : vector<128xf32> to vector<1x128xf32>
    %cst_259 = arith.constant 3.125000e-02 : f32
    %303 = vector.broadcast %cst_259 : f32 to vector<1x128xf32>
    %304 = arith.mulf %302, %303 : vector<1x128xf32>
    %305 = arith.mulf %299, %299 : vector<80x128xf32>
    %cst_260 = arith.constant dense<0.000000e+00> : vector<128xf32>
    %306 = vector.multi_reduction <add>, %305, %cst_260 [0] : vector<80x128xf32> to vector<128xf32>
    %307 = vector.shape_cast %306 : vector<128xf32> to vector<1x128xf32>
    %cst_261 = arith.constant 3.125000e-02 : f32
    %308 = vector.broadcast %cst_261 : f32 to vector<1x128xf32>
    %309 = arith.mulf %307, %308 : vector<1x128xf32>
    %310 = arith.mulf %304, %304 : vector<1x128xf32>
    %311 = arith.subf %309, %310 : vector<1x128xf32>
    %cst_262 = arith.constant 0.000000e+00 : f32
    %312 = vector.broadcast %cst_262 : f32 to vector<1x128xf32>
    %313 = arith.maximumf %311, %312 : vector<1x128xf32>
    %314 = vector.broadcast %304 : vector<1x128xf32> to vector<80x128xf32>
    %315 = arith.subf %299, %314 : vector<80x128xf32>
    %cst_263 = arith.constant 9.99999974E-6 : f32
    %316 = vector.broadcast %cst_263 : f32 to vector<1x128xf32>
    %317 = arith.addf %313, %316 : vector<1x128xf32>
    %318 = math.rsqrt %317 : vector<1x128xf32>
    %319 = vector.broadcast %318 : vector<1x128xf32> to vector<80x128xf32>
    %320 = arith.mulf %315, %319 : vector<80x128xf32>
    %321 = vector.broadcast %9 : vector<80x1xf32> to vector<80x128xf32>
    %322 = arith.mulf %320, %321 : vector<80x128xf32>
    %323 = vector.shape_cast %322 : vector<80x128xf32> to vector<2x40x128xf32>
    %cst_264 = arith.constant dense<0.000000e+00> : vector<2x128xf32>
    %324 = vector.multi_reduction <add>, %323, %cst_264 [1] : vector<2x40x128xf32> to vector<2x128xf32>
    %cst_265 = arith.constant 6.250000e-02 : f32
    %325 = vector.broadcast %cst_265 : f32 to vector<2x128xf32>
    %326 = arith.mulf %324, %325 : vector<2x128xf32>
    %c0_266 = arith.constant 0 : index
    %c0_267 = arith.constant 0 : index
    %327 = vector.load %arg3[%c0_266, %c0_267] : memref<2x128xf32, #tpu.memory_space<vmem>>, vector<2x128xf32>
    tpu.vector_store %arg3[%c0_266, %c0_267], %326 {strides = array<i32>} : memref<2x128xf32, #tpu.memory_space<vmem>>, vector<2x128xf32>,
    return
  }
}

</mosaic_0001>

<bundles_post_ra>
// kernel: tile.8
= control target key start
LH: loop header
LB: loop body
LE: loop exit
PB: predicated region body
PF: predicated region fallthrough
CT: control target
= control target key end

     0   :  { %s22_s0 = inlined_call_operand.vmem [shape: f32[40], index: 0, kind: input, shape index: {}]   ;;  %s23_s1 = inlined_call_operand.vmem [shape: f32[2,40], index: 1, kind: output, shape index: {}]  }
   0x1   :  { %v4_v0 = vld [vmem:[%s22_s0] ss:$0 sm:$0xff] }
   0x2   :  { %5 = vst [vmem:[%s23_s1] sm:$0x3] %v4_v0 }

// kernel: tile.0
= control target key start
LH: loop header
LB: loop body
LE: loop exit
PB: predicated region body
PF: predicated region fallthrough
CT: control target
= control target key end

     0   :  { %s338_s8 = smov 125   ;;  %s339_s9 = smov 126   ;;  %vm7_vm0 = vcmask 7168   ;;  %s549_s0 = inlined_call_operand.vmem [shape: f32[2,40], index: 0, kind: input, shape index: {}]   ;;  %s550_s1 = inlined_call_operand.vmem [shape: f32[80,1], index: 1, kind: output, shape index: {}]  }
   0x1   :  { %v4_v0 = vld [vmem:[%s549_s0] sm:$0x3]  ;;  %s337_s0 = smov 127   ;;  %s340_s10 = smov 124  }
   0x2   :  { %5 = vst [vmem:[#allocation0] sm:$0x3] %v4_v0  ;;  %s341_s11 = smov 123   ;;  %s342_s12 = smov 122  }
   0x3   :  { %s343_s13 = smov 121   ;;  %s344_s14 = smov 120  }
   0x4   :  { %s345_s15 = smov 119   ;;  %s346_s16 = smov 118  }
   0x5   :  { %s347_s17 = smov 117   ;;  %s348_s18 = smov 116  }
   0x6   :  { %s349_s19 = smov 115   ;;  %s350_s20 = smov 114  }
   0x7   :  { %s351_s21 = smov 113   ;;  %s352_s22 = smov 112  }
   0x8   :  { %s353_s23 = smov 111   ;;  %s354_s24 = smov 110  }
   0x9   :  { %v9_v1 = vld [vmem:[#allocation0] sm:$0x3]   ;;  %s355_s25 = smov 109   ;;  %s356_s26 = smov 108  }
   0xa   :  { %v21_v2 = vld [vmem:[#allocation0] sm:$0x3]   ;;  %10 = vrot.lane.b32.xlu0 %v9_v1, %s337_s0  ;;  %s148_s27 = smov 3  ;;  %s357_s28 = smov 107  }
   0xb   :  { %22 = vrot.lane.b32.xlu1 %v21_v2, %s338_s8  ;;  %v15_v3 = vld [vmem:[#allocation0] sm:$0x3]   ;;  %s358_s29 = smov 106   ;;  %s156_s30 = smov 3 }
   0xc   :  { %v27_v4 = vld [vmem:[#allocation0] sm:$0x3]   ;;  %s164_s2 = smov 3  ;;  %s359_s3 = smov 105  }
   0xd   :  { %v33_v5 = vld [vmem:[#allocation0] sm:$0x3]   ;;  %s360_s4 = smov 104   ;;  %s172_s5 = smov 3 }
   0xe   :  { %16 = vrot.lane.b32.xlu0 %v15_v3, %s339_s9  ;;  %v39_v6 = vld [vmem:[#allocation0] sm:$0x3]   ;;  %s180_s6 = smov 3  ;;  %s361_s7 = smov 103  }
   0xf   :  { %28 = vrot.lane.b32.xlu1 %v27_v4, %s340_s10  ;;  %v45_v7 = vld [vmem:[#allocation0] sm:$0x3]   ;;  %s362_s0 = smov 102   ;;  %s188_s8 = smov 3 }
  0x10   :  { %v51_v8 = vld [vmem:[#allocation0] sm:$0x3]   ;;  %s196_s9 = smov 3  ;;  %s363_s10 = smov 101  }
  0x11   :  { %v57_v9 = vld [vmem:[#allocation0] sm:$0x3]  }
  0x12   :  { %34 = vrot.lane.b32.xlu0 %v33_v5, %s341_s11  ;;  %v63_v10 = vld [vmem:[#allocation0] sm:$0x3]   ;;  %s364_s11 = smov 100  }
  0x13   :  { %40 = vrot.lane.b32.xlu1 %v39_v6, %s342_s12  ;;  %v69_v11 = vld [vmem:[#allocation0] sm:$0x3]   ;;  %s204_s12 = smov 3 }
  0x14   :  { %v75_v12 = vld [vmem:[#allocation0] sm:$0x3]  }
  0x15   :  { %v81_v13 = vld [vmem:[#allocation0] sm:$0x3]  }
  0x16   :  { %46 = vrot.lane.b32.xlu0 %v45_v7, %s343_s13  ;;  %v87_v14 = vld [vmem:[#allocation0] sm:$0x3]   ;;  %s365_s13 = smov 99  }
  0x17   :  { %52 = vrot.lane.b32.xlu1 %v51_v8, %s344_s14  ;;  %v93_v15 = vld [vmem:[#allocation0] sm:$0x3]   ;;  %s366_s14 = smov 98  }
  0x18   :  { %v99_v16 = vld [vmem:[#allocation0] sm:$0x3]  }
  0x19   :  { %v105_v17 = vld [vmem:[#allocation0] sm:$0x3]  }
  0x1a   :  { %58 = vrot.lane.b32.xlu0 %v57_v9, %s345_s15  ;;  %v111_v18 = vld [vmem:[#allocation0] sm:$0x3]   ;;  %s367_s15 = smov 97  }
  0x1b   :  { %64 = vrot.lane.b32.xlu1 %v63_v10, %s346_s16  ;;  %v117_v19 = vld [vmem:[#allocation0] sm:$0x3]   ;;  %s368_s16 = smov 96  }
  0x1c   :  { %v123_v20 = vld [vmem:[#allocation0] sm:$0x3]  }
  0x1d   :  { %v129_v21 = vld [vmem:[#allocation0] sm:$0x3]  }
  0x1e   :  { %70 = vrot.lane.b32.xlu0 %v69_v11, %s347_s17  ;;  %v135_v22 = vld [vmem:[#allocation0] sm:$0x3]  }
  0x1f   :  { %76 = vrot.lane.b32.xlu1 %v75_v12, %s348_s18  ;;  %v141_v23 = vld [vmem:[#allocation0] sm:$0x3]  }
  0x20   :  { %v149_v24 = vld [vmem:[#allocation0 + $0x1] ss:$-1 sm:%s148_s27]  }
  0x21   :  { %v157_v25 = vld [vmem:[#allocation0 + $0x1] ss:$-1 sm:%s156_s30]  }
  0x22   :  { %82 = vrot.lane.b32.xlu0 %v81_v13, %s349_s19  ;;  %v165_v26 = vld [vmem:[#allocation0 + $0x1] ss:$-1 sm:%s164_s2]   ;;  %s369_s19 = smov 95  }
  0x23   :  { %88 = vrot.lane.b32.xlu1 %v87_v14, %s350_s20  ;;  %v173_v27 = vld [vmem:[#allocation0 + $0x1] ss:$-1 sm:%s172_s5]   ;;  %s370_s20 = smov 94  }
  0x24   :  { %v181_v28 = vld [vmem:[#allocation0 + $0x1] ss:$-1 sm:%s180_s6]  }
  0x25   :  { %v189_v29 = vld [vmem:[#allocation0 + $0x1] ss:$-1 sm:%s188_s8]  }
  0x26   :  { %94 = vrot.lane.b32.xlu0 %v93_v15, %s351_s21  ;;  %v197_v30 = vld [vmem:[#allocation0 + $0x1] ss:$-1 sm:%s196_s9]   ;;  %s371_s21 = smov 93  }
  0x27   :  { %100 = vrot.lane.b32.xlu1 %v99_v16, %s352_s22  ;;  %v205_v31 = vld [vmem:[#allocation0 + $0x1] ss:$-1 sm:%s204_s12]   ;;  %s372_s22 = smov 92  }
  0x28   :  { %v211_v32 = vld [vmem:[#allocation0] sm:$0x3]  }
  0x29   :  { %v217_v33 = vld [vmem:[#allocation0] sm:$0x3]  }
  0x2a   :  { %106 = vrot.lane.b32.xlu0 %v105_v17, %s353_s23  ;;  %v223_v34 = vld [vmem:[#allocation0] sm:$0x3]   ;;  %s373_s23 = smov 91  }
  0x2b   :  { %112 = vrot.lane.b32.xlu1 %v111_v18, %s354_s24  ;;  %v6_v35 = vld [vmem:[#allocation0] sm:$0x3]   ;;  %s374_s24 = smov 90  }
  0x2c   :  { %8 = vst.msk [vmem:[%s550_s1] ss:$40 sm:$0x3] %vm7_vm0, %v6_v35   ;;  %v229_v36 = vld [vmem:[#allocation0] sm:$0x3]  }
  0x2d   :  { %v235_v37 = vld [vmem:[#allocation0] sm:$0x3]  }
  0x2e   :  { %118 = vrot.lane.b32.xlu0 %v117_v19, %s355_s25  ;;  %v241_v38 = vld [vmem:[#allocation0] sm:$0x3]   ;;  %s375_s25 = smov 89  }
  0x2f   :  { %124 = vrot.lane.b32.xlu1 %v123_v20, %s356_s26  ;;  %v247_v39 = vld [vmem:[#allocation0] sm:$0x3]  }
  0x30   :  { %v253_v40 = vld [vmem:[#allocation0] sm:$0x3]  }
  0x32   :  { %130 = vrot.lane.b32.xlu0 %v129_v21, %s357_s28 }
  0x33   :  { %136 = vrot.lane.b32.xlu1 %v135_v22, %s358_s29 }
  0x36   :  { %142 = vrot.lane.b32.xlu0 %v141_v23, %s359_s3 }
  0x37   :  { %150 = vrot.lane.b32.xlu1 %v149_v24, %s360_s4 }
  0x3a   :  { %158 = vrot.lane.b32.xlu0 %v157_v25, %s361_s7 }
  0x3b   :  { %166 = vrot.lane.b32.xlu1 %v165_v26, %s362_s0 }
  0x3e   :  { %174 = vrot.lane.b32.xlu0 %v173_v27, %s363_s10 }
  0x3f   :  { %182 = vrot.lane.b32.xlu1 %v181_v28, %s364_s11 }
  0x42   :  { %190 = vrot.lane.b32.xlu0 %v189_v29, %s365_s13 }
  0x43   :  { %198 = vrot.lane.b32.xlu1 %v197_v30, %s366_s14 }
  0x46   :  { %206 = vrot.lane.b32.xlu0 %v205_v31, %s367_s15 }
  0x47   :  { %212 = vrot.lane.b32.xlu1 %v211_v32, %s368_s16 }
  0x4a   :  { %218 = vrot.lane.b32.xlu0 %v217_v33, %s369_s19 }
  0x4b   :  { %224 = vrot.lane.b32.xlu1 %v223_v34, %s370_s20 }
  0x4e   :  { %230 = vrot.lane.b32.xlu0 %v229_v36, %s371_s21 }
  0x4f   :  { %236 = vrot.lane.b32.xlu1 %v235_v37, %s372_s22 }
  0x52   :  { %242 = vrot.lane.b32.xlu0 %v241_v38, %s373_s23 }
  0x53   :  { %248 = vrot.lane.b32.xlu1 %v247_v39, %s374_s24 }
  0x56   :  { %254 = vrot.lane.b32.xlu0 %v253_v40, %s375_s25 }
  0x7c   :  { %v11_v41 = vpop.permute.xlu0 %10  }
  0x7d   :  { %v23_v42 = vpop.permute.xlu1 %22   ;;  %259 = vst.msk [vmem:[%s550_s1 + $0x1] ss:$40 sm:$0x3] %vm7_vm0, %v11_v41  }
  0x7e   :  { %261 = vst.msk [vmem:[%s550_s1 + $0x3] ss:$40 sm:$0x3] %vm7_vm0, %v23_v42  }
  0x80   :  { %v17_v43 = vpop.permute.xlu0 %16  }
  0x81   :  { %v29_v44 = vpop.permute.xlu1 %28   ;;  %260 = vst.msk [vmem:[%s550_s1 + $0x2] ss:$40 sm:$0x3] %vm7_vm0, %v17_v43  }
  0x82   :  { %262 = vst.msk [vmem:[%s550_s1 + $0x4] ss:$40 sm:$0x3] %vm7_vm0, %v29_v44  }
  0x84   :  { %v35_v45 = vpop.permute.xlu0 %34  }
  0x85   :  { %v41_v46 = vpop.permute.xlu1 %40   ;;  %263 = vst.msk [vmem:[%s550_s1 + $0x5] ss:$40 sm:$0x3] %vm7_vm0, %v35_v45  }
  0x86   :  { %264 = vst.msk [vmem:[%s550_s1 + $0x6] ss:$40 sm:$0x3] %vm7_vm0, %v41_v46  }
  0x88   :  { %v47_v47 = vpop.permute.xlu0 %46  }
  0x89   :  { %v53_v48 = vpop.permute.xlu1 %52   ;;  %265 = vst.msk [vmem:[%s550_s1 + $0x7] ss:$40 sm:$0x3] %vm7_vm0, %v47_v47  }
  0x8a   :  { %266 = vst.msk [vmem:[%s550_s1 + $0x8] ss:$40 sm:$0x3] %vm7_vm0, %v53_v48  }
  0x8c   :  { %v59_v49 = vpop.permute.xlu0 %58  }
  0x8d   :  { %v65_v50 = vpop.permute.xlu1 %64   ;;  %267 = vst.msk [vmem:[%s550_s1 + $0x9] ss:$40 sm:$0x3] %vm7_vm0, %v59_v49  }
  0x8e   :  { %268 = vst.msk [vmem:[%s550_s1 + $0xa] ss:$40 sm:$0x3] %vm7_vm0, %v65_v50  }
  0x90   :  { %v71_v51 = vpop.permute.xlu0 %70  }
  0x91   :  { %v77_v52 = vpop.permute.xlu1 %76   ;;  %269 = vst.msk [vmem:[%s550_s1 + $0xb] ss:$40 sm:$0x3] %vm7_vm0, %v71_v51  }
  0x92   :  { %270 = vst.msk [vmem:[%s550_s1 + $0xc] ss:$40 sm:$0x3] %vm7_vm0, %v77_v52  }
  0x94   :  { %v83_v53 = vpop.permute.xlu0 %82  }
  0x95   :  { %v89_v54 = vpop.permute.xlu1 %88   ;;  %271 = vst.msk [vmem:[%s550_s1 + $0xd] ss:$40 sm:$0x3] %vm7_vm0, %v83_v53  }
  0x96   :  { %272 = vst.msk [vmem:[%s550_s1 + $0xe] ss:$40 sm:$0x3] %vm7_vm0, %v89_v54  }
  0x98   :  { %v95_v55 = vpop.permute.xlu0 %94  }
  0x99   :  { %v101_v56 = vpop.permute.xlu1 %100   ;;  %273 = vst.msk [vmem:[%s550_s1 + $0xf] ss:$40 sm:$0x3] %vm7_vm0, %v95_v55  }
  0x9a   :  { %274 = vst.msk [vmem:[%s550_s1 + $0x10] ss:$40 sm:$0x3] %vm7_vm0, %v101_v56  }
  0x9c   :  { %v107_v57 = vpop.permute.xlu0 %106  }
  0x9d   :  { %v113_v58 = vpop.permute.xlu1 %112   ;;  %275 = vst.msk [vmem:[%s550_s1 + $0x11] ss:$40 sm:$0x3] %vm7_vm0, %v107_v57  }
  0x9e   :  { %276 = vst.msk [vmem:[%s550_s1 + $0x12] ss:$40 sm:$0x3] %vm7_vm0, %v113_v58  }
  0xa0   :  { %v119_v59 = vpop.permute.xlu0 %118  }
  0xa1   :  { %v125_v60 = vpop.permute.xlu1 %124   ;;  %277 = vst.msk [vmem:[%s550_s1 + $0x13] ss:$40 sm:$0x3] %vm7_vm0, %v119_v59  }
  0xa2   :  { %278 = vst.msk [vmem:[%s550_s1 + $0x14] ss:$40 sm:$0x3] %vm7_vm0, %v125_v60  }
  0xa4   :  { %v131_v61 = vpop.permute.xlu0 %130  }
  0xa5   :  { %v137_v62 = vpop.permute.xlu1 %136   ;;  %279 = vst.msk [vmem:[%s550_s1 + $0x15] ss:$40 sm:$0x3] %vm7_vm0, %v131_v61  }
  0xa6   :  { %280 = vst.msk [vmem:[%s550_s1 + $0x16] ss:$40 sm:$0x3] %vm7_vm0, %v137_v62  }
  0xa8   :  { %v143_v63 = vpop.permute.xlu0 %142  }
  0xa9   :  { %v151_v0 = vpop.permute.xlu1 %150   ;;  %281 = vst.msk [vmem:[%s550_s1 + $0x17] ss:$40 sm:$0x3] %vm7_vm0, %v143_v63  }
  0xaa   :  { %282 = vst.msk [vmem:[%s550_s1 + $0x40] ss:$-40 sm:$0x3] %vm7_vm0, %v151_v0  }
  0xac   :  { %v159_v1 = vpop.permute.xlu0 %158  }
  0xad   :  { %v167_v2 = vpop.permute.xlu1 %166   ;;  %283 = vst.msk [vmem:[%s550_s1 + $0x41] ss:$-40 sm:$0x3] %vm7_vm0, %v159_v1  }
  0xae   :  { %284 = vst.msk [vmem:[%s550_s1 + $0x42] ss:$-40 sm:$0x3] %vm7_vm0, %v167_v2  }
  0xb0   :  { %v175_v3 = vpop.permute.xlu0 %174  }
  0xb1   :  { %v183_v4 = vpop.permute.xlu1 %182   ;;  %285 = vst.msk [vmem:[%s550_s1 + $0x43] ss:$-40 sm:$0x3] %vm7_vm0, %v175_v3  }
  0xb2   :  { %286 = vst.msk [vmem:[%s550_s1 + $0x44] ss:$-40 sm:$0x3] %vm7_vm0, %v183_v4  }
  0xb4   :  { %v191_v5 = vpop.permute.xlu0 %190  }
  0xb5   :  { %v199_v6 = vpop.permute.xlu1 %198   ;;  %287 = vst.msk [vmem:[%s550_s1 + $0x45] ss:$-40 sm:$0x3] %vm7_vm0, %v191_v5  }
  0xb6   :  { %288 = vst.msk [vmem:[%s550_s1 + $0x46] ss:$-40 sm:$0x3] %vm7_vm0, %v199_v6  }
  0xb8   :  { %v207_v7 = vpop.permute.xlu0 %206  }
  0xb9   :  { %v213_v8 = vpop.permute.xlu1 %212   ;;  %289 = vst.msk [vmem:[%s550_s1 + $0x47] ss:$-40 sm:$0x3] %vm7_vm0, %v207_v7  }
  0xba   :  { %290 = vst.msk [vmem:[%s550_s1 + $0x20] ss:$40 sm:$0x3] %vm7_vm0, %v213_v8  }
  0xbc   :  { %v219_v9 = vpop.permute.xlu0 %218  }
  0xbd   :  { %v225_v10 = vpop.permute.xlu1 %224   ;;  %291 = vst.msk [vmem:[%s550_s1 + $0x21] ss:$40 sm:$0x3] %vm7_vm0, %v219_v9  }
  0xbe   :  { %292 = vst.msk [vmem:[%s550_s1 + $0x22] ss:$40 sm:$0x3] %vm7_vm0, %v225_v10  }
  0xc0   :  { %v231_v11 = vpop.permute.xlu0 %230  }
  0xc1   :  { %v237_v12 = vpop.permute.xlu1 %236   ;;  %293 = vst.msk [vmem:[%s550_s1 + $0x23] ss:$40 sm:$0x3] %vm7_vm0, %v231_v11  }
  0xc2   :  { %294 = vst.msk [vmem:[%s550_s1 + $0x24] ss:$40 sm:$0x3] %vm7_vm0, %v237_v12  }
  0xc4   :  { %v243_v13 = vpop.permute.xlu0 %242  }
  0xc5   :  { %v249_v14 = vpop.permute.xlu1 %248   ;;  %295 = vst.msk [vmem:[%s550_s1 + $0x25] ss:$40 sm:$0x3] %vm7_vm0, %v243_v13  }
  0xc6   :  { %296 = vst.msk [vmem:[%s550_s1 + $0x26] ss:$40 sm:$0x3] %vm7_vm0, %v249_v14  }
  0xc8   :  { %v255_v15 = vpop.permute.xlu0 %254  }
  0xc9   :  { %297 = vst.msk [vmem:[%s550_s1 + $0x27] ss:$40 sm:$0x3] %vm7_vm0, %v255_v15  }

// kernel: res8_forward.2
= control target key start
LH: loop header
LB: loop body
LE: loop exit
PB: predicated region body
PF: predicated region fallthrough
CT: control target
= control target key end

     0   :  { %s1126_s9 = smov 0   ;;  %s1258_s0 = inlined_call_operand.vmem [shape: f32[2,9,480], index: 0, kind: input, shape index: {}]   ;;  %s1259_s1 = inlined_call_operand.vmem [shape: bf16[9,128], index: 1, kind: input, shape index: {}]   ;;  %s1260_s2 = inlined_call_operand.vmem [shape: f32[2,40,128], index: 2, kind: output, shape index: {}]  }
   0x1 LB: > { %s869_s10 = sadd.s32 4294967295, %s1108_s9   ;;  %p873_p0 = scmp.ge.s32.totalorder %s1108_s9, 1  ;;  %s1108_s9 = sphi %s1126_s9, %s12_s9  }
   0x2   : > { %p112_p1 = scmp.lt.s32.totalorder %s1108_s9, 3 }
   0x4   : > { %p113_p2 = pnand %p873_p0, %p112_p1 }
   0x5   : > { %p134_p3 = scmp.lt.s32.totalorder (!%p113_p2), %s869_s10, 1  ;;  %vm409_vm0 = vcmask (!%p113_p2), 1043456   ;;  %v1101_v8 = vld [vmem:[%s1259_s1] sm:$0x1f] (!%p113_p2)   ;;  %vm410_vm1 = vcmask (!%p113_p2), 1044480   ;;  %v1110_v9 = vmov (!%p113_p2), 65535  }
   0x6   : > { %116 = sbr.rel (%p113_p2) target bundleno = 480 (0x1e0), region = 28  ;;  %v411_v10 = vsel (!%p113_p2), %vm409_vm0, 4294967295, %v1110_v9  ;;  %vm318_vm2 = vcmask (!%p113_p2), 72704  }
   0x7   : > { %v412_v11 = vsel (!%p113_p2), %vm410_vm1, %v411_v10, 0 }
   0x8   : > { %v414_v12 = vand.u32 (!%p113_p2), %v1101_v8, %v412_v11 }
   0xa   : > { %942 = vmatprep.subr.bf16.mxu0 (!%p113_p2), %v414_v12  ;;  %1004 = vmatprep.subr.bf16.mxu1 (!%p113_p2), %v414_v12 }
   0xb   : > { %943 = vmatpush3.bf16.msra.mxu0 (!%p113_p2), %v414_v12  ;;  %1005 = vmatpush3.bf16.msra.mxu1 (!%p113_p2), %v414_v12 }
   0xd   : > { %s1262_s10 = smov (!%p134_p3, %s869_s10), 1 }
   0xe   : > { %s910_s11 = sshll.u32 %s1262_s10, 6  ;;  %s1006_s17 = smul.u32 40, %s1262_s10 }
   0xf   : > { %s138_s14 = scalar_lea.vmem %s1258_s0, %s910_s11 }
  0x10   : > { %v145_v0 = vld [vmem:[%s138_s14] sm:$0xff]  ;;  %v147_v1 = vld [vmem:[%s138_s14 + $0x10] sm:$0xff]  ;;  %v146_v5 = vld [vmem:[%s138_s14 + $0x8] sm:$0xff]  ;;  %s143_s20 = scalar_lea.vmem %s1260_s2, %s1006_s17 }
  0x11   : > { %v149_v2 = vld [vmem:[%s138_s14 + $0x20] sm:$0x1]  ;;  %v1017_v3 = vpack.i.bf16 %v147_v1, %v145_v0  ;;  %v151_v4 = vld [vmem:[%s138_s14 + $0x30] sm:$0x1]  ;;  %185 = vxpose.xlu1.b32.start [1/2] (short) %v146_v5, 128  ;;  %v150_v7 = vld [vmem:[%s138_s14 + $0x28] sm:$0x1] }
  0x12   : > { %v1019_v6 = vpack.i.bf16 %v151_v4, %v149_v2  ;;  %v148_v13 = vld [vmem:[%s138_s14 + $0x18] sm:$0xff] }
  0x13   : > { %1018 = vxpose.xlu0.b32.start [1/2] (short) %v1017_v3, 128  ;;  %v152_v14 = vld [vmem:[%s138_s14 + $0x38] sm:$0x1] }
  0x15   : > { %186 = vxpose.xlu1.b32.end [2/2] (short) %v150_v7, 128 }
  0x17   : > { %1020 = vxpose.xlu0.b32.end [2/2] (short) %v1019_v6, 128 }
  0x50   : > { %249 = vxpose.xlu0.b32.start [1/2] (short) (narrow) %v148_v13, 96 }
  0x54   : > { %250 = vxpose.xlu0.b32.end [2/2] (short) (narrow) %v152_v14, 96 }
  0x91   : > { %v1143_v16 = vpop.trf.xlu1 }
  0x93   : > { %v1021_v15 = vpop.trf.xlu0 }
  0x94   : > { %v1022_v18 = vunpack.i.l.bf16 %v1021_v15  ;;  %v1025_v19 = vunpack.i.h.bf16 %v1021_v15 }
  0x95   : > { %v1145_v25 = vpop.trf.xlu1 }
  0x97   : > { %v1026_v17 = vpop.trf.xlu0 }
  0x98   : > { %v1027_v20 = vunpack.i.l.bf16 %v1026_v17  ;;  %v1030_v21 = vunpack.i.h.bf16 %v1026_v17 }
  0x99   : > { %v1149_v31 = vpop.trf.xlu1 }
  0x9a   : > { %v281_v22 = vpack.c.bf16 %v1027_v20, %v1022_v18  ;;  %v297_v23 = vpack.c.bf16 %v1030_v21, %v1025_v19 }
  0x9b   : > { %v1031_v24 = vpop.trf.xlu0 }
  0x9c   : > { %944 = vmatprep.mubr.msk.bf16.mxu0 %vm318_vm2, %v281_v22  ;;  %976 = vmatprep.mubr.msk.bf16.mxu1 %vm318_vm2, %v297_v23  ;;  %v1035_v26 = vunpack.i.h.bf16 %v1031_v24  ;;  %v1032_v27 = vunpack.i.l.bf16 %v1031_v24 }
  0x9d   : > { %v1153_v38 = vpop.trf.xlu1 }
  0x9f   : > { %v1036_v28 = vpop.trf.xlu0 }
  0xa0   : > { %v1040_v29 = vunpack.i.h.bf16 %v1036_v28  ;;  %v1037_v30 = vunpack.i.l.bf16 %v1036_v28  ;;  %v289_v28 = vpack.c.bf16 %v1145_v25, %v1143_v16 }
  0xa1   : > { %v1157_v44 = vpop.trf.xlu1 }
  0xa2   : > { %v282_v32 = vpack.c.bf16 %v1037_v30, %v1032_v27  ;;  %v298_v33 = vpack.c.bf16 %v1040_v29, %v1035_v26 }
  0xa3   : > { %v1041_v34 = vpop.trf.xlu0 }
  0xa4   : > { %945 = vmatmul.mubr.msk.bf16.vlgmr.msra.gmra.mrb[0].mxu0 %vm318_vm2, %v282_v32  ;;  %977 = vmatmul.mubr.msk.bf16.vlgmr.msra.gmra.mrb[0].mxu1 %vm318_vm2, %v298_v33  ;;  %v1045_v35 = vunpack.i.h.bf16 %v1041_v34  ;;  %v1042_v36 = vunpack.i.l.bf16 %v1041_v34  ;;  %v290_v34 = vpack.c.bf16 %v1153_v38, %v1149_v31 }
  0xa5   : > { %v206_v53 = vpop.trf.xlu1 }
  0xa7   : > { %v1046_v37 = vpop.trf.xlu0 }
  0xa8   : > { %v1050_v39 = vunpack.i.h.bf16 %v1046_v37  ;;  %v1047_v40 = vunpack.i.l.bf16 %v1046_v37 }
  0xa9   : > { %v207_v59 = vpop.trf.xlu1 }
  0xaa   : > { %v283_v41 = vpack.c.bf16 %v1047_v40, %v1042_v36  ;;  %v299_v42 = vpack.c.bf16 %v1050_v39, %v1045_v35  ;;  %v291_v35 = vpack.c.bf16 %v206_v53, %v1157_v44 }
  0xab   : > { %v1051_v43 = vpop.trf.xlu0 }
  0xac   : > { %948 = vmatprep.mubr.msk.bf16.mxu0 %vm318_vm2, %v283_v41  ;;  %980 = vmatprep.mubr.msk.bf16.mxu1 %vm318_vm2, %v299_v42  ;;  %v1055_v45 = vunpack.i.h.bf16 %v1051_v43  ;;  %v1052_v46 = vunpack.i.l.bf16 %v1051_v43 }
  0xad   : > { %v208_v2 = vpop.trf.xlu1 }
  0xae   : > { %v292_v39 = vpack.c.bf16 %v208_v2, %v207_v59 }
  0xaf   : > { %v1056_v47 = vpop.trf.xlu0 }
  0xb0   : > { %v1060_v48 = vunpack.i.h.bf16 %v1056_v47  ;;  %v1057_v49 = vunpack.i.l.bf16 %v1056_v47 }
  0xb1   : > { %v209_v8 = vpop.trf.xlu1 }
  0xb2   : > { %v284_v50 = vpack.c.bf16 %v1057_v49, %v1052_v46  ;;  %v300_v51 = vpack.c.bf16 %v1060_v48, %v1055_v45 }
  0xb3   : > { %v1061_v52 = vpop.trf.xlu0 }
  0xb4   : > { %949 = vmatmul.mubr.msk.bf16.gmra.mrb[4].mxu0 %vm318_vm2, %v284_v50  ;;  %981 = vmatmul.mubr.msk.bf16.gmra.mrb[4].mxu1 %vm318_vm2, %v300_v51  ;;  %v1065_v54 = vunpack.i.h.bf16 %v1061_v52  ;;  %v1062_v55 = vunpack.i.l.bf16 %v1061_v52 }
  0xb5   : > { %v210_v18 = vpop.trf.xlu1 }
  0xb6   : > { %v293_v40 = vpack.c.bf16 %v210_v18, %v209_v8 }
  0xb7   : > { %v1066_v56 = vpop.trf.xlu0 }
  0xb8   : > { %v1070_v57 = vunpack.i.h.bf16 %v1066_v56  ;;  %v1067_v58 = vunpack.i.l.bf16 %v1066_v56 }
  0xb9   : > { %v211_v24 = vpop.trf.xlu1 }
  0xba   : > { %v285_v60 = vpack.c.bf16 %v1067_v58, %v1062_v55  ;;  %v301_v61 = vpack.c.bf16 %v1070_v57, %v1065_v54 }
  0xbb   : > { %v1071_v62 = vpop.trf.xlu0 }
  0xbc   : > { %952 = vmatprep.mubr.msk.bf16.mxu0 %vm318_vm2, %v285_v60  ;;  %984 = vmatprep.mubr.msk.bf16.mxu1 %vm318_vm2, %v301_v61  ;;  %v1075_v63 = vunpack.i.h.bf16 %v1071_v62  ;;  %v1072_v0 = vunpack.i.l.bf16 %v1071_v62 }
  0xbd   : > { %v212_v32 = vpop.trf.xlu1 }
  0xbe   : > { %v294_v44 = vpack.c.bf16 %v212_v32, %v211_v24 }
  0xbf   : > { %v1076_v1 = vpop.trf.xlu0 }
  0xc0   : > { %v1080_v3 = vunpack.i.h.bf16 %v1076_v1  ;;  %v1077_v4 = vunpack.i.l.bf16 %v1076_v1 }
  0xc1   : > { %v213_v16 = vpop.trf.xlu1 }
  0xc2   : > { %v286_v5 = vpack.c.bf16 %v1077_v4, %v1072_v0  ;;  %v302_v6 = vpack.c.bf16 %v1080_v3, %v1075_v63 }
  0xc3   : > { %v1081_v7 = vpop.trf.xlu0 }
  0xc4   : > { %953 = vmatmul.mubr.msk.bf16.gmra.mrb[8].mxu0 %vm318_vm2, %v286_v5  ;;  %985 = vmatmul.mubr.msk.bf16.gmra.mrb[8].mxu1 %vm318_vm2, %v302_v6  ;;  %v1085_v9 = vunpack.i.h.bf16 %v1081_v7  ;;  %v1082_v10 = vunpack.i.l.bf16 %v1081_v7 }
  0xc5   : > { %v214_v42 = vpop.trf.xlu1 }
  0xc6   : > { %v295_v45 = vpack.c.bf16 %v214_v42, %v213_v16 }
  0xc7   : > { %v1086_v11 = vpop.trf.xlu0 }
  0xc8   : > { %v1090_v12 = vunpack.i.h.bf16 %v1086_v11  ;;  %v1087_v13 = vunpack.i.l.bf16 %v1086_v11 }
  0xc9   : > { %v215_v43 = vpop.trf.xlu1 }
  0xca   : > { %v287_v14 = vpack.c.bf16 %v1087_v13, %v1082_v10  ;;  %v303_v15 = vpack.c.bf16 %v1090_v12, %v1085_v9 }
  0xcb   : > { %v1091_v17 = vpop.trf.xlu0 }
  0xcc   : > { %956 = vmatprep.mubr.msk.bf16.mxu0 %vm318_vm2, %v287_v14  ;;  %988 = vmatprep.mubr.msk.bf16.mxu1 %vm318_vm2, %v303_v15  ;;  %v1095_v19 = vunpack.i.h.bf16 %v1091_v17  ;;  %v1092_v20 = vunpack.i.l.bf16 %v1091_v17 }
  0xcd   : > { %v216_v47 = vpop.trf.xlu1 }
  0xce   : > { %v296_v50 = vpack.c.bf16 %v216_v47, %v215_v43 }
  0xcf   : > { %v1096_v21 = vpop.trf.xlu0 }
  0xd0   : > { %v1100_v22 = vunpack.i.h.bf16 %v1096_v21  ;;  %v1097_v23 = vunpack.i.l.bf16 %v1096_v21 }
  0xd2   : > { %v288_v26 = vpack.c.bf16 %v1097_v23, %v1092_v20  ;;  %v304_v27 = vpack.c.bf16 %v1100_v22, %v1095_v19 }
  0xd3   : > { %v265_v29 = vpop.trf.xlu0 }
  0xd4   : > { %957 = vmatmul.mubr.msk.bf16.gmra.mrb[12].mxu0 %vm318_vm2, %v288_v26  ;;  %989 = vmatmul.mubr.msk.bf16.gmra.mrb[12].mxu1 %vm318_vm2, %v304_v27 }
  0xd5   : > { %960 = vmatprep.mubr.msk.bf16.mxu0 %vm318_vm2, %v289_v28 }
  0xd7   : > { %v266_v30 = vpop.trf.xlu0 }
  0xd8   : > { %v305_v33 = vpack.c.bf16 %v266_v30, %v265_v29 }
  0xda   : > { %992 = vmatprep.mubr.msk.bf16.mxu1 %vm318_vm2, %v305_v33 }
  0xdb   : > { %v267_v36 = vpop.trf.xlu0 }
  0xdc   : > { %961 = vmatmul.mubr.msk.bf16.gmra.mrb[16].mxu0 %vm318_vm2, %v290_v34 }
  0xdd   : > { %964 = vmatprep.mubr.msk.bf16.mxu0 %vm318_vm2, %v291_v35 }
  0xdf   : > { %v268_v25 = vpop.trf.xlu0 }
  0xe0   : > { %v306_v37 = vpack.c.bf16 %v268_v25, %v267_v36 }
  0xe2   : > { %993 = vmatmul.mubr.msk.bf16.gmra.mrb[16].mxu1 %vm318_vm2, %v306_v37 }
  0xe3   : > { %v269_v41 = vpop.trf.xlu0 }
  0xe4   : > { %965 = vmatmul.mubr.msk.bf16.gmra.mrb[20].mxu0 %vm318_vm2, %v292_v39 }
  0xe5   : > { %968 = vmatprep.mubr.msk.bf16.mxu0 %vm318_vm2, %v293_v40 }
  0xe7   : > { %v270_v31 = vpop.trf.xlu0 }
  0xe8   : > { %v307_v38 = vpack.c.bf16 %v270_v31, %v269_v41 }
  0xea   : > { %996 = vmatprep.mubr.msk.bf16.mxu1 %vm318_vm2, %v307_v38 }
  0xeb   : > { %v271_v46 = vpop.trf.xlu0 }
  0xec   : > { %969 = vmatmul.mubr.msk.bf16.gmra.mrb[24].mxu0 %vm318_vm2, %v294_v44 }
  0xed   : > { %972 = vmatprep.mubr.msk.bf16.mxu0 %vm318_vm2, %v295_v45 }
  0xef   : > { %v272_v48 = vpop.trf.xlu0 }
  0xf0   : > { %v308_v49 = vpack.c.bf16 %v272_v48, %v271_v46 }
  0xf2   : > { %997 = vmatmul.mubr.msk.bf16.gmra.mrb[20].mxu1 %vm318_vm2, %v308_v49 }
  0xf3   : > { %v273_v51 = vpop.trf.xlu0 }
  0xf4   : > { %973 = vmatmul.mubr.msk.bf16.gmra.mrb[28].mxu0 %vm318_vm2, %v296_v50 }
  0xf7   : > { %v274_v52 = vpop.trf.xlu0 }
  0xf8   : > { %v309_v53 = vpack.c.bf16 %v274_v52, %v273_v51 }
  0xfa   : > { %1000 = vmatprep.mubr.msk.bf16.mxu1 %vm318_vm2, %v309_v53 }
  0xfb   : > { %v275_v54 = vpop.trf.xlu0 }
  0xff   : > { %v276_v55 = vpop.trf.xlu0 }
 0x100   : > { %v310_v56 = vpack.c.bf16 %v276_v55, %v275_v54 }
 0x102   : > { %1001 = vmatmul.mubr.msk.bf16.gmra.mrb[24].mxu1 %vm318_vm2, %v310_v56 }
 0x177   : > { %v946_v57 = vpop.f32.mrb[0].mxu0  ;;  %v1188_v58 = vpop.f32.mrb[0].mxu1 }
 0x178   : > { %v450_v59 = vpop.f32.mrb[1].mxu0  ;;  %v1190_v60 = vpop.f32.mrb[1].mxu1  ;;  %v691_v9 = vmax.f32 %v946_v57, 0.0 }
 0x179   : > { %v947_v61 = vpop.f32.mrb[2].mxu0  ;;  %v1192_v62 = vpop.f32.mrb[2].mxu1  ;;  %v689_v14 = vmax.f32 %v450_v59, 0.0 }
 0x17a   : > { %v453_v63 = vpop.f32.mrb[3].mxu0  ;;  %v1194_v0 = vpop.f32.mrb[3].mxu1  ;;  %v692_v24 = vmax.f32 %v947_v61, 0.0 }
 0x17b   : > { %v690_v3 = vmax.f32 %v453_v63, 0.0 }
 0x187   : > { %v950_v1 = vpop.f32.mrb[4].mxu0  ;;  %v1196_v2 = vpop.f32.mrb[4].mxu1 }
 0x188   : > { %v695_v4 = vmax.f32 %v950_v1, 0.0  ;;  %v466_v5 = vpop.f32.mrb[5].mxu0  ;;  %v1198_v6 = vpop.f32.mrb[5].mxu1 }
 0x189   : > { %v951_v7 = vpop.f32.mrb[6].mxu0  ;;  %v1200_v8 = vpop.f32.mrb[6].mxu1  ;;  %v693_v34 = vmax.f32 %v466_v5, 0.0 }
 0x18a   : > { %v750_v10 = vadd.f32 %v695_v4, %v690_v3  ;;  %v696_v11 = vmax.f32 %v951_v7, 0.0  ;;  %v469_v12 = vpop.f32.mrb[7].mxu0  ;;  %v1202_v13 = vpop.f32.mrb[7].mxu1 }
 0x18b   : > { %v694_v15 = vmax.f32 %v469_v12, 0.0 }
 0x18c   : > { %v751_v17 = vadd.f32 %v696_v11, %v691_v9 }
 0x18d   : > { %v749_v18 = vadd.f32 %v694_v15, %v689_v14 }
 0x197   : > { %v954_v19 = vpop.f32.mrb[8].mxu0  ;;  %v1204_v20 = vpop.f32.mrb[8].mxu1 }
 0x198   : > { %v699_v21 = vmax.f32 %v954_v19, 0.0  ;;  %v482_v22 = vpop.f32.mrb[9].mxu0  ;;  %v1206_v23 = vpop.f32.mrb[9].mxu1 }
 0x199   : > { %v697_v26 = vmax.f32 %v482_v22, 0.0  ;;  %v955_v27 = vpop.f32.mrb[10].mxu0  ;;  %v1208_v28 = vpop.f32.mrb[10].mxu1 }
 0x19a   : > { %v754_v29 = vadd.f32 %v749_v18, %v699_v21  ;;  %v700_v30 = vmax.f32 %v955_v27, 0.0  ;;  %v485_v32 = vpop.f32.mrb[11].mxu0  ;;  %v1210_v33 = vpop.f32.mrb[11].mxu1 }
 0x19b   : > { %v752_v35 = vadd.f32 %v697_v26, %v692_v24  ;;  %v698_v36 = vmax.f32 %v485_v32, 0.0 }
 0x19c   : > { %v755_v16 = vadd.f32 %v750_v10, %v700_v30 }
 0x19d   : > { %v753_v25 = vadd.f32 %v698_v36, %v693_v34 }
 0x1a7   : > { %v958_v37 = vpop.f32.mrb[12].mxu0  ;;  %v1212_v39 = vpop.f32.mrb[12].mxu1 }
 0x1a8   : > { %v703_v40 = vmax.f32 %v958_v37, 0.0  ;;  %v498_v41 = vpop.f32.mrb[13].mxu0  ;;  %v1214_v42 = vpop.f32.mrb[13].mxu1 }
 0x1a9   : > { %v701_v31 = vmax.f32 %v498_v41, 0.0  ;;  %v959_v38 = vpop.f32.mrb[14].mxu0  ;;  %v1216_v43 = vpop.f32.mrb[14].mxu1  ;;  %v721_v41 = vmax.f32 %v1190_v60, 0.0  ;;  %v724_v60 = vmax.f32 %v1192_v62, 0.0 }
 0x1aa   : > { %v758_v44 = vadd.f32 %v753_v25, %v703_v40  ;;  %v704_v45 = vmax.f32 %v959_v38, 0.0  ;;  %v501_v46 = vpop.f32.mrb[15].mxu0  ;;  %v1218_v47 = vpop.f32.mrb[15].mxu1 }
 0x1ab   : > { %v756_v48 = vadd.f32 %v751_v17, %v701_v31  ;;  %v702_v49 = vmax.f32 %v501_v46, 0.0 }
 0x1ac   : > { %v759_v50 = vadd.f32 %v754_v29, %v704_v45  ;;  %v726_v45 = vmax.f32 %v1202_v13, 0.0  ;;  %v736_v13 = vmax.f32 %v1216_v43, 0.0 }
 0x1ad   : > { %v757_v51 = vadd.f32 %v752_v35, %v702_v49 }
 0x1af   : > { %v962_v52 = vpop.f32.mrb[16].mxu0 }
 0x1b0   : > { %v707_v53 = vmax.f32 %v962_v52, 0.0  ;;  %v514_v54 = vpop.f32.mrb[17].mxu0 }
 0x1b1   : > { %v705_v55 = vmax.f32 %v514_v54, 0.0  ;;  %v963_v56 = vpop.f32.mrb[18].mxu0 }
 0x1b2   : > { %v762_v57 = vadd.f32 %v757_v51, %v707_v53  ;;  %v708_v59 = vmax.f32 %v963_v56, 0.0  ;;  %v517_v61 = vpop.f32.mrb[19].mxu0  ;;  %v731_v51 = vmax.f32 %v1204_v20, 0.0  ;;  %v723_v56 = vmax.f32 %v1188_v58, 0.0 }
 0x1b3   : > { %v760_v63 = vadd.f32 %v755_v16, %v705_v55  ;;  %v706_v1 = vmax.f32 %v517_v61, 0.0  ;;  %v725_v20 = vmax.f32 %v1198_v6, 0.0 }
 0x1b4   : > { %v763_v3 = vadd.f32 %v758_v44, %v708_v59 }
 0x1b5   : > { %v761_v4 = vadd.f32 %v756_v48, %v706_v1  ;;  %v1220_v5 = vpop.f32.mrb[16].mxu1 }
 0x1b6   : > { %v1222_v7 = vpop.f32.mrb[17].mxu1 }
 0x1b7   : > { %v966_v9 = vpop.f32.mrb[20].mxu0  ;;  %v1224_v10 = vpop.f32.mrb[18].mxu1 }
 0x1b8   : > { %v711_v11 = vmax.f32 %v966_v9, 0.0  ;;  %v530_v12 = vpop.f32.mrb[21].mxu0  ;;  %v1226_v14 = vpop.f32.mrb[19].mxu1  ;;  %v729_v9 = vmax.f32 %v1206_v23, 0.0  ;;  %v728_v23 = vmax.f32 %v1200_v8, 0.0 }
 0x1b9   : > { %v709_v15 = vmax.f32 %v530_v12, 0.0  ;;  %v967_v17 = vpop.f32.mrb[22].mxu0 }
 0x1ba   : > { %v766_v18 = vadd.f32 %v761_v4, %v711_v11  ;;  %v712_v19 = vmax.f32 %v967_v17, 0.0  ;;  %v533_v21 = vpop.f32.mrb[23].mxu0 }
 0x1bb   : > { %v764_v22 = vadd.f32 %v759_v50, %v709_v15  ;;  %v710_v24 = vmax.f32 %v533_v21, 0.0  ;;  %v734_v21 = vmax.f32 %v1218_v47, 0.0 }
 0x1bc   : > { %v767_v26 = vadd.f32 %v762_v57, %v712_v19  ;;  %v722_v57 = vmax.f32 %v1194_v0, 0.0  ;;  %v727_v0 = vmax.f32 %v1196_v2, 0.0  ;;  %v739_v2 = vmax.f32 %v1220_v5, 0.0 }
 0x1bd   : > { %v765_v27 = vadd.f32 %v760_v63, %v710_v24 }
 0x1bf   : > { %v970_v29 = vpop.f32.mrb[24].mxu0 }
 0x1c0   : > { %v715_v30 = vmax.f32 %v970_v29, 0.0  ;;  %v546_v32 = vpop.f32.mrb[25].mxu0 }
 0x1c1   : > { %v713_v34 = vmax.f32 %v546_v32, 0.0  ;;  %v971_v35 = vpop.f32.mrb[26].mxu0 }
 0x1c2   : > { %v770_v36 = vadd.f32 %v765_v27, %v715_v30  ;;  %v716_v16 = vmax.f32 %v971_v35, 0.0  ;;  %v549_v25 = vpop.f32.mrb[27].mxu0  ;;  %v735_v30 = vmax.f32 %v1212_v39, 0.0  ;;  %v737_v35 = vmax.f32 %v1222_v7, 0.0 }
 0x1c3   : > { %v768_v37 = vadd.f32 %v763_v3, %v713_v34  ;;  %v714_v40 = vmax.f32 %v549_v25, 0.0  ;;  %v733_v34 = vmax.f32 %v1214_v42, 0.0 }
 0x1c4   : > { %v771_v31 = vadd.f32 %v766_v18, %v716_v16  ;;  %v730_v18 = vmax.f32 %v1210_v33, 0.0  ;;  %v740_v16 = vmax.f32 %v1224_v10, 0.0 }
 0x1c5   : > { %v769_v38 = vadd.f32 %v764_v22, %v714_v40  ;;  %v1229_v44 = vpop.f32.mrb[20].mxu1 }
 0x1c6   : > { %v776_v46 = vadd.f32 %v771_v31, %v721_v41  ;;  %v658_v48 = vpop.f32.mrb[21].mxu1 }
 0x1c7   : > { %v974_v49 = vpop.f32.mrb[28].mxu0  ;;  %v999_v50 = vpop.f32.mrb[22].mxu1  ;;  %v741_v15 = vmax.f32 %v658_v48, 0.0 }
 0x1c8   : > { %v781_v52 = vadd.f32 %v776_v46, %v726_v45  ;;  %v719_v53 = vmax.f32 %v974_v49, 0.0  ;;  %v562_v54 = vpop.f32.mrb[29].mxu0  ;;  %v661_v55 = vpop.f32.mrb[23].mxu1  ;;  %v744_v8 = vmax.f32 %v999_v50, 0.0 }
 0x1c9   : > { %v717_v59 = vmax.f32 %v562_v54, 0.0  ;;  %v975_v61 = vpop.f32.mrb[30].mxu0  ;;  %v742_v40 = vmax.f32 %v661_v55, 0.0 }
 0x1ca   : > { %v786_v63 = vadd.f32 %v781_v52, %v731_v51  ;;  %v774_v1 = vadd.f32 %v769_v38, %v719_v53  ;;  %v720_v3 = vmax.f32 %v975_v61, 0.0  ;;  %v565_v4 = vpop.f32.mrb[31].mxu0  ;;  %v743_v38 = vmax.f32 %v1229_v44, 0.0 }
 0x1cb   : > { %v772_v11 = vadd.f32 %v767_v26, %v717_v59  ;;  %v718_v12 = vmax.f32 %v565_v4, 0.0  ;;  %v732_v26 = vmax.f32 %v1208_v28, 0.0 }
 0x1cc   : > { %v791_v58 = vadd.f32 %v786_v63, %v736_v13  ;;  %v779_v17 = vadd.f32 %v774_v1, %v724_v60  ;;  %v775_v62 = vadd.f32 %v770_v36, %v720_v3 }
 0x1cd   : > { %v777_v19 = vadd.f32 %v772_v11, %v722_v57  ;;  %v773_v43 = vadd.f32 %v768_v37, %v718_v12  ;;  %v738_v37 = vmax.f32 %v1226_v14, 0.0 }
 0x1ce   : > { %v796_v22 = vadd.f32 %v791_v58, %v741_v15  ;;  %v784_v24 = vadd.f32 %v779_v17, %v729_v9  ;;  %v780_v6 = vadd.f32 %v775_v62, %v725_v20 }
 0x1cf   : > { %v782_v27 = vadd.f32 %v777_v19, %v727_v0  ;;  %v778_v29 = vadd.f32 %v773_v43, %v723_v56 }
 0x1d0   : > { %v789_v32 = vadd.f32 %v784_v24, %v734_v21  ;;  %v785_v33 = vadd.f32 %v780_v6, %v730_v18 }
 0x1d1   : > { %v787_v47 = vadd.f32 %v782_v27, %v732_v26  ;;  %v783_v36 = vadd.f32 %v778_v29, %v728_v23 }
 0x1d2   : > { %v794_v25 = vadd.f32 %v789_v32, %v739_v2  ;;  %v790_v28 = vadd.f32 %v785_v33, %v735_v30 }
 0x1d3   : > { %v792_v39 = vadd.f32 %v787_v47, %v737_v35  ;;  %v788_v41 = vadd.f32 %v783_v36, %v733_v34 }
 0x1d4   : > { %v799_v5 = vadd.f32 %v794_v25, %v744_v8  ;;  %v795_v31 = vadd.f32 %v790_v28, %v740_v16 }
 0x1d5   : > { %v797_v42 = vadd.f32 %v792_v39, %v742_v40  ;;  %v1002_v7 = vpop.f32.mrb[24].mxu1  ;;  %v793_v45 = vadd.f32 %v788_v41, %v738_v37 }
 0x1d6   : > { %v804_v10 = vmul.f32 0.083333336, %v799_v5  ;;  %v747_v46 = vmax.f32 %v1002_v7, 0.0  ;;  %v674_v48 = vpop.f32.mrb[25].mxu1 }
 0x1d7   : > { %v745_v49 = vmax.f32 %v674_v48, 0.0  ;;  %v1003_v50 = vpop.f32.mrb[26].mxu1  ;;  %v798_v14 = vadd.f32 %v793_v45, %v743_v38 }
 0x1d8   : > { %809 = vst [vmem:[%s143_s20] sm:$0xff] %v804_v10  ;;  %v802_v51 = vadd.f32 %v797_v42, %v747_v46  ;;  %v748_v52 = vmax.f32 %v1003_v50, 0.0  ;;  %v677_v53 = vpop.f32.mrb[27].mxu1 }
 0x1d9   : > { %v800_v54 = vadd.f32 %v795_v31, %v745_v49  ;;  %v746_v55 = vmax.f32 %v677_v53, 0.0 }
 0x1da   : > { %v807_v44 = vmul.f32 0.083333336, %v802_v51  ;;  %v803_v56 = vadd.f32 %v798_v14, %v748_v52 }
 0x1db   : > { %v805_v60 = vmul.f32 0.083333336, %v800_v54  ;;  %v801_v57 = vadd.f32 %v796_v22, %v746_v55 }
 0x1dc   : > { %812 = vst [vmem:[%s143_s20 + $0x18] sm:$0xff] %v807_v44  ;;  %v808_v59 = vmul.f32 0.083333336, %v803_v56 }
 0x1dd   : > { %810 = vst [vmem:[%s143_s20 + $0x8] sm:$0xff] %v805_v60  ;;  %v806_v61 = vmul.f32 0.083333336, %v801_v57 }
 0x1de   : > { %813 = vst [vmem:[%s143_s20 + $0x20] sm:$0xff] %v808_v59 }
 0x1df   : > { %811 = vst [vmem:[%s143_s20 + $0x10] sm:$0xff] %v806_v61 }
 0x1e0 PF: > { %s12_s9 = sadd.s32 1, %s1108_s9  }
 0x1e1   : > { %p9_p4 = scmp.ge.s32.totalorder %s12_s9, 4  }
 0x1e3   :  { %11 = sbr.rel (!%p9_p4) target bundleno = 1 (0x1), region = 58 }

// kernel: res8_forward.3
= control target key start
LH: loop header
LB: loop body
LE: loop exit
PB: predicated region body
PF: predicated region fallthrough
CT: control target
= control target key end

     0   :  { %v18569_v1 = vmov 0.0   ;;  %vm13859_vm0 = vmmov 0   ;;  %v13860_v7 = vmov 0   ;;  %vm38_vm1 = vcmask 1043456   ;;  %s18558_s0 = inlined_call_operand.vmem [shape: f32[80,128], index: 0, kind: input, shape index: {}]   ;;  %s18559_s1 = inlined_call_operand.vmem [shape: bf16[6,3,384,128], index: 1, kind: input, shape index: {}]   ;;  %s18560_s2 = inlined_call_operand.vmem [shape: f32[80,1], index: 2, kind: input, shape index: {}]   ;;  %s18561_s3 = inlined_call_operand.hbm [shape: f32[2,128], index: 3, kind: output, shape index: {}]  }
   0x1   :  { %v13390_v0 = vld [vmem:[%s18559_s1 + $0x100] sm:$0xff]   ;;  %12316 = vmatprep.subr.bf16.mxu1 %v18569_v1  ;;  %12332 = vmatprep.mubr.msk.bf16.mxu1 %vm13859_vm0, %v18569_v1  ;;  %v13393_v4 = vld [vmem:[%s18559_s1 + $0x108] sm:$0xff]   ;;  %16 = vst [vmem:[#allocation2] sm:$0xf] %v13860_v7  ;;  %17 = vst [vmem:[#allocation2 + $0x28] sm:$0xf0] %v13860_v7 }
   0x2   :  { %v13391_v2 = vld [vmem:[%s18559_s1 + $0x140] sm:$0xff]   ;;  %11254 = vmatprep.subr.bf16.mxu0 %v13390_v0  ;;  %v13394_v5 = vld [vmem:[%s18559_s1 + $0x148] sm:$0xff]   ;;  %13388 = vset.pattern.permute.xlu0 %v13860_v7  ;;  %v13396_v8 = vld [vmem:[%s18559_s1 + $0x110] sm:$0xff]   ;;  %vm151_vm2 = vcmask 1046528   ;;  %vm98_vm3 = vsmask.f32 7424 }
   0x3   :  { %v13392_v3 = vld [vmem:[%s18559_s1 + $0xc0] sm:$0xff]   ;;  %12317 = vmatpush3.bf16.msra.mxu1 %v13391_v2  ;;  %v13395_v6 = vld [vmem:[%s18559_s1 + $0xc8] sm:$0xff]   ;;  %13389 = vset.pattern.permute.xlu1 %v13860_v7  ;;  %v13397_v9 = vld [vmem:[%s18559_s1 + $0x150] sm:$0xff]   ;;  %vm286_vm4 = vsmask.f32 4352 }
   0x4   :  { %11255 = vmatpush3.bf16.msra.mxu0 %v13392_v3  ;;  %12318 = vmatprep.subr.bf16.mxu1 %v18569_v1  ;;  %v13398_v10 = vld [vmem:[%s18559_s1 + $0xd0] sm:$0xff]   ;;  %v13399_v11 = vld [vmem:[%s18559_s1 + $0x118] sm:$0xff]   ;;  %v13402_v14 = vld [vmem:[%s18559_s1 + $0x120] sm:$0xff]   ;;  %vm1172_vm5 = vsmask.f32 1280 }
   0x5   :  { %11256 = vmatprep.subr.bf16.mxu0 %v13393_v4  ;;  %v13400_v12 = vld [vmem:[%s18559_s1 + $0x158] sm:$0xff]   ;;  %v13403_v15 = vld [vmem:[%s18559_s1 + $0x160] sm:$0xff]   ;;  %v13405_v17 = vld [vmem:[%s18559_s1 + $0x128] sm:$0xff]  }
   0x6   :  { %v13401_v13 = vld [vmem:[%s18559_s1 + $0xd8] sm:$0xff]   ;;  %v13404_v16 = vld [vmem:[%s18559_s1 + $0xe0] sm:$0xff]   ;;  %v13406_v18 = vld [vmem:[%s18559_s1 + $0x168] sm:$0xff]  }
   0x7   :  { %12319 = vmatpush3.bf16.msra.mxu1 %v13394_v5  ;;  %v13407_v19 = vld [vmem:[%s18559_s1 + $0xe8] sm:$0xff]   ;;  %v13408_v20 = vld [vmem:[%s18559_s1 + $0x130] sm:$0xff]   ;;  %v13411_v23 = vld [vmem:[%s18559_s1 + $0x138] sm:$0xff]  }
   0x8   :  { %11257 = vmatpush3.bf16.msra.mxu0 %v13395_v6  ;;  %12320 = vmatprep.subr.bf16.mxu1 %v18569_v1  ;;  %v13409_v21 = vld [vmem:[%s18559_s1 + $0x170] sm:$0xff]   ;;  %v18_v24 = vld [vmem:[%s18558_s0] sm:$0xff]  ;;  %v19_v25 = vld [vmem:[%s18558_s0 + $0x8] sm:$0xff] }
   0x9   :  { %11258 = vmatprep.subr.bf16.mxu0 %v13396_v8  ;;  %v13410_v22 = vld [vmem:[%s18559_s1 + $0xf0] sm:$0xff]   ;;  %v21_v27 = vld [vmem:[%s18558_s0 + $0x18] sm:$0xff]  ;;  %v22_v28 = vld [vmem:[%s18558_s0 + $0x20] sm:$0xff]  ;;  %v28_v30 = vpack.c.bf16 %v19_v25, %v18_v24 }
   0xa   :  { %v20_v26 = vld [vmem:[%s18558_s0 + $0x10] sm:$0xff]  ;;  %v23_v29 = vld [vmem:[%s18558_s0 + $0x28] sm:$0xff]  ;;  %v13412_v31 = vld [vmem:[%s18559_s1 + $0x178] sm:$0xff]  }
   0xb   :  { %12321 = vmatpush3.bf16.msra.mxu1 %v13397_v9  ;;  %v29_v32 = vpack.c.bf16 %v21_v27, %v20_v26  ;;  %v30_v33 = vpack.c.bf16 %v23_v29, %v22_v28  ;;  %v13413_v34 = vld [vmem:[%s18559_s1 + $0xf8] sm:$0xff]   ;;  %v39_v35 = vrot.slane %v28_v30, 4  ;;  %v13414_v38 = vld [vmem:[%s18559_s1 + $0x40] sm:$0xff]   ;;  %v24_v45 = vld [vmem:[%s18558_s0 + $0x30] sm:$0xff] }
   0xc   :  { %11259 = vmatpush3.bf16.msra.mxu0 %v13398_v10  ;;  %12322 = vmatprep.subr.bf16.mxu1 %v18569_v1  ;;  %v25_v47 = vld [vmem:[%s18558_s0 + $0x38] sm:$0xff] }
   0xd   :  { %11260 = vmatprep.subr.bf16.mxu0 %v13399_v11  ;;  %v40_v36 = vrot.slane %v29_v32, 4  ;;  %v42_v37 = vrot.slane %v30_v33, 4  ;;  %54 = vst [vmem:[#allocation2] sm:$0xf0] %v39_v35  ;;  %v31_v54 = vpack.c.bf16 %v25_v47, %v24_v45 }
   0xf   :  { %12323 = vmatpush3.bf16.msra.mxu1 %v13400_v12  ;;  %v41_v39 = vsel %vm38_vm1, %v39_v35, %v40_v36  ;;  %v13987_v40 = vsel %vm38_vm1, %v40_v36, %v42_v37  ;;  %v44_v61 = vrot.slane %v31_v54, 4 }
  0x10   :  { %11261 = vmatpush3.bf16.msra.mxu0 %v13401_v13  ;;  %12324 = vmatprep.subr.bf16.mxu1 %v18569_v1  ;;  %v13989_v41 = vshll.u32 %v41_v39, 16  ;;  %v13991_v42 = vshrl.u32 %v41_v39, 16  ;;  %v13994_v43 = vshll.u32 %v13987_v40, 16  ;;  %v13996_v44 = vrot.slane %v41_v39, 1 }
  0x11   :  { %11262 = vmatprep.subr.bf16.mxu0 %v13402_v14  ;;  %v155_v46 = vrot.slane %v13987_v40, 1  ;;  %v14011_v50 = vshrl.u32 %v13987_v40, 16  ;;  %v45_v25 = vsel %vm38_vm1, %v42_v37, %v44_v61 }
  0x12   :  { %v14007_v48 = vrot.slane %v13989_v41, 1  ;;  %v117_v49 = vrot.slane %v13994_v43, 1  ;;  %v295_v52 = vrot.slane %v13991_v42, 3  ;;  %v296_v53 = vrot.slane %v13989_v41, 4 }
  0x13   :  { %12325 = vmatpush3.bf16.msra.mxu1 %v13403_v15  ;;  %v156_v51 = vsel %vm151_vm2, %v13996_v44, %v155_v46  ;;  %v333_v58 = vrot.slane %v14011_v50, 3  ;;  %v334_v62 = vrot.slane %v13994_v43, 4  ;;  %v14052_v28 = vshll.u32 %v45_v25, 16 }
  0x14   :  { %11263 = vmatpush3.bf16.msra.mxu0 %v13404_v16  ;;  %12326 = vmatprep.subr.bf16.mxu1 %v18569_v1  ;;  %v113_v55 = vor.u32 %v13991_v42, %v14007_v48  ;;  %v14019_v56 = vshrl.u32 %v156_v51, 16  ;;  %v14021_v57 = vshll.u32 %v156_v51, 16  ;;  %v213_v59 = vld [vmem:[#allocation2] sm:$0xf0]  ;;  %v121_v27 = vor.u32 %v14011_v50, %v117_v49 }
  0x15   :  { %11264 = vmatprep.subr.bf16.mxu0 %v13405_v17  ;;  %v211_v60 = vld [vmem:[#allocation2] sm:$0xf8]  ;;  %v216_v0 = vshrl.u32 %v213_v59, 16  ;;  %v218_v2 = vshll.u32 %v213_v59, 16  ;;  %v233_v3 = vrot.slane %v213_v59, 1  ;;  %v157_v29 = vrot.slane %v45_v25, 1 }
  0x16   :  { %v14026_v63 = vsel %vm98_vm3, %v113_v55, %v117_v49  ;;  %v327_v6 = vrot.slane %v14019_v56, 3  ;;  %v330_v7 = vrot.slane %v14021_v57, 4  ;;  %v288_v10 = vshrl.u32 %v211_v60, 16 }
  0x17   :  { %12327 = vmatpush3.bf16.msra.mxu1 %v13406_v18  ;;  %v14029_v4 = vshrl.u32 %v14026_v63, 16  ;;  %v14032_v5 = vshll.u32 %v14026_v63, 16  ;;  %v220_v8 = vrot.slane %v218_v2, 1  ;;  %v234_v9 = vsel %vm151_vm2, %v233_v3, %v13996_v44  ;;  %v13415_v2 = vld [vmem:[%s18559_s1] sm:$0xff]  }
  0x18   :  { %11265 = vmatpush3.bf16.msra.mxu0 %v13407_v19  ;;  %12328 = vmatprep.subr.bf16.mxu1 %v18569_v1  ;;  %v291_v11 = vshll.u32 %v211_v60, 16  ;;  %v317_v14 = vshrl.u32 %v234_v9, 16  ;;  %v320_v15 = vshll.u32 %v234_v9, 16  ;;  %v290_v17 = vrot.slane %v288_v10, 3  ;;  %v13421_v60 = vld [vmem:[%s18559_s1 + $0x88] sm:$0xff]  }
  0x19   :  { %11266 = vmatprep.subr.bf16.mxu0 %v13408_v20  ;;  %v310_v12 = vrot.slane %v14029_v4, 3  ;;  %v313_v13 = vrot.slane %v14032_v5, 4  ;;  %v221_v16 = vor.u32 %v220_v8, %v216_v0  ;;  %v14040_v19 = vor.u32 %v296_v53, %v295_v52  ;;  %v26_v20 = vld [vmem:[%s18558_s0 + $0x40] sm:$0xff]  ;;  %v13416_v9 = vld [vmem:[%s18559_s1 + $0x48] sm:$0xff]  }
  0x1a   :  { %v293_v18 = vrot.slane %v291_v11, 4  ;;  %v331_v24 = vor.u32 %v330_v7, %v327_v6  ;;  %v125_v36 = vrot.slane %v14052_v28, 1  ;;  %v158_v37 = vsel %vm151_vm2, %v155_v46, %v157_v29 }
  0x1b   :  { %12329 = vmatpush3.bf16.msra.mxu1 %v13409_v21  ;;  %v27_v21 = vld [vmem:[%s18558_s0 + $0x48] sm:$0xff]  ;;  %v222_v26 = vsel %vm98_vm3, %v221_v16, %v14007_v48  ;;  %v314_v32 = vor.u32 %v313_v13, %v310_v12  ;;  %v14060_v47 = vshrl.u32 %v158_v37, 16  ;;  %v14065_v51 = vshll.u32 %v158_v37, 16 }
  0x1c   :  { %11267 = vmatpush3.bf16.msra.mxu0 %v13410_v22  ;;  %12330 = vmatprep.subr.bf16.mxu1 %v18569_v1  ;;  %v319_v22 = vrot.slane %v317_v14, 3  ;;  %v300_v30 = vshrl.u32 %v222_v26, 16  ;;  %v294_v35 = vor.u32 %v293_v18, %v290_v17  ;;  %v14063_v49 = vsel %vm98_vm3, %v121_v27, %v125_v36  ;;  %v13419_v18 = vld [vmem:[%s18559_s1 + $0x50] sm:$0xff]  }
  0x1d   :  { %11268 = vmatprep.subr.bf16.mxu0 %v13411_v23  ;;  %v322_v23 = vrot.slane %v320_v15, 4  ;;  %v14067_v53 = vshrl.u32 %v45_v25, 16  ;;  %v14072_v46 = vshrl.u32 %v14063_v49, 16  ;;  %v14075_v55 = vshll.u32 %v14063_v49, 16  ;;  %v13424_v15 = vld [vmem:[%s18559_s1 + $0x90] sm:$0xff]  }
  0x1e   :  { %v302_v39 = vrot.slane %v300_v30, 3  ;;  %v349_v59 = vrot.slane %v14060_v47, 3  ;;  %v298_v0 = vsel %vm286_vm4, %v294_v35, %v14040_v19  ;;  %v352_v3 = vrot.slane %v14065_v51, 4 }
  0x1f   :  { %12331 = vmatpush3.bf16.msra.mxu1 %v13412_v31  ;;  %v303_v31 = vshll.u32 %v222_v26, 16  ;;  %v323_v33 = vor.u32 %v322_v23, %v319_v22  ;;  %v129_v7 = vor.u32 %v14067_v53, %v125_v36  ;;  %v340_v10 = vrot.slane %v14072_v46, 3 }
  0x20   :  { %11269 = vmatpush3.bf16.msra.mxu0 %v13413_v34  ;;  %12352 = vmatprep.subr.bf16.mxu1 %v18569_v1  ;;  %v13418_v34 = vld [vmem:[%s18559_s1 + $0x80] sm:$0xff]   ;;  %v343_v11 = vrot.slane %v14075_v55, 4  ;;  %v353_v13 = vor.u32 %v352_v3, %v349_v59  ;;  %v14110_v17 = vor.u32 %v334_v62, %v333_v58  ;;  %v355_v58 = vrot.slane %v14067_v53, 3 }
  0x21   :  { %11313 = vmatprep.subr.bf16.mxu0 %v13414_v38  ;;  %v32_v38 = vpack.c.bf16 %v27_v21, %v26_v20  ;;  %v305_v40 = vrot.slane %v303_v31, 4  ;;  %v332_v45 = vsel %vm286_vm4, %v323_v33, %v331_v24  ;;  %v356_v62 = vrot.slane %v14052_v28, 4 }
  0x22   :  { %12333 = vmatmul.mubr.bf16.vlgmr.msra.gmra.mrb[0].mxu1 %v332_v45  ;;  %v344_v16 = vor.u32 %v343_v11, %v340_v10  ;;  %v354_v22 = vsel %vm286_vm4, %v331_v24, %v353_v13  ;;  %v13426_v24 = vld [vmem:[%s18559_s1 + $0x98] sm:$0xff]   ;;  %v13428_v10 = vld [vmem:[%s18559_s1 + $0xa0] sm:$0xff]  }
  0x23   :  { %v46_v52 = vrot.slane %v32_v38, 4  ;;  %v306_v54 = vor.u32 %v305_v40, %v302_v39  ;;  %12336 = vmatprep.mubr.msk.bf16.mxu1 %vm13859_vm0, %v18569_v1  ;;  %12353 = vmatpush3.bf16.msra.mxu1 %v13418_v34  ;;  %v13420_v38 = vld [vmem:[%s18559_s1 + $0x10] sm:$0xff]  }
  0x24   :  { %12354 = vmatprep.subr.bf16.mxu1 %v18569_v1  ;;  %v345_v25 = vsel %vm286_vm4, %v314_v32, %v344_v16 }
  0x25   :  { %v47_v6 = vsel %vm38_vm1, %v44_v61, %v46_v52  ;;  %59 = vst [vmem:[#allocation2 + $0x28] sm:$0xf] %v46_v52  ;;  %v315_v8 = vsel %vm286_vm4, %v306_v54, %v314_v32  ;;  %v13417_v61 = vld [vmem:[%s18559_s1 + $0x8] sm:$0xff]   ;;  %v336_v32 = vsel %vm286_vm4, %v14040_v19, %v14110_v17  ;;  %v13422_v54 = vld [vmem:[%s18559_s1 + $0x58] sm:$0xff]  }
  0x26   :  { %v14096_v12 = vshll.u32 %v47_v6, 16  ;;  %612 = vmatprep.mubr.bf16.mxu0 %v315_v8  ;;  %v14101_v14 = vrot.slane %v47_v6, 1  ;;  %v14116_v21 = vshrl.u32 %v47_v6, 16 }
  0x27   :  { %613 = vmatmul.mubr.bf16.vlgmr.msra.gmra.mrb[0].mxu0 %v298_v0  ;;  %12355 = vmatpush3.bf16.msra.mxu1 %v13421_v60 }
  0x28   :  { %v133_v20 = vrot.slane %v14096_v12, 1  ;;  %11314 = vmatpush3.bf16.msra.mxu0 %v13415_v2  ;;  %v160_v23 = vsel %vm151_vm2, %v157_v29, %v14101_v14  ;;  %12356 = vmatprep.subr.bf16.mxu1 %v18569_v1  ;;  %v378_v3 = vrot.slane %v14096_v12, 4 }
  0x29   :  { %11315 = vmatprep.subr.bf16.mxu0 %v13416_v9  ;;  %v14128_v27 = vshrl.u32 %v160_v23, 16  ;;  %v14130_v30 = vshll.u32 %v160_v23, 16  ;;  %620 = vmatprep.mubr.bf16.mxu0 %v345_v25 }
  0x2a   :  { %v14126_v26 = vsel %vm98_vm3, %v129_v7, %v133_v20  ;;  %12337 = vmatmul.mubr.bf16.gmra.mrb[4].mxu1 %v354_v22  ;;  %v14149_v35 = vor.u32 %v14116_v21, %v133_v20  ;;  %v14170_v7 = vor.u32 %v356_v62, %v355_v58  ;;  %v13427_v62 = vld [vmem:[%s18559_s1 + $0x20] sm:$0xff]  }
  0x2b   :  { %v14136_v29 = vshrl.u32 %v14126_v26, 16  ;;  %v14139_v31 = vshll.u32 %v14126_v26, 16  ;;  %12340 = vmatprep.mubr.msk.bf16.mxu1 %vm13859_vm0, %v18569_v1  ;;  %v371_v33 = vrot.slane %v14128_v27, 3  ;;  %v374_v34 = vrot.slane %v14130_v30, 4  ;;  %12357 = vmatpush3.bf16.msra.mxu1 %v13424_v15 }
  0x2c   :  { %v14151_v36 = vld [vmem:[#allocation2 + $0x28] sm:$0xf]  ;;  %11316 = vmatpush3.bf16.msra.mxu0 %v13417_v61  ;;  %12358 = vmatprep.subr.bf16.mxu1 %v18569_v1  ;;  %v13423_v61 = vld [vmem:[%s18559_s1 + $0x18] sm:$0xff]  }
  0x2d   :  { %v214_v37 = vld [vmem:[#allocation2 + $0x28] sm:$0x1f]  ;;  %v362_v19 = vrot.slane %v14136_v29, 3  ;;  %v365_v39 = vrot.slane %v14139_v31, 4  ;;  %v224_v40 = vshll.u32 %v14151_v36, 16  ;;  %11317 = vmatprep.subr.bf16.mxu0 %v13419_v18  ;;  %v375_v52 = vor.u32 %v374_v34, %v371_v33 }
  0x2e   :  { %v235_v45 = vrot.slane %v214_v37, 1  ;;  %v228_v59 = vshrl.u32 %v14151_v36, 16 }
  0x2f   :  { %v366_v60 = vor.u32 %v365_v39, %v362_v19  ;;  %v226_v0 = vrot.slane %v224_v40, 1  ;;  %621 = vmatmul.mubr.bf16.gmra.mrb[4].mxu0 %v336_v32  ;;  %v376_v6 = vsel %vm286_vm4, %v353_v13, %v375_v52  ;;  %12359 = vmatpush3.bf16.msra.mxu1 %v13426_v24  ;;  %v13425_v13 = vld [vmem:[%s18559_s1 + $0x60] sm:$0xff]   ;;  %v358_v39 = vsel %vm286_vm4, %v14110_v17, %v14170_v7 }
  0x30   :  { %v236_v2 = vsel %vm151_vm2, %v14101_v14, %v235_v45  ;;  %11318 = vmatpush3.bf16.msra.mxu0 %v13420_v38  ;;  %12360 = vmatprep.subr.bf16.mxu1 %v18569_v1  ;;  %v413_v20 = vshrl.u32 %v235_v45, 16  ;;  %v96_v32 = vld [vmem:[#allocation2] sm:$0xfe]  ;;  %v13431_v38 = vld [vmem:[%s18559_s1 + $0xa8] sm:$0xff]   ;;  %v416_v19 = vshll.u32 %v235_v45, 16 }
  0x31   :  { %v391_v8 = vshrl.u32 %v236_v2, 16  ;;  %v394_v9 = vshll.u32 %v236_v2, 16  ;;  %v367_v11 = vsel %vm286_vm4, %v344_v16, %v366_v60  ;;  %v227_v15 = vsel %vm98_vm3, %v14149_v35, %v226_v0  ;;  %11319 = vmatprep.subr.bf16.mxu0 %v13422_v54 }
  0x32   :  { %v230_v18 = vor.u32 %v228_v59, %v226_v0  ;;  %628 = vmatprep.mubr.bf16.mxu0 %v367_v11  ;;  %v382_v16 = vshrl.u32 %v227_v15, 16  ;;  %v385_v22 = vshll.u32 %v227_v15, 16  ;;  %12341 = vmatmul.mubr.bf16.gmra.mrb[8].mxu1 %v376_v6  ;;  %v377_v54 = vrot.slane %v14116_v21, 3  ;;  %v13429_v0 = vld [vmem:[%s18559_s1 + $0x68] sm:$0xff]  }
  0x33   :  { %v393_v23 = vrot.slane %v391_v8, 3  ;;  %v396_v58 = vrot.slane %v394_v9, 4  ;;  %12344 = vmatprep.mubr.msk.bf16.mxu1 %vm13859_vm0, %v18569_v1  ;;  %12361 = vmatpush3.bf16.msra.mxu1 %v13428_v10  ;;  %v100_v9 = vshrl.u32 %v96_v32, 16  ;;  %v102_v10 = vshll.u32 %v96_v32, 16 }
  0x34   :  { %v404_v25 = vshrl.u32 %v230_v18, 16  ;;  %v407_v24 = vshll.u32 %v230_v18, 16  ;;  %v384_v33 = vrot.slane %v382_v16, 3  ;;  %v387_v34 = vrot.slane %v385_v22, 4  ;;  %11320 = vmatpush3.bf16.msra.mxu0 %v13423_v61  ;;  %12362 = vmatprep.subr.bf16.mxu1 %v18569_v1  ;;  %v13434_v18 = vld [vmem:[%s18559_s1 + $0xb0] sm:$0xff]  }
  0x35   :  { %v397_v37 = vor.u32 %v396_v58, %v393_v23  ;;  %11321 = vmatprep.subr.bf16.mxu0 %v13425_v13  ;;  %v415_v45 = vrot.slane %v413_v20, 3  ;;  %v152_v11 = vrot.slane %v96_v32, 1  ;;  %v418_v15 = vrot.slane %v416_v19, 4  ;;  %v13430_v20 = vld [vmem:[%s18559_s1 + $0x28] sm:$0xff]   ;;  %v13437_v58 = vld [vmem:[%s18559_s1 + $0xb8] sm:$0xff]  }
  0x36   :  { %v406_v2 = vrot.slane %v404_v25, 3  ;;  %v409_v6 = vrot.slane %v407_v24, 4  ;;  %v388_v8 = vor.u32 %v387_v34, %v384_v33  ;;  %v104_v16 = vrot.slane %v102_v10, 1  ;;  %v90_v33 = vld [vmem:[#allocation2] sm:$0xff] }
  0x37   :  { %629 = vmatmul.mubr.bf16.gmra.mrb[8].mxu0 %v358_v39  ;;  %v398_v61 = vsel %vm286_vm4, %v375_v52, %v397_v37  ;;  %12363 = vmatpush3.bf16.msra.mxu1 %v13431_v38  ;;  %v379_v13 = vor.u32 %v378_v3, %v377_v54  ;;  %v154_v22 = vsel %vm151_vm2, %v152_v11, %v13996_v44  ;;  %v13432_v52 = vld [vmem:[%s18559_s1 + $0x70] sm:$0xff]   ;;  %v399_v24 = vrot.slane %v228_v59, 3  ;;  %v13435_v59 = vld [vmem:[%s18559_s1 + $0x78] sm:$0xff]  }
  0x38   :  { %v389_v17 = vsel %vm286_vm4, %v366_v60, %v388_v8  ;;  %11322 = vmatpush3.bf16.msra.mxu0 %v13427_v62  ;;  %v410_v60 = vor.u32 %v409_v6, %v406_v2  ;;  %12364 = vmatprep.subr.bf16.mxu1 %v18569_v1  ;;  %v105_v23 = vor.u32 %v104_v16, %v100_v9  ;;  %v13433_v3 = vld [vmem:[%s18559_s1 + $0x30] sm:$0xff]   ;;  %v746_v62 = vshll.u32 %v154_v22, 16 }
  0x39   :  { %636 = vmatprep.mubr.bf16.mxu0 %v389_v17  ;;  %11323 = vmatprep.subr.bf16.mxu0 %v13429_v0  ;;  %v419_v25 = vor.u32 %v418_v15, %v415_v45  ;;  %v380_v34 = vsel %vm286_vm4, %v14170_v7, %v379_v13  ;;  %v400_v38 = vrot.slane %v224_v40, 4  ;;  %v13436_v0 = vld [vmem:[%s18559_s1 + $0x38] sm:$0xff]   ;;  %v744_v2 = vshrl.u32 %v154_v22, 16 }
  0x3a   :  { %12345 = vmatmul.mubr.bf16.gmra.mrb[12].mxu1 %v398_v61  ;;  %v110_v32 = vsel %vm98_vm3, %v105_v23, %v14007_v48  ;;  %v411_v39 = vsel %vm286_vm4, %v388_v8, %v410_v60  ;;  %v748_v6 = vrot.slane %v746_v62, 1  ;;  %v729_v36 = vshll.u32 %v90_v33, 16  ;;  %v13438_v8 = vld [vmem:[%s18559_s1 + $0x1c0] sm:$0xff]  }
  0x3b   :  { %12348 = vmatprep.mubr.msk.bf16.mxu1 %vm13859_vm0, %v18569_v1  ;;  %12365 = vmatpush3.bf16.msra.mxu1 %v13434_v18  ;;  %v737_v19 = vshll.u32 %v110_v32, 16  ;;  %v735_v54 = vshrl.u32 %v110_v32, 16  ;;  %v420_v40 = vsel %vm286_vm4, %v397_v37, %v419_v25  ;;  %v401_v9 = vor.u32 %v400_v38, %v399_v24  ;;  %v95_v18 = vld [vmem:[#allocation2 + $0x28] sm:$0x1]  ;;  %v13442_v62 = vld [vmem:[%s18559_s1 + $0x200] sm:$0xff]  }
  0x3c   :  { %11324 = vmatpush3.bf16.msra.mxu0 %v13430_v20  ;;  %12366 = vmatprep.subr.bf16.mxu1 %v18569_v1  ;;  %v741_v10 = vrot.slane %v14032_v5, 1  ;;  %v1193_v45 = vrot.slane %v14029_v4, 6  ;;  %v750_v17 = vrot.slane %v14021_v57, 1  ;;  %v1194_v37 = vrot.slane %v14032_v5, 7 }
  0x3d   :  { %11325 = vmatprep.subr.bf16.mxu0 %v13432_v52  ;;  %v739_v7 = vrot.slane %v737_v19, 1  ;;  %v727_v61 = vshrl.u32 %v90_v33, 16  ;;  %v731_v15 = vrot.slane %v729_v36, 1  ;;  %v749_v16 = vor.u32 %v748_v6, %v744_v2  ;;  %v97_v52 = vld [vmem:[#allocation2 + $0x28] sm:$0x3] }
  0x3e   :  { %v753_v20 = vrot.slane %v14075_v55, 1  ;;  %v139_v22 = vshll.u32 %v95_v18, 16  ;;  %v14253_v60 = vor.u32 %v1194_v37, %v1193_v45  ;;  %v402_v23 = vsel %vm286_vm4, %v379_v13, %v401_v9 }
  0x3f   :  { %637 = vmatmul.mubr.bf16.gmra.mrb[12].mxu0 %v380_v34  ;;  %12367 = vmatpush3.bf16.msra.mxu1 %v13437_v58  ;;  %v740_v11 = vor.u32 %v739_v7, %v735_v54  ;;  %v161_v5 = vrot.slane %v97_v52, 1  ;;  %v759_v25 = vrot.slane %v14139_v31, 1  ;;  %v752_v32 = vor.u32 %v741_v10, %v14029_v4 }
  0x40   :  { %644 = vmatprep.mubr.bf16.mxu0 %v411_v39  ;;  %11326 = vmatpush3.bf16.msra.mxu0 %v13433_v3  ;;  %v756_v3 = vrot.slane %v14065_v51, 1  ;;  %v141_v24 = vrot.slane %v139_v22, 1  ;;  %v755_v33 = vor.u32 %v750_v17, %v14019_v56  ;;  %v751_v34 = vsel %vm98_vm3, %v749_v16, %v750_v17 }
  0x41   :  { %11327 = vmatprep.subr.bf16.mxu0 %v13435_v59  ;;  %12388 = vmatprep.subr.bf16.mxu1 %v18569_v1  ;;  %v742_v58 = vsel %vm98_vm3, %v740_v11, %v741_v10  ;;  %v14266_v13 = vsel %vm151_vm2, %v14101_v14, %v161_v5  ;;  %v762_v38 = vrot.slane %v14130_v30, 1  ;;  %v732_v59 = vor.u32 %v731_v15, %v727_v61  ;;  %v13445_v11 = vld [vmem:[%s18559_s1 + $0x208] sm:$0xff]  }
  0x42   :  { %12349 = vmatmul.mubr.bf16.gmra.mrb[16].mxu1 %v420_v40  ;;  %v14272_v19 = vsel %vm98_vm3, %v14149_v35, %v141_v24  ;;  %v772_v39 = vshll.u32 %v14266_v13, 16  ;;  %v758_v4 = vor.u32 %v753_v20, %v14072_v46  ;;  %v761_v7 = vor.u32 %v756_v3, %v14060_v47  ;;  %v13439_v40 = vld [vmem:[%s18559_s1 + $0x180] sm:$0xff]   ;;  %v13440_v61 = vld [vmem:[%s18559_s1 + $0x1c8] sm:$0xff]  }
  0x43   :  { %12368 = vmatprep.mubr.msk.bf16.mxu1 %vm13859_vm0, %v18569_v1  ;;  %v766_v54 = vshll.u32 %v14272_v19, 16  ;;  %v770_v2 = vor.u32 %v762_v38, %v14128_v27  ;;  %v14281_v36 = vshll.u32 %v161_v5, 16  ;;  %v754_v45 = vsel %vm98_vm3, %v752_v32, %v753_v20 }
  0x44   :  { %11328 = vmatpush3.bf16.msra.mxu0 %v13436_v0  ;;  %v143_v0 = vshrl.u32 %v95_v18, 16  ;;  %v14279_v6 = vrot.slane %v772_v39, 1  ;;  %v1205_v17 = vrot.slane %v14019_v56, 6  ;;  %v733_v37 = vsel %vm98_vm3, %v732_v59, %v14007_v48 }
  0x45   :  { %11372 = vmatprep.subr.bf16.mxu0 %v13438_v8  ;;  %v764_v8 = vor.u32 %v759_v25, %v14136_v29  ;;  %v14287_v9 = vrot.slane %v766_v54, 1  ;;  %v757_v15 = vsel %vm98_vm3, %v755_v33, %v756_v3  ;;  %v14306_v18 = vsel %vm98_vm3, %v758_v4, %v759_v25  ;;  %v13448_v25 = vld [vmem:[%s18559_s1 + $0x210] sm:$0xff]  }
  0x46   :  { %v14289_v10 = vshll.u32 %v143_v0, 16  ;;  %v776_v16 = vshrl.u32 %v14272_v19, 16  ;;  %v14310_v20 = vsel %vm98_vm3, %v761_v7, %v762_v38  ;;  %v14314_v56 = vsel %vm98_vm3, %v770_v2, %v14279_v6  ;;  %v13441_v38 = vld [vmem:[%s18559_s1 + $0x188] sm:$0xff]   ;;  %v13443_v54 = vld [vmem:[%s18559_s1 + $0x1d0] sm:$0xff]  }
  0x47   :  { %645 = vmatmul.mubr.bf16.gmra.mrb[16].mxu0 %v402_v23  ;;  %v784_v22 = vshrl.u32 %v14266_v13, 16  ;;  %v1206_v52 = vrot.slane %v14021_v57, 7  ;;  %v14320_v23 = vsel %vm98_vm3, %v764_v8, %v14287_v9  ;;  %v790_v5 = vrot.slane %v14281_v36, 1 }
  0x48   :  { %983 = vmatprep.mubr.bf16.mxu0 %v742_v58  ;;  %v782_v3 = vrot.slane %v14289_v10, 1  ;;  %v1099_v58 = vld [vmem:[#allocation2] sm:$0x80]  ;;  %v1182_v59 = vrot.slane %v13989_v41, 7  ;;  %v1213_v4 = vrot.slane %v14072_v46, 6  ;;  %v1214_v2 = vrot.slane %v14075_v55, 7 }
  0x49   :  { %v1102_v24 = vshrl.u32 %v1099_v58, 16  ;;  %v1104_v32 = vshll.u32 %v1099_v58, 16  ;;  %v1119_v57 = vrot.slane %v1099_v58, 1  ;;  %v14328_v33 = vor.u32 %v1206_v52, %v1205_v17  ;;  %v80_v41 = vld [vmem:[%s18560_s2] sm:$0xff]  ;;  %v13446_v52 = vld [vmem:[%s18559_s1 + $0x1d8] sm:$0xff]  }
  0x4a   :  { %12369 = vmatmul.mubr.bf16.vlgmr.msra.gmra.mrb[0].mxu1 %v751_v34  ;;  %v1097_v34 = vld [vmem:[#allocation2] sm:$0xc0]  ;;  %1604 = vperm.xlu0 %13388, %v80_v41   ;;  %v1215_v17 = vor.u32 %v1214_v2, %v1213_v4 }
  0x4b   :  { %12372 = vmatprep.mubr.msk.bf16.mxu1 %vm13859_vm0, %v18569_v1  ;;  %12389 = vmatpush3.bf16.msra.mxu1 %v13442_v62  ;;  %v1181_v62 = vrot.slane %v13991_v42, 6  ;;  %v1174_v39 = vshrl.u32 %v1097_v34, 16  ;;  %v1177_v42 = vshll.u32 %v1097_v34, 16  ;;  %v1106_v0 = vrot.slane %v1104_v32, 1 }
  0x4c   :  { %12390 = vmatprep.subr.bf16.mxu1 %v18569_v1  ;;  %v1120_v7 = vsel %vm151_vm2, %v1119_v57, %v13996_v44  ;;  %v13450_v44 = vld [vmem:[%s18559_s1 + $0x218] sm:$0xff]   ;;  %v14379_v57 = vsel %vm1172_vm5, %v14253_v60, %v1215_v17 }
  0x4d   :  { %v1198_v46 = vshrl.u32 %v1120_v7, 16  ;;  %v1201_v8 = vshll.u32 %v1120_v7, 16  ;;  %v14356_v55 = vor.u32 %v1182_v59, %v1181_v62  ;;  %v13447_v59 = vld [vmem:[%s18559_s1 + $0x198] sm:$0xff]  }
  0x4f   :  { %984 = vmatmul.mubr.bf16.vlgmr.msra.gmra.mrb[20].mxu0 %v733_v37  ;;  %12391 = vmatpush3.bf16.msra.mxu1 %v13445_v11  ;;  %v82_v11 = vld [vmem:[%s18560_s2 + $0x10] sm:$0xff]  ;;  %v1218_v37 = vrot.slane %v14065_v51, 7  ;;  %v1200_v58 = vrot.slane %v1198_v46, 6  ;;  %v1203_v62 = vrot.slane %v1201_v8, 7  ;;  %v1209_v51 = vrot.slane %v14011_v50, 6  ;;  %v83_v50 = vld [vmem:[%s18560_s2 + $0x18] sm:$0xff] }
  0x50   :  { %11373 = vmatpush3.bf16.msra.mxu0 %v13439_v40  ;;  %991 = vmatprep.mubr.bf16.mxu0 %v754_v45  ;;  %v1217_v40 = vrot.slane %v14060_v47, 6  ;;  %v14346_v45 = vrot.slane %v1174_v39, 6  ;;  %v1107_v47 = vor.u32 %v1106_v0, %v1102_v24  ;;  %v13452_v24 = vld [vmem:[%s18559_s1 + $0x220] sm:$0xff]   ;;  %v14382_v39 = vld [vmem:[#allocation2 + $0x28] sm:$0x7f]  ;;  %v1229_v46 = vrot.slane %v14128_v27, 6 }
  0x51   :  { %11374 = vmatprep.subr.bf16.mxu0 %v13440_v61  ;;  %12392 = vmatprep.subr.bf16.mxu1 %v18569_v1  ;;  %v81_v61 = vld [vmem:[%s18560_s2 + $0x8] sm:$0xff]  ;;  %v13449_v0 = vld [vmem:[%s18559_s1 + $0x1e0] sm:$0xff]   ;;  %v1221_v27 = vrot.slane %v14067_v53, 6 }
  0x52   :  { %12373 = vmatmul.mubr.bf16.gmra.mrb[4].mxu1 %v757_v15  ;;  %v13444_v15 = vld [vmem:[%s18559_s1 + $0x190] sm:$0xff]   ;;  %v1108_v32 = vsel %vm98_vm3, %v1107_v47, %v14007_v48  ;;  %v1219_v34 = vor.u32 %v1218_v37, %v1217_v40  ;;  %1614 = vperm.xlu1 %13389, %v82_v11   ;;  %v14393_v48 = vor.u32 %v776_v16, %v14287_v9  ;;  %v1225_v40 = vrot.slane %v14136_v29, 6  ;;  %v84_v8 = vld [vmem:[%s18560_s2 + $0x20] sm:$0xff]  ;;  %v13455_v29 = vld [vmem:[%s18559_s1 + $0x228] sm:$0xff]  }
  0x53   :  { %12376 = vmatprep.mubr.msk.bf16.mxu1 %vm13859_vm0, %v18569_v1  ;;  %12393 = vmatpush3.bf16.msra.mxu1 %v13448_v25  ;;  %v14369_v25 = vrot.slane %v1177_v42, 7  ;;  %v1100_v42 = vld [vmem:[#allocation2 + $0x28] sm:$0xff]  ;;  %v1186_v4 = vshrl.u32 %v1108_v32, 16  ;;  %v1226_v9 = vrot.slane %v14139_v31, 7  ;;  %v13451_v11 = vld [vmem:[%s18559_s1 + $0x1a0] sm:$0xff]   ;;  %v1222_v47 = vrot.slane %v14052_v28, 7 }
  0x54   :  { %11375 = vmatpush3.bf16.msra.mxu0 %v13441_v38  ;;  %12394 = vmatprep.subr.bf16.mxu1 %v18569_v1  ;;  %v1210_v38 = vrot.slane %v13994_v43, 7  ;;  %v1204_v43 = vor.u32 %v1203_v62, %v1200_v58  ;;  %v14401_v7 = vsel %vm1172_vm5, %v14328_v33, %v1219_v34  ;;  %v1110_v37 = vshll.u32 %v14382_v39, 16 }
  0x55   :  { %11376 = vmatprep.subr.bf16.mxu0 %v13443_v54  ;;  %v1189_v54 = vshll.u32 %v1108_v32, 16  ;;  %1609 = vperm.xlu0 %13388, %v81_v61   ;;  %v1188_v16 = vrot.slane %v1186_v4, 6  ;;  %v1121_v61 = vrot.slane %v1100_v42, 1  ;;  %v1234_v28 = vrot.slane %v14096_v12, 7  ;;  %v13458_v12 = vld [vmem:[%s18559_s1 + $0x230] sm:$0xff]  }
  0x56   :  { %v1211_v2 = vor.u32 %v1210_v38, %v1209_v51  ;;  %1619 = vperm.xlu1 %13389, %v83_v50   ;;  %v1223_v62 = vor.u32 %v1222_v47, %v1221_v27  ;;  %v1112_v51 = vrot.slane %v1110_v37, 1  ;;  %v1114_v50 = vshrl.u32 %v14382_v39, 16  ;;  %v13456_v4 = vld [vmem:[%s18559_s1 + $0x1f0] sm:$0xff]  }
  0x57   :  { %992 = vmatmul.mubr.bf16.gmra.mrb[24].mxu0 %v14026_v63  ;;  %12395 = vmatpush3.bf16.msra.mxu1 %v13450_v44  ;;  %v1191_v41 = vrot.slane %v1189_v54, 7  ;;  %v14408_v63 = vsel %vm1172_vm5, %v1204_v43, %v14328_v33  ;;  %v1230_v33 = vrot.slane %v14130_v30, 7  ;;  %v1256_v47 = vrot.slane %v1110_v37, 7 }
  0x58   :  { %11377 = vmatpush3.bf16.msra.mxu0 %v13444_v15  ;;  %999 = vmatprep.mubr.bf16.mxu0 %v14306_v18  ;;  %v14420_v31 = vsel %vm1172_vm5, %v14356_v55, %v1211_v2  ;;  %v14422_v18 = vor.u32 %v1226_v9, %v1225_v40  ;;  %v85_v15 = vld [vmem:[%s18560_s2 + $0x28] sm:$0xff]  ;;  %v14468_v42 = vsel %vm1172_vm5, %v1211_v2, %v1223_v62  ;;  %v87_v9 = vld [vmem:[%s18560_s2 + $0x38] sm:$0xff] }
  0x59   :  { %11378 = vmatprep.subr.bf16.mxu0 %v13446_v52  ;;  %12396 = vmatprep.subr.bf16.mxu1 %v18569_v1  ;;  %v1192_v44 = vor.u32 %v1191_v41, %v1188_v16  ;;  %v1231_v30 = vor.u32 %v1230_v33, %v1229_v46  ;;  %v13453_v52 = vld [vmem:[%s18559_s1 + $0x1e8] sm:$0xff]   ;;  %v1116_v39 = vor.u32 %v1114_v50, %v1112_v51  ;;  %v13461_v16 = vld [vmem:[%s18559_s1 + $0x238] sm:$0xff]   ;;  %v13457_v33 = vld [vmem:[%s18559_s1 + $0x1b0] sm:$0xff]  }
  0x5a   :  { %12377 = vmatmul.mubr.bf16.gmra.mrb[8].mxu1 %v14310_v20  ;;  %v14439_v53 = vsel %vm1172_vm5, %v1215_v17, %v14422_v18  ;;  %v1233_v20 = vrot.slane %v14116_v21, 6  ;;  %v1122_v17 = vsel %vm151_vm2, %v14101_v14, %v1121_v61  ;;  %1624 = vperm.xlu0 %13388, %v84_v8   ;;  %v13454_v14 = vld [vmem:[%s18559_s1 + $0x1a8] sm:$0xff]   ;;  %v14491_v8 = vrot.slane %v1114_v50, 6 }
  0x5b   :  { %12380 = vmatprep.mubr.msk.bf16.mxu1 %vm13859_vm0, %v18569_v1  ;;  %12397 = vmatpush3.bf16.msra.mxu1 %v13452_v24  ;;  %v14449_v58 = vsel %vm1172_vm5, %v1192_v44, %v14253_v60  ;;  %v14457_v21 = vsel %vm1172_vm5, %v1219_v34, %v1231_v30  ;;  %v1247_v24 = vshrl.u32 %v1122_v17, 16  ;;  %v1250_v32 = vshll.u32 %v1122_v17, 16  ;;  %v86_v60 = vld [vmem:[%s18560_s2 + $0x30] sm:$0xff] }
  0x5c   :  { %11379 = vmatpush3.bf16.msra.mxu0 %v13447_v59  ;;  %12398 = vmatprep.subr.bf16.mxu1 %v18569_v1  ;;  %v14459_v38 = vor.u32 %v1234_v28, %v1233_v20  ;;  %v1113_v34 = vsel %vm98_vm3, %v14149_v35, %v1112_v51  ;;  %v1269_v59 = vshrl.u32 %v1121_v61, 16  ;;  %v1260_v27 = vshrl.u32 %v1116_v39, 16 }
  0x5d   :  { %11380 = vmatprep.subr.bf16.mxu0 %v13449_v0  ;;  %1629 = vperm.xlu1 %13389, %v85_v15   ;;  %v1238_v54 = vshrl.u32 %v1113_v34, 16  ;;  %v1241_v43 = vshll.u32 %v1113_v34, 16  ;;  %v1249_v0 = vrot.slane %v1247_v24, 6  ;;  %v1252_v40 = vrot.slane %v1250_v32, 7 }
  0x5e   :  { %v14480_v35 = vsel %vm1172_vm5, %v1223_v62, %v14459_v38  ;;  %v14482_v2 = vrot.slane %v1269_v59, 6  ;;  %1634 = vperm.xlu0 %13388, %v86_v60   ;;  %v1262_v37 = vrot.slane %v1260_v27, 6  ;;  %v783_v13 = vsel %vm98_vm3, %v14393_v48, %v782_v3 }
  0x5f   :  { %1000 = vmatmul.mubr.bf16.gmra.mrb[28].mxu0 %v14063_v49  ;;  %12399 = vmatpush3.bf16.msra.mxu1 %v13455_v29  ;;  %v1272_v49 = vshll.u32 %v1121_v61, 16  ;;  %v1243_v41 = vrot.slane %v1241_v43, 7  ;;  %v1253_v46 = vor.u32 %v1252_v40, %v1249_v0  ;;  %v88_v29 = vld [vmem:[%s18560_s2 + $0x40] sm:$0xff]  ;;  %v786_v61 = vor.u32 %v784_v22, %v14279_v6  ;;  %v13460_v22 = vld [vmem:[%s18559_s1 + $0x1b8] sm:$0xff]  }
  0x60   :  { %11381 = vmatpush3.bf16.msra.mxu0 %v13451_v11  ;;  %1007 = vmatprep.mubr.bf16.mxu0 %v14320_v23  ;;  %v1240_v23 = vrot.slane %v1238_v54, 6  ;;  %v1263_v11 = vshll.u32 %v1116_v39, 16  ;;  %v13464_v54 = vld [vmem:[%s18559_s1 + $0x380] sm:$0xff]  }
  0x61   :  { %11382 = vmatprep.subr.bf16.mxu0 %v13453_v52  ;;  %12400 = vmatprep.subr.bf16.mxu1 %v18569_v1  ;;  %v1274_v44 = vrot.slane %v1272_v49, 7  ;;  %v1254_v20 = vsel %vm1172_vm5, %v1231_v30, %v1253_v46  ;;  %v89_v52 = vld [vmem:[%s18560_s2 + $0x48] sm:$0xff]  ;;  %v791_v30 = vsel %vm98_vm3, %v786_v61, %v790_v5  ;;  %v13462_v39 = vld [vmem:[%s18559_s1 + $0x340] sm:$0xff]   ;;  %v13469_v61 = vld [vmem:[%s18559_s1 + $0x310] sm:$0xff]  }
  0x62   :  { %12381 = vmatmul.mubr.bf16.gmra.mrb[12].mxu1 %v14314_v56  ;;  %v13459_v56 = vld [vmem:[%s18559_s1 + $0x1f8] sm:$0xff]   ;;  %v1244_v15 = vor.u32 %v1243_v41, %v1240_v23  ;;  %v1265_v28 = vrot.slane %v1263_v11, 7  ;;  %1639 = vperm.xlu1 %13389, %v87_v9   ;;  %v13463_v9 = vld [vmem:[%s18559_s1 + $0x300] sm:$0xff]   ;;  %v13465_v23 = vld [vmem:[%s18559_s1 + $0x348] sm:$0xff]  }
  0x63   :  { %12384 = vmatprep.mubr.msk.bf16.mxu1 %vm13859_vm0, %v18569_v1  ;;  %12401 = vmatpush3.bf16.msra.mxu1 %v13458_v12  ;;  %v1275_v10 = vor.u32 %v1274_v44, %v14482_v2  ;;  %v13467_v2 = vld [vmem:[%s18559_s1 + $0x388] sm:$0xff]   ;;  %v13470_v41 = vld [vmem:[%s18559_s1 + $0x390] sm:$0xff]   ;;  %v13473_v44 = vld [vmem:[%s18559_s1 + $0x398] sm:$0xff]  }
  0x64   :  { %11383 = vmatpush3.bf16.msra.mxu0 %v13454_v14  ;;  %12402 = vmatprep.subr.bf16.mxu1 %v18569_v1  ;;  %v1245_v6 = vsel %vm1172_vm5, %v14422_v18, %v1244_v15  ;;  %v13468_v11 = vld [vmem:[%s18559_s1 + $0x350] sm:$0xff]  }
  0x65   :  { %11384 = vmatprep.subr.bf16.mxu0 %v13456_v4  ;;  %1644 = vperm.xlu0 %13388, %v88_v29   ;;  %v1276_v5 = vsel %vm1172_vm5, %v1253_v46, %v1275_v10  ;;  %v13466_v46 = vld [vmem:[%s18559_s1 + $0x308] sm:$0xff]  }
  0x66   :  { %1649 = vperm.xlu1 %13389, %v89_v52   ;;  %v13478_v10 = vld [vmem:[%s18559_s1 + $0x368] sm:$0xff]  }
  0x67   :  { %1008 = vmatmul.mubr.bf16.gmra.mrb[32].mxu0 %v14126_v26  ;;  %12403 = vmatpush3.bf16.msra.mxu1 %v13461_v16  ;;  %v1180_v26 = vor.u32 %v14369_v25, %v14346_v45  ;;  %v1257_v45 = vor.u32 %v1256_v47, %v14491_v8 }
  0x68   :  { %1015 = vmatprep.mubr.bf16.mxu0 %v783_v13  ;;  %11385 = vmatpush3.bf16.msra.mxu0 %v13457_v33  ;;  %v13474_v13 = vld [vmem:[%s18559_s1 + $0x360] sm:$0xff]  }
  0x69   :  { %11386 = vmatprep.subr.bf16.mxu0 %v13459_v56  ;;  %12424 = vmatprep.subr.bf16.mxu1 %v18569_v1  ;;  %v1184_v36 = vsel %vm1172_vm5, %v1180_v26, %v14356_v55  ;;  %v1258_v55 = vsel %vm1172_vm5, %v14459_v38, %v1257_v45  ;;  %v13476_v26 = vld [vmem:[%s18559_s1 + $0x320] sm:$0xff]   ;;  %v13480_v45 = vld [vmem:[%s18559_s1 + $0x3b0] sm:$0xff]  }
  0x6a   :  { %12385 = vmatmul.mubr.bf16.gmra.mrb[16].mxu1 %v791_v30 }
  0x6b   :  { %12404 = vmatprep.mubr.msk.bf16.mxu1 %vm13859_vm0, %v18569_v1 }
  0x6c   :  { %11387 = vmatpush3.bf16.msra.mxu0 %v13460_v22  ;;  %v13477_v22 = vld [vmem:[%s18559_s1 + $0x3a8] sm:$0xff]  }
  0x6d   :  { %11431 = vmatprep.subr.bf16.mxu0 %v13462_v39 }
  0x6f   :  { %1016 = vmatmul.mubr.bf16.gmra.mrb[36].mxu0 %v14272_v19  ;;  %v1266_v19 = vor.u32 %v1265_v28, %v1262_v37  ;;  %v13472_v37 = vld [vmem:[%s18559_s1 + $0x318] sm:$0xff]   ;;  %v13475_v28 = vld [vmem:[%s18559_s1 + $0x3a0] sm:$0xff]  }
  0x70   :  { %1468 = vmatprep.mubr.bf16.mxu0 %v14449_v58 }
  0x71   :  { %v1267_v3 = vsel %vm1172_vm5, %v1244_v15, %v1266_v19 }
  0x72   :  { %12405 = vmatmul.mubr.bf16.vlgmr.msra.gmra.mrb[0].mxu1 %v14408_v63 }
  0x73   :  { %12408 = vmatprep.mubr.msk.bf16.mxu1 %vm13859_vm0, %v18569_v1  ;;  %12425 = vmatpush3.bf16.msra.mxu1 %v13464_v54 }
  0x74   :  { %12426 = vmatprep.subr.bf16.mxu1 %v18569_v1 }
  0x77   :  { %1469 = vmatmul.mubr.bf16.vlgmr.msra.gmra.mrb[40].mxu0 %v1184_v36  ;;  %12427 = vmatpush3.bf16.msra.mxu1 %v13467_v2 }
  0x78   :  { %1476 = vmatprep.mubr.bf16.mxu0 %v14379_v57  ;;  %11432 = vmatpush3.bf16.msra.mxu0 %v13463_v9 }
  0x79   :  { %12428 = vmatprep.subr.bf16.mxu1 %v18569_v1  ;;  %11433 = vmatprep.subr.bf16.mxu0 %v13465_v23 }
  0x7a   :  { %12409 = vmatmul.mubr.bf16.gmra.mrb[4].mxu1 %v14401_v7 }
  0x7b   :  { %12412 = vmatprep.mubr.msk.bf16.mxu1 %vm13859_vm0, %v18569_v1  ;;  %12429 = vmatpush3.bf16.msra.mxu1 %v13470_v41 }
  0x7c   :  { %11434 = vmatpush3.bf16.msra.mxu0 %v13466_v46  ;;  %12430 = vmatprep.subr.bf16.mxu1 %v18569_v1 }
  0x7d   :  { %11435 = vmatprep.subr.bf16.mxu0 %v13468_v11 }
  0x7f   :  { %1477 = vmatmul.mubr.bf16.gmra.mrb[44].mxu0 %v14420_v31  ;;  %12431 = vmatpush3.bf16.msra.mxu1 %v13473_v44 }
  0x80   :  { %1484 = vmatprep.mubr.bf16.mxu0 %v14439_v53  ;;  %11436 = vmatpush3.bf16.msra.mxu0 %v13469_v61 }
  0x81   :  { %12432 = vmatprep.subr.bf16.mxu1 %v18569_v1 }
  0x82   :  { %12413 = vmatmul.mubr.bf16.gmra.mrb[8].mxu1 %v14457_v21 }
  0x83   :  { %12416 = vmatprep.mubr.msk.bf16.mxu1 %vm13859_vm0, %v18569_v1  ;;  %12433 = vmatpush3.bf16.msra.mxu1 %v13475_v28 }
  0x84   :  { %12434 = vmatprep.subr.bf16.mxu1 %v18569_v1 }
  0x87   :  { %1485 = vmatmul.mubr.bf16.gmra.mrb[48].mxu0 %v14468_v42  ;;  %12435 = vmatpush3.bf16.msra.mxu1 %v13477_v22 }
  0x88   :  { %1492 = vmatprep.mubr.bf16.mxu0 %v1245_v6  ;;  %12436 = vmatprep.subr.bf16.mxu1 %v18569_v1 }
  0x8a   :  { %12417 = vmatmul.mubr.bf16.gmra.mrb[12].mxu1 %v1254_v20  ;;  %v13471_v20 = vld [vmem:[%s18559_s1 + $0x358] sm:$0xff]  }
  0x8b   :  { %12420 = vmatprep.mubr.msk.bf16.mxu1 %vm13859_vm0, %v18569_v1  ;;  %11437 = vmatprep.subr.bf16.mxu0 %v13471_v20 }
  0x8c   :  { %11438 = vmatpush3.bf16.msra.mxu0 %v13472_v37  ;;  %12437 = vmatpush3.bf16.msra.mxu1 %v13480_v45 }
  0x8d   :  { %11439 = vmatprep.subr.bf16.mxu0 %v13474_v13  ;;  %12438 = vmatprep.subr.bf16.mxu1 %v18569_v1 }
  0x8f   :  { %1493 = vmatmul.mubr.bf16.gmra.mrb[52].mxu0 %v14480_v35 }
  0x90   :  { %1500 = vmatprep.mubr.bf16.mxu0 %v1267_v3  ;;  %11440 = vmatpush3.bf16.msra.mxu0 %v13476_v26 }
  0x91   :  { %11441 = vmatprep.subr.bf16.mxu0 %v13478_v10 }
  0x92   :  { %12421 = vmatmul.mubr.bf16.gmra.mrb[16].mxu1 %v1276_v5  ;;  %v13479_v5 = vld [vmem:[%s18559_s1 + $0x328] sm:$0xff]  }
  0x93   :  { %12440 = vmatprep.mubr.msk.bf16.mxu1 %vm13859_vm0, %v18569_v1 }
  0x94   :  { %11442 = vmatpush3.bf16.msra.mxu0 %v13479_v5 }
  0x97   :  { %1501 = vmatmul.mubr.bf16.gmra.mrb[56].mxu0 %v1258_v55 }
  0xc9   :  { %v14686_v44 = vpop.permute.xlu0 %1604 }
  0xfa   :  { %v11270_v25 = vpop.f32.mrb[0].mxu0 }
  0xfb   :  { %v11271_v57 = vpop.f32.mrb[1].mxu0 }
  0xfc   :  { %v11272_v48 = vadd.f32 %v11271_v57, %v11270_v25  ;;  %v11273_v7 = vpop.f32.mrb[2].mxu0  ;;  %v13481_v57 = vld [vmem:[%s18559_s1 + $0x370] sm:$0xff]  }
  0xfd   :  { %v11274_v63 = vpop.f32.mrb[3].mxu0  ;;  %11443 = vmatprep.subr.bf16.mxu0 %v13481_v57 }
  0xfe   :  { %v11275_v31 = vadd.f32 %v11274_v63, %v11273_v7  ;;  %v13483_v63 = vld [vmem:[%s18559_s1 + $0x3b8] sm:$0xff]  }
  0xff   :  { %12439 = vmatpush3.bf16.msra.mxu1 %v13483_v63 }
 0x100   :  { %12460 = vmatprep.subr.bf16.mxu1 %v18569_v1 }
 0x102   :  { %v11276_v18 = vpop.f32.mrb[4].mxu0 }
 0x103   :  { %v11277_v53 = vpop.f32.mrb[5].mxu0 }
 0x104   :  { %v14559_v58 = vadd.f32 %v11277_v53, %v11276_v18  ;;  %v11279_v62 = vpop.f32.mrb[6].mxu0  ;;  %v13482_v18 = vld [vmem:[%s18559_s1 + $0x330] sm:$0xff]  }
 0x105   :  { %v11280_v51 = vpop.f32.mrb[7].mxu0  ;;  %11444 = vmatpush3.bf16.msra.mxu0 %v13482_v18 }
 0x106   :  { %v14561_v17 = vadd.f32 %v11280_v51, %v11279_v62  ;;  %v13484_v62 = vld [vmem:[%s18559_s1 + $0x378] sm:$0xff]  }
 0x107   :  { %11445 = vmatprep.subr.bf16.mxu0 %v13484_v62 }
 0x10a   :  { %v11282_v12 = vpop.f32.mrb[8].mxu0 }
 0x10b   :  { %v11283_v21 = vpop.f32.mrb[9].mxu0 }
 0x10c   :  { %v14563_v24 = vadd.f32 %v11283_v21, %v11282_v12  ;;  %v11285_v32 = vpop.f32.mrb[10].mxu0  ;;  %v13485_v21 = vld [vmem:[%s18559_s1 + $0x338] sm:$0xff]  }
 0x10d   :  { %v11286_v38 = vpop.f32.mrb[11].mxu0  ;;  %11446 = vmatpush3.bf16.msra.mxu0 %v13485_v21 }
 0x10e   :  { %v14565_v60 = vadd.f32 %v11286_v38, %v11285_v32 }
 0x112   :  { %v11288_v14 = vpop.f32.mrb[12].mxu0 }
 0x113   :  { %v11289_v42 = vpop.f32.mrb[13].mxu0 }
 0x114   :  { %v14567_v34 = vadd.f32 %v11289_v42, %v11288_v14  ;;  %v11291_v50 = vpop.f32.mrb[14].mxu0 }
 0x115   :  { %v11292_v59 = vpop.f32.mrb[15].mxu0 }
 0x116   :  { %v14569_v4 = vadd.f32 %v11292_v59, %v11291_v50  ;;  %v13486_v59 = vld [vmem:[%s18559_s1 + $0x280] sm:$0xff]  }
 0x117   :  { %11490 = vmatprep.subr.bf16.mxu0 %v13486_v59 }
 0x11a   :  { %v11294_v43 = vpop.f32.mrb[16].mxu0 }
 0x11b   :  { %v11295_v0 = vpop.f32.mrb[17].mxu0 }
 0x11c   :  { %v14575_v40 = vadd.f32 %v11295_v0, %v11294_v43  ;;  %v11297_v35 = vpop.f32.mrb[18].mxu0 }
 0x11d   :  { %v11298_v49 = vpop.f32.mrb[19].mxu0 }
 0x11e   :  { %v14586_v16 = vadd.f32 %v11298_v49, %v11297_v35 }
 0x122   :  { %v11329_v8 = vpop.f32.mrb[20].mxu0 }
 0x123   :  { %v11330_v29 = vpop.f32.mrb[21].mxu0 }
 0x124   :  { %v11331_v33 = vadd.f32 %v11330_v29, %v11329_v8  ;;  %v11332_v27 = vpop.f32.mrb[22].mxu0 }
 0x125   :  { %v11333_v47 = vpop.f32.mrb[23].mxu0 }
 0x126   :  { %v14608_v56 = vadd.f32 %v11331_v33, %v11272_v48  ;;  %v11334_v15 = vadd.f32 %v11333_v47, %v11332_v27 }
 0x128   :  { %v14620_v52 = vadd.f32 %v11334_v15, %v11275_v31 }
 0x12a   :  { %v11335_v6 = vpop.f32.mrb[24].mxu0 }
 0x12b   :  { %v11336_v30 = vpop.f32.mrb[25].mxu0 }
 0x12c   :  { %v11337_v36 = vadd.f32 %v11336_v30, %v11335_v6  ;;  %v11338_v19 = vpop.f32.mrb[26].mxu0 }
 0x12d   :  { %v11339_v3 = vpop.f32.mrb[27].mxu0 }
 0x12e   :  { %v14642_v55 = vadd.f32 %v11337_v36, %v14559_v58  ;;  %v11340_v25 = vadd.f32 %v11339_v3, %v11338_v19  ;;  %v14690_v36 = vpop.permute.xlu0 %1609 }
 0x130   :  { %v14649_v48 = vadd.f32 %v11340_v25, %v14561_v17 }
 0x132   :  { %v11341_v7 = vpop.f32.mrb[28].mxu0 }
 0x133   :  { %v11342_v31 = vpop.f32.mrb[29].mxu0 }
 0x134   :  { %v11343_v53 = vadd.f32 %v11342_v31, %v11341_v7  ;;  %v11344_v58 = vpop.f32.mrb[30].mxu0  ;;  %v14696_v7 = vpop.permute.xlu1 %1614 }
 0x135   :  { %v11345_v51 = vpop.f32.mrb[31].mxu0  ;;  %18633 = vst [vmem:[#allocation7_spill] sm:$0xff] %v14696_v7 }
 0x136   :  { %v14662_v17 = vadd.f32 %v11343_v53, %v14563_v24  ;;  %v11346_v12 = vadd.f32 %v11345_v51, %v11344_v58 }
 0x138   :  { %v14669_v32 = vadd.f32 %v11346_v12, %v14565_v60 }
 0x13a   :  { %v11347_v38 = vpop.f32.mrb[32].mxu0 }
 0x13b   :  { %v11348_v14 = vpop.f32.mrb[33].mxu0 }
 0x13c   :  { %v11349_v42 = vadd.f32 %v11348_v14, %v11347_v38  ;;  %v11350_v50 = vpop.f32.mrb[34].mxu0 }
 0x13d   :  { %v11351_v24 = vpop.f32.mrb[35].mxu0 }
 0x13e   :  { %v14675_v54 = vadd.f32 %v11349_v42, %v14567_v34  ;;  %v11352_v43 = vadd.f32 %v11351_v24, %v11350_v50  ;;  %v14708_v24 = vpop.permute.xlu1 %1619 }
 0x13f   :  { %18634 = vst [vmem:[#allocation8_spill] sm:$0xff] %v14708_v24 }
 0x140   :  { %v14678_v0 = vadd.f32 %v11352_v43, %v14569_v4 }
 0x142   :  { %v11353_v60 = vpop.f32.mrb[36].mxu0 }
 0x143   :  { %v11354_v35 = vpop.f32.mrb[37].mxu0 }
 0x144   :  { %v11355_v39 = vadd.f32 %v11354_v35, %v11353_v60  ;;  %v11356_v2 = vpop.f32.mrb[38].mxu0 }
 0x145   :  { %v11357_v49 = vpop.f32.mrb[39].mxu0  ;;  %v1543_v9 = vpop.f32.mrb[0].mxu1 }
 0x146   :  { %v14681_v23 = vadd.f32 %v11355_v39, %v14575_v40  ;;  %v11358_v41 = vadd.f32 %v11357_v49, %v11356_v2  ;;  %v12406_v46 = vpop.f32.mrb[1].mxu1 }
 0x147   :  { %v1546_v8 = vpop.f32.mrb[2].mxu1 }
 0x148   :  { %v14684_v34 = vadd.f32 %v11358_v41, %v14586_v16  ;;  %v12407_v29 = vpop.f32.mrb[3].mxu1 }
 0x14a   :  { %v11388_v33 = vpop.f32.mrb[40].mxu0 }
 0x14b   :  { %v11389_v27 = vpop.f32.mrb[41].mxu0 }
 0x14c   :  { %v11390_v4 = vadd.f32 %v11389_v27, %v11388_v33  ;;  %v11391_v11 = vpop.f32.mrb[42].mxu0 }
 0x14d   :  { %v11392_v47 = vpop.f32.mrb[43].mxu0  ;;  %v1551_v61 = vpop.f32.mrb[4].mxu1 }
 0x14e   :  { %v12965_v15 = vadd.f32 %v14608_v56, %v11390_v4  ;;  %v11393_v20 = vadd.f32 %v11392_v47, %v11391_v11  ;;  %v12410_v40 = vpop.f32.mrb[5].mxu1 }
 0x14f   :  { %v1554_v37 = vpop.f32.mrb[6].mxu1 }
 0x150   :  { %v12966_v28 = vadd.f32 %v12965_v15, %v1543_v9  ;;  %v12968_v13 = vadd.f32 %v14620_v52, %v11393_v20  ;;  %v12411_v6 = vpop.f32.mrb[7].mxu1  ;;  %v14724_v20 = vpop.permute.xlu0 %1624 }
 0x151   :  { %18635 = vst [vmem:[#allocation9_spill] sm:$0xff] %v14724_v20 }
 0x152   :  { %v1592_v16 = vmax.f32 %v12966_v28, 0.0  ;;  %v12969_v22 = vadd.f32 %v12968_v13, %v1546_v8  ;;  %v11394_v30 = vpop.f32.mrb[44].mxu0 }
 0x153   :  { %v11395_v26 = vpop.f32.mrb[45].mxu0 }
 0x154   :  { %v1593_v19 = vmax.f32 %v12969_v22, 0.0  ;;  %v11396_v10 = vadd.f32 %v11395_v26, %v11394_v30  ;;  %v11397_v3 = vpop.f32.mrb[46].mxu0  ;;  %v14693_v5 = vmul.f32 %v14686_v44, %v1592_v16 }
 0x155   :  { %v11398_v56 = vpop.f32.mrb[47].mxu0  ;;  %v1559_v45 = vpop.f32.mrb[8].mxu1 }
 0x156   :  { %v12971_v25 = vadd.f32 %v14642_v55, %v11396_v10  ;;  %v11399_v57 = vadd.f32 %v11398_v56, %v11397_v3  ;;  %v12414_v52 = vpop.f32.mrb[9].mxu1  ;;  %v14699_v63 = vmul.f32 %v14690_v36, %v1593_v19  ;;  %v1678_v31 = vmul.f32 %v14693_v5, %v14693_v5  ;;  %v14732_v19 = vpop.permute.xlu1 %1629 }
 0x157   :  { %v1562_v18 = vpop.f32.mrb[10].mxu1  ;;  %18636 = vst [vmem:[#allocation10_spill] sm:$0xff] %v14732_v19 }
 0x158   :  { %v12972_v53 = vadd.f32 %v12971_v25, %v1551_v61  ;;  %v12974_v58 = vadd.f32 %v14649_v48, %v11399_v57  ;;  %v1662_v62 = vadd.f32 %v14699_v63, %v14693_v5  ;;  %v1679_v55 = vmul.f32 %v14699_v63, %v14699_v63  ;;  %v12415_v51 = vpop.f32.mrb[11].mxu1 }
 0x15a   :  { %v1594_v12 = vmax.f32 %v12972_v53, 0.0  ;;  %v12975_v21 = vadd.f32 %v12974_v58, %v1554_v37  ;;  %v11400_v38 = vpop.f32.mrb[48].mxu0  ;;  %v1688_v14 = vadd.f32 %v1679_v55, %v1678_v31 }
 0x15b   :  { %v11401_v42 = vpop.f32.mrb[49].mxu0 }
 0x15c   :  { %v1595_v50 = vmax.f32 %v12975_v21, 0.0  ;;  %v11402_v59 = vadd.f32 %v11401_v42, %v11400_v38  ;;  %v14711_v43 = vmul.f32 %v14696_v7, %v1594_v12  ;;  %v11403_v48 = vpop.f32.mrb[50].mxu0 }
 0x15d   :  { %v11404_v60 = vpop.f32.mrb[51].mxu0  ;;  %v1567_v35 = vpop.f32.mrb[12].mxu1 }
 0x15e   :  { %v12977_v39 = vadd.f32 %v14662_v17, %v11402_v59  ;;  %v14715_v2 = vmul.f32 %v14708_v24, %v1595_v50  ;;  %v1663_v49 = vadd.f32 %v1662_v62, %v14711_v43  ;;  %v1680_v9 = vmul.f32 %v14711_v43, %v14711_v43  ;;  %v12418_v41 = vpop.f32.mrb[13].mxu1 }
 0x15f   :  { %v11405_v46 = vadd.f32 %v11404_v60, %v11403_v48  ;;  %v1570_v8 = vpop.f32.mrb[14].mxu1 }
 0x160   :  { %v12978_v29 = vadd.f32 %v12977_v39, %v1559_v45  ;;  %v1664_v33 = vadd.f32 %v1663_v49, %v14715_v2  ;;  %v1681_v27 = vmul.f32 %v14715_v2, %v14715_v2  ;;  %v1689_v4 = vadd.f32 %v1688_v14, %v1680_v9  ;;  %v12419_v11 = vpop.f32.mrb[15].mxu1 }
 0x161   :  { %v12980_v17 = vadd.f32 %v14669_v32, %v11405_v46 }
 0x162   :  { %v1596_v47 = vmax.f32 %v12978_v29, 0.0  ;;  %v1690_v61 = vadd.f32 %v1689_v4, %v1681_v27  ;;  %v11406_v15 = vpop.f32.mrb[52].mxu0 }
 0x163   :  { %v12981_v40 = vadd.f32 %v12980_v17, %v1562_v18  ;;  %v11407_v37 = vpop.f32.mrb[53].mxu0 }
 0x164   :  { %v14727_v28 = vmul.f32 %v14724_v20, %v1596_v47  ;;  %v11408_v13 = vadd.f32 %v11407_v37, %v11406_v15  ;;  %v11409_v6 = vpop.f32.mrb[54].mxu0 }
 0x165   :  { %v1597_v16 = vmax.f32 %v12981_v40, 0.0  ;;  %v11410_v22 = vpop.f32.mrb[55].mxu0  ;;  %v1575_v30 = vpop.f32.mrb[16].mxu1 }
 0x166   :  { %v1665_v26 = vadd.f32 %v1664_v33, %v14727_v28  ;;  %v1682_v32 = vmul.f32 %v14727_v28, %v14727_v28  ;;  %v12983_v10 = vadd.f32 %v14675_v54, %v11408_v13  ;;  %v11411_v3 = vadd.f32 %v11410_v22, %v11409_v6  ;;  %v12422_v56 = vpop.f32.mrb[17].mxu1  ;;  %v14742_v54 = vpop.permute.xlu0 %1634 }
 0x167   :  { %v14736_v45 = vmul.f32 %v14732_v19, %v1597_v16  ;;  %v1578_v25 = vpop.f32.mrb[18].mxu1  ;;  %18637 = vst [vmem:[#allocation11_spill] sm:$0xff] %v14742_v54 }
 0x168   :  { %v1691_v57 = vadd.f32 %v1690_v61, %v1682_v32  ;;  %v12984_v52 = vadd.f32 %v12983_v10, %v1567_v35  ;;  %v12986_v31 = vadd.f32 %v14678_v0, %v11411_v3  ;;  %v12423_v18 = vpop.f32.mrb[19].mxu1  ;;  %v14747_v0 = vpop.permute.xlu1 %1639 }
 0x169   :  { %v1666_v53 = vadd.f32 %v1665_v26, %v14736_v45  ;;  %v1683_v58 = vmul.f32 %v14736_v45, %v14736_v45  ;;  %18638 = vst [vmem:[#allocation12_spill] sm:$0xff] %v14747_v0 }
 0x16a   :  { %v1598_v62 = vmax.f32 %v12984_v52, 0.0  ;;  %v12987_v55 = vadd.f32 %v12986_v31, %v1570_v8  ;;  %v11412_v51 = vpop.f32.mrb[56].mxu0 }
 0x16b   :  { %v1692_v12 = vadd.f32 %v1691_v57, %v1683_v58  ;;  %v11413_v21 = vpop.f32.mrb[57].mxu0 }
 0x16c   :  { %v14745_v38 = vmul.f32 %v14742_v54, %v1598_v62  ;;  %v1599_v14 = vmax.f32 %v12987_v55, 0.0  ;;  %v11414_v42 = vadd.f32 %v11413_v21, %v11412_v51  ;;  %v11415_v50 = vpop.f32.mrb[58].mxu0 }
 0x16d   :  { %v11416_v59 = vpop.f32.mrb[59].mxu0 }
 0x16e   :  { %v1667_v48 = vadd.f32 %v1666_v53, %v14745_v38  ;;  %v1684_v60 = vmul.f32 %v14745_v38, %v14745_v38  ;;  %v1659_v35 = vmul.f32 %v14747_v0, %v1599_v14  ;;  %v12989_v39 = vadd.f32 %v14681_v23, %v11414_v42 }
 0x16f   :  { %v11417_v49 = vadd.f32 %v11416_v59, %v11415_v50 }
 0x170   :  { %v1693_v9 = vadd.f32 %v1692_v12, %v1684_v60  ;;  %v1668_v41 = vadd.f32 %v1667_v48, %v1659_v35  ;;  %v1685_v46 = vmul.f32 %v1659_v35, %v1659_v35  ;;  %v12990_v8 = vadd.f32 %v12989_v39, %v1575_v30 }
 0x171   :  { %v12992_v29 = vadd.f32 %v14684_v34, %v11417_v49 }
 0x172   :  { %v1694_v33 = vadd.f32 %v1693_v9, %v1685_v46  ;;  %v1600_v27 = vmax.f32 %v12990_v8, 0.0 }
 0x173   :  { %8 = vsyncpa [#allocation5], 0  ;;  %v14755_v4 = vpop.permute.xlu0 %1644  ;;  %v12993_v11 = vadd.f32 %v12992_v29, %v1578_v25  ;;  %v14758_v61 = vpop.permute.xlu1 %1649  ;;  %vm9988_vm6 = vcmask 1041409  }
 0x174   :  { %18639 = vst [vmem:[#allocation13_spill] sm:$0xff] %v14755_v4  ;;  %v1660_v17 = vmul.f32 %v14755_v4, %v1600_v27  ;;  %18640 = vst [vmem:[#allocation14_spill] sm:$0xff] %v14758_v61 }
 0x175   :  { %v1601_v47 = vmax.f32 %v12993_v11, 0.0 }
 0x176   :  { %v1669_v15 = vadd.f32 %v1668_v41, %v1660_v17  ;;  %v1686_v23 = vmul.f32 %v1660_v17, %v1660_v17 }
 0x177   :  { %v1661_v40 = vmul.f32 %v14758_v61, %v1601_v47 }
 0x178   :  { %v1695_v37 = vadd.f32 %v1694_v33, %v1686_v23 }
 0x179   :  { %v1670_v13 = vadd.f32 %v1669_v15, %v1661_v40  ;;  %v1687_v6 = vmul.f32 %v1661_v40, %v1661_v40 }
 0x17b   :  { %v1671_v16 = vrot.slane %v1670_v13, 4  ;;  %v1696_v34 = vadd.f32 %v1695_v37, %v1687_v6 }
 0x17d   :  { %v1672_v22 = vadd.f32 %v1671_v16, %v1670_v13  ;;  %v1697_v30 = vrot.slane %v1696_v34, 4 }
 0x17f   :  { %v1673_v26 = vrot.slane %v1672_v22, 2  ;;  %v1698_v32 = vadd.f32 %v1697_v30, %v1696_v34 }
 0x181   :  { %v1674_v10 = vadd.f32 %v1673_v26, %v1672_v22  ;;  %v1699_v3 = vrot.slane %v1698_v32, 2 }
 0x183   :  { %v1675_v56 = vrot.slane %v1674_v10, 1  ;;  %v1700_v25 = vadd.f32 %v1699_v3, %v1698_v32 }
 0x185   :  { %v1676_v57 = vadd.f32 %v1675_v56, %v1674_v10  ;;  %v1701_v52 = vrot.slane %v1700_v25, 1 }
 0x187   :  { %v1677_v31 = vmul.f32 0.03125, %v1676_v57  ;;  %v1702_v18 = vadd.f32 %v1701_v52, %v1700_v25 }
 0x189   :  { %v1703_v53 = vmul.f32 0.03125, %v1702_v18  ;;  %v1704_v58 = vmul.f32 %v1677_v31, %v1677_v31  ;;  %v1707_v62 = vsub.f32 %v14693_v5, %v1677_v31  ;;  %v1708_v55 = vsub.f32 %v14699_v63, %v1677_v31 }
 0x18a   :  { %v1709_v51 = vsub.f32 %v14711_v43, %v1677_v31  ;;  %v1710_v12 = vsub.f32 %v14715_v2, %v1677_v31  ;;  %v1711_v21 = vsub.f32 %v14727_v28, %v1677_v31  ;;  %v1712_v14 = vsub.f32 %v14736_v45, %v1677_v31 }
 0x18b   :  { %v1705_v42 = vsub.f32 %v1703_v53, %v1704_v58  ;;  %v1713_v50 = vsub.f32 %v14745_v38, %v1677_v31  ;;  %v1714_v59 = vsub.f32 %v1659_v35, %v1677_v31  ;;  %v1715_v48 = vsub.f32 %v1660_v17, %v1677_v31 }
 0x18c   :  { %v1716_v60 = vsub.f32 %v1661_v40, %v1677_v31 }
 0x18d   :  { %v1706_v39 = vmax.f32 %v1705_v42, 0.0 }
 0x18f   :  { %v1717_v49 = vadd.f32 1e-05, %v1706_v39 }
 0x191   :  { %13822 = vrsqrt.f32 %v1717_v49 }
 0x19b   :  { %v13823_v5 = vpop.eup %13822 }
 0x19c   :  { %v1719_v9 = vmul.f32 %v13823_v5, %v1707_v62  ;;  %v1720_v63 = vmul.f32 %v13823_v5, %v1708_v55  ;;  %v1721_v41 = vmul.f32 %v13823_v5, %v1709_v51  ;;  %v1722_v43 = vmul.f32 %v13823_v5, %v1710_v12 }
 0x19d   :  { %v1723_v46 = vmul.f32 %v13823_v5, %v1711_v21  ;;  %v1724_v2 = vmul.f32 %v13823_v5, %v1712_v14  ;;  %v1725_v8 = vmul.f32 %v13823_v5, %v1713_v50  ;;  %v1726_v28 = vmul.f32 %v13823_v5, %v1714_v59 }
 0x19e   :  { %v1727_v29 = vmul.f32 %v13823_v5, %v1715_v48  ;;  %v1728_v45 = vmul.f32 %v13823_v5, %v1716_v60  ;;  %v1729_v33 = vmul.f32 %v1719_v9, %v14686_v44  ;;  %v1730_v38 = vmul.f32 %v1720_v63, %v14690_v36 }
 0x19f   :  { %v1731_v35 = vmul.f32 %v1721_v41, %v14696_v7  ;;  %v1732_v27 = vmul.f32 %v1722_v43, %v14708_v24  ;;  %v1733_v11 = vmul.f32 %v1723_v46, %v14724_v20  ;;  %v1734_v17 = vmul.f32 %v1724_v2, %v14732_v19 }
 0x1a0   :  { %v1735_v47 = vmul.f32 %v1725_v8, %v14742_v54  ;;  %v1736_v15 = vmul.f32 %v1726_v28, %v14747_v0  ;;  %v1737_v23 = vmul.f32 %v1727_v29, %v14755_v4  ;;  %v1738_v40 = vmul.f32 %v1728_v45, %v14758_v61 }
 0x1a1   :  { %v1739_v37 = vpack.c.bf16 %v1730_v38, %v1729_v33  ;;  %v1740_v13 = vpack.c.bf16 %v1732_v27, %v1731_v35  ;;  %v1741_v6 = vpack.c.bf16 %v1734_v17, %v1733_v11 }
 0x1a2   :  { %v1742_v16 = vpack.c.bf16 %v1736_v15, %v1735_v47  ;;  %v1743_v34 = vpack.c.bf16 %v1738_v40, %v1737_v23 }
 0x1a3   :  { %v1749_v22 = vrot.slane %v1739_v37, 4  ;;  %v1750_v30 = vrot.slane %v1740_v13, 4  ;;  %v1752_v26 = vrot.slane %v1741_v6, 4 }
 0x1a4   :  { %v1754_v32 = vrot.slane %v1742_v16, 4  ;;  %v1756_v10 = vrot.slane %v1743_v34, 4 }
 0x1a5   :  { %v1751_v3 = vsel %vm38_vm1, %v1749_v22, %v1750_v30  ;;  %v1753_v56 = vsel %vm38_vm1, %v1750_v30, %v1752_v26  ;;  %1764 = vst [vmem:[#allocation2] sm:$0xf0] %v1749_v22 }
 0x1a6   :  { %v14781_v25 = vsel %vm38_vm1, %v1752_v26, %v1754_v32  ;;  %v14784_v57 = vsel %vm38_vm1, %v1754_v32, %v1756_v10  ;;  %1769 = vst [vmem:[#allocation2 + $0x28] sm:$0xf] %v1756_v10  ;;  %v14786_v52 = vrot.slane %v1751_v3, 1  ;;  %v1833_v31 = vrot.slane %v1753_v56, 1 }
 0x1a7   :  { %v14788_v18 = vshll.u32 %v1751_v3, 16  ;;  %v14790_v53 = vshrl.u32 %v1751_v3, 16  ;;  %v14792_v58 = vshll.u32 %v1753_v56, 16  ;;  %v14794_v62 = vshrl.u32 %v1753_v56, 16 }
 0x1a8   :  { %v1834_v55 = vsel %vm151_vm2, %v14786_v52, %v1833_v31  ;;  %v14799_v51 = vshll.u32 %v14781_v25, 16  ;;  %v1835_v12 = vrot.slane %v14781_v25, 1  ;;  %v14803_v21 = vshrl.u32 %v14781_v25, 16 }
 0x1a9   :  { %v14805_v14 = vshrl.u32 %v1834_v55, 16  ;;  %v14807_v42 = vshll.u32 %v1834_v55, 16  ;;  %v14810_v50 = vrot.slane %v14788_v18, 1  ;;  %v1796_v59 = vrot.slane %v14792_v58, 1 }
 0x1aa   :  { %v1973_v48 = vrot.slane %v14790_v53, 3  ;;  %v1974_v60 = vrot.slane %v14788_v18, 4  ;;  %v1804_v39 = vrot.slane %v14799_v51, 1  ;;  %v1836_v49 = vsel %vm151_vm2, %v1833_v31, %v1835_v12 }
 0x1ab   :  { %v2005_v5 = vrot.slane %v14805_v14, 3  ;;  %v2008_v9 = vrot.slane %v14807_v42, 4  ;;  %v1792_v63 = vor.u32 %v14790_v53, %v14810_v50  ;;  %v1800_v41 = vor.u32 %v14794_v62, %v1796_v59 }
 0x1ac   :  { %v1892_v43 = vld [vmem:[#allocation2] sm:$0xf0]  ;;  %v14824_v2 = vor.u32 %v1974_v60, %v1973_v48  ;;  %v14826_v8 = vshrl.u32 %v1836_v49, 16  ;;  %v14828_v28 = vshll.u32 %v1836_v49, 16  ;;  %v14831_v29 = vor.u32 %v14803_v21, %v1804_v39 }
 0x1ad   :  { %v1890_v46 = vld [vmem:[#allocation2] sm:$0xf8]  ;;  %v1912_v45 = vrot.slane %v1892_v43, 1  ;;  %v2009_v33 = vor.u32 %v2008_v9, %v2005_v5  ;;  %v14834_v38 = vsel %vm98_vm3, %v1792_v63, %v1796_v59  ;;  %v1895_v35 = vshrl.u32 %v1892_v43, 16 }
 0x1ae   :  { %v1897_v27 = vshll.u32 %v1892_v43, 16  ;;  %v14837_v11 = vshrl.u32 %v14834_v38, 16  ;;  %v14840_v17 = vshll.u32 %v14834_v38, 16  ;;  %v1966_v47 = vshrl.u32 %v1890_v46, 16  ;;  %v13488_v9 = vld [vmem:[%s18559_s1 + $0x2c0] sm:$0xff]  }
 0x1af   :  { %v1913_v15 = vsel %vm151_vm2, %v1912_v45, %v14786_v52  ;;  %v1969_v23 = vshll.u32 %v1890_v46, 16  ;;  %v14845_v40 = vsel %vm98_vm3, %v1800_v41, %v1804_v39  ;;  %v2027_v37 = vrot.slane %v14826_v8, 3 }
 0x1b0   :  { %v1995_v13 = vshrl.u32 %v1913_v15, 16  ;;  %v1998_v6 = vshll.u32 %v1913_v15, 16  ;;  %v1899_v16 = vrot.slane %v1897_v27, 1  ;;  %v1988_v34 = vrot.slane %v14837_v11, 3 }
 0x1b1   :  { %v1991_v22 = vrot.slane %v14840_v17, 4  ;;  %v1968_v30 = vrot.slane %v1966_v47, 3  ;;  %v1971_v26 = vrot.slane %v1969_v23, 4  ;;  %v14851_v32 = vshrl.u32 %v14845_v40, 16 }
 0x1b2   :  { %v1997_v10 = vrot.slane %v1995_v13, 3  ;;  %v2000_v3 = vrot.slane %v1998_v6, 4  ;;  %v1900_v56 = vor.u32 %v1899_v16, %v1895_v35  ;;  %v14854_v31 = vshll.u32 %v14845_v40, 16 }
 0x1b3   :  { %v1992_v55 = vor.u32 %v1991_v22, %v1988_v34  ;;  %v1972_v59 = vor.u32 %v1971_v26, %v1968_v30  ;;  %v2018_v48 = vrot.slane %v14851_v32, 3  ;;  %v2030_v60 = vrot.slane %v14828_v28, 4  ;;  %v13491_v22 = vld [vmem:[%s18559_s1 + $0x2c8] sm:$0xff]  }
 0x1b4   :  { %v2001_v39 = vor.u32 %v2000_v3, %v1997_v10  ;;  %v1901_v49 = vsel %vm98_vm3, %v1900_v56, %v14810_v50  ;;  %v2021_v5 = vrot.slane %v14854_v31, 4  ;;  %v2011_v63 = vrot.slane %v14794_v62, 3 }
 0x1b5   :  { %v1978_v41 = vshrl.u32 %v1901_v49, 16  ;;  %v1981_v43 = vshll.u32 %v1901_v49, 16  ;;  %v1976_v46 = vsel %vm286_vm4, %v1972_v59, %v14824_v2  ;;  %v2031_v45 = vor.u32 %v2030_v60, %v2027_v37  ;;  %v14896_v59 = vld [vmem:[#allocation2 + $0x28] sm:$0xf] }
 0x1b6   :  { %v2010_v35 = vsel %vm286_vm4, %v2001_v39, %v2009_v33  ;;  %v14868_v27 = vor.u32 %v2021_v5, %v2018_v48  ;;  %v2012_v47 = vrot.slane %v14792_v58, 4  ;;  %v14872_v15 = vshll.u32 %v14784_v57, 16  ;;  %v13487_v48 = vld [vmem:[%s18559_s1 + $0x240] sm:$0xff]   ;;  %v13489_v5 = vld [vmem:[%s18559_s1 + $0x288] sm:$0xff]  }
 0x1b7   :  { %12441 = vmatmul.mubr.bf16.vlgmr.msra.gmra.mrb[20].mxu1 %v2010_v35  ;;  %v1980_v23 = vrot.slane %v1978_v41, 3  ;;  %v1983_v13 = vrot.slane %v1981_v43, 4  ;;  %v2032_v6 = vsel %vm286_vm4, %v2009_v33, %v2031_v45  ;;  %v14876_v16 = vrot.slane %v14784_v57, 1 }
 0x1b8   :  { %v2023_v37 = vsel %vm286_vm4, %v1992_v55, %v14868_v27  ;;  %12444 = vmatprep.mubr.msk.bf16.mxu1 %vm13859_vm0, %v18569_v1  ;;  %12461 = vmatpush3.bf16.msra.mxu1 %v13488_v9  ;;  %v2013_v34 = vor.u32 %v2012_v47, %v2011_v63  ;;  %v1812_v30 = vrot.slane %v14872_v15, 1  ;;  %v2033_v26 = vrot.slane %v14803_v21, 3 }
 0x1b9   :  { %v1984_v33 = vor.u32 %v1983_v13, %v1980_v23  ;;  %12462 = vmatprep.subr.bf16.mxu1 %v18569_v1  ;;  %v1838_v10 = vsel %vm151_vm2, %v1835_v12, %v14876_v16  ;;  %v2034_v3 = vrot.slane %v14799_v51, 4  ;;  %v14894_v56 = vshrl.u32 %v14784_v57, 16  ;;  %v1893_v57 = vld [vmem:[#allocation2 + $0x28] sm:$0x1f] }
 0x1ba   :  { %v14903_v60 = vsel %vm286_vm4, %v14824_v2, %v2013_v34  ;;  %v14907_v25 = vsel %vm98_vm3, %v14831_v29, %v1812_v30  ;;  %v14909_v12 = vshrl.u32 %v1838_v10, 16  ;;  %v14911_v39 = vshll.u32 %v1838_v10, 16 }
 0x1bb   :  { %v1993_v49 = vsel %vm286_vm4, %v1984_v33, %v1992_v55  ;;  %v14918_v9 = vshrl.u32 %v14907_v25, 16  ;;  %v14921_v2 = vshll.u32 %v14907_v25, 16  ;;  %v2035_v63 = vor.u32 %v2034_v3, %v2033_v26  ;;  %v13494_v55 = vld [vmem:[%s18559_s1 + $0x2d0] sm:$0xff]  }
 0x1bc   :  { %2290 = vmatprep.mubr.bf16.mxu0 %v1993_v49  ;;  %12463 = vmatpush3.bf16.msra.mxu1 %v13491_v22  ;;  %v2049_v29 = vrot.slane %v14909_v12, 3  ;;  %v2052_v41 = vrot.slane %v14911_v39, 4  ;;  %v14929_v43 = vor.u32 %v14894_v56, %v1812_v30  ;;  %v18562_v35 = vshll.u32 %v14896_v59, 16  ;;  %v13490_v30 = vld [vmem:[%s18559_s1 + $0x248] sm:$0xff]  }
 0x1bd   :  { %2291 = vmatmul.mubr.bf16.vlgmr.msra.gmra.mrb[60].mxu0 %v1976_v46  ;;  %v2040_v47 = vrot.slane %v14918_v9, 3  ;;  %v2043_v23 = vrot.slane %v14921_v2, 4  ;;  %12464 = vmatprep.subr.bf16.mxu1 %v18569_v1  ;;  %v14936_v13 = vsel %vm286_vm4, %v2013_v34, %v2035_v63  ;;  %v1914_v22 = vrot.slane %v1893_v57, 1 }
 0x1be   :  { %2298 = vmatprep.mubr.bf16.mxu0 %v2023_v37  ;;  %11491 = vmatpush3.bf16.msra.mxu0 %v13487_v48  ;;  %v2053_v26 = vor.u32 %v2052_v41, %v2049_v29  ;;  %v1905_v46 = vrot.slane %v18562_v35, 1  ;;  %v2055_v33 = vrot.slane %v14894_v56, 3  ;;  %v2056_v10 = vrot.slane %v14872_v15, 4  ;;  %v13492_v37 = vld [vmem:[%s18559_s1 + $0x290] sm:$0xff]  }
 0x1bf   :  { %12445 = vmatmul.mubr.bf16.gmra.mrb[24].mxu1 %v2032_v6  ;;  %11492 = vmatprep.subr.bf16.mxu0 %v13489_v5  ;;  %v2044_v3 = vor.u32 %v2043_v23, %v2040_v47  ;;  %v1915_v34 = vsel %vm151_vm2, %v14876_v16, %v1914_v22  ;;  %v1907_v48 = vshrl.u32 %v14896_v59, 16  ;;  %v13497_v6 = vld [vmem:[%s18559_s1 + $0x2d8] sm:$0xff]   ;;  %v2091_v0 = vshrl.u32 %v1914_v22, 16 }
 0x1c0   :  { %12448 = vmatprep.mubr.msk.bf16.mxu1 %vm13859_vm0, %v18569_v1  ;;  %v2054_v57 = vsel %vm286_vm4, %v2031_v45, %v2053_v26  ;;  %12465 = vmatpush3.bf16.msra.mxu1 %v13494_v55  ;;  %v1906_v49 = vsel %vm98_vm3, %v14929_v43, %v1905_v46  ;;  %v2069_v5 = vshrl.u32 %v1915_v34, 16  ;;  %v2072_v29 = vshll.u32 %v1915_v34, 16  ;;  %v13493_v45 = vld [vmem:[%s18559_s1 + $0x250] sm:$0xff]  }
 0x1c1   :  { %v2045_v41 = vsel %vm286_vm4, %v14868_v27, %v2044_v3  ;;  %12466 = vmatprep.subr.bf16.mxu1 %v18569_v1  ;;  %v2060_v47 = vshrl.u32 %v1906_v49, 16  ;;  %v2063_v23 = vshll.u32 %v1906_v49, 16  ;;  %v14962_v35 = vor.u32 %v2056_v10, %v2055_v33  ;;  %v13495_v27 = vld [vmem:[%s18559_s1 + $0x298] sm:$0xff]   ;;  %v1776_v10 = vld [vmem:[#allocation2] sm:$0xfe] }
 0x1c2   :  { %11493 = vmatpush3.bf16.msra.mxu0 %v13490_v30  ;;  %v2071_v55 = vrot.slane %v2069_v5, 3  ;;  %v2074_v61 = vrot.slane %v2072_v29, 4  ;;  %v1909_v4 = vor.u32 %v1907_v48, %v1905_v46  ;;  %v2094_v30 = vshll.u32 %v1914_v22, 16  ;;  %v13499_v46 = vld [vmem:[%s18559_s1 + $0x2e0] sm:$0xff]  }
 0x1c3   :  { %11494 = vmatprep.subr.bf16.mxu0 %v13492_v37  ;;  %v2062_v34 = vrot.slane %v2060_v47, 3  ;;  %v2065_v1 = vrot.slane %v2063_v23, 4  ;;  %v14972_v33 = vsel %vm286_vm4, %v2035_v63, %v14962_v35  ;;  %v18641_v5 = vmov 0.0   ;;  %v13496_v63 = vld [vmem:[%s18559_s1 + $0x258] sm:$0xff]  }
 0x1c4   :  { %12467 = vmatpush3.bf16.msra.mxu1 %v13497_v6  ;;  %v14974_v49 = vor.u32 %v2074_v61, %v2071_v55  ;;  %v2082_v22 = vshrl.u32 %v1909_v4, 16  ;;  %v14988_v6 = vrot.slane %v2091_v0, 3  ;;  %v1781_v29 = vshll.u32 %v1776_v10, 16  ;;  %v13501_v0 = vld [vmem:[%s18559_s1 + $0x2e8] sm:$0xff]   ;;  %v13500_v55 = vld [vmem:[%s18559_s1 + $0x260] sm:$0xff]  }
 0x1c5   :  { %2299 = vmatmul.mubr.bf16.gmra.mrb[64].mxu0 %v14903_v60  ;;  %v14980_v37 = vor.u32 %v2065_v1, %v2062_v34  ;;  %12468 = vmatprep.subr.bf16.mxu1 %v18641_v5  ;;  %v13498_v60 = vld [vmem:[%s18559_s1 + $0x2a0] sm:$0xff]   ;;  %v14995_v47 = vrot.slane %v2094_v30, 4  ;;  %v18573_v23 = vrot.slane %v14840_v17, 1 }
 0x1c6   :  { %2306 = vmatprep.mubr.bf16.mxu0 %v2045_v41  ;;  %11495 = vmatpush3.bf16.msra.mxu0 %v13493_v45  ;;  %v2076_v61 = vsel %vm286_vm4, %v2053_v26, %v14974_v49  ;;  %v2085_v41 = vshll.u32 %v1909_v4, 16  ;;  %v1779_v26 = vshrl.u32 %v1776_v10, 16  ;;  %v2428_v45 = vrot.slane %v14807_v42, 1 }
 0x1c7   :  { %12449 = vmatmul.mubr.bf16.gmra.mrb[28].mxu1 %v2054_v57  ;;  %11496 = vmatprep.subr.bf16.mxu0 %v13495_v27  ;;  %v2067_v1 = vsel %vm286_vm4, %v2044_v3, %v14980_v37  ;;  %v1783_v57 = vrot.slane %v1781_v29, 1  ;;  %v1830_v3 = vrot.slane %v1776_v10, 1  ;;  %v15005_v4 = vrot.slane %v1907_v48, 3 }
 0x1c8   :  { %12452 = vmatprep.mubr.msk.bf16.mxu1 %vm13859_vm0, %v18641_v5  ;;  %12469 = vmatpush3.bf16.msra.mxu1 %v13499_v46  ;;  %v18642_v27 = vshll.u32 %v14896_v59, 16  ;;  %v2430_v10 = vor.u32 %v18573_v23, %v14837_v11  ;;  %v2084_v48 = vrot.slane %v2082_v22, 3  ;;  %v2087_v29 = vrot.slane %v2085_v41, 4  ;;  %v15037_v23 = vld [vmem:[#allocation2 + $0x28] sm:$0x3] }
 0x1c9   :  { %12470 = vmatprep.subr.bf16.mxu1 %v18641_v5  ;;  %v1784_v30 = vor.u32 %v1783_v57, %v1779_v26  ;;  %v1832_v46 = vsel %vm151_vm2, %v1830_v3, %v14786_v52  ;;  %v2431_v59 = vrot.slane %v14854_v31, 1  ;;  %v2097_v26 = vor.u32 %v14995_v47, %v14988_v6  ;;  %v13504_v57 = vld [vmem:[%s18559_s1 + $0x2f0] sm:$0xff]   ;;  %v15032_v3 = vld [vmem:[#allocation2 + $0x28] sm:$0x1] }
 0x1ca   :  { %11497 = vmatpush3.bf16.msra.mxu0 %v13496_v63  ;;  %v15012_v34 = vrot.slane %v18642_v27, 4  ;;  %v13502_v63 = vld [vmem:[%s18559_s1 + $0x2a8] sm:$0xff]   ;;  %v2424_v54 = vshll.u32 %v1832_v46, 16  ;;  %v2433_v22 = vor.u32 %v2428_v45, %v14805_v14  ;;  %v2434_v41 = vrot.slane %v14828_v28, 1 }
 0x1cb   :  { %11498 = vmatprep.subr.bf16.mxu0 %v13498_v60  ;;  %v1789_v60 = vsel %vm98_vm3, %v1784_v30, %v14810_v50  ;;  %v2422_v27 = vshrl.u32 %v1832_v46, 16  ;;  %v2437_v47 = vrot.slane %v14921_v2, 1  ;;  %v13503_v30 = vld [vmem:[%s18559_s1 + $0x268] sm:$0xff]   ;;  %v15043_v20 = vsel %vm98_vm3, %v2430_v10, %v2431_v59 }
 0x1cc   :  { %12471 = vmatpush3.bf16.msra.mxu1 %v13501_v0  ;;  %v2415_v0 = vshll.u32 %v1789_v60, 16  ;;  %v2426_v6 = vrot.slane %v2424_v54, 1  ;;  %v2413_v19 = vshrl.u32 %v1789_v60, 16  ;;  %v2436_v46 = vor.u32 %v2431_v59, %v14851_v32  ;;  %v13505_v54 = vld [vmem:[%s18559_s1 + $0x2b0] sm:$0xff]  }
 0x1cd   :  { %2307 = vmatmul.mubr.bf16.gmra.mrb[68].mxu0 %v14936_v13  ;;  %12472 = vmatprep.subr.bf16.mxu1 %v18641_v5  ;;  %v15046_v13 = vsel %vm98_vm3, %v2433_v22, %v2434_v41  ;;  %v2439_v24 = vor.u32 %v2434_v41, %v14826_v8  ;;  %v2440_v60 = vrot.slane %v14911_v39, 1  ;;  %v2088_v7 = vor.u32 %v2087_v29, %v2084_v48  ;;  %v15068_v29 = vld [vmem:[#allocation2] sm:$0xff] }
 0x1ce   :  { %2314 = vmatprep.mubr.bf16.mxu0 %v2067_v1  ;;  %11499 = vmatpush3.bf16.msra.mxu0 %v13500_v55  ;;  %v2417_v1 = vrot.slane %v2415_v0, 1  ;;  %v2427_v55 = vor.u32 %v2426_v6, %v2422_v27  ;;  %v15060_v10 = vsel %vm98_vm3, %v2436_v46, %v2437_v47  ;;  %v1839_v59 = vrot.slane %v15037_v23, 1  ;;  %v2777_v41 = vld [vmem:[#allocation2] sm:$0x80]  ;;  %v13506_v0 = vld [vmem:[%s18559_s1 + $0x270] sm:$0xff]   ;;  %v13508_v46 = vld [vmem:[%s18559_s1 + $0x2b8] sm:$0xff]  }
 0x1cf   :  { %12453 = vmatmul.mubr.bf16.gmra.mrb[32].mxu1 %v2076_v61  ;;  %11500 = vmatprep.subr.bf16.mxu0 %v13502_v63  ;;  %v13507_v61 = vld [vmem:[%s18559_s1 + $0x2f8] sm:$0xff]   ;;  %v1818_v63 = vshll.u32 %v15032_v3, 16  ;;  %v18643_v6 = vrot.slane %v14840_v17, 1 }
 0x1d0   :  { %12456 = vmatprep.mubr.msk.bf16.mxu1 %vm13859_vm0, %v18641_v5  ;;  %12473 = vmatpush3.bf16.msra.mxu1 %v13504_v57  ;;  %v2418_v22 = vor.u32 %v2417_v1, %v2413_v19  ;;  %v15066_v48 = vsel %vm98_vm3, %v2427_v55, %v2428_v45  ;;  %v15071_v57 = vsel %vm98_vm3, %v2439_v24, %v2440_v60  ;;  %v13532_v23 = vld [vmem:[%s18559_s1 + $0x438] sm:$0xff]  }
 0x1d1   :  { %12474 = vmatprep.subr.bf16.mxu1 %v18641_v5  ;;  %v1820_v27 = vrot.slane %v1818_v63, 1  ;;  %v15080_v19 = vsel %vm151_vm2, %v14876_v16, %v1839_v59  ;;  %v2098_v45 = vsel %vm286_vm4, %v14974_v49, %v2097_v26  ;;  %v2079_v24 = vor.u32 %v15012_v34, %v15005_v4 }
 0x1d2   :  { %11501 = vmatpush3.bf16.msra.mxu0 %v13503_v30  ;;  %v2420_v30 = vsel %vm98_vm3, %v2418_v22, %v18643_v6  ;;  %v2450_v1 = vshll.u32 %v15080_v19, 16  ;;  %v2089_v55 = vsel %vm286_vm4, %v14980_v37, %v2088_v7  ;;  %v2407_v49 = vshll.u32 %v15068_v29, 16  ;;  %v13509_v37 = vld [vmem:[%s18559_s1 + $0x278] sm:$0xff]  }
 0x1d3   :  { %11502 = vmatprep.subr.bf16.mxu0 %v13505_v54  ;;  %v15098_v26 = vsel %vm98_vm3, %v14929_v43, %v1820_v27  ;;  %v2782_v4 = vshll.u32 %v2777_v41, 16  ;;  %v2448_v54 = vor.u32 %v2440_v60, %v14909_v12  ;;  %v2870_v7 = vrot.slane %v14837_v11, 6  ;;  %v13510_v60 = vld [vmem:[%s18559_s1 + $0x400] sm:$0xff]  }
 0x1d4   :  { %12475 = vmatpush3.bf16.msra.mxu1 %v13507_v61  ;;  %v2444_v34 = vshll.u32 %v15098_v26, 16  ;;  %v15104_v63 = vrot.slane %v2450_v1, 1  ;;  %v2780_v61 = vshrl.u32 %v2777_v41, 16  ;;  %v2797_v27 = vrot.slane %v2777_v41, 1 }
 0x1d5   :  { %2315 = vmatmul.mubr.bf16.gmra.mrb[72].mxu0 %v14972_v33  ;;  %12496 = vmatprep.subr.bf16.mxu1 %v18641_v5  ;;  %v2784_v22 = vrot.slane %v2782_v4, 1  ;;  %v2871_v33 = vrot.slane %v14840_v17, 7  ;;  %v2442_v6 = vor.u32 %v2437_v47, %v14918_v9  ;;  %v2882_v1 = vrot.slane %v14805_v14, 6 }
 0x1d6   :  { %2322 = vmatprep.mubr.bf16.mxu0 %v2089_v55  ;;  %11503 = vmatpush3.bf16.msra.mxu0 %v13506_v0  ;;  %v15115_v11 = vrot.slane %v2444_v34, 1  ;;  %v15119_v0 = vsel %vm98_vm3, %v2448_v54, %v15104_v63  ;;  %v2409_v4 = vrot.slane %v2407_v49, 1  ;;  %v2858_v49 = vrot.slane %v14790_v53, 6 }
 0x1d7   :  { %12457 = vmatmul.mubr.bf16.gmra.mrb[36].mxu1 %v2098_v45  ;;  %11504 = vmatprep.subr.bf16.mxu0 %v13508_v46  ;;  %v2785_v17 = vor.u32 %v2784_v22, %v2780_v61  ;;  %v2872_v41 = vor.u32 %v2871_v33, %v2870_v7  ;;  %v2798_v45 = vsel %vm151_vm2, %v2797_v27, %v14786_v52  ;;  %v2883_v46 = vrot.slane %v14807_v42, 7  ;;  %v13512_v33 = vld [vmem:[%s18559_s1 + $0x440] sm:$0xff]  }
 0x1d8   :  { %12476 = vmatprep.mubr.msk.bf16.mxu1 %vm13859_vm0, %v18641_v5  ;;  %v15129_v47 = vsel %vm98_vm3, %v2442_v6, %v15115_v11  ;;  %v2875_v55 = vshrl.u32 %v2798_v45, 16  ;;  %v2878_v34 = vshll.u32 %v2798_v45, 16  ;;  %v2080_v52 = vsel %vm286_vm4, %v14962_v35, %v2079_v24 }
 0x1d9   :  { %v2786_v14 = vsel %vm98_vm3, %v2785_v17, %v14810_v50  ;;  %v2884_v54 = vor.u32 %v2883_v46, %v2882_v1  ;;  %v2405_v42 = vshrl.u32 %v15068_v29, 16  ;;  %v2890_v1 = vrot.slane %v14851_v32, 6 }
 0x1da   :  { %11505 = vmatpush3.bf16.msra.mxu0 %v13509_v37  ;;  %v2863_v61 = vshrl.u32 %v2786_v14, 16  ;;  %v2866_v7 = vshll.u32 %v2786_v14, 16  ;;  %v2877_v22 = vrot.slane %v2875_v55, 6  ;;  %v2880_v37 = vrot.slane %v2878_v34, 7  ;;  %v2778_v14 = vld [vmem:[#allocation2 + $0x28] sm:$0xff] }
 0x1db   :  { %11549 = vmatprep.subr.bf16.mxu0 %v13510_v60  ;;  %v2859_v60 = vrot.slane %v14788_v18, 7  ;;  %v2410_v17 = vor.u32 %v2409_v4, %v2405_v42  ;;  %v2891_v35 = vrot.slane %v14854_v31, 7  ;;  %v2894_v29 = vrot.slane %v14826_v8, 6  ;;  %v13515_v18 = vld [vmem:[%s18559_s1 + $0x448] sm:$0xff]  }
 0x1dc   :  { %v2865_v27 = vrot.slane %v2863_v61, 6  ;;  %v2868_v6 = vrot.slane %v2866_v7, 7  ;;  %v2881_v45 = vor.u32 %v2880_v37, %v2877_v22  ;;  %v2895_v53 = vrot.slane %v14828_v28, 7  ;;  %v15164_v4 = vld [vmem:[#allocation2 + $0x28] sm:$0x7f] }
 0x1dd   :  { %2323 = vmatmul.mubr.bf16.gmra.mrb[76].mxu0 %v2080_v52  ;;  %v15145_v46 = vor.u32 %v2859_v60, %v2858_v49  ;;  %v2886_v55 = vrot.slane %v14794_v62, 6  ;;  %v2892_v8 = vor.u32 %v2891_v35, %v2890_v1  ;;  %v2887_v31 = vrot.slane %v14792_v58, 7  ;;  %v13511_v58 = vld [vmem:[%s18559_s1 + $0x3c0] sm:$0xff]  }
 0x1de   :  { %2661 = vmatprep.mubr.bf16.mxu0 %v2420_v30  ;;  %v2869_v24 = vor.u32 %v2868_v6, %v2865_v27  ;;  %v15155_v32 = vsel %vm1172_vm5, %v2881_v45, %v2884_v54  ;;  %v2896_v62 = vor.u32 %v2895_v53, %v2894_v29  ;;  %v2903_v30 = vrot.slane %v14921_v2, 7 }
 0x1df   :  { %12477 = vmatmul.mubr.bf16.vlgmr.msra.gmra.mrb[20].mxu1 %v15066_v48  ;;  %v2902_v48 = vrot.slane %v14918_v9, 6  ;;  %v2411_v34 = vsel %vm98_vm3, %v2410_v17, %v14810_v50  ;;  %v15172_v61 = vsel %vm1172_vm5, %v2872_v41, %v2892_v8  ;;  %v2888_v7 = vor.u32 %v2887_v31, %v2886_v55  ;;  %v13513_v9 = vld [vmem:[%s18559_s1 + $0x408] sm:$0xff]  }
 0x1e0   :  { %12480 = vmatprep.mubr.msk.bf16.mxu1 %vm13859_vm0, %v18641_v5  ;;  %12497 = vmatpush3.bf16.msra.mxu1 %v13512_v33  ;;  %v15160_v28 = vsel %vm1172_vm5, %v2869_v24, %v2872_v41  ;;  %v2906_v22 = vrot.slane %v14909_v12, 6  ;;  %v15179_v2 = vsel %vm1172_vm5, %v2884_v54, %v2896_v62  ;;  %v2907_v50 = vrot.slane %v14911_v39, 7  ;;  %v13518_v41 = vld [vmem:[%s18559_s1 + $0x450] sm:$0xff]  }
 0x1e1   :  { %12498 = vmatprep.subr.bf16.mxu1 %v18641_v5  ;;  %v2904_v52 = vor.u32 %v2903_v30, %v2902_v48  ;;  %v2898_v42 = vrot.slane %v14803_v21, 6  ;;  %v15188_v12 = vsel %vm1172_vm5, %v15145_v46, %v2888_v7  ;;  %v2899_v33 = vrot.slane %v14799_v51, 7  ;;  %v13514_v51 = vld [vmem:[%s18559_s1 + $0x3c8] sm:$0xff]   ;;  %v13523_v30 = vld [vmem:[%s18559_s1 + $0x460] sm:$0xff]  }
 0x1e2   :  { %v2788_v37 = vshll.u32 %v15164_v4, 16  ;;  %v15192_v54 = vrot.slane %v2778_v14, 1  ;;  %v2908_v39 = vor.u32 %v2907_v50, %v2906_v22  ;;  %v2910_v49 = vrot.slane %v14894_v56, 6 }
 0x1e3   :  { %v15196_v21 = vsel %vm1172_vm5, %v2892_v8, %v2904_v52  ;;  %v2911_v27 = vrot.slane %v14872_v15, 7  ;;  %v2900_v6 = vor.u32 %v2899_v33, %v2898_v42  ;;  %v1822_v22 = vshrl.u32 %v15032_v3, 16  ;;  %v13527_v3 = vld [vmem:[%s18559_s1 + $0x3e8] sm:$0xff]  }
 0x1e4   :  { %12499 = vmatpush3.bf16.msra.mxu1 %v13515_v18  ;;  %v15206_v60 = vrot.slane %v2788_v37, 1  ;;  %v2800_v1 = vsel %vm151_vm2, %v14876_v16, %v15192_v54  ;;  %v15216_v15 = vsel %vm1172_vm5, %v2896_v62, %v2908_v39  ;;  %v13521_v16 = vld [vmem:[%s18559_s1 + $0x458] sm:$0xff]   ;;  %v13517_v18 = vld [vmem:[%s18559_s1 + $0x3d0] sm:$0xff]   ;;  %v2454_v50 = vshrl.u32 %v15098_v26, 16 }
 0x1e5   :  { %2662 = vmatmul.mubr.bf16.vlgmr.msra.gmra.mrb[80].mxu0 %v2411_v34  ;;  %12500 = vmatprep.subr.bf16.mxu1 %v18641_v5  ;;  %v2924_v56 = vshrl.u32 %v2800_v1, 16  ;;  %v2927_v17 = vshll.u32 %v2800_v1, 16  ;;  %v15218_v45 = vor.u32 %v2911_v27, %v2910_v49  ;;  %v2458_v42 = vshll.u32 %v1822_v22, 16  ;;  %v13530_v49 = vld [vmem:[%s18559_s1 + $0x3f0] sm:$0xff]   ;;  %v2775_v27 = vld [vmem:[#allocation2] sm:$0xc0] }
 0x1e6   :  { %2669 = vmatprep.mubr.bf16.mxu0 %v15043_v20  ;;  %11550 = vmatpush3.bf16.msra.mxu0 %v13511_v58  ;;  %v13516_v20 = vld [vmem:[%s18559_s1 + $0x410] sm:$0xff]   ;;  %v2791_v35 = vsel %vm98_vm3, %v14929_v43, %v15206_v60  ;;  %v13519_v43 = vld [vmem:[%s18559_s1 + $0x418] sm:$0xff]   ;;  %v2456_v33 = vor.u32 %v2454_v50, %v15115_v11 }
 0x1e7   :  { %12481 = vmatmul.mubr.bf16.gmra.mrb[24].mxu1 %v15046_v13  ;;  %11551 = vmatprep.subr.bf16.mxu0 %v13513_v9  ;;  %v15226_v13 = vsel %vm1172_vm5, %v2888_v7, %v2900_v6  ;;  %v2915_v29 = vshrl.u32 %v2791_v35, 16  ;;  %v2918_v24 = vshll.u32 %v2791_v35, 16  ;;  %v2926_v53 = vrot.slane %v2924_v56, 6  ;;  %v13520_v58 = vld [vmem:[%s18559_s1 + $0x3d8] sm:$0xff]   ;;  %v13526_v9 = vld [vmem:[%s18559_s1 + $0x428] sm:$0xff]  }
 0x1e8   :  { %12484 = vmatprep.mubr.msk.bf16.mxu1 %vm13859_vm0, %v18641_v5  ;;  %12501 = vmatpush3.bf16.msra.mxu1 %v13518_v41  ;;  %v2929_v55 = vrot.slane %v2927_v17, 7  ;;  %v15237_v8 = vsel %vm1172_vm5, %v2900_v6, %v15218_v45  ;;  %v13529_v41 = vld [vmem:[%s18559_s1 + $0x430] sm:$0xff]   ;;  %v2851_v6 = vshrl.u32 %v2775_v27, 16 }
 0x1e9   :  { %12502 = vmatprep.subr.bf16.mxu1 %v18641_v5  ;;  %v2917_v31 = vrot.slane %v2915_v29, 6  ;;  %v2920_v62 = vrot.slane %v2918_v24, 7  ;;  %v2933_v24 = vrot.slane %v2788_v37, 7 }
 0x1ea   :  { %11552 = vmatpush3.bf16.msra.mxu0 %v13514_v51  ;;  %v15242_v48 = vor.u32 %v2929_v55, %v2926_v53  ;;  %v13533_v51 = vld [vmem:[%s18559_s1 + $0x3f8] sm:$0xff]   ;;  %v2853_v1 = vrot.slane %v2851_v6, 6 }
 0x1eb   :  { %11553 = vmatprep.subr.bf16.mxu0 %v13516_v20  ;;  %v15249_v14 = vor.u32 %v2920_v62, %v2917_v31 }
 0x1ec   :  { %12503 = vmatpush3.bf16.msra.mxu1 %v13521_v16  ;;  %v15253_v34 = vsel %vm1172_vm5, %v2908_v39, %v15242_v48 }
 0x1ed   :  { %2670 = vmatmul.mubr.bf16.gmra.mrb[84].mxu0 %v14834_v38  ;;  %12504 = vmatprep.subr.bf16.mxu1 %v18641_v5  ;;  %v13522_v38 = vld [vmem:[%s18559_s1 + $0x420] sm:$0xff]   ;;  %v15265_v7 = vsel %vm1172_vm5, %v2904_v52, %v15249_v14  ;;  %v13528_v52 = vld [vmem:[%s18559_s1 + $0x470] sm:$0xff]  }
 0x1ee   :  { %2677 = vmatprep.mubr.bf16.mxu0 %v15060_v10  ;;  %11554 = vmatpush3.bf16.msra.mxu0 %v13517_v18  ;;  %v13525_v10 = vld [vmem:[%s18559_s1 + $0x468] sm:$0xff]  }
 0x1ef   :  { %12485 = vmatmul.mubr.bf16.gmra.mrb[28].mxu1 %v15071_v57  ;;  %11555 = vmatprep.subr.bf16.mxu0 %v13519_v43  ;;  %v13524_v57 = vld [vmem:[%s18559_s1 + $0x3e0] sm:$0xff]  }
 0x1f0   :  { %12488 = vmatprep.mubr.msk.bf16.mxu1 %vm13859_vm0, %v18641_v5  ;;  %12505 = vmatpush3.bf16.msra.mxu1 %v13523_v30 }
 0x1f1   :  { %12506 = vmatprep.subr.bf16.mxu1 %v18641_v5 }
 0x1f2   :  { %11556 = vmatpush3.bf16.msra.mxu0 %v13520_v58 }
 0x1f3   :  { %11557 = vmatprep.subr.bf16.mxu0 %v13522_v38 }
 0x1f4   :  { %12507 = vmatpush3.bf16.msra.mxu1 %v13525_v10 }
 0x1f5   :  { %2678 = vmatmul.mubr.bf16.gmra.mrb[88].mxu0 %v14845_v40  ;;  %12508 = vmatprep.subr.bf16.mxu1 %v18641_v5  ;;  %v2462_v40 = vshrl.u32 %v15080_v19, 16  ;;  %v2460_v19 = vrot.slane %v2458_v42, 1 }
 0x1f6   :  { %2685 = vmatprep.mubr.bf16.mxu0 %v15129_v47  ;;  %11558 = vmatpush3.bf16.msra.mxu0 %v13524_v57  ;;  %v2466_v47 = vshll.u32 %v1839_v59, 16 }
 0x1f7   :  { %12489 = vmatmul.mubr.bf16.gmra.mrb[32].mxu1 %v15119_v0  ;;  %11559 = vmatprep.subr.bf16.mxu0 %v13526_v9  ;;  %v13531_v0 = vld [vmem:[%s18559_s1 + $0x478] sm:$0xff]   ;;  %v2464_v39 = vor.u32 %v2462_v40, %v15104_v63  ;;  %v2461_v11 = vsel %vm98_vm3, %v2456_v33, %v2460_v19 }
 0x1f8   :  { %12492 = vmatprep.mubr.msk.bf16.mxu1 %vm13859_vm0, %v18641_v5  ;;  %12509 = vmatpush3.bf16.msra.mxu1 %v13528_v52  ;;  %v2468_v59 = vrot.slane %v2466_v47, 1 }
 0x1f9   :  { %12510 = vmatprep.subr.bf16.mxu1 %v18641_v5 }
 0x1fa   :  { %11560 = vmatpush3.bf16.msra.mxu0 %v13527_v3  ;;  %v2469_v63 = vsel %vm98_vm3, %v2464_v39, %v2468_v59 }
 0x1fb   :  { %11561 = vmatprep.subr.bf16.mxu0 %v13529_v41 }
 0x1fc   :  { %12511 = vmatpush3.bf16.msra.mxu1 %v13531_v0 }
 0x1fd   :  { %2686 = vmatmul.mubr.bf16.gmra.mrb[92].mxu0 %v14907_v25  ;;  %12532 = vmatprep.subr.bf16.mxu1 %v18641_v5  ;;  %v2854_v25 = vshll.u32 %v2775_v27, 16 }
 0x1fe   :  { %2693 = vmatprep.mubr.bf16.mxu0 %v2461_v11  ;;  %11562 = vmatpush3.bf16.msra.mxu0 %v13530_v49 }
 0x1ff   :  { %12493 = vmatmul.mubr.bf16.gmra.mrb[36].mxu1 %v2469_v63  ;;  %11563 = vmatprep.subr.bf16.mxu0 %v13532_v23  ;;  %v2856_v20 = vrot.slane %v2854_v25, 7  ;;  %v13534_v25 = vld [vmem:[%s18559_s1 + $0x580] sm:$0xff]  }
 0x200   :  { %12512 = vmatprep.mubr.msk.bf16.mxu1 %vm13859_vm0, %v18641_v5 }
 0x201   :  { %v2857_v56 = vor.u32 %v2856_v20, %v2853_v1  ;;  %v13535_v1 = vld [vmem:[%s18559_s1 + $0x540] sm:$0xff]  }
 0x202   :  { %11564 = vmatpush3.bf16.msra.mxu0 %v13533_v51  ;;  %v13536_v20 = vld [vmem:[%s18559_s1 + $0x5c0] sm:$0xff]  }
 0x203   :  { %v2861_v17 = vsel %vm1172_vm5, %v2857_v56, %v15145_v46  ;;  %v13537_v56 = vld [vmem:[%s18559_s1 + $0x588] sm:$0xff]   ;;  %11608 = vmatprep.subr.bf16.mxu0 %v13534_v25 }
 0x205   :  { %2694 = vmatmul.mubr.bf16.gmra.mrb[96].mxu0 %v15098_v26  ;;  %v2792_v26 = vshrl.u32 %v15164_v4, 16 }
 0x206   :  { %3145 = vmatprep.mubr.bf16.mxu0 %v15160_v28 }
 0x207   :  { %12513 = vmatmul.mubr.bf16.vlgmr.msra.gmra.mrb[20].mxu1 %v15155_v32  ;;  %v2794_v32 = vor.u32 %v2792_v26, %v15206_v60  ;;  %v2932_v29 = vrot.slane %v2792_v26, 6  ;;  %v13539_v26 = vld [vmem:[%s18559_s1 + $0x5c8] sm:$0xff]  }
 0x208   :  { %12516 = vmatprep.mubr.msk.bf16.mxu1 %vm13859_vm0, %v18641_v5  ;;  %12533 = vmatpush3.bf16.msra.mxu1 %v13536_v20 }
 0x209   :  { %v2937_v46 = vshrl.u32 %v2794_v32, 16  ;;  %v2940_v28 = vshll.u32 %v2794_v32, 16  ;;  %v2934_v53 = vor.u32 %v2933_v24, %v2932_v29  ;;  %12534 = vmatprep.subr.bf16.mxu1 %v18641_v5  ;;  %v13543_v29 = vld [vmem:[%s18559_s1 + $0x598] sm:$0xff]  }
 0x20b   :  { %v2939_v16 = vrot.slane %v2937_v46, 6  ;;  %v2942_v35 = vrot.slane %v2940_v28, 7  ;;  %v2935_v55 = vsel %vm1172_vm5, %v15218_v45, %v2934_v53  ;;  %v13538_v46 = vld [vmem:[%s18559_s1 + $0x548] sm:$0xff]   ;;  %v13544_v53 = vld [vmem:[%s18559_s1 + $0x558] sm:$0xff]  }
 0x20c   :  { %12535 = vmatpush3.bf16.msra.mxu1 %v13539_v26 }
 0x20d   :  { %3146 = vmatmul.mubr.bf16.vlgmr.msra.gmra.mrb[100].mxu0 %v2861_v17  ;;  %12536 = vmatprep.subr.bf16.mxu1 %v18641_v5 }
 0x20e   :  { %3153 = vmatprep.mubr.bf16.mxu0 %v15172_v61  ;;  %v2946_v61 = vshrl.u32 %v15192_v54, 16  ;;  %11609 = vmatpush3.bf16.msra.mxu0 %v13535_v1 }
 0x20f   :  { %12517 = vmatmul.mubr.bf16.gmra.mrb[24].mxu1 %v15179_v2  ;;  %v2949_v2 = vshll.u32 %v15192_v54, 16  ;;  %11610 = vmatprep.subr.bf16.mxu0 %v13537_v56 }
 0x210   :  { %12520 = vmatprep.mubr.msk.bf16.mxu1 %vm13859_vm0, %v18641_v5 }
 0x211   :  { %v2951_v60 = vrot.slane %v2949_v2, 7  ;;  %v13540_v2 = vld [vmem:[%s18559_s1 + $0x590] sm:$0xff]  }
 0x212   :  { %11611 = vmatpush3.bf16.msra.mxu0 %v13538_v46 }
 0x213   :  { %11612 = vmatprep.subr.bf16.mxu0 %v13540_v2 }
 0x215   :  { %3154 = vmatmul.mubr.bf16.gmra.mrb[104].mxu0 %v15188_v12  ;;  %v2948_v12 = vrot.slane %v2946_v61, 6 }
 0x216   :  { %3161 = vmatprep.mubr.bf16.mxu0 %v15196_v21  ;;  %v2943_v21 = vor.u32 %v2942_v35, %v2939_v16 }
 0x217   :  { %12521 = vmatmul.mubr.bf16.gmra.mrb[28].mxu1 %v15216_v15  ;;  %v2952_v15 = vor.u32 %v2951_v60, %v2948_v12  ;;  %v13542_v60 = vld [vmem:[%s18559_s1 + $0x5d0] sm:$0xff]  }
 0x218   :  { %12524 = vmatprep.mubr.msk.bf16.mxu1 %vm13859_vm0, %v18641_v5  ;;  %v2944_v54 = vsel %vm1172_vm5, %v15249_v14, %v2943_v21  ;;  %v13541_v21 = vld [vmem:[%s18559_s1 + $0x550] sm:$0xff]   ;;  %12537 = vmatpush3.bf16.msra.mxu1 %v13542_v60 }
 0x219   :  { %11613 = vmatpush3.bf16.msra.mxu0 %v13541_v21  ;;  %12538 = vmatprep.subr.bf16.mxu1 %v18641_v5 }
 0x21a   :  { %11614 = vmatprep.subr.bf16.mxu0 %v13543_v29 }
 0x21d   :  { %3162 = vmatmul.mubr.bf16.gmra.mrb[108].mxu0 %v15226_v13  ;;  %v2953_v13 = vsel %vm1172_vm5, %v15242_v48, %v2952_v15 }
 0x21e   :  { %3169 = vmatprep.mubr.bf16.mxu0 %v15265_v7  ;;  %11615 = vmatpush3.bf16.msra.mxu0 %v13544_v53 }
 0x21f   :  { %12525 = vmatmul.mubr.bf16.gmra.mrb[32].mxu1 %v15253_v34 }
 0x220   :  { %12528 = vmatprep.mubr.msk.bf16.mxu1 %vm13859_vm0, %v18641_v5 }
 0x225   :  { %3170 = vmatmul.mubr.bf16.gmra.mrb[112].mxu0 %v15237_v8 }
 0x226   :  { %3177 = vmatprep.mubr.bf16.mxu0 %v2944_v54  ;;  %v13545_v54 = vld [vmem:[%s18559_s1 + $0x5d8] sm:$0xff]  }
 0x227   :  { %12529 = vmatmul.mubr.bf16.gmra.mrb[36].mxu1 %v2953_v13 }
 0x228   :  { %12548 = vmatprep.mubr.msk.bf16.mxu1 %vm13859_vm0, %v18641_v5  ;;  %12539 = vmatpush3.bf16.msra.mxu1 %v13545_v54 }
 0x229   :  { %12540 = vmatprep.subr.bf16.mxu1 %v18641_v5 }
 0x22d   :  { %3178 = vmatmul.mubr.bf16.gmra.mrb[116].mxu0 %v2935_v55 }
 0x290   :  { %v11447_v4 = vpop.f32.mrb[60].mxu0 }
 0x291   :  { %v11448_v37 = vpop.f32.mrb[61].mxu0 }
 0x292   :  { %v11449_v18 = vadd.f32 %v11448_v37, %v11447_v4  ;;  %v11450_v8 = vpop.f32.mrb[62].mxu0  ;;  %v13546_v37 = vld [vmem:[%s18559_s1 + $0x5a0] sm:$0xff]  }
 0x293   :  { %v11451_v43 = vpop.f32.mrb[63].mxu0  ;;  %11616 = vmatprep.subr.bf16.mxu0 %v13546_v37 }
 0x294   :  { %v11452_v31 = vadd.f32 %v11451_v43, %v11450_v8 }
 0x298   :  { %v11453_v62 = vpop.f32.mrb[64].mxu0 }
 0x299   :  { %v11454_v30 = vpop.f32.mrb[65].mxu0 }
 0x29a   :  { %v11455_v14 = vadd.f32 %v11454_v30, %v11453_v62  ;;  %v11456_v34 = vpop.f32.mrb[66].mxu0  ;;  %v13548_v62 = vld [vmem:[%s18559_s1 + $0x560] sm:$0xff]  }
 0x29b   :  { %v11457_v48 = vpop.f32.mrb[67].mxu0  ;;  %11617 = vmatpush3.bf16.msra.mxu0 %v13548_v62 }
 0x29c   :  { %v11458_v58 = vadd.f32 %v11457_v48, %v11456_v34  ;;  %v13549_v48 = vld [vmem:[%s18559_s1 + $0x5e8] sm:$0xff]  }
 0x2a0   :  { %v11459_v38 = vpop.f32.mrb[68].mxu0 }
 0x2a1   :  { %v11460_v7 = vpop.f32.mrb[69].mxu0 }
 0x2a2   :  { %v15356_v10 = vadd.f32 %v11460_v7, %v11459_v38  ;;  %v11462_v57 = vpop.f32.mrb[70].mxu0  ;;  %v13551_v38 = vld [vmem:[%s18559_s1 + $0x568] sm:$0xff]  }
 0x2a3   :  { %v11463_v22 = vpop.f32.mrb[71].mxu0 }
 0x2a4   :  { %v15358_v45 = vadd.f32 %v11463_v22, %v11462_v57  ;;  %v13553_v57 = vld [vmem:[%s18559_s1 + $0x5b0] sm:$0xff]  }
 0x2a8   :  { %v11465_v9 = vpop.f32.mrb[72].mxu0 }
 0x2a9   :  { %v11466_v52 = vpop.f32.mrb[73].mxu0 }
 0x2aa   :  { %v15360_v3 = vadd.f32 %v11466_v52, %v11465_v9  ;;  %v11468_v50 = vpop.f32.mrb[74].mxu0  ;;  %v13552_v52 = vld [vmem:[%s18559_s1 + $0x5f0] sm:$0xff]  }
 0x2ab   :  { %v11469_v42 = vpop.f32.mrb[75].mxu0 }
 0x2ac   :  { %v15362_v41 = vadd.f32 %v11469_v42, %v11468_v50  ;;  %v13554_v50 = vld [vmem:[%s18559_s1 + $0x570] sm:$0xff]  }
 0x2b0   :  { %v11471_v40 = vpop.f32.mrb[76].mxu0 }
 0x2b1   :  { %v11472_v47 = vpop.f32.mrb[77].mxu0 }
 0x2b2   :  { %v15364_v0 = vadd.f32 %v11472_v47, %v11471_v40  ;;  %v11474_v33 = vpop.f32.mrb[78].mxu0  ;;  %v13555_v47 = vld [vmem:[%s18559_s1 + $0x5f8] sm:$0xff]  }
 0x2b3   :  { %v11475_v39 = vpop.f32.mrb[79].mxu0 }
 0x2b4   :  { %v15366_v49 = vadd.f32 %v11475_v39, %v11474_v33 }
 0x2b8   :  { %v11506_v19 = vpop.f32.mrb[80].mxu0 }
 0x2b9   :  { %v11507_v23 = vpop.f32.mrb[81].mxu0 }
 0x2ba   :  { %v11508_v59 = vadd.f32 %v11507_v23, %v11506_v19  ;;  %v11509_v11 = vpop.f32.mrb[82].mxu0 }
 0x2bb   :  { %v11510_v27 = vpop.f32.mrb[83].mxu0 }
 0x2bc   :  { %v15368_v63 = vadd.f32 %v11508_v59, %v11449_v18  ;;  %v11511_v51 = vadd.f32 %v11510_v27, %v11509_v11  ;;  %v13558_v59 = vld [vmem:[%s18559_s1 + $0x4c0] sm:$0xff]  }
 0x2be   :  { %v15370_v6 = vadd.f32 %v11511_v51, %v11452_v31  ;;  %v13547_v31 = vld [vmem:[%s18559_s1 + $0x5e0] sm:$0xff]  }
 0x2bf   :  { %12541 = vmatpush3.bf16.msra.mxu1 %v13547_v31 }
 0x2c0   :  { %v11512_v17 = vpop.f32.mrb[84].mxu0  ;;  %12542 = vmatprep.subr.bf16.mxu1 %v18641_v5 }
 0x2c1   :  { %v11513_v32 = vpop.f32.mrb[85].mxu0 }
 0x2c2   :  { %v11514_v28 = vadd.f32 %v11513_v32, %v11512_v17  ;;  %v11515_v61 = vpop.f32.mrb[86].mxu0 }
 0x2c3   :  { %v11516_v16 = vpop.f32.mrb[87].mxu0  ;;  %12543 = vmatpush3.bf16.msra.mxu1 %v13549_v48 }
 0x2c4   :  { %v11517_v35 = vadd.f32 %v11516_v16, %v11515_v61  ;;  %v15394_v12 = vadd.f32 %v11514_v28, %v11455_v14  ;;  %v13550_v14 = vld [vmem:[%s18559_s1 + $0x5a8] sm:$0xff]   ;;  %12544 = vmatprep.subr.bf16.mxu1 %v18641_v5 }
 0x2c5   :  { %11618 = vmatprep.subr.bf16.mxu0 %v13550_v14 }
 0x2c6   :  { %v15403_v15 = vadd.f32 %v11517_v35, %v11458_v58  ;;  %11619 = vmatpush3.bf16.msra.mxu0 %v13551_v38 }
 0x2c7   :  { %11620 = vmatprep.subr.bf16.mxu0 %v13553_v57  ;;  %12545 = vmatpush3.bf16.msra.mxu1 %v13552_v52 }
 0x2c8   :  { %v11518_v24 = vpop.f32.mrb[88].mxu0  ;;  %12546 = vmatprep.subr.bf16.mxu1 %v18641_v5 }
 0x2c9   :  { %v11519_v13 = vpop.f32.mrb[89].mxu0 }
 0x2ca   :  { %v11520_v55 = vadd.f32 %v11519_v13, %v11518_v24  ;;  %v11521_v4 = vpop.f32.mrb[90].mxu0  ;;  %11621 = vmatpush3.bf16.msra.mxu0 %v13554_v50 }
 0x2cb   :  { %v11522_v18 = vpop.f32.mrb[91].mxu0  ;;  %12547 = vmatpush3.bf16.msra.mxu1 %v13555_v47 }
 0x2cc   :  { %v11523_v8 = vadd.f32 %v11522_v18, %v11521_v4  ;;  %v15419_v43 = vadd.f32 %v11520_v55, %v15356_v10  ;;  %12568 = vmatprep.subr.bf16.mxu1 %v18641_v5 }
 0x2ce   :  { %v15429_v30 = vadd.f32 %v11523_v8, %v15358_v45 }
 0x2d0   :  { %v11524_v34 = vpop.f32.mrb[92].mxu0 }
 0x2d1   :  { %v11525_v58 = vpop.f32.mrb[93].mxu0 }
 0x2d2   :  { %v11526_v7 = vadd.f32 %v11525_v58, %v11524_v34  ;;  %v11527_v10 = vpop.f32.mrb[94].mxu0  ;;  %v61_v58 = vld [vmem:[%s18558_s0 + $0x8] sm:$0xff] }
 0x2d3   :  { %v11528_v22 = vpop.f32.mrb[95].mxu0 }
 0x2d4   :  { %v11529_v45 = vadd.f32 %v11528_v22, %v11527_v10  ;;  %v15445_v9 = vadd.f32 %v11526_v7, %v15360_v3  ;;  %v13556_v3 = vld [vmem:[%s18559_s1 + $0x5b8] sm:$0xff]  }
 0x2d5   :  { %11622 = vmatprep.subr.bf16.mxu0 %v13556_v3 }
 0x2d6   :  { %v15455_v42 = vadd.f32 %v11529_v45, %v15362_v41  ;;  %v13557_v41 = vld [vmem:[%s18559_s1 + $0x578] sm:$0xff]  }
 0x2d7   :  { %11623 = vmatpush3.bf16.msra.mxu0 %v13557_v41  ;;  %v18644_v45 = vld [vmem:[#allocation7_spill] sm:$0xff] }
 0x2d8   :  { %v11530_v40 = vpop.f32.mrb[96].mxu0  ;;  %11667 = vmatprep.subr.bf16.mxu0 %v13558_v59 }
 0x2d9   :  { %v11531_v33 = vpop.f32.mrb[97].mxu0 }
 0x2da   :  { %v11532_v39 = vadd.f32 %v11531_v33, %v11530_v40  ;;  %v11533_v19 = vpop.f32.mrb[98].mxu0  ;;  %v3220_v23 = vpop.f32.mrb[20].mxu1 }
 0x2db   :  { %v11534_v11 = vpop.f32.mrb[99].mxu0  ;;  %v12514_v27 = vpop.f32.mrb[21].mxu1 }
 0x2dc   :  { %v11535_v51 = vadd.f32 %v11534_v11, %v11533_v19  ;;  %v3223_v25 = vpop.f32.mrb[22].mxu1  ;;  %v15471_v1 = vadd.f32 %v11532_v39, %v15364_v0 }
 0x2dd   :  { %v12515_v20 = vpop.f32.mrb[23].mxu1 }
 0x2de   :  { %v15475_v56 = vadd.f32 %v11535_v51, %v15366_v49  ;;  %v18648_v51 = vld [vmem:[#allocation8_spill] sm:$0xff] }
 0x2e0   :  { %v11565_v17 = vpop.f32.mrb[100].mxu0 }
 0x2e1   :  { %v11566_v26 = vpop.f32.mrb[101].mxu0 }
 0x2e2   :  { %v11567_v32 = vadd.f32 %v11566_v26, %v11565_v17  ;;  %v11568_v46 = vpop.f32.mrb[102].mxu0  ;;  %v3228_v28 = vpop.f32.mrb[24].mxu1  ;;  %v63_v17 = vld [vmem:[%s18558_s0 + $0x18] sm:$0xff] }
 0x2e3   :  { %v11569_v61 = vpop.f32.mrb[103].mxu0  ;;  %v12518_v2 = vpop.f32.mrb[25].mxu1 }
 0x2e4   :  { %v12995_v16 = vadd.f32 %v15368_v63, %v11567_v32  ;;  %v11570_v0 = vadd.f32 %v11569_v61, %v11568_v46  ;;  %v3231_v35 = vpop.f32.mrb[26].mxu1 }
 0x2e5   :  { %v12519_v60 = vpop.f32.mrb[27].mxu1 }
 0x2e6   :  { %v12996_v21 = vadd.f32 %v12995_v16, %v3220_v23  ;;  %v12998_v29 = vadd.f32 %v15370_v6, %v11570_v0  ;;  %v64_v0 = vld [vmem:[%s18558_s0 + $0x20] sm:$0xff] }
 0x2e8   :  { %v12999_v24 = vadd.f32 %v12998_v29, %v3223_v25  ;;  %v11571_v54 = vpop.f32.mrb[104].mxu0  ;;  %v3269_v63 = vmax.f32 %v12996_v21, 0.0 }
 0x2e9   :  { %v11572_v49 = vpop.f32.mrb[105].mxu0 }
 0x2ea   :  { %v11573_v13 = vadd.f32 %v11572_v49, %v11571_v54  ;;  %v11574_v53 = vpop.f32.mrb[106].mxu0  ;;  %v3236_v55 = vpop.f32.mrb[28].mxu1  ;;  %v3270_v4 = vmax.f32 %v12999_v24, 0.0  ;;  %v3279_v57 = vmul.f32 %v3269_v63, %v14686_v44 }
 0x2eb   :  { %v11575_v37 = vpop.f32.mrb[107].mxu0  ;;  %v12522_v18 = vpop.f32.mrb[29].mxu1 }
 0x2ec   :  { %v13001_v8 = vadd.f32 %v15394_v12, %v11573_v13  ;;  %v11576_v31 = vadd.f32 %v11575_v37, %v11574_v53  ;;  %v3239_v62 = vpop.f32.mrb[30].mxu1  ;;  %v3280_v6 = vmul.f32 %v3270_v4, %v14690_v36  ;;  %v60_v12 = vld [vmem:[%s18558_s0] sm:$0xff] }
 0x2ed   :  { %v12523_v14 = vpop.f32.mrb[31].mxu1  ;;  %v15496_v11 = vadd.f32 %v3279_v57, %v60_v12 }
 0x2ee   :  { %v13002_v34 = vadd.f32 %v13001_v8, %v3228_v28  ;;  %v13004_v48 = vadd.f32 %v15403_v15, %v11576_v31  ;;  %v62_v15 = vld [vmem:[%s18558_s0 + $0x10] sm:$0xff]  ;;  %v15493_v33 = vadd.f32 %v3280_v6, %v61_v58  ;;  %v65_v8 = vld [vmem:[%s18558_s0 + $0x28] sm:$0xff] }
 0x2ef   :  { %18646 = vst [vmem:[#allocation16_spill] sm:$0xff] %v15496_v11  ;;  %v3335_v61 = vmul.f32 %v15496_v11, %v15496_v11 }
 0x2f0   :  { %v3271_v38 = vmax.f32 %v13002_v34, 0.0  ;;  %v13005_v7 = vadd.f32 %v13004_v48, %v3231_v35  ;;  %v11577_v10 = vpop.f32.mrb[108].mxu0  ;;  %18645 = vst [vmem:[#allocation15_spill] sm:$0xff] %v15493_v33  ;;  %v3336_v32 = vmul.f32 %v15493_v33, %v15493_v33  ;;  %v3319_v21 = vadd.f32 %v15493_v33, %v15496_v11  ;;  %v18652_v48 = vld [vmem:[#allocation10_spill] sm:$0xff] }
 0x2f1   :  { %v11578_v22 = vpop.f32.mrb[109].mxu0 }
 0x2f2   :  { %v3281_v52 = vmul.f32 %v3271_v38, %v18644_v45  ;;  %v3272_v50 = vmax.f32 %v13005_v7, 0.0  ;;  %v11579_v3 = vadd.f32 %v11578_v22, %v11577_v10  ;;  %v11580_v40 = vpop.f32.mrb[110].mxu0  ;;  %v3244_v47 = vpop.f32.mrb[32].mxu1  ;;  %v3345_v13 = vadd.f32 %v3336_v32, %v3335_v61 }
 0x2f3   :  { %v11581_v41 = vpop.f32.mrb[111].mxu0  ;;  %v12526_v39 = vpop.f32.mrb[33].mxu1 }
 0x2f4   :  { %v13007_v19 = vadd.f32 %v15419_v43, %v11579_v3  ;;  %v11582_v23 = vadd.f32 %v11581_v41, %v11580_v40  ;;  %v3247_v59 = vpop.f32.mrb[34].mxu1  ;;  %v15498_v27 = vadd.f32 %v3281_v52, %v62_v15  ;;  %v3282_v25 = vmul.f32 %v3272_v50, %v18648_v51  ;;  %v66_v50 = vld [vmem:[%s18558_s0 + $0x30] sm:$0xff] }
 0x2f5   :  { %v12527_v20 = vpop.f32.mrb[35].mxu1 }
 0x2f6   :  { %18647 = vst [vmem:[#allocation17_spill] sm:$0xff] %v15498_v27  ;;  %v13008_v26 = vadd.f32 %v13007_v19, %v3236_v55  ;;  %v13010_v46 = vadd.f32 %v15429_v30, %v11582_v23  ;;  %v3337_v2 = vmul.f32 %v15498_v27, %v15498_v27  ;;  %v15511_v16 = vadd.f32 %v3282_v25, %v63_v17  ;;  %v18650_v30 = vld [vmem:[#allocation9_spill] sm:$0xff] }
 0x2f7   :  { %v3320_v37 = vadd.f32 %v3319_v21, %v15498_v27 }
 0x2f8   :  { %v3273_v43 = vmax.f32 %v13008_v26, 0.0  ;;  %v11583_v28 = vpop.f32.mrb[112].mxu0  ;;  %18649 = vst [vmem:[#allocation18_spill] sm:$0xff] %v15511_v16  ;;  %v13011_v35 = vadd.f32 %v13010_v46, %v3239_v62  ;;  %v3346_v14 = vadd.f32 %v3345_v13, %v3337_v2  ;;  %v3338_v34 = vmul.f32 %v15511_v16, %v15511_v16  ;;  %v18656_v26 = vld [vmem:[#allocation12_spill] sm:$0xff] }
 0x2f9   :  { %v11584_v60 = vpop.f32.mrb[113].mxu0  ;;  %v3321_v22 = vadd.f32 %v3320_v37, %v15511_v16 }
 0x2fa   :  { %v3283_v29 = vmul.f32 %v3273_v43, %v18650_v30  ;;  %v11585_v24 = vadd.f32 %v11584_v60, %v11583_v28  ;;  %v11586_v54 = vpop.f32.mrb[114].mxu0  ;;  %v3252_v49 = vpop.f32.mrb[36].mxu1  ;;  %v3274_v53 = vmax.f32 %v13011_v35, 0.0  ;;  %v3347_v52 = vadd.f32 %v3346_v14, %v3338_v34 }
 0x2fb   :  { %v11587_v55 = vpop.f32.mrb[115].mxu0  ;;  %v12530_v4 = vpop.f32.mrb[37].mxu1 }
 0x2fc   :  { %v15520_v18 = vadd.f32 %v3283_v29, %v64_v0  ;;  %v13013_v31 = vadd.f32 %v15445_v9, %v11585_v24  ;;  %v11588_v62 = vadd.f32 %v11587_v55, %v11586_v54  ;;  %v3255_v63 = vpop.f32.mrb[38].mxu1  ;;  %v3284_v6 = vmul.f32 %v3274_v53, %v18652_v48  ;;  %v68_v24 = vld [vmem:[%s18558_s0 + $0x40] sm:$0xff] }
 0x2fd   :  { %v12531_v58 = vpop.f32.mrb[39].mxu1  ;;  %v18658_v53 = vld [vmem:[#allocation13_spill] sm:$0xff] }
 0x2fe   :  { %18651 = vst [vmem:[#allocation19_spill] sm:$0xff] %v15520_v18  ;;  %v13014_v38 = vadd.f32 %v13013_v31, %v3244_v47  ;;  %v13016_v7 = vadd.f32 %v15455_v42, %v11588_v62  ;;  %v3339_v10 = vmul.f32 %v15520_v18, %v15520_v18  ;;  %v15532_v57 = vadd.f32 %v3284_v6, %v65_v8  ;;  %v18654_v47 = vld [vmem:[#allocation11_spill] sm:$0xff]  ;;  %v18660_v8 = vld [vmem:[#allocation14_spill] sm:$0xff] }
 0x2ff   :  { %v3322_v40 = vadd.f32 %v3321_v22, %v15520_v18 }
 0x300   :  { %18653 = vst [vmem:[#allocation20_spill] sm:$0xff] %v15532_v57  ;;  %v3275_v9 = vmax.f32 %v13014_v38, 0.0  ;;  %v13017_v12 = vadd.f32 %v13016_v7, %v3247_v59  ;;  %v11589_v15 = vpop.f32.mrb[116].mxu0  ;;  %v3348_v23 = vadd.f32 %v3347_v52, %v3339_v10  ;;  %v3340_v25 = vmul.f32 %v15532_v57, %v15532_v57  ;;  %v67_v59 = vld [vmem:[%s18558_s0 + $0x38] sm:$0xff] }
 0x301   :  { %v11590_v3 = vpop.f32.mrb[117].mxu0  ;;  %v3323_v28 = vadd.f32 %v3322_v40, %v15532_v57 }
 0x302   :  { %v3285_v42 = vmul.f32 %v3275_v9, %v18654_v47  ;;  %v3276_v41 = vmax.f32 %v13017_v12, 0.0  ;;  %v11591_v39 = vadd.f32 %v11590_v3, %v11589_v15  ;;  %v11592_v19 = vpop.f32.mrb[118].mxu0  ;;  %v3349_v60 = vadd.f32 %v3348_v23, %v3340_v25 }
 0x303   :  { %v11593_v20 = vpop.f32.mrb[119].mxu0 }
 0x304   :  { %v15545_v17 = vadd.f32 %v3285_v42, %v66_v50  ;;  %v3286_v32 = vmul.f32 %v3276_v41, %v18656_v26  ;;  %v13019_v46 = vadd.f32 %v15471_v1, %v11591_v39  ;;  %v11594_v43 = vadd.f32 %v11593_v20, %v11592_v19 }
 0x306   :  { %18655 = vst [vmem:[#allocation21_spill] sm:$0xff] %v15545_v17  ;;  %v3341_v61 = vmul.f32 %v15545_v17, %v15545_v17  ;;  %v15552_v2 = vadd.f32 %v3286_v32, %v67_v59  ;;  %v13020_v0 = vadd.f32 %v13019_v46, %v3252_v49  ;;  %v13022_v35 = vadd.f32 %v15475_v56, %v11594_v43  ;;  %v69_v56 = vld [vmem:[%s18558_s0 + $0x48] sm:$0xff] }
 0x307   :  { %v3324_v21 = vadd.f32 %v3323_v28, %v15545_v17 }
 0x308   :  { %18657 = vst [vmem:[#allocation22_spill] sm:$0xff] %v15552_v2  ;;  %v3277_v29 = vmax.f32 %v13020_v0, 0.0  ;;  %v13023_v1 = vadd.f32 %v13022_v35, %v3255_v63  ;;  %v3350_v54 = vadd.f32 %v3349_v60, %v3341_v61  ;;  %v3342_v13 = vmul.f32 %v15552_v2, %v15552_v2 }
 0x309   :  { %v3325_v49 = vadd.f32 %v3324_v21, %v15552_v2 }
 0x30a   :  { %v3287_v55 = vmul.f32 %v3277_v29, %v18658_v53  ;;  %v3278_v4 = vmax.f32 %v13023_v1, 0.0  ;;  %v3351_v62 = vadd.f32 %v3350_v54, %v3342_v13 }
 0x30c   :  { %v15563_v37 = vadd.f32 %v3287_v55, %v68_v24  ;;  %v3288_v31 = vmul.f32 %v3278_v4, %v18660_v8 }
 0x30e   :  { %18659 = vst [vmem:[#allocation23_spill] sm:$0xff] %v15563_v37  ;;  %v3326_v63 = vadd.f32 %v3325_v49, %v15563_v37  ;;  %v3343_v14 = vmul.f32 %v15563_v37, %v15563_v37  ;;  %v15572_v34 = vadd.f32 %v3288_v31, %v69_v56 }
 0x310   :  { %18661 = vst [vmem:[#allocation24_spill] sm:$0xff] %v15572_v34  ;;  %v3352_v6 = vadd.f32 %v3351_v62, %v3343_v14  ;;  %v3327_v58 = vadd.f32 %v3326_v63, %v15572_v34  ;;  %v3344_v38 = vmul.f32 %v15572_v34, %v15572_v34 }
 0x312   :  { %v3328_v7 = vrot.slane %v3327_v58, 4  ;;  %v3353_v10 = vadd.f32 %v3352_v6, %v3344_v38 }
 0x314   :  { %v3329_v22 = vadd.f32 %v3328_v7, %v3327_v58  ;;  %v3354_v9 = vrot.slane %v3353_v10, 4 }
 0x316   :  { %v3330_v12 = vrot.slane %v3329_v22, 2  ;;  %v3355_v15 = vadd.f32 %v3354_v9, %v3353_v10 }
 0x318   :  { %v3331_v52 = vadd.f32 %v3330_v12, %v3329_v22  ;;  %v3356_v50 = vrot.slane %v3355_v15, 2 }
 0x31a   :  { %v3332_v3 = vrot.slane %v3331_v52, 1  ;;  %v3357_v40 = vadd.f32 %v3356_v50, %v3355_v15 }
 0x31c   :  { %v3333_v42 = vadd.f32 %v3332_v3, %v3331_v52  ;;  %v3358_v41 = vrot.slane %v3357_v40, 1 }
 0x31e   :  { %v3334_v39 = vmul.f32 0.03125, %v3333_v42  ;;  %v3359_v19 = vadd.f32 %v3358_v41, %v3357_v40 }
 0x320   :  { %v3360_v23 = vmul.f32 0.03125, %v3359_v19  ;;  %v3361_v25 = vmul.f32 %v3334_v39, %v3334_v39  ;;  %v3364_v46 = vsub.f32 %v15496_v11, %v3334_v39  ;;  %v3365_v43 = vsub.f32 %v15493_v33, %v3334_v39 }
 0x321   :  { %v3366_v28 = vsub.f32 %v15498_v27, %v3334_v39  ;;  %v3367_v61 = vsub.f32 %v15511_v16, %v3334_v39  ;;  %v3368_v0 = vsub.f32 %v15520_v18, %v3334_v39  ;;  %v3369_v35 = vsub.f32 %v15532_v57, %v3334_v39 }
 0x322   :  { %v3362_v59 = vsub.f32 %v3360_v23, %v3361_v25  ;;  %v3370_v21 = vsub.f32 %v15545_v17, %v3334_v39  ;;  %v3371_v29 = vsub.f32 %v15552_v2, %v3334_v39  ;;  %v3372_v24 = vsub.f32 %v15563_v37, %v3334_v39 }
 0x323   :  { %v3373_v1 = vsub.f32 %v15572_v34, %v3334_v39 }
 0x324   :  { %v3363_v20 = vmax.f32 %v3362_v59, 0.0 }
 0x326   :  { %v3374_v32 = vadd.f32 1e-05, %v3363_v20 }
 0x328   :  { %13824 = vrsqrt.f32 %v3374_v32 }
 0x332   :  { %v13825_v60 = vpop.eup %13824 }
 0x333   :  { %v3376_v54 = vmul.f32 %v13825_v60, %v3364_v46  ;;  %v3377_v13 = vmul.f32 %v13825_v60, %v3365_v43  ;;  %v3378_v55 = vmul.f32 %v13825_v60, %v3366_v28  ;;  %v3379_v4 = vmul.f32 %v13825_v60, %v3367_v61 }
 0x334   :  { %v3380_v49 = vmul.f32 %v13825_v60, %v3368_v0  ;;  %v3381_v56 = vmul.f32 %v13825_v60, %v3369_v35  ;;  %v3382_v31 = vmul.f32 %v13825_v60, %v3370_v21  ;;  %v3383_v62 = vmul.f32 %v13825_v60, %v3371_v29 }
 0x335   :  { %v3384_v63 = vmul.f32 %v13825_v60, %v3372_v24  ;;  %v3385_v14 = vmul.f32 %v13825_v60, %v3373_v1  ;;  %v3386_v6 = vmul.f32 %v3376_v54, %v14686_v44  ;;  %v3387_v58 = vmul.f32 %v3377_v13, %v14690_v36 }
 0x336   :  { %v3388_v38 = vmul.f32 %v3378_v55, %v18644_v45  ;;  %v3389_v7 = vmul.f32 %v3379_v4, %v18648_v51  ;;  %v3390_v10 = vmul.f32 %v3380_v49, %v18650_v30  ;;  %v3391_v22 = vmul.f32 %v3381_v56, %v18652_v48 }
 0x337   :  { %v3392_v9 = vmul.f32 %v3382_v31, %v18654_v47  ;;  %v3393_v12 = vmul.f32 %v3383_v62, %v18656_v26  ;;  %v3394_v15 = vmul.f32 %v3384_v63, %v18658_v53  ;;  %v3395_v52 = vmul.f32 %v3385_v14, %v18660_v8 }
 0x338   :  { %v3396_v50 = vpack.c.bf16 %v3387_v58, %v3386_v6  ;;  %v3397_v3 = vpack.c.bf16 %v3389_v7, %v3388_v38  ;;  %v3398_v40 = vpack.c.bf16 %v3391_v22, %v3390_v10 }
 0x339   :  { %v3399_v42 = vpack.c.bf16 %v3393_v12, %v3392_v9  ;;  %v3400_v41 = vpack.c.bf16 %v3395_v52, %v3394_v15 }
 0x33a   :  { %v3406_v39 = vrot.slane %v3396_v50, 4  ;;  %v3407_v19 = vrot.slane %v3397_v3, 4  ;;  %v3409_v23 = vrot.slane %v3398_v40, 4 }
 0x33b   :  { %v3411_v25 = vrot.slane %v3399_v42, 4  ;;  %v3413_v59 = vrot.slane %v3400_v41, 4 }
 0x33c   :  { %v3408_v20 = vsel %vm38_vm1, %v3406_v39, %v3407_v19  ;;  %v3410_v32 = vsel %vm38_vm1, %v3407_v19, %v3409_v23  ;;  %3421 = vst [vmem:[#allocation2] sm:$0xf0] %v3406_v39 }
 0x33d   :  { %v15600_v46 = vsel %vm38_vm1, %v3409_v23, %v3411_v25  ;;  %3426 = vst [vmem:[#allocation2 + $0x28] sm:$0xf] %v3413_v59  ;;  %v15602_v43 = vrot.slane %v3408_v20, 1  ;;  %v3490_v28 = vrot.slane %v3410_v32, 1  ;;  %v15604_v61 = vshll.u32 %v3408_v20, 16 }
 0x33e   :  { %v15606_v0 = vshrl.u32 %v3408_v20, 16  ;;  %v15608_v35 = vshll.u32 %v3410_v32, 16  ;;  %v15612_v21 = vshrl.u32 %v3410_v32, 16  ;;  %v15615_v29 = vshll.u32 %v15600_v46, 16 }
 0x33f   :  { %v3491_v60 = vsel %vm151_vm2, %v15602_v43, %v3490_v28  ;;  %v18582_v24 = vrot.slane %v15600_v46, 1  ;;  %v15623_v13 = vrot.slane %v15604_v61, 1  ;;  %v15633_v31 = vshrl.u32 %v15600_v46, 16 }
 0x340   :  { %v15618_v1 = vshrl.u32 %v3491_v60, 16  ;;  %v15620_v54 = vshll.u32 %v3491_v60, 16  ;;  %v3453_v55 = vrot.slane %v15608_v35, 1  ;;  %v15636_v62 = vsel %vm38_vm1, %v3411_v25, %v3413_v59 }
 0x341   :  { %v3493_v4 = vsel %vm151_vm2, %v3490_v28, %v18582_v24  ;;  %v3449_v49 = vor.u32 %v15606_v0, %v15623_v13  ;;  %v3461_v58 = vrot.slane %v15615_v29, 1  ;;  %v3630_v59 = vrot.slane %v15606_v0, 3 }
 0x342   :  { %v3457_v56 = vor.u32 %v15612_v21, %v3453_v55  ;;  %v3662_v14 = vrot.slane %v15618_v1, 3  ;;  %v3665_v7 = vrot.slane %v15620_v54, 4  ;;  %v15644_v22 = vshrl.u32 %v3493_v4, 16 }
 0x343   :  { %v3549_v63 = vld [vmem:[#allocation2] sm:$0xf0]  ;;  %v15642_v10 = vsel %vm98_vm3, %v3449_v49, %v3453_v55  ;;  %v15649_v52 = vshll.u32 %v3493_v4, 16  ;;  %v3631_v20 = vrot.slane %v15604_v61, 4  ;;  %v15684_v34 = vrot.slane %v15636_v62, 1 }
 0x344   :  { %v3547_v6 = vld [vmem:[#allocation2] sm:$0xf8]  ;;  %v3569_v38 = vrot.slane %v3549_v63, 1  ;;  %v3552_v9 = vshrl.u32 %v3549_v63, 16  ;;  %v3554_v12 = vshll.u32 %v3549_v63, 16  ;;  %v15647_v15 = vshrl.u32 %v15642_v10, 16 }
 0x345   :  { %v3623_v3 = vshrl.u32 %v3547_v6, 16  ;;  %v3626_v40 = vshll.u32 %v3547_v6, 16  ;;  %v15654_v42 = vsel %vm98_vm3, %v3457_v56, %v3461_v58  ;;  %v15657_v23 = vshll.u32 %v15642_v10, 16 }
 0x346   :  { %v3570_v50 = vsel %vm151_vm2, %v3569_v38, %v15602_v43  ;;  %v3556_v19 = vrot.slane %v3554_v12, 1  ;;  %v3666_v25 = vor.u32 %v3665_v7, %v3662_v14  ;;  %v15662_v32 = vshrl.u32 %v15654_v42, 16 }
 0x347   :  { %v3652_v41 = vshrl.u32 %v3570_v50, 16  ;;  %v3655_v39 = vshll.u32 %v3570_v50, 16  ;;  %v15665_v4 = vshll.u32 %v15654_v42, 16  ;;  %v3645_v49 = vrot.slane %v15647_v15, 3 }
 0x348   :  { %v3557_v55 = vor.u32 %v3556_v19, %v3552_v9  ;;  %v3625_v56 = vrot.slane %v3623_v3, 3  ;;  %v3628_v63 = vrot.slane %v3626_v40, 4  ;;  %v3684_v6 = vrot.slane %v15644_v22, 3  ;;  %v13560_v9 = vld [vmem:[%s18559_s1 + $0x500] sm:$0xff]  }
 0x349   :  { %v3654_v28 = vrot.slane %v3652_v41, 3  ;;  %v3657_v60 = vrot.slane %v3655_v39, 4  ;;  %v3648_v7 = vrot.slane %v15657_v23, 4  ;;  %v3687_v12 = vrot.slane %v15649_v52, 4 }
 0x34a   :  { %v3558_v38 = vsel %vm98_vm3, %v3557_v55, %v15623_v13  ;;  %v3675_v39 = vrot.slane %v15662_v32, 3  ;;  %v3678_v3 = vrot.slane %v15665_v4, 4  ;;  %v3465_v19 = vor.u32 %v15633_v31, %v3461_v58  ;;  %v13563_v58 = vld [vmem:[%s18559_s1 + $0x508] sm:$0xff]  }
 0x34b   :  { %v3658_v14 = vor.u32 %v3657_v60, %v3654_v28  ;;  %v3635_v50 = vshrl.u32 %v3558_v38, 16  ;;  %v3638_v41 = vshll.u32 %v3558_v38, 16  ;;  %v15681_v28 = vshll.u32 %v15636_v62, 16 }
 0x34c   :  { %v3629_v24 = vor.u32 %v3628_v63, %v3625_v56  ;;  %v15686_v37 = vor.u32 %v3631_v20, %v3630_v59  ;;  %v15690_v38 = vor.u32 %v3687_v12, %v3684_v6  ;;  %v15696_v56 = vor.u32 %v3678_v3, %v3675_v39  ;;  %v15703_v63 = vld [vmem:[#allocation2 + $0x28] sm:$0xf]  ;;  %v13559_v6 = vld [vmem:[%s18559_s1 + $0x480] sm:$0xff]  }
 0x34d   :  { %v3667_v40 = vsel %vm286_vm4, %v3658_v14, %v3666_v25  ;;  %v3637_v60 = vrot.slane %v3635_v50, 3  ;;  %v3640_v55 = vrot.slane %v3638_v41, 4  ;;  %v3469_v14 = vrot.slane %v15681_v28, 1  ;;  %v3550_v39 = vld [vmem:[#allocation2 + $0x28] sm:$0x1f] }
 0x34e   :  { %12549 = vmatmul.mubr.bf16.vlgmr.msra.gmra.mrb[40].mxu1 %v3667_v40  ;;  %v3649_v41 = vor.u32 %v3648_v7, %v3645_v49  ;;  %v18662_v59 = vrot.slane %v15600_v46, 1  ;;  %v3668_v12 = vrot.slane %v15612_v21, 3  ;;  %v3633_v3 = vsel %vm286_vm4, %v3629_v24, %v15686_v37  ;;  %v13561_v40 = vld [vmem:[%s18559_s1 + $0x4c8] sm:$0xff]   ;;  %v13566_v24 = vld [vmem:[%s18559_s1 + $0x510] sm:$0xff]  }
 0x34f   :  { %12552 = vmatprep.mubr.msk.bf16.mxu1 %vm13859_vm0, %v18641_v5  ;;  %12569 = vmatpush3.bf16.msra.mxu1 %v13560_v9  ;;  %v3641_v50 = vor.u32 %v3640_v55, %v3637_v60  ;;  %v15710_v9 = vsel %vm98_vm3, %v3465_v19, %v3469_v14  ;;  %v3689_v55 = vsel %vm286_vm4, %v3666_v25, %v15690_v38  ;;  %v18663_v17 = vshll.u32 %v15703_v63, 16 }
 0x350   :  { %12570 = vmatprep.subr.bf16.mxu1 %v18641_v5  ;;  %v3495_v20 = vsel %vm151_vm2, %v18662_v59, %v15684_v34  ;;  %v15723_v60 = vshrl.u32 %v15710_v9, 16  ;;  %v15726_v19 = vshll.u32 %v15710_v9, 16  ;;  %v3669_v59 = vrot.slane %v15608_v35, 4 }
 0x351   :  { %v15712_v49 = vshrl.u32 %v3495_v20, 16  ;;  %v15714_v7 = vshll.u32 %v3495_v20, 16  ;;  %v3650_v46 = vsel %vm286_vm4, %v3641_v50, %v3649_v41  ;;  %v15735_v50 = vshrl.u32 %v15636_v62, 16  ;;  %v13562_v62 = vld [vmem:[%s18559_s1 + $0x488] sm:$0xff]  }
 0x352   :  { %3947 = vmatprep.mubr.bf16.mxu0 %v3650_v46  ;;  %v3680_v2 = vsel %vm286_vm4, %v3649_v41, %v15696_v56  ;;  %v3697_v46 = vrot.slane %v15723_v60, 3  ;;  %v3700_v25 = vrot.slane %v15726_v19, 4  ;;  %v3562_v57 = vrot.slane %v18663_v17, 1  ;;  %v13569_v17 = vld [vmem:[%s18559_s1 + $0x518] sm:$0xff]  }
 0x353   :  { %12571 = vmatpush3.bf16.msra.mxu1 %v13563_v58  ;;  %3948 = vmatmul.mubr.bf16.vlgmr.msra.gmra.mrb[120].mxu0 %v3633_v3  ;;  %v15743_v58 = vrot.slane %v3550_v39, 1  ;;  %v3706_v20 = vrot.slane %v15712_v49, 3  ;;  %v3709_v3 = vrot.slane %v15714_v7, 4  ;;  %v15751_v41 = vor.u32 %v15735_v50, %v3469_v14 }
 0x354   :  { %12572 = vmatprep.subr.bf16.mxu1 %v18641_v5  ;;  %3955 = vmatprep.mubr.bf16.mxu0 %v3680_v2  ;;  %v13564_v2 = vld [vmem:[%s18559_s1 + $0x4d0] sm:$0xff]   ;;  %v15761_v39 = vor.u32 %v3669_v59, %v3668_v12  ;;  %v3564_v27 = vshrl.u32 %v15703_v63, 16 }
 0x355   :  { %11668 = vmatpush3.bf16.msra.mxu0 %v13559_v6  ;;  %v3572_v6 = vsel %vm151_vm2, %v15684_v34, %v15743_v58  ;;  %v3563_v14 = vsel %vm98_vm3, %v15751_v41, %v3562_v57  ;;  %v15773_v12 = vor.u32 %v3709_v3, %v3706_v20  ;;  %v13565_v59 = vld [vmem:[%s18559_s1 + $0x490] sm:$0xff]   ;;  %v13571_v3 = vld [vmem:[%s18559_s1 + $0x520] sm:$0xff]  }
 0x356   :  { %12553 = vmatmul.mubr.bf16.gmra.mrb[44].mxu1 %v3689_v55  ;;  %11669 = vmatprep.subr.bf16.mxu0 %v13561_v40  ;;  %v15770_v40 = vor.u32 %v3700_v25, %v3697_v46  ;;  %v3717_v55 = vshrl.u32 %v3563_v14, 16  ;;  %v3720_v18 = vshll.u32 %v3563_v14, 16  ;;  %v3729_v16 = vshll.u32 %v3572_v6, 16  ;;  %v13567_v46 = vld [vmem:[%s18559_s1 + $0x4d8] sm:$0xff]  }
 0x357   :  { %12556 = vmatprep.mubr.msk.bf16.mxu1 %vm13859_vm0, %v18641_v5  ;;  %12573 = vmatpush3.bf16.msra.mxu1 %v13566_v24  ;;  %v3726_v24 = vshrl.u32 %v3572_v6, 16  ;;  %v3690_v25 = vrot.slane %v15633_v31, 3  ;;  %v3691_v14 = vrot.slane %v15615_v29, 4  ;;  %v3671_v20 = vsel %vm286_vm4, %v15686_v37, %v15761_v39 }
 0x358   :  { %12574 = vmatprep.subr.bf16.mxu1 %v18641_v5  ;;  %v3566_v6 = vor.u32 %v3564_v27, %v3562_v57  ;;  %v3719_v11 = vrot.slane %v3717_v55, 3  ;;  %v3722_v33 = vrot.slane %v3720_v18, 4  ;;  %v3711_v37 = vsel %vm286_vm4, %v15690_v38, %v15773_v12  ;;  %v13570_v18 = vld [vmem:[%s18559_s1 + $0x4e0] sm:$0xff]  }
 0x359   :  { %11670 = vmatpush3.bf16.msra.mxu0 %v13562_v62  ;;  %v3433_v62 = vld [vmem:[#allocation2] sm:$0xfe]  ;;  %v3728_v57 = vrot.slane %v3726_v24, 3  ;;  %v3748_v55 = vshrl.u32 %v15743_v58, 16 }
 0x35a   :  { %11671 = vmatprep.subr.bf16.mxu0 %v13564_v2  ;;  %v3702_v2 = vsel %vm286_vm4, %v15696_v56, %v15770_v40  ;;  %v3438_v8 = vshll.u32 %v3433_v62, 16  ;;  %v3692_v56 = vor.u32 %v3691_v14, %v3690_v25  ;;  %v3739_v38 = vshrl.u32 %v3566_v6, 16 }
 0x35b   :  { %12575 = vmatpush3.bf16.msra.mxu1 %v13569_v17  ;;  %3956 = vmatmul.mubr.bf16.gmra.mrb[124].mxu0 %v3671_v20  ;;  %v13568_v17 = vld [vmem:[%s18559_s1 + $0x498] sm:$0xff]   ;;  %v3731_v20 = vrot.slane %v3729_v16, 4  ;;  %v13573_v16 = vld [vmem:[%s18559_s1 + $0x528] sm:$0xff]   ;;  %v3436_v24 = vshrl.u32 %v3433_v62, 16  ;;  %v3723_v25 = vor.u32 %v3722_v33, %v3719_v11  ;;  %v3712_v14 = vrot.slane %v15735_v50, 3 }
 0x35c   :  { %12576 = vmatprep.subr.bf16.mxu1 %v18641_v5  ;;  %3963 = vmatprep.mubr.bf16.mxu0 %v3702_v2  ;;  %v3751_v2 = vshll.u32 %v15743_v58, 16  ;;  %v3487_v26 = vrot.slane %v3433_v62, 1  ;;  %v3750_v33 = vrot.slane %v3748_v55, 3  ;;  %v3741_v47 = vrot.slane %v3739_v38, 3 }
 0x35d   :  { %11672 = vmatpush3.bf16.msra.mxu0 %v13565_v59  ;;  %v3742_v59 = vshll.u32 %v3566_v6, 16  ;;  %v3732_v58 = vor.u32 %v3731_v20, %v3728_v57  ;;  %v3693_v6 = vsel %vm286_vm4, %v15761_v39, %v3692_v56  ;;  %v13576_v57 = vld [vmem:[%s18559_s1 + $0x530] sm:$0xff]   ;;  %v3427_v20 = vld [vmem:[#allocation2] sm:$0xff] }
 0x35e   :  { %12557 = vmatmul.mubr.bf16.gmra.mrb[48].mxu1 %v3711_v37  ;;  %11673 = vmatprep.subr.bf16.mxu0 %v13567_v46  ;;  %v3440_v46 = vrot.slane %v3438_v8, 1  ;;  %v3713_v37 = vrot.slane %v15681_v28, 4  ;;  %v13574_v8 = vld [vmem:[%s18559_s1 + $0x4e8] sm:$0xff]   ;;  %v3753_v11 = vrot.slane %v3751_v2, 4 }
 0x35f   :  { %12560 = vmatprep.mubr.msk.bf16.mxu1 %vm13859_vm0, %v18641_v5  ;;  %12577 = vmatpush3.bf16.msra.mxu1 %v13571_v3  ;;  %v13572_v3 = vld [vmem:[%s18559_s1 + $0x4a0] sm:$0xff]   ;;  %v3733_v39 = vsel %vm286_vm4, %v15773_v12, %v3732_v58  ;;  %v13575_v2 = vld [vmem:[%s18559_s1 + $0x4a8] sm:$0xff]  }
 0x360   :  { %12578 = vmatprep.subr.bf16.mxu1 %v18641_v5  ;;  %v3441_v53 = vor.u32 %v3440_v46, %v3436_v24  ;;  %v15828_v55 = vor.u32 %v3713_v37, %v3712_v14  ;;  %v13577_v24 = vld [vmem:[%s18559_s1 + $0x4f0] sm:$0xff]   ;;  %v4064_v46 = vshll.u32 %v3427_v20, 16  ;;  %v4434_v37 = vld [vmem:[#allocation2] sm:$0x80] }
 0x361   :  { %11674 = vmatpush3.bf16.msra.mxu0 %v13568_v17  ;;  %v3744_v17 = vrot.slane %v3742_v59, 4  ;;  %v3754_v59 = vor.u32 %v3753_v11, %v3750_v33  ;;  %v4085_v33 = vrot.slane %v15620_v54, 1 }
 0x362   :  { %11675 = vmatprep.subr.bf16.mxu0 %v13570_v18  ;;  %v3446_v62 = vsel %vm98_vm3, %v3441_v53, %v15623_v13  ;;  %v3724_v18 = vsel %vm286_vm4, %v15770_v40, %v3723_v25  ;;  %v18664_v53 = vshll.u32 %v15703_v63, 16  ;;  %v3489_v40 = vsel %vm151_vm2, %v3487_v26, %v15602_v43 }
 0x363   :  { %12579 = vmatpush3.bf16.msra.mxu1 %v13573_v16  ;;  %3964 = vmatmul.mubr.bf16.gmra.mrb[128].mxu0 %v3693_v6  ;;  %v3734_v16 = vrot.slane %v3564_v27, 3  ;;  %v4072_v12 = vshll.u32 %v3446_v62, 16  ;;  %v3745_v14 = vor.u32 %v3744_v17, %v3741_v47  ;;  %v13579_v27 = vld [vmem:[%s18559_s1 + $0x538] sm:$0xff]   ;;  %v4076_v26 = vrot.slane %v15657_v23, 1  ;;  %v13578_v47 = vld [vmem:[%s18559_s1 + $0x4b0] sm:$0xff]  }
 0x364   :  { %12580 = vmatprep.subr.bf16.mxu1 %v18641_v5  ;;  %3971 = vmatprep.mubr.bf16.mxu0 %v3724_v18  ;;  %v3735_v38 = vrot.slane %v18664_v53, 4  ;;  %v4081_v63 = vshll.u32 %v3489_v40, 16  ;;  %v3755_v11 = vsel %vm286_vm4, %v3732_v58, %v3754_v59  ;;  %v13580_v17 = vld [vmem:[%s18559_s1 + $0x4f8] sm:$0xff]   ;;  %v4066_v18 = vrot.slane %v4064_v46, 1 }
 0x365   :  { %11676 = vmatpush3.bf16.msra.mxu0 %v13572_v3  ;;  %v3715_v3 = vsel %vm286_vm4, %v3692_v56, %v15828_v55  ;;  %v4074_v6 = vrot.slane %v4072_v12, 1  ;;  %v3746_v56 = vsel %vm286_vm4, %v3723_v25, %v3745_v14  ;;  %v4439_v53 = vshll.u32 %v4434_v37, 16  ;;  %v13581_v25 = vld [vmem:[%s18559_s1 + $0x4b8] sm:$0xff]   ;;  %v13582_v14 = vld [vmem:[%s18559_s1 + $0x640] sm:$0xff]  }
 0x366   :  { %12561 = vmatmul.mubr.bf16.gmra.mrb[52].mxu1 %v3733_v39  ;;  %11677 = vmatprep.subr.bf16.mxu0 %v13574_v8  ;;  %v3736_v8 = vor.u32 %v3735_v38, %v3734_v16  ;;  %v4079_v39 = vshrl.u32 %v3489_v40, 16  ;;  %v4070_v16 = vshrl.u32 %v3446_v62, 16  ;;  %v4083_v38 = vrot.slane %v4081_v63, 1 }
 0x367   :  { %12564 = vmatprep.mubr.msk.bf16.mxu1 %vm13859_vm0, %v18641_v5  ;;  %12581 = vmatpush3.bf16.msra.mxu1 %v13576_v57  ;;  %v4062_v57 = vshrl.u32 %v3427_v20, 16  ;;  %v4088_v58 = vrot.slane %v15665_v4, 1  ;;  %v4527_v59 = vrot.slane %v15647_v15, 6  ;;  %v4437_v20 = vshrl.u32 %v4434_v37, 16 }
 0x368   :  { %12582 = vmatprep.subr.bf16.mxu1 %v18641_v5  ;;  %v4441_v40 = vrot.slane %v4439_v53, 1  ;;  %v4454_v12 = vrot.slane %v4434_v37, 1  ;;  %v4075_v62 = vor.u32 %v4074_v6, %v4070_v16  ;;  %v13584_v16 = vld [vmem:[%s18559_s1 + $0x680] sm:$0xff]  }
 0x369   :  { %11678 = vmatpush3.bf16.msra.mxu0 %v13575_v2  ;;  %v4087_v2 = vor.u32 %v4076_v26, %v15647_v15  ;;  %v4067_v46 = vor.u32 %v4066_v18, %v4062_v57  ;;  %v4090_v15 = vor.u32 %v4085_v33, %v15618_v1 }
 0x36a   :  { %11679 = vmatprep.subr.bf16.mxu0 %v13577_v24  ;;  %v4528_v24 = vrot.slane %v15657_v23, 7  ;;  %v4442_v63 = vor.u32 %v4441_v40, %v4437_v20  ;;  %v4455_v37 = vsel %vm151_vm2, %v4454_v12, %v15602_v43  ;;  %v4077_v53 = vsel %vm98_vm3, %v4075_v62, %v4076_v26 }
 0x36b   :  { %12583 = vmatpush3.bf16.msra.mxu1 %v13579_v27  ;;  %3972 = vmatmul.mubr.bf16.gmra.mrb[132].mxu0 %v3715_v3  ;;  %v4539_v27 = vrot.slane %v15618_v1, 6  ;;  %v4540_v3 = vrot.slane %v15620_v54, 7  ;;  %v4091_v1 = vrot.slane %v15649_v52, 1  ;;  %v4532_v6 = vshrl.u32 %v4455_v37, 16  ;;  %v13587_v54 = vld [vmem:[%s18559_s1 + $0x688] sm:$0xff]  }
 0x36c   :  { %12604 = vmatprep.subr.bf16.mxu1 %v18641_v5  ;;  %3979 = vmatprep.mubr.bf16.mxu0 %v3746_v56  ;;  %v4529_v23 = vor.u32 %v4528_v24, %v4527_v59  ;;  %v4443_v57 = vsel %vm98_vm3, %v4442_v63, %v15623_v13  ;;  %v4535_v18 = vshll.u32 %v4455_v37, 16  ;;  %v4515_v59 = vrot.slane %v15606_v0, 6  ;;  %v15912_v0 = vld [vmem:[#allocation2 + $0x28] sm:$0x3] }
 0x36d   :  { %11680 = vmatpush3.bf16.msra.mxu0 %v13578_v47  ;;  %v3737_v47 = vsel %vm286_vm4, %v15828_v55, %v3736_v8  ;;  %v4541_v43 = vor.u32 %v4540_v3, %v4539_v27  ;;  %v15894_v55 = vsel %vm98_vm3, %v4090_v15, %v4091_v1  ;;  %v4520_v8 = vshrl.u32 %v4443_v57, 16 }
 0x36e   :  { %12565 = vmatmul.mubr.bf16.gmra.mrb[56].mxu1 %v3755_v11  ;;  %11681 = vmatprep.subr.bf16.mxu0 %v13580_v17  ;;  %v15886_v11 = vsel %vm98_vm3, %v4087_v2, %v4088_v58  ;;  %v4084_v17 = vor.u32 %v4083_v38, %v4079_v39  ;;  %v4523_v56 = vshll.u32 %v4443_v57, 16  ;;  %v4534_v2 = vrot.slane %v4532_v6, 6  ;;  %v15934_v57 = vld [vmem:[#allocation2 + $0x28] sm:$0x7f] }
 0x36f   :  { %12584 = vmatprep.mubr.msk.bf16.mxu1 %vm13859_vm0, %v18641_v5  ;;  %v4068_v39 = vsel %vm98_vm3, %v4067_v46, %v15623_v13  ;;  %v4537_v38 = vrot.slane %v4535_v18, 7  ;;  %v4522_v20 = vrot.slane %v4520_v8, 6  ;;  %v4516_v24 = vrot.slane %v15604_v61, 7  ;;  %v4435_v18 = vld [vmem:[#allocation2 + $0x28] sm:$0xff]  ;;  %v13583_v8 = vld [vmem:[%s18559_s1 + $0x600] sm:$0xff]  }
 0x370   :  { %v4525_v40 = vrot.slane %v4523_v56, 7  ;;  %v4547_v12 = vrot.slane %v15662_v32, 6  ;;  %v4086_v13 = vsel %vm98_vm3, %v4084_v17, %v4085_v33  ;;  %v4548_v62 = vrot.slane %v15665_v4, 7 }
 0x371   :  { %11682 = vmatpush3.bf16.msra.mxu0 %v13581_v25  ;;  %v15903_v25 = vld [vmem:[#allocation2 + $0x28] sm:$0x1]  ;;  %v4538_v26 = vor.u32 %v4537_v38, %v4534_v2  ;;  %v4551_v46 = vrot.slane %v15644_v22, 6  ;;  %v15914_v15 = vor.u32 %v4516_v24, %v4515_v59  ;;  %v4552_v61 = vrot.slane %v15649_v52, 7 }
 0x372   :  { %11726 = vmatprep.subr.bf16.mxu0 %v13582_v14  ;;  %v4526_v14 = vor.u32 %v4525_v40, %v4522_v20  ;;  %v4543_v27 = vrot.slane %v15612_v21, 6  ;;  %v3475_v33 = vshll.u32 %v15903_v25, 16  ;;  %v4549_v37 = vor.u32 %v4548_v62, %v4547_v12 }
 0x373   :  { %3980 = vmatmul.mubr.bf16.gmra.mrb[136].mxu0 %v3737_v47  ;;  %v15925_v63 = vsel %vm1172_vm5, %v4538_v26, %v4541_v43  ;;  %v4544_v3 = vrot.slane %v15608_v35, 7  ;;  %v4553_v47 = vor.u32 %v4552_v61, %v4551_v46  ;;  %v4559_v6 = vrot.slane %v15723_v60, 6 }
 0x374   :  { %4318 = vmatprep.mubr.bf16.mxu0 %v4077_v53  ;;  %v15930_v21 = vsel %vm1172_vm5, %v4526_v14, %v4529_v23  ;;  %v4560_v17 = vrot.slane %v15726_v19, 7  ;;  %v3496_v56 = vrot.slane %v15912_v0, 1  ;;  %v15941_v35 = vsel %vm1172_vm5, %v4529_v23, %v4549_v37  ;;  %v13590_v23 = vld [vmem:[%s18559_s1 + $0x690] sm:$0xff]   ;;  %v13604_v0 = vld [vmem:[%s18559_s1 + $0x678] sm:$0xff]  }
 0x375   :  { %v4545_v2 = vor.u32 %v4544_v3, %v4543_v27  ;;  %v4563_v53 = vrot.slane %v15712_v49, 6  ;;  %v15948_v38 = vsel %vm1172_vm5, %v4541_v43, %v4553_v47  ;;  %v4564_v20 = vrot.slane %v15714_v7, 7 }
 0x376   :  { %12585 = vmatmul.mubr.bf16.vlgmr.msra.gmra.mrb[40].mxu1 %v4086_v13  ;;  %v15950_v59 = vor.u32 %v4560_v17, %v4559_v6  ;;  %v4555_v40 = vrot.slane %v15633_v31, 6  ;;  %v4556_v12 = vrot.slane %v15615_v29, 7  ;;  %v4445_v43 = vshll.u32 %v15934_v57, 16  ;;  %v13586_v29 = vld [vmem:[%s18559_s1 + $0x608] sm:$0xff]  }
 0x377   :  { %12588 = vmatprep.mubr.msk.bf16.mxu1 %vm13859_vm0, %v18641_v5  ;;  %12605 = vmatpush3.bf16.msra.mxu1 %v13584_v16  ;;  %v13585_v16 = vld [vmem:[%s18559_s1 + $0x648] sm:$0xff]   ;;  %v15959_v24 = vsel %vm1172_vm5, %v15914_v15, %v4545_v2  ;;  %v15963_v13 = vrot.slane %v4435_v18, 1  ;;  %v4565_v26 = vor.u32 %v4564_v20, %v4563_v53  ;;  %v4567_v62 = vrot.slane %v15735_v50, 6  ;;  %v13595_v20 = vld [vmem:[%s18559_s1 + $0x6a0] sm:$0xff]  }
 0x378   :  { %12606 = vmatprep.subr.bf16.mxu1 %v18641_v5  ;;  %v15968_v31 = vsel %vm1172_vm5, %v4549_v37, %v15950_v59  ;;  %v4568_v46 = vrot.slane %v15681_v28, 7  ;;  %v3477_v14 = vrot.slane %v3475_v33, 1  ;;  %v15978_v61 = vrot.slane %v4445_v43, 1  ;;  %v13588_v28 = vld [vmem:[%s18559_s1 + $0x650] sm:$0xff]  }
 0x379   :  { %v4457_v27 = vsel %vm151_vm2, %v15684_v34, %v15963_v13  ;;  %v15988_v50 = vsel %vm1172_vm5, %v4553_v47, %v4565_v26  ;;  %v4093_v37 = vor.u32 %v4088_v58, %v15662_v32  ;;  %v4094_v17 = vrot.slane %v15726_v19, 1  ;;  %v13591_v19 = vld [vmem:[%s18559_s1 + $0x658] sm:$0xff]  }
 0x37a   :  { %v15990_v33 = vor.u32 %v4568_v46, %v4567_v62  ;;  %v4448_v47 = vsel %vm98_vm3, %v15751_v41, %v15978_v61  ;;  %v4096_v18 = vor.u32 %v4091_v1, %v15644_v22  ;;  %v3497_v22 = vsel %vm151_vm2, %v15684_v34, %v3496_v56  ;;  %v13594_v46 = vld [vmem:[%s18559_s1 + $0x660] sm:$0xff]  }
 0x37b   :  { %12607 = vmatpush3.bf16.msra.mxu1 %v13587_v54  ;;  %4319 = vmatmul.mubr.bf16.vlgmr.msra.gmra.mrb[140].mxu0 %v4068_v39  ;;  %v4557_v39 = vor.u32 %v4556_v12, %v4555_v40  ;;  %v4584_v54 = vshll.u32 %v4457_v27, 16  ;;  %v4572_v6 = vshrl.u32 %v4448_v47, 16  ;;  %v4575_v4 = vshll.u32 %v4448_v47, 16 }
 0x37c   :  { %12608 = vmatprep.subr.bf16.mxu1 %v18641_v5  ;;  %4326 = vmatprep.mubr.bf16.mxu0 %v15886_v11  ;;  %v4581_v11 = vshrl.u32 %v4457_v27, 16  ;;  %v4095_v40 = vsel %vm98_vm3, %v4093_v37, %v4094_v17  ;;  %v4107_v62 = vshll.u32 %v3497_v22, 16  ;;  %v13596_v27 = vld [vmem:[%s18559_s1 + $0x620] sm:$0xff]   ;;  %v13600_v37 = vld [vmem:[%s18559_s1 + $0x6b0] sm:$0xff]  }
 0x37d   :  { %11727 = vmatpush3.bf16.msra.mxu0 %v13583_v8  ;;  %v16001_v3 = vsel %vm1172_vm5, %v4545_v2, %v4557_v39  ;;  %v4586_v58 = vrot.slane %v4584_v54, 7  ;;  %v13589_v8 = vld [vmem:[%s18559_s1 + $0x610] sm:$0xff]   ;;  %v16016_v2 = vsel %vm98_vm3, %v15751_v41, %v3477_v14  ;;  %v16020_v53 = vsel %vm1172_vm5, %v4557_v39, %v15990_v33 }
 0x37e   :  { %12589 = vmatmul.mubr.bf16.gmra.mrb[44].mxu1 %v15894_v55  ;;  %11728 = vmatprep.subr.bf16.mxu0 %v13585_v16  ;;  %v13593_v55 = vld [vmem:[%s18559_s1 + $0x698] sm:$0xff]   ;;  %v4583_v32 = vrot.slane %v4581_v11, 6  ;;  %v4574_v52 = vrot.slane %v4572_v6, 6  ;;  %v4577_v1 = vrot.slane %v4575_v4, 7  ;;  %v4097_v41 = vrot.slane %v15714_v7, 1  ;;  %v13598_v11 = vld [vmem:[%s18559_s1 + $0x668] sm:$0xff]  }
 0x37f   :  { %12592 = vmatprep.mubr.msk.bf16.mxu1 %vm13859_vm0, %v18641_v5  ;;  %12609 = vmatpush3.bf16.msra.mxu1 %v13590_v23  ;;  %v4101_v23 = vshll.u32 %v16016_v2, 16  ;;  %v4109_v39 = vrot.slane %v4107_v62, 1  ;;  %v4119_v6 = vshrl.u32 %v3497_v22, 16  ;;  %v4123_v4 = vshll.u32 %v3496_v56, 16  ;;  %v4432_v22 = vld [vmem:[#allocation2] sm:$0xc0] }
 0x380   :  { %12610 = vmatprep.subr.bf16.mxu1 %v18641_v5  ;;  %v16029_v16 = vor.u32 %v4586_v58, %v4583_v32  ;;  %v16039_v34 = vor.u32 %v4577_v1, %v4574_v52  ;;  %v4098_v7 = vsel %vm98_vm3, %v4096_v18, %v4097_v41  ;;  %v4105_v54 = vor.u32 %v4097_v41, %v15712_v49  ;;  %v13603_v32 = vld [vmem:[%s18559_s1 + $0x6b8] sm:$0xff]   ;;  %v13602_v18 = vld [vmem:[%s18559_s1 + $0x630] sm:$0xff]  }
 0x381   :  { %11729 = vmatpush3.bf16.msra.mxu0 %v13586_v29  ;;  %v13597_v29 = vld [vmem:[%s18559_s1 + $0x6a8] sm:$0xff]   ;;  %v4103_v14 = vrot.slane %v4101_v23, 1  ;;  %v4111_v49 = vshrl.u32 %v16016_v2, 16  ;;  %v4125_v56 = vrot.slane %v4123_v4, 1  ;;  %v13605_v1 = vld [vmem:[%s18559_s1 + $0x638] sm:$0xff]   ;;  %v4508_v41 = vshrl.u32 %v4432_v22, 16 }
 0x382   :  { %11730 = vmatprep.subr.bf16.mxu0 %v13588_v28  ;;  %v16043_v12 = vsel %vm1172_vm5, %v4565_v26, %v16029_v16  ;;  %v16055_v26 = vsel %vm1172_vm5, %v15950_v59, %v16039_v34  ;;  %v4099_v59 = vor.u32 %v4094_v17, %v15723_v60  ;;  %v3479_v28 = vshrl.u32 %v15903_v25, 16  ;;  %v13599_v25 = vld [vmem:[%s18559_s1 + $0x628] sm:$0xff]  }
 0x383   :  { %12611 = vmatpush3.bf16.msra.mxu1 %v13593_v55  ;;  %4327 = vmatmul.mubr.bf16.gmra.mrb[144].mxu0 %v15642_v10  ;;  %v13592_v10 = vld [vmem:[%s18559_s1 + $0x618] sm:$0xff]   ;;  %v4110_v60 = vsel %vm98_vm3, %v4105_v54, %v4109_v39  ;;  %v4113_v58 = vor.u32 %v4111_v49, %v4103_v14  ;;  %v4121_v17 = vor.u32 %v4119_v6, %v4109_v39 }
 0x384   :  { %12612 = vmatprep.subr.bf16.mxu1 %v18641_v5  ;;  %4334 = vmatprep.mubr.bf16.mxu0 %v4095_v40  ;;  %v4104_v55 = vsel %vm98_vm3, %v4099_v59, %v4103_v14  ;;  %v4115_v47 = vshll.u32 %v3479_v28, 16 }
 0x385   :  { %11731 = vmatpush3.bf16.msra.mxu0 %v13589_v8  ;;  %v4126_v52 = vsel %vm98_vm3, %v4121_v17, %v4125_v56 }
 0x386   :  { %12593 = vmatmul.mubr.bf16.gmra.mrb[48].mxu1 %v4098_v7  ;;  %11732 = vmatprep.subr.bf16.mxu0 %v13591_v19  ;;  %v4117_v8 = vrot.slane %v4115_v47, 1 }
 0x387   :  { %12596 = vmatprep.mubr.msk.bf16.mxu1 %vm13859_vm0, %v18641_v5  ;;  %12613 = vmatpush3.bf16.msra.mxu1 %v13595_v20  ;;  %v4510_v20 = vrot.slane %v4508_v41, 6 }
 0x388   :  { %12614 = vmatprep.subr.bf16.mxu1 %v18641_v5  ;;  %v4118_v19 = vsel %vm98_vm3, %v4113_v58, %v4117_v8 }
 0x389   :  { %11733 = vmatpush3.bf16.msra.mxu0 %v13592_v10 }
 0x38a   :  { %11734 = vmatprep.subr.bf16.mxu0 %v13594_v46 }
 0x38b   :  { %12615 = vmatpush3.bf16.msra.mxu1 %v13597_v29  ;;  %4335 = vmatmul.mubr.bf16.gmra.mrb[148].mxu0 %v15654_v42  ;;  %v13601_v42 = vld [vmem:[%s18559_s1 + $0x670] sm:$0xff]   ;;  %v4590_v29 = vrot.slane %v4445_v43, 7 }
 0x38c   :  { %12616 = vmatprep.subr.bf16.mxu1 %v18641_v5  ;;  %4342 = vmatprep.mubr.bf16.mxu0 %v4104_v55 }
 0x38d   :  { %11735 = vmatpush3.bf16.msra.mxu0 %v13596_v27 }
 0x38e   :  { %12597 = vmatmul.mubr.bf16.gmra.mrb[52].mxu1 %v4110_v60  ;;  %11736 = vmatprep.subr.bf16.mxu0 %v13598_v11 }
 0x38f   :  { %12600 = vmatprep.mubr.msk.bf16.mxu1 %vm13859_vm0, %v18641_v5  ;;  %12617 = vmatpush3.bf16.msra.mxu1 %v13600_v37 }
 0x390   :  { %12618 = vmatprep.subr.bf16.mxu1 %v18641_v5 }
 0x391   :  { %11737 = vmatpush3.bf16.msra.mxu0 %v13599_v25 }
 0x392   :  { %11738 = vmatprep.subr.bf16.mxu0 %v13601_v42 }
 0x393   :  { %12619 = vmatpush3.bf16.msra.mxu1 %v13603_v32  ;;  %4343 = vmatmul.mubr.bf16.gmra.mrb[152].mxu0 %v15710_v9  ;;  %v4511_v9 = vshll.u32 %v4432_v22, 16 }
 0x394   :  { %12640 = vmatprep.subr.bf16.mxu1 %v18641_v5  ;;  %4350 = vmatprep.mubr.bf16.mxu0 %v4118_v19 }
 0x395   :  { %11739 = vmatpush3.bf16.msra.mxu0 %v13602_v18  ;;  %v4513_v40 = vrot.slane %v4511_v9, 7 }
 0x396   :  { %12601 = vmatmul.mubr.bf16.gmra.mrb[56].mxu1 %v4126_v52  ;;  %11740 = vmatprep.subr.bf16.mxu0 %v13604_v0 }
 0x397   :  { %12620 = vmatprep.mubr.msk.bf16.mxu1 %vm13859_vm0, %v18641_v5  ;;  %v4514_v23 = vor.u32 %v4513_v40, %v4510_v20 }
 0x399   :  { %11741 = vmatpush3.bf16.msra.mxu0 %v13605_v1  ;;  %v4518_v7 = vsel %vm1172_vm5, %v4514_v23, %v15914_v15  ;;  %v13606_v23 = vld [vmem:[%s18559_s1 + $0x7c0] sm:$0xff]  }
 0x39a   :  { %11785 = vmatprep.subr.bf16.mxu0 %v13606_v23 }
 0x39b   :  { %4351 = vmatmul.mubr.bf16.gmra.mrb[156].mxu0 %v16016_v2  ;;  %v4449_v2 = vshrl.u32 %v15934_v57, 16 }
 0x39c   :  { %4802 = vmatprep.mubr.bf16.mxu0 %v15930_v21 }
 0x39d   :  { %v4589_v46 = vrot.slane %v4449_v2, 6 }
 0x39e   :  { %12621 = vmatmul.mubr.bf16.vlgmr.msra.gmra.mrb[40].mxu1 %v15925_v63  ;;  %v4451_v63 = vor.u32 %v4449_v2, %v15978_v61  ;;  %v13608_v2 = vld [vmem:[%s18559_s1 + $0x800] sm:$0xff]  }
 0x39f   :  { %12624 = vmatprep.mubr.msk.bf16.mxu1 %vm13859_vm0, %v18641_v5  ;;  %12641 = vmatpush3.bf16.msra.mxu1 %v13608_v2 }
 0x3a0   :  { %v4594_v15 = vshrl.u32 %v4451_v63, 16  ;;  %v4597_v21 = vshll.u32 %v4451_v63, 16  ;;  %v13609_v63 = vld [vmem:[%s18559_s1 + $0x7c8] sm:$0xff]   ;;  %12642 = vmatprep.subr.bf16.mxu1 %v18641_v5 }
 0x3a2   :  { %v4596_v10 = vrot.slane %v4594_v15, 6  ;;  %v4599_v62 = vrot.slane %v4597_v21, 7  ;;  %v13611_v21 = vld [vmem:[%s18559_s1 + $0x808] sm:$0xff]  }
 0x3a3   :  { %4803 = vmatmul.mubr.bf16.vlgmr.msra.gmra.mrb[160].mxu0 %v4518_v7  ;;  %v13607_v7 = vld [vmem:[%s18559_s1 + $0x780] sm:$0xff]   ;;  %12643 = vmatpush3.bf16.msra.mxu1 %v13611_v21 }
 0x3a4   :  { %4810 = vmatprep.mubr.bf16.mxu0 %v15941_v35  ;;  %v4603_v35 = vshrl.u32 %v15963_v13, 16  ;;  %11786 = vmatpush3.bf16.msra.mxu0 %v13607_v7 }
 0x3a5   :  { %11787 = vmatprep.subr.bf16.mxu0 %v13609_v63  ;;  %12644 = vmatprep.subr.bf16.mxu1 %v18641_v5 }
 0x3a6   :  { %12625 = vmatmul.mubr.bf16.gmra.mrb[44].mxu1 %v15948_v38  ;;  %v4606_v38 = vshll.u32 %v15963_v13, 16 }
 0x3a7   :  { %12628 = vmatprep.mubr.msk.bf16.mxu1 %vm13859_vm0, %v18641_v5 }
 0x3a8   :  { %v4608_v61 = vrot.slane %v4606_v38, 7 }
 0x3ab   :  { %4811 = vmatmul.mubr.bf16.gmra.mrb[164].mxu0 %v15959_v24  ;;  %v4605_v24 = vrot.slane %v4603_v35, 6  ;;  %v13610_v35 = vld [vmem:[%s18559_s1 + $0x788] sm:$0xff]  }
 0x3ac   :  { %4818 = vmatprep.mubr.bf16.mxu0 %v15968_v31  ;;  %v4600_v31 = vor.u32 %v4599_v62, %v4596_v10  ;;  %v13612_v10 = vld [vmem:[%s18559_s1 + $0x7d0] sm:$0xff]   ;;  %11788 = vmatpush3.bf16.msra.mxu0 %v13610_v35 }
 0x3ad   :  { %11789 = vmatprep.subr.bf16.mxu0 %v13612_v10 }
 0x3ae   :  { %12629 = vmatmul.mubr.bf16.gmra.mrb[48].mxu1 %v15988_v50  ;;  %v4609_v50 = vor.u32 %v4608_v61, %v4605_v24  ;;  %v4601_v13 = vsel %vm1172_vm5, %v16039_v34, %v4600_v31  ;;  %v13614_v31 = vld [vmem:[%s18559_s1 + $0x810] sm:$0xff]  }
 0x3af   :  { %12632 = vmatprep.mubr.msk.bf16.mxu1 %vm13859_vm0, %v18641_v5  ;;  %12645 = vmatpush3.bf16.msra.mxu1 %v13614_v31 }
 0x3b0   :  { %12646 = vmatprep.subr.bf16.mxu1 %v18641_v5 }
 0x3b3   :  { %4819 = vmatmul.mubr.bf16.gmra.mrb[168].mxu0 %v16001_v3  ;;  %v4610_v3 = vsel %vm1172_vm5, %v16029_v16, %v4609_v50 }
 0x3b4   :  { %4826 = vmatprep.mubr.bf16.mxu0 %v16055_v26 }
 0x3b6   :  { %12633 = vmatmul.mubr.bf16.gmra.mrb[52].mxu1 %v16043_v12  ;;  %v4591_v12 = vor.u32 %v4590_v29, %v4589_v46  ;;  %v13613_v46 = vld [vmem:[%s18559_s1 + $0x790] sm:$0xff]  }
 0x3b7   :  { %12636 = vmatprep.mubr.msk.bf16.mxu1 %vm13859_vm0, %v18641_v5  ;;  %11790 = vmatpush3.bf16.msra.mxu0 %v13613_v46 }
 0x3b8   :  { %v4592_v26 = vsel %vm1172_vm5, %v15990_v33, %v4591_v12 }
 0x3bb   :  { %4827 = vmatmul.mubr.bf16.gmra.mrb[172].mxu0 %v16020_v53 }
 0x3bc   :  { %4834 = vmatprep.mubr.bf16.mxu0 %v4601_v13 }
 0x3be   :  { %12637 = vmatmul.mubr.bf16.gmra.mrb[56].mxu1 %v4610_v3  ;;  %v13615_v3 = vld [vmem:[%s18559_s1 + $0x7d8] sm:$0xff]  }
 0x3bf   :  { %12656 = vmatprep.mubr.msk.bf16.mxu1 %vm13859_vm0, %v18641_v5  ;;  %11791 = vmatprep.subr.bf16.mxu0 %v13615_v3 }
 0x3c3   :  { %4835 = vmatmul.mubr.bf16.gmra.mrb[176].mxu0 %v4592_v26  ;;  %v13617_v26 = vld [vmem:[%s18559_s1 + $0x818] sm:$0xff]  }
 0x3c4   :  { %12647 = vmatpush3.bf16.msra.mxu1 %v13617_v26 }
 0x3c5   :  { %12648 = vmatprep.subr.bf16.mxu1 %v18641_v5 }
 0x426   :  { %v11624_v57 = vpop.f32.mrb[120].mxu0 }
 0x427   :  { %v11625_v43 = vpop.f32.mrb[121].mxu0 }
 0x428   :  { %v11626_v14 = vadd.f32 %v11625_v43, %v11624_v57  ;;  %v11627_v53 = vpop.f32.mrb[122].mxu0  ;;  %v13616_v57 = vld [vmem:[%s18559_s1 + $0x798] sm:$0xff]  }
 0x429   :  { %v11628_v39 = vpop.f32.mrb[123].mxu0  ;;  %11792 = vmatpush3.bf16.msra.mxu0 %v13616_v57 }
 0x42a   :  { %v11629_v27 = vadd.f32 %v11628_v39, %v11627_v53 }
 0x42e   :  { %v11630_v34 = vpop.f32.mrb[124].mxu0 }
 0x42f   :  { %v11631_v59 = vpop.f32.mrb[125].mxu0 }
 0x430   :  { %v11632_v28 = vadd.f32 %v11631_v59, %v11630_v34  ;;  %v11633_v11 = vpop.f32.mrb[126].mxu0  ;;  %v13619_v34 = vld [vmem:[%s18559_s1 + $0x820] sm:$0xff]  }
 0x431   :  { %v11634_v16 = vpop.f32.mrb[127].mxu0  ;;  %12649 = vmatpush3.bf16.msra.mxu1 %v13619_v34 }
 0x432   :  { %v11635_v54 = vadd.f32 %v11634_v16, %v11633_v11  ;;  %12650 = vmatprep.subr.bf16.mxu1 %v18641_v5 }
 0x436   :  { %v11636_v37 = vpop.f32.mrb[128].mxu0 }
 0x437   :  { %v11637_v55 = vpop.f32.mrb[129].mxu0 }
 0x438   :  { %v16145_v60 = vadd.f32 %v11637_v55, %v11636_v37  ;;  %v11639_v25 = vpop.f32.mrb[130].mxu0  ;;  %v13621_v55 = vld [vmem:[%s18559_s1 + $0x828] sm:$0xff]  }
 0x439   :  { %v11640_v49 = vpop.f32.mrb[131].mxu0  ;;  %12651 = vmatpush3.bf16.msra.mxu1 %v13621_v55 }
 0x43a   :  { %v16147_v33 = vadd.f32 %v11640_v49, %v11639_v25  ;;  %v13625_v49 = vld [vmem:[%s18559_s1 + $0x7f0] sm:$0xff]   ;;  %12652 = vmatprep.subr.bf16.mxu1 %v18641_v5 }
 0x43e   :  { %v11642_v47 = vpop.f32.mrb[132].mxu0 }
 0x43f   :  { %v11643_v42 = vpop.f32.mrb[133].mxu0 }
 0x440   :  { %v16149_v6 = vadd.f32 %v11643_v42, %v11642_v47  ;;  %v11645_v4 = vpop.f32.mrb[134].mxu0 }
 0x441   :  { %v11646_v32 = vpop.f32.mrb[135].mxu0 }
 0x442   :  { %v16151_v58 = vadd.f32 %v11646_v32, %v11645_v4  ;;  %v13624_v4 = vld [vmem:[%s18559_s1 + $0x830] sm:$0xff]  }
 0x443   :  { %12653 = vmatpush3.bf16.msra.mxu1 %v13624_v4 }
 0x444   :  { %12654 = vmatprep.subr.bf16.mxu1 %v18641_v5 }
 0x446   :  { %v11648_v17 = vpop.f32.mrb[136].mxu0 }
 0x447   :  { %v11649_v18 = vpop.f32.mrb[137].mxu0 }
 0x448   :  { %v16153_v8 = vadd.f32 %v11649_v18, %v11648_v17  ;;  %v11651_v0 = vpop.f32.mrb[138].mxu0  ;;  %v13626_v17 = vld [vmem:[%s18559_s1 + $0x7b0] sm:$0xff]  }
 0x449   :  { %v11652_v56 = vpop.f32.mrb[139].mxu0 }
 0x44a   :  { %v16155_v19 = vadd.f32 %v11652_v56, %v11651_v0  ;;  %v13628_v56 = vld [vmem:[%s18559_s1 + $0x7f8] sm:$0xff]  }
 0x44e   :  { %v11683_v22 = vpop.f32.mrb[140].mxu0 }
 0x44f   :  { %v11684_v52 = vpop.f32.mrb[141].mxu0 }
 0x450   :  { %v11685_v1 = vadd.f32 %v11684_v52, %v11683_v22  ;;  %v11686_v41 = vpop.f32.mrb[142].mxu0  ;;  %v13627_v52 = vld [vmem:[%s18559_s1 + $0x838] sm:$0xff]  }
 0x451   :  { %v11687_v9 = vpop.f32.mrb[143].mxu0  ;;  %12655 = vmatpush3.bf16.msra.mxu1 %v13627_v52 }
 0x452   :  { %v16157_v20 = vadd.f32 %v11685_v1, %v11626_v14  ;;  %v11688_v40 = vadd.f32 %v11687_v9, %v11686_v41  ;;  %v13618_v14 = vld [vmem:[%s18559_s1 + $0x7e0] sm:$0xff]   ;;  %12676 = vmatprep.subr.bf16.mxu1 %v18641_v5 }
 0x453   :  { %11793 = vmatprep.subr.bf16.mxu0 %v13618_v14  ;;  %v13630_v41 = vld [vmem:[%s18559_s1 + $0x700] sm:$0xff]  }
 0x454   :  { %v16171_v15 = vadd.f32 %v11688_v40, %v11629_v27 }
 0x456   :  { %v11689_v38 = vpop.f32.mrb[144].mxu0 }
 0x457   :  { %v11690_v62 = vpop.f32.mrb[145].mxu0 }
 0x458   :  { %v11691_v24 = vadd.f32 %v11690_v62, %v11689_v38  ;;  %v11692_v61 = vpop.f32.mrb[146].mxu0 }
 0x459   :  { %v11693_v50 = vpop.f32.mrb[147].mxu0 }
 0x45a   :  { %v16190_v29 = vadd.f32 %v11691_v24, %v11632_v28  ;;  %v11694_v13 = vadd.f32 %v11693_v50, %v11692_v61  ;;  %v13620_v28 = vld [vmem:[%s18559_s1 + $0x7a0] sm:$0xff]  }
 0x45b   :  { %11794 = vmatpush3.bf16.msra.mxu0 %v13620_v28 }
 0x45c   :  { %v16195_v12 = vadd.f32 %v11694_v13, %v11635_v54  ;;  %v13622_v54 = vld [vmem:[%s18559_s1 + $0x7e8] sm:$0xff]  }
 0x45d   :  { %11795 = vmatprep.subr.bf16.mxu0 %v13622_v54 }
 0x45e   :  { %v11695_v43 = vpop.f32.mrb[148].mxu0 }
 0x45f   :  { %v11696_v53 = vpop.f32.mrb[149].mxu0 }
 0x460   :  { %v11697_v39 = vadd.f32 %v11696_v53, %v11695_v43  ;;  %v11698_v27 = vpop.f32.mrb[150].mxu0 }
 0x461   :  { %v11699_v59 = vpop.f32.mrb[151].mxu0 }
 0x462   :  { %v16215_v11 = vadd.f32 %v11697_v39, %v16145_v60  ;;  %v11700_v16 = vadd.f32 %v11699_v59, %v11698_v27  ;;  %v13623_v60 = vld [vmem:[%s18559_s1 + $0x7a8] sm:$0xff]  }
 0x463   :  { %11796 = vmatpush3.bf16.msra.mxu0 %v13623_v60 }
 0x464   :  { %v16221_v37 = vadd.f32 %v11700_v16, %v16147_v33  ;;  %11797 = vmatprep.subr.bf16.mxu0 %v13625_v49 }
 0x466   :  { %v11701_v25 = vpop.f32.mrb[152].mxu0 }
 0x467   :  { %v11702_v33 = vpop.f32.mrb[153].mxu0  ;;  %11798 = vmatpush3.bf16.msra.mxu0 %v13626_v17 }
 0x468   :  { %v11703_v47 = vadd.f32 %v11702_v33, %v11701_v25  ;;  %v11704_v42 = vpop.f32.mrb[154].mxu0  ;;  %11799 = vmatprep.subr.bf16.mxu0 %v13628_v56 }
 0x469   :  { %v11705_v32 = vpop.f32.mrb[155].mxu0 }
 0x46a   :  { %v16241_v18 = vadd.f32 %v11703_v47, %v16149_v6  ;;  %v11706_v0 = vadd.f32 %v11705_v32, %v11704_v42  ;;  %v13629_v6 = vld [vmem:[%s18559_s1 + $0x7b8] sm:$0xff]  }
 0x46b   :  { %11800 = vmatpush3.bf16.msra.mxu0 %v13629_v6 }
 0x46c   :  { %v16247_v22 = vadd.f32 %v11706_v0, %v16151_v58  ;;  %11844 = vmatprep.subr.bf16.mxu0 %v13630_v41 }
 0x46e   :  { %v11707_v1 = vpop.f32.mrb[156].mxu0 }
 0x46f   :  { %v11708_v58 = vpop.f32.mrb[157].mxu0 }
 0x470   :  { %v11709_v9 = vadd.f32 %v11708_v58, %v11707_v1  ;;  %v11710_v40 = vpop.f32.mrb[158].mxu0 }
 0x471   :  { %v4877_v23 = vpop.f32.mrb[40].mxu1  ;;  %v11711_v7 = vpop.f32.mrb[159].mxu0 }
 0x472   :  { %v12622_v2 = vpop.f32.mrb[41].mxu1  ;;  %v16261_v63 = vadd.f32 %v11709_v9, %v16153_v8  ;;  %v11712_v21 = vadd.f32 %v11711_v7, %v11710_v40 }
 0x473   :  { %v4880_v35 = vpop.f32.mrb[42].mxu1 }
 0x474   :  { %v12623_v38 = vpop.f32.mrb[43].mxu1  ;;  %v16264_v10 = vadd.f32 %v11712_v21, %v16155_v19 }
 0x476   :  { %v11742_v62 = vpop.f32.mrb[160].mxu0 }
 0x477   :  { %v11743_v24 = vpop.f32.mrb[161].mxu0 }
 0x478   :  { %v11744_v61 = vadd.f32 %v11743_v24, %v11742_v62  ;;  %v11745_v31 = vpop.f32.mrb[162].mxu0 }
 0x479   :  { %v4885_v50 = vpop.f32.mrb[44].mxu1  ;;  %v11746_v46 = vpop.f32.mrb[163].mxu0 }
 0x47a   :  { %v12626_v13 = vpop.f32.mrb[45].mxu1  ;;  %v13025_v3 = vadd.f32 %v16157_v20, %v11744_v61  ;;  %v11747_v26 = vadd.f32 %v11746_v46, %v11745_v31 }
 0x47b   :  { %v4888_v57 = vpop.f32.mrb[46].mxu1 }
 0x47c   :  { %v12627_v8 = vpop.f32.mrb[47].mxu1  ;;  %v13026_v43 = vadd.f32 %v13025_v3, %v4877_v23  ;;  %v13028_v14 = vadd.f32 %v16171_v15, %v11747_v26 }
 0x47e   :  { %v4926_v53 = vmax.f32 %v13026_v43, 0.0  ;;  %v13029_v39 = vadd.f32 %v13028_v14, %v4880_v35  ;;  %v11748_v27 = vpop.f32.mrb[164].mxu0 }
 0x47f   :  { %v11749_v19 = vpop.f32.mrb[165].mxu0 }
 0x480   :  { %v16269_v34 = vmul.f32 %v4926_v53, %v14686_v44  ;;  %v4927_v59 = vmax.f32 %v13029_v39, 0.0  ;;  %v11750_v28 = vadd.f32 %v11749_v19, %v11748_v27  ;;  %v11751_v16 = vpop.f32.mrb[166].mxu0 }
 0x481   :  { %v4893_v54 = vpop.f32.mrb[48].mxu1  ;;  %v11752_v55 = vpop.f32.mrb[167].mxu0 }
 0x482   :  { %v12630_v60 = vpop.f32.mrb[49].mxu1  ;;  %v16272_v20 = vmul.f32 %v4927_v59, %v14690_v36  ;;  %v13031_v25 = vadd.f32 %v16190_v29, %v11750_v28  ;;  %v11753_v49 = vadd.f32 %v11752_v55, %v11751_v16  ;;  %v4962_v33 = vmul.f32 %v16269_v34, %v16269_v34 }
 0x483   :  { %v4896_v15 = vpop.f32.mrb[50].mxu1 }
 0x484   :  { %v12631_v47 = vpop.f32.mrb[51].mxu1  ;;  %v4946_v42 = vadd.f32 %v16272_v20, %v16269_v34  ;;  %v4963_v4 = vmul.f32 %v16272_v20, %v16272_v20  ;;  %v13032_v32 = vadd.f32 %v13031_v25, %v4885_v50  ;;  %v13034_v17 = vadd.f32 %v16195_v12, %v11753_v49 }
 0x486   :  { %v4972_v0 = vadd.f32 %v4963_v4, %v4962_v33  ;;  %v4928_v56 = vmax.f32 %v13032_v32, 0.0  ;;  %v13035_v52 = vadd.f32 %v13034_v17, %v4888_v57  ;;  %v11754_v6 = vpop.f32.mrb[168].mxu0 }
 0x487   :  { %v11755_v29 = vpop.f32.mrb[169].mxu0 }
 0x488   :  { %v16283_v1 = vmul.f32 %v4928_v56, %v18644_v45  ;;  %v4929_v41 = vmax.f32 %v13035_v52, 0.0  ;;  %v11756_v58 = vadd.f32 %v11755_v29, %v11754_v6  ;;  %v11757_v9 = vpop.f32.mrb[170].mxu0  ;;  %v18665_v56 = vld [vmem:[#allocation11_spill] sm:$0xff] }
 0x489   :  { %v4901_v40 = vpop.f32.mrb[52].mxu1  ;;  %v11758_v23 = vpop.f32.mrb[171].mxu0 }
 0x48a   :  { %v12634_v7 = vpop.f32.mrb[53].mxu1  ;;  %v4947_v2 = vadd.f32 %v4946_v42, %v16283_v1  ;;  %v4964_v21 = vmul.f32 %v16283_v1, %v16283_v1  ;;  %v16289_v12 = vmul.f32 %v4929_v41, %v18648_v51  ;;  %v13037_v35 = vadd.f32 %v16215_v11, %v11756_v58 }
 0x48b   :  { %v4904_v38 = vpop.f32.mrb[54].mxu1  ;;  %v11759_v62 = vadd.f32 %v11758_v23, %v11757_v9 }
 0x48c   :  { %v12635_v24 = vpop.f32.mrb[55].mxu1  ;;  %v4973_v61 = vadd.f32 %v4972_v0, %v4964_v21  ;;  %v4948_v31 = vadd.f32 %v4947_v2, %v16289_v12  ;;  %v4965_v50 = vmul.f32 %v16289_v12, %v16289_v12  ;;  %v13038_v46 = vadd.f32 %v13037_v35, %v4893_v54 }
 0x48d   :  { %v13040_v13 = vadd.f32 %v16221_v37, %v11759_v62 }
 0x48e   :  { %v4974_v3 = vadd.f32 %v4973_v61, %v4965_v50  ;;  %v4930_v26 = vmax.f32 %v13038_v46, 0.0  ;;  %v11760_v57 = vpop.f32.mrb[172].mxu0  ;;  %v18667_v46 = vld [vmem:[#allocation13_spill] sm:$0xff] }
 0x48f   :  { %v13041_v8 = vadd.f32 %v13040_v13, %v4896_v15  ;;  %v11761_v43 = vpop.f32.mrb[173].mxu0 }
 0x490   :  { %v16297_v14 = vmul.f32 %v4930_v26, %v18650_v30  ;;  %v11762_v11 = vadd.f32 %v11761_v43, %v11760_v57  ;;  %v11763_v53 = vpop.f32.mrb[174].mxu0 }
 0x491   :  { %v4909_v39 = vpop.f32.mrb[56].mxu1  ;;  %v4931_v27 = vmax.f32 %v13041_v8, 0.0  ;;  %v11764_v19 = vpop.f32.mrb[175].mxu0  ;;  %v18668_v8 = vld [vmem:[#allocation14_spill] sm:$0xff] }
 0x492   :  { %v12638_v59 = vpop.f32.mrb[57].mxu1  ;;  %v4949_v28 = vadd.f32 %v4948_v31, %v16297_v14  ;;  %v4966_v16 = vmul.f32 %v16297_v14, %v16297_v14  ;;  %v13043_v37 = vadd.f32 %v16241_v18, %v11762_v11  ;;  %v11765_v54 = vadd.f32 %v11764_v19, %v11763_v53 }
 0x493   :  { %v4912_v55 = vpop.f32.mrb[58].mxu1  ;;  %v16304_v60 = vmul.f32 %v4931_v27, %v18652_v48 }
 0x494   :  { %v12639_v25 = vpop.f32.mrb[59].mxu1  ;;  %v4975_v49 = vadd.f32 %v4974_v3, %v4966_v16  ;;  %v13044_v15 = vadd.f32 %v13043_v37, %v4901_v40  ;;  %v13046_v33 = vadd.f32 %v16247_v22, %v11765_v54  ;;  %v18666_v40 = vld [vmem:[#allocation12_spill] sm:$0xff] }
 0x495   :  { %v4950_v47 = vadd.f32 %v4949_v28, %v16304_v60  ;;  %v4967_v42 = vmul.f32 %v16304_v60, %v16304_v60 }
 0x496   :  { %v4932_v4 = vmax.f32 %v13044_v15, 0.0  ;;  %v13047_v32 = vadd.f32 %v13046_v33, %v4904_v38  ;;  %v11766_v17 = vpop.f32.mrb[176].mxu0 }
 0x497   :  { %v4976_v0 = vadd.f32 %v4975_v49, %v4967_v42  ;;  %v11767_v18 = vpop.f32.mrb[177].mxu0 }
 0x498   :  { %v16311_v52 = vmul.f32 %v4932_v4, %v18665_v56  ;;  %v4933_v6 = vmax.f32 %v13047_v32, 0.0  ;;  %v11768_v29 = vadd.f32 %v11767_v18, %v11766_v17  ;;  %v11769_v41 = vpop.f32.mrb[178].mxu0 }
 0x499   :  { %v11770_v58 = vpop.f32.mrb[179].mxu0 }
 0x49a   :  { %v4951_v9 = vadd.f32 %v4950_v47, %v16311_v52  ;;  %v4968_v22 = vmul.f32 %v16311_v52, %v16311_v52  ;;  %v4943_v23 = vmul.f32 %v4933_v6, %v18666_v40  ;;  %v13049_v7 = vadd.f32 %v16261_v63, %v11768_v29 }
 0x49b   :  { %v11771_v2 = vadd.f32 %v11770_v58, %v11769_v41 }
 0x49c   :  { %v4977_v21 = vadd.f32 %v4976_v0, %v4968_v22  ;;  %v4952_v35 = vadd.f32 %v4951_v9, %v4943_v23  ;;  %v4969_v38 = vmul.f32 %v4943_v23, %v4943_v23  ;;  %v13050_v62 = vadd.f32 %v13049_v7, %v4909_v39 }
 0x49d   :  { %v13052_v24 = vadd.f32 %v16264_v10, %v11771_v2 }
 0x49e   :  { %v4978_v61 = vadd.f32 %v4977_v21, %v4969_v38  ;;  %v4934_v31 = vmax.f32 %v13050_v62, 0.0 }
 0x49f   :  { %v13053_v50 = vadd.f32 %v13052_v24, %v4912_v55 }
 0x4a0   :  { %v4944_v13 = vmul.f32 %v4934_v31, %v18667_v46 }
 0x4a1   :  { %v4935_v3 = vmax.f32 %v13053_v50, 0.0 }
 0x4a2   :  { %v4953_v26 = vadd.f32 %v4952_v35, %v4944_v13  ;;  %v4970_v57 = vmul.f32 %v4944_v13, %v4944_v13 }
 0x4a3   :  { %v4945_v43 = vmul.f32 %v4935_v3, %v18668_v8 }
 0x4a4   :  { %v4979_v11 = vadd.f32 %v4978_v61, %v4970_v57 }
 0x4a5   :  { %v4954_v53 = vadd.f32 %v4953_v26, %v4945_v43  ;;  %v4971_v63 = vmul.f32 %v4945_v43, %v4945_v43 }
 0x4a7   :  { %v4955_v27 = vrot.slane %v4954_v53, 4  ;;  %v4980_v19 = vadd.f32 %v4979_v11, %v4971_v63 }
 0x4a9   :  { %v4956_v59 = vadd.f32 %v4955_v27, %v4954_v53  ;;  %v4981_v28 = vrot.slane %v4980_v19, 4 }
 0x4ab   :  { %v4957_v39 = vrot.slane %v4956_v59, 2  ;;  %v4982_v16 = vadd.f32 %v4981_v28, %v4980_v19 }
 0x4ad   :  { %v4958_v10 = vadd.f32 %v4957_v39, %v4956_v59  ;;  %v4983_v37 = vrot.slane %v4982_v16, 2 }
 0x4af   :  { %v4959_v54 = vrot.slane %v4958_v10, 1  ;;  %v4984_v55 = vadd.f32 %v4983_v37, %v4982_v16 }
 0x4b1   :  { %v4960_v25 = vadd.f32 %v4959_v54, %v4958_v10  ;;  %v4985_v49 = vrot.slane %v4984_v55, 1 }
 0x4b3   :  { %v4961_v15 = vmul.f32 0.03125, %v4960_v25  ;;  %v4986_v33 = vadd.f32 %v4985_v49, %v4984_v55 }
 0x4b5   :  { %v4987_v47 = vmul.f32 0.03125, %v4986_v33  ;;  %v4988_v42 = vmul.f32 %v4961_v15, %v4961_v15  ;;  %v4991_v4 = vsub.f32 %v16269_v34, %v4961_v15  ;;  %v4992_v32 = vsub.f32 %v16272_v20, %v4961_v15 }
 0x4b6   :  { %v4993_v17 = vsub.f32 %v16283_v1, %v4961_v15  ;;  %v4994_v0 = vsub.f32 %v16289_v12, %v4961_v15  ;;  %v4995_v18 = vsub.f32 %v16297_v14, %v4961_v15  ;;  %v4996_v6 = vsub.f32 %v16304_v60, %v4961_v15 }
 0x4b7   :  { %v4989_v29 = vsub.f32 %v4987_v47, %v4988_v42  ;;  %v4997_v41 = vsub.f32 %v16311_v52, %v4961_v15  ;;  %v4998_v58 = vsub.f32 %v4943_v23, %v4961_v15  ;;  %v4999_v9 = vsub.f32 %v4944_v13, %v4961_v15 }
 0x4b8   :  { %v5000_v22 = vsub.f32 %v4945_v43, %v4961_v15 }
 0x4b9   :  { %v4990_v7 = vmax.f32 %v4989_v29, 0.0 }
 0x4bb   :  { %v5001_v2 = vadd.f32 1e-05, %v4990_v7 }
 0x4bd   :  { %13826 = vrsqrt.f32 %v5001_v2 }
 0x4c7   :  { %v13827_v34 = vpop.eup %13826 }
 0x4c8   :  { %v5003_v21 = vmul.f32 %v13827_v34, %v4991_v4  ;;  %v5004_v20 = vmul.f32 %v13827_v34, %v4992_v32  ;;  %v5005_v35 = vmul.f32 %v13827_v34, %v4993_v17  ;;  %v5006_v1 = vmul.f32 %v13827_v34, %v4994_v0 }
 0x4c9   :  { %v5007_v38 = vmul.f32 %v13827_v34, %v4995_v18  ;;  %v5008_v12 = vmul.f32 %v13827_v34, %v4996_v6  ;;  %v5009_v62 = vmul.f32 %v13827_v34, %v4997_v41  ;;  %v5010_v14 = vmul.f32 %v13827_v34, %v4998_v58 }
 0x4ca   :  { %v5011_v24 = vmul.f32 %v13827_v34, %v4999_v9  ;;  %v5012_v60 = vmul.f32 %v13827_v34, %v5000_v22  ;;  %v5013_v61 = vmul.f32 %v5003_v21, %v14686_v44  ;;  %v5014_v52 = vmul.f32 %v5004_v20, %v14690_v36 }
 0x4cb   :  { %v5015_v23 = vmul.f32 %v5005_v35, %v18644_v45  ;;  %v5016_v31 = vmul.f32 %v5006_v1, %v18648_v51  ;;  %v5017_v50 = vmul.f32 %v5007_v38, %v18650_v30  ;;  %v5018_v13 = vmul.f32 %v5008_v12, %v18652_v48 }
 0x4cc   :  { %v5019_v3 = vmul.f32 %v5009_v62, %v18665_v56  ;;  %v5020_v26 = vmul.f32 %v5010_v14, %v18666_v40  ;;  %v5021_v57 = vmul.f32 %v5011_v24, %v18667_v46  ;;  %v5022_v43 = vmul.f32 %v5012_v60, %v18668_v8 }
 0x4cd   :  { %v5023_v11 = vpack.c.bf16 %v5014_v52, %v5013_v61  ;;  %v5024_v53 = vpack.c.bf16 %v5016_v31, %v5015_v23  ;;  %v5025_v63 = vpack.c.bf16 %v5018_v13, %v5017_v50 }
 0x4ce   :  { %v5026_v27 = vpack.c.bf16 %v5020_v26, %v5019_v3  ;;  %v5027_v19 = vpack.c.bf16 %v5022_v43, %v5021_v57 }
 0x4cf   :  { %v5033_v59 = vrot.slane %v5023_v11, 4  ;;  %v5034_v28 = vrot.slane %v5024_v53, 4  ;;  %v5036_v39 = vrot.slane %v5025_v63, 4 }
 0x4d0   :  { %v5038_v16 = vrot.slane %v5026_v27, 4  ;;  %v5040_v10 = vrot.slane %v5027_v19, 4 }
 0x4d1   :  { %v5035_v37 = vsel %vm38_vm1, %v5033_v59, %v5034_v28  ;;  %v5037_v54 = vsel %vm38_vm1, %v5034_v28, %v5036_v39  ;;  %5048 = vst [vmem:[#allocation2] sm:$0xf0] %v5033_v59 }
 0x4d2   :  { %v16341_v55 = vsel %vm38_vm1, %v5036_v39, %v5038_v16  ;;  %v16344_v25 = vsel %vm38_vm1, %v5038_v16, %v5040_v10  ;;  %5053 = vst [vmem:[#allocation2 + $0x28] sm:$0xf] %v5040_v10  ;;  %v16346_v49 = vrot.slane %v5035_v37, 1  ;;  %v5117_v15 = vrot.slane %v5037_v54, 1 }
 0x4d3   :  { %v16348_v33 = vshll.u32 %v5035_v37, 16  ;;  %v16350_v47 = vshrl.u32 %v5035_v37, 16  ;;  %v16352_v42 = vshll.u32 %v5037_v54, 16  ;;  %v16354_v4 = vshrl.u32 %v5037_v54, 16 }
 0x4d4   :  { %v5118_v32 = vsel %vm151_vm2, %v16346_v49, %v5117_v15  ;;  %v16359_v17 = vshll.u32 %v16341_v55, 16  ;;  %v5119_v0 = vrot.slane %v16341_v55, 1  ;;  %v16363_v18 = vshrl.u32 %v16341_v55, 16 }
 0x4d5   :  { %v16365_v6 = vshrl.u32 %v5118_v32, 16  ;;  %v16367_v29 = vshll.u32 %v5118_v32, 16  ;;  %v16370_v41 = vrot.slane %v16348_v33, 1  ;;  %v5080_v58 = vrot.slane %v16352_v42, 1 }
 0x4d6   :  { %v5257_v9 = vrot.slane %v16350_v47, 3  ;;  %v5258_v22 = vrot.slane %v16348_v33, 4  ;;  %v5088_v7 = vrot.slane %v16359_v17, 1  ;;  %v5120_v2 = vsel %vm151_vm2, %v5117_v15, %v5119_v0 }
 0x4d7   :  { %v5289_v34 = vrot.slane %v16365_v6, 3  ;;  %v5292_v21 = vrot.slane %v16367_v29, 4  ;;  %v5076_v20 = vor.u32 %v16350_v47, %v16370_v41  ;;  %v5084_v35 = vor.u32 %v16354_v4, %v5080_v58 }
 0x4d8   :  { %v5176_v1 = vld [vmem:[#allocation2] sm:$0xf0]  ;;  %v16384_v12 = vor.u32 %v5258_v22, %v5257_v9  ;;  %v16386_v62 = vshrl.u32 %v5120_v2, 16  ;;  %v16388_v14 = vshll.u32 %v5120_v2, 16  ;;  %v16391_v24 = vor.u32 %v16363_v18, %v5088_v7 }
 0x4d9   :  { %v5174_v38 = vld [vmem:[#allocation2] sm:$0xf8]  ;;  %v5196_v60 = vrot.slane %v5176_v1, 1  ;;  %v5293_v61 = vor.u32 %v5292_v21, %v5289_v34  ;;  %v16394_v52 = vsel %vm98_vm3, %v5076_v20, %v5080_v58  ;;  %v5179_v23 = vshrl.u32 %v5176_v1, 16 }
 0x4da   :  { %v5181_v31 = vshll.u32 %v5176_v1, 16  ;;  %v16397_v50 = vshrl.u32 %v16394_v52, 16  ;;  %v16400_v13 = vshll.u32 %v16394_v52, 16  ;;  %v5250_v3 = vshrl.u32 %v5174_v38, 16  ;;  %v13632_v21 = vld [vmem:[%s18559_s1 + $0x740] sm:$0xff]  }
 0x4db   :  { %v5197_v26 = vsel %vm151_vm2, %v5196_v60, %v16346_v49  ;;  %v5253_v57 = vshll.u32 %v5174_v38, 16  ;;  %v16405_v43 = vsel %vm98_vm3, %v5084_v35, %v5088_v7  ;;  %v5311_v11 = vrot.slane %v16386_v62, 3 }
 0x4dc   :  { %v5279_v53 = vshrl.u32 %v5197_v26, 16  ;;  %v5282_v63 = vshll.u32 %v5197_v26, 16  ;;  %v5183_v27 = vrot.slane %v5181_v31, 1  ;;  %v5272_v19 = vrot.slane %v16397_v50, 3 }
 0x4dd   :  { %v5275_v59 = vrot.slane %v16400_v13, 4  ;;  %v5252_v28 = vrot.slane %v5250_v3, 3  ;;  %v5255_v39 = vrot.slane %v5253_v57, 4  ;;  %v16411_v16 = vshrl.u32 %v16405_v43, 16 }
 0x4de   :  { %v5281_v10 = vrot.slane %v5279_v53, 3  ;;  %v5284_v37 = vrot.slane %v5282_v63, 4  ;;  %v5184_v54 = vor.u32 %v5183_v27, %v5179_v23  ;;  %v16414_v15 = vshll.u32 %v16405_v43, 16 }
 0x4df   :  { %v5276_v32 = vor.u32 %v5275_v59, %v5272_v19  ;;  %v5256_v58 = vor.u32 %v5255_v39, %v5252_v28  ;;  %v5302_v9 = vrot.slane %v16411_v16, 3  ;;  %v5314_v22 = vrot.slane %v16388_v14, 4  ;;  %v13635_v59 = vld [vmem:[%s18559_s1 + $0x748] sm:$0xff]  }
 0x4e0   :  { %v5285_v7 = vor.u32 %v5284_v37, %v5281_v10  ;;  %v5185_v2 = vsel %vm98_vm3, %v5184_v54, %v16370_v41  ;;  %v5305_v34 = vrot.slane %v16414_v15, 4  ;;  %v5295_v20 = vrot.slane %v16354_v4, 3 }
 0x4e1   :  { %v5262_v35 = vshrl.u32 %v5185_v2, 16  ;;  %v5265_v1 = vshll.u32 %v5185_v2, 16  ;;  %v5260_v38 = vsel %vm286_vm4, %v5256_v58, %v16384_v12  ;;  %v5315_v60 = vor.u32 %v5314_v22, %v5311_v11  ;;  %v16456_v58 = vld [vmem:[#allocation2 + $0x28] sm:$0xf] }
 0x4e2   :  { %v5294_v23 = vsel %vm286_vm4, %v5285_v7, %v5293_v61  ;;  %v16428_v31 = vor.u32 %v5305_v34, %v5302_v9  ;;  %v5296_v3 = vrot.slane %v16352_v42, 4  ;;  %v16432_v26 = vshll.u32 %v16344_v25, 16  ;;  %v13631_v9 = vld [vmem:[%s18559_s1 + $0x6c0] sm:$0xff]   ;;  %v13633_v34 = vld [vmem:[%s18559_s1 + $0x708] sm:$0xff]  }
 0x4e3   :  { %12657 = vmatmul.mubr.bf16.vlgmr.msra.gmra.mrb[60].mxu1 %v5294_v23  ;;  %v5264_v57 = vrot.slane %v5262_v35, 3  ;;  %v5267_v53 = vrot.slane %v5265_v1, 4  ;;  %v5316_v63 = vsel %vm286_vm4, %v5293_v61, %v5315_v60  ;;  %v16436_v27 = vrot.slane %v16344_v25, 1 }
 0x4e4   :  { %v5307_v11 = vsel %vm286_vm4, %v5276_v32, %v16428_v31  ;;  %12660 = vmatprep.mubr.msk.bf16.mxu1 %vm13859_vm0, %v18641_v5  ;;  %12677 = vmatpush3.bf16.msra.mxu1 %v13632_v21  ;;  %v5297_v19 = vor.u32 %v5296_v3, %v5295_v20  ;;  %v5096_v28 = vrot.slane %v16432_v26, 1  ;;  %v5317_v39 = vrot.slane %v16363_v18, 3 }
 0x4e5   :  { %v5268_v61 = vor.u32 %v5267_v53, %v5264_v57  ;;  %12678 = vmatprep.subr.bf16.mxu1 %v18641_v5  ;;  %v5122_v10 = vsel %vm151_vm2, %v5119_v0, %v16436_v27  ;;  %v5318_v37 = vrot.slane %v16359_v17, 4  ;;  %v16454_v54 = vshrl.u32 %v16344_v25, 16  ;;  %v5177_v25 = vld [vmem:[#allocation2 + $0x28] sm:$0x1f] }
 0x4e6   :  { %v16463_v22 = vsel %vm286_vm4, %v16384_v12, %v5297_v19  ;;  %v16467_v55 = vsel %vm98_vm3, %v16391_v24, %v5096_v28  ;;  %v16469_v0 = vshrl.u32 %v5122_v10, 16  ;;  %v16471_v7 = vshll.u32 %v5122_v10, 16 }
 0x4e7   :  { %v5277_v2 = vsel %vm286_vm4, %v5268_v61, %v5276_v32  ;;  %v16478_v21 = vshrl.u32 %v16467_v55, 16  ;;  %v16481_v12 = vshll.u32 %v16467_v55, 16  ;;  %v5319_v20 = vor.u32 %v5318_v37, %v5317_v39  ;;  %v13638_v32 = vld [vmem:[%s18559_s1 + $0x750] sm:$0xff]  }
 0x4e8   :  { %5574 = vmatprep.mubr.bf16.mxu0 %v5277_v2  ;;  %12679 = vmatpush3.bf16.msra.mxu1 %v13635_v59  ;;  %v5333_v24 = vrot.slane %v16469_v0, 3  ;;  %v5336_v35 = vrot.slane %v16471_v7, 4  ;;  %v16489_v1 = vor.u32 %v16454_v54, %v5096_v28  ;;  %v18597_v23 = vshll.u32 %v16456_v58, 16  ;;  %v13634_v28 = vld [vmem:[%s18559_s1 + $0x6c8] sm:$0xff]  }
 0x4e9   :  { %5575 = vmatmul.mubr.bf16.vlgmr.msra.gmra.mrb[180].mxu0 %v5260_v38  ;;  %v5324_v3 = vrot.slane %v16478_v21, 3  ;;  %v5327_v57 = vrot.slane %v16481_v12, 4  ;;  %12680 = vmatprep.subr.bf16.mxu1 %v18641_v5  ;;  %v16496_v53 = vsel %vm286_vm4, %v5297_v19, %v5319_v20  ;;  %v5198_v59 = vrot.slane %v5177_v25, 1 }
 0x4ea   :  { %5582 = vmatprep.mubr.bf16.mxu0 %v5307_v11  ;;  %11845 = vmatpush3.bf16.msra.mxu0 %v13631_v9  ;;  %v5337_v39 = vor.u32 %v5336_v35, %v5333_v24  ;;  %v5189_v38 = vrot.slane %v18597_v23, 1  ;;  %v5339_v61 = vrot.slane %v16454_v54, 3  ;;  %v5340_v10 = vrot.slane %v16432_v26, 4  ;;  %v13636_v11 = vld [vmem:[%s18559_s1 + $0x710] sm:$0xff]  }
 0x4eb   :  { %12661 = vmatmul.mubr.bf16.gmra.mrb[64].mxu1 %v5316_v63  ;;  %11846 = vmatprep.subr.bf16.mxu0 %v13633_v34  ;;  %v5328_v37 = vor.u32 %v5327_v57, %v5324_v3  ;;  %v5199_v19 = vsel %vm151_vm2, %v16436_v27, %v5198_v59  ;;  %v5191_v9 = vshrl.u32 %v16456_v58, 16  ;;  %v13641_v63 = vld [vmem:[%s18559_s1 + $0x758] sm:$0xff]   ;;  %v5375_v40 = vshrl.u32 %v5198_v59, 16 }
 0x4ec   :  { %12664 = vmatprep.mubr.msk.bf16.mxu1 %vm13859_vm0, %v18641_v5  ;;  %v5338_v25 = vsel %vm286_vm4, %v5315_v60, %v5337_v39  ;;  %12681 = vmatpush3.bf16.msra.mxu1 %v13638_v32  ;;  %v5190_v2 = vsel %vm98_vm3, %v16489_v1, %v5189_v38  ;;  %v5353_v34 = vshrl.u32 %v5199_v19, 16  ;;  %v5356_v24 = vshll.u32 %v5199_v19, 16  ;;  %v13637_v60 = vld [vmem:[%s18559_s1 + $0x6d0] sm:$0xff]  }
 0x4ed   :  { %v5329_v35 = vsel %vm286_vm4, %v16428_v31, %v5328_v37  ;;  %12682 = vmatprep.subr.bf16.mxu1 %v18641_v5  ;;  %v5344_v3 = vshrl.u32 %v5190_v2, 16  ;;  %v5347_v57 = vshll.u32 %v5190_v2, 16  ;;  %v16522_v23 = vor.u32 %v5340_v10, %v5339_v61  ;;  %v13639_v31 = vld [vmem:[%s18559_s1 + $0x718] sm:$0xff]   ;;  %v5060_v10 = vld [vmem:[#allocation2] sm:$0xfe] }
 0x4ee   :  { %11847 = vmatpush3.bf16.msra.mxu0 %v13634_v28  ;;  %v5355_v32 = vrot.slane %v5353_v34, 3  ;;  %v5358_v8 = vrot.slane %v5356_v24, 4  ;;  %v5193_v46 = vor.u32 %v5191_v9, %v5189_v38  ;;  %v5378_v28 = vshll.u32 %v5198_v59, 16  ;;  %v13643_v38 = vld [vmem:[%s18559_s1 + $0x760] sm:$0xff]  }
 0x4ef   :  { %11848 = vmatprep.subr.bf16.mxu0 %v13636_v11  ;;  %v5346_v19 = vrot.slane %v5344_v3, 3  ;;  %v5349_v56 = vrot.slane %v5347_v57, 4  ;;  %v16532_v61 = vsel %vm286_vm4, %v5319_v20, %v16522_v23  ;;  %v13640_v20 = vld [vmem:[%s18559_s1 + $0x6d8] sm:$0xff]   ;;  %v5065_v34 = vshll.u32 %v5060_v10, 16 }
 0x4f0   :  { %12683 = vmatpush3.bf16.msra.mxu1 %v13641_v63  ;;  %v16534_v2 = vor.u32 %v5358_v8, %v5355_v32  ;;  %v5366_v59 = vshrl.u32 %v5193_v46, 16  ;;  %v16548_v63 = vrot.slane %v5375_v40, 3  ;;  %v5369_v24 = vshll.u32 %v5193_v46, 16  ;;  %v13645_v40 = vld [vmem:[%s18559_s1 + $0x768] sm:$0xff]  }
 0x4f1   :  { %5583 = vmatmul.mubr.bf16.gmra.mrb[184].mxu0 %v16463_v22  ;;  %v16540_v11 = vor.u32 %v5349_v56, %v5346_v19  ;;  %12684 = vmatprep.subr.bf16.mxu1 %v18641_v5  ;;  %v13642_v22 = vld [vmem:[%s18559_s1 + $0x720] sm:$0xff]   ;;  %v18602_v3 = vrot.slane %v16400_v13, 1  ;;  %v5712_v57 = vrot.slane %v16367_v29, 1  ;;  %v16565_v46 = vrot.slane %v5191_v9, 3 }
 0x4f2   :  { %5590 = vmatprep.mubr.bf16.mxu0 %v5329_v35  ;;  %11849 = vmatpush3.bf16.msra.mxu0 %v13637_v60  ;;  %v5360_v8 = vsel %vm286_vm4, %v5337_v39, %v16534_v2  ;;  %v16555_v35 = vrot.slane %v5378_v28, 4  ;;  %v5063_v39 = vshrl.u32 %v5060_v10, 16  ;;  %v13644_v60 = vld [vmem:[%s18559_s1 + $0x6e0] sm:$0xff]   ;;  %v18669_v32 = vshll.u32 %v16456_v58, 16 }
 0x4f3   :  { %12665 = vmatmul.mubr.bf16.gmra.mrb[68].mxu1 %v5338_v25  ;;  %11850 = vmatprep.subr.bf16.mxu0 %v13639_v31  ;;  %v5351_v56 = vsel %vm286_vm4, %v5328_v37, %v16540_v11  ;;  %v5067_v25 = vrot.slane %v5065_v34, 1  ;;  %v5114_v37 = vrot.slane %v5060_v10, 1  ;;  %v5714_v10 = vor.u32 %v18602_v3, %v16397_v50  ;;  %v16597_v3 = vld [vmem:[#allocation2 + $0x28] sm:$0x3] }
 0x4f4   :  { %12668 = vmatprep.mubr.msk.bf16.mxu1 %vm13859_vm0, %v18641_v5  ;;  %12685 = vmatpush3.bf16.msra.mxu1 %v13643_v38  ;;  %v16572_v31 = vrot.slane %v18669_v32, 4  ;;  %v5368_v9 = vrot.slane %v5366_v59, 3  ;;  %v5371_v38 = vrot.slane %v5369_v24, 4  ;;  %v5715_v58 = vrot.slane %v16414_v15, 1 }
 0x4f5   :  { %12686 = vmatprep.subr.bf16.mxu1 %v18641_v5  ;;  %v5068_v19 = vor.u32 %v5067_v25, %v5063_v39  ;;  %v5116_v28 = vsel %vm151_vm2, %v5114_v37, %v16346_v49  ;;  %v5381_v39 = vor.u32 %v16555_v35, %v16548_v63  ;;  %v13648_v25 = vld [vmem:[%s18559_s1 + $0x770] sm:$0xff]   ;;  %v5717_v59 = vor.u32 %v5712_v57, %v16365_v6  ;;  %v16592_v37 = vld [vmem:[#allocation2 + $0x28] sm:$0x1] }
 0x4f6   :  { %11851 = vmatpush3.bf16.msra.mxu0 %v13640_v20  ;;  %v13646_v20 = vld [vmem:[%s18559_s1 + $0x728] sm:$0xff]   ;;  %v5708_v34 = vshll.u32 %v5116_v28, 16  ;;  %v5718_v24 = vrot.slane %v16388_v14, 1  ;;  %v5706_v32 = vshrl.u32 %v5116_v28, 16  ;;  %v5721_v35 = vrot.slane %v16481_v12, 1 }
 0x4f7   :  { %11852 = vmatprep.subr.bf16.mxu0 %v13642_v22  ;;  %v5073_v22 = vsel %vm98_vm3, %v5068_v19, %v16370_v41  ;;  %v13647_v19 = vld [vmem:[%s18559_s1 + $0x6e8] sm:$0xff]   ;;  %v16603_v30 = vsel %vm98_vm3, %v5714_v10, %v5715_v58  ;;  %v5720_v28 = vor.u32 %v5715_v58, %v16411_v16  ;;  %v5372_v45 = vor.u32 %v5371_v38, %v5368_v9  ;;  %v16628_v38 = vld [vmem:[#allocation2] sm:$0xff] }
 0x4f8   :  { %12687 = vmatpush3.bf16.msra.mxu1 %v13645_v40  ;;  %v5699_v40 = vshll.u32 %v5073_v22, 16  ;;  %v5710_v63 = vrot.slane %v5708_v34, 1  ;;  %v5697_v48 = vshrl.u32 %v5073_v22, 16  ;;  %v5723_v51 = vor.u32 %v5718_v24, %v16386_v62 }
 0x4f9   :  { %5591 = vmatmul.mubr.bf16.gmra.mrb[188].mxu0 %v16496_v53  ;;  %12688 = vmatprep.subr.bf16.mxu1 %v18641_v5  ;;  %v16606_v53 = vsel %vm98_vm3, %v5717_v59, %v5718_v24  ;;  %v5724_v22 = vrot.slane %v16471_v7, 1  ;;  %v16620_v10 = vsel %vm98_vm3, %v5720_v28, %v5721_v35  ;;  %v5123_v58 = vrot.slane %v16597_v3, 1  ;;  %v6061_v24 = vld [vmem:[#allocation2] sm:$0x80]  ;;  %v13652_v28 = vld [vmem:[%s18559_s1 + $0x738] sm:$0xff]  }
 0x4fa   :  { %5598 = vmatprep.mubr.bf16.mxu0 %v5351_v56  ;;  %11853 = vmatpush3.bf16.msra.mxu0 %v13644_v60  ;;  %v13649_v56 = vld [vmem:[%s18559_s1 + $0x730] sm:$0xff]   ;;  %v5701_v60 = vrot.slane %v5699_v40, 1  ;;  %v5711_v34 = vor.u32 %v5710_v63, %v5706_v32  ;;  %v18670_v63 = vrot.slane %v16400_v13, 1  ;;  %v13676_v3 = vld [vmem:[%s18559_s1 + $0x8b8] sm:$0xff]  }
 0x4fb   :  { %12669 = vmatmul.mubr.bf16.gmra.mrb[72].mxu1 %v5360_v8  ;;  %11854 = vmatprep.subr.bf16.mxu0 %v13646_v20  ;;  %v13651_v8 = vld [vmem:[%s18559_s1 + $0x778] sm:$0xff]   ;;  %v5102_v20 = vshll.u32 %v16592_v37, 16  ;;  %v13650_v40 = vld [vmem:[%s18559_s1 + $0x6f0] sm:$0xff]  }
 0x4fc   :  { %12672 = vmatprep.mubr.msk.bf16.mxu1 %vm13859_vm0, %v18641_v5  ;;  %12689 = vmatpush3.bf16.msra.mxu1 %v13648_v25  ;;  %v5702_v59 = vor.u32 %v5701_v60, %v5697_v48  ;;  %v16626_v9 = vsel %vm98_vm3, %v5711_v34, %v5712_v57  ;;  %v16631_v25 = vsel %vm98_vm3, %v5723_v51, %v5724_v22 }
 0x4fd   :  { %12690 = vmatprep.subr.bf16.mxu1 %v18641_v5  ;;  %v5104_v32 = vrot.slane %v5102_v20, 1  ;;  %v16640_v48 = vsel %vm151_vm2, %v16436_v27, %v5123_v58  ;;  %v5382_v57 = vsel %vm286_vm4, %v16534_v2, %v5381_v39  ;;  %v5363_v51 = vor.u32 %v16572_v31, %v16565_v46 }
 0x4fe   :  { %11855 = vmatpush3.bf16.msra.mxu0 %v13647_v19  ;;  %v5704_v19 = vsel %vm98_vm3, %v5702_v59, %v18670_v63  ;;  %v5734_v60 = vshll.u32 %v16640_v48, 16  ;;  %v5373_v34 = vsel %vm286_vm4, %v16540_v11, %v5372_v45  ;;  %v5691_v2 = vshll.u32 %v16628_v38, 16  ;;  %v13653_v11 = vld [vmem:[%s18559_s1 + $0x6f8] sm:$0xff]  }
 0x4ff   :  { %11856 = vmatprep.subr.bf16.mxu0 %v13649_v56  ;;  %v16658_v39 = vsel %vm98_vm3, %v16489_v1, %v5104_v32  ;;  %v6066_v46 = vshll.u32 %v6061_v24, 16  ;;  %v5732_v56 = vor.u32 %v5724_v22, %v16469_v0  ;;  %v6154_v45 = vrot.slane %v16397_v50, 6  ;;  %v13654_v22 = vld [vmem:[%s18559_s1 + $0x880] sm:$0xff]  }
 0x500   :  { %12691 = vmatpush3.bf16.msra.mxu1 %v13651_v8  ;;  %v5728_v31 = vshll.u32 %v16658_v39, 16  ;;  %v16664_v20 = vrot.slane %v5734_v60, 1  ;;  %v6064_v8 = vshrl.u32 %v6061_v24, 16  ;;  %v6081_v32 = vrot.slane %v6061_v24, 1 }
 0x501   :  { %5599 = vmatmul.mubr.bf16.gmra.mrb[192].mxu0 %v16532_v61  ;;  %12712 = vmatprep.subr.bf16.mxu1 %v18641_v5  ;;  %v6068_v59 = vrot.slane %v6066_v46, 1  ;;  %v6155_v61 = vrot.slane %v16400_v13, 7  ;;  %v5726_v63 = vor.u32 %v5721_v35, %v16478_v21  ;;  %v6166_v60 = vrot.slane %v16365_v6, 6 }
 0x502   :  { %5606 = vmatprep.mubr.bf16.mxu0 %v5373_v34  ;;  %11857 = vmatpush3.bf16.msra.mxu0 %v13650_v40  ;;  %v16675_v50 = vrot.slane %v5728_v31, 1  ;;  %v16679_v40 = vsel %vm98_vm3, %v5732_v56, %v16664_v20  ;;  %v5693_v46 = vrot.slane %v5691_v2, 1  ;;  %v6142_v2 = vrot.slane %v16350_v47, 6 }
 0x503   :  { %12673 = vmatmul.mubr.bf16.gmra.mrb[76].mxu1 %v5382_v57  ;;  %11858 = vmatprep.subr.bf16.mxu0 %v13652_v28  ;;  %v6069_v13 = vor.u32 %v6068_v59, %v6064_v8  ;;  %v6156_v24 = vor.u32 %v6155_v61, %v6154_v45  ;;  %v6082_v57 = vsel %vm151_vm2, %v6081_v32, %v16346_v49  ;;  %v6167_v28 = vrot.slane %v16367_v29, 7  ;;  %v13656_v61 = vld [vmem:[%s18559_s1 + $0x8c0] sm:$0xff]  }
 0x504   :  { %12692 = vmatprep.mubr.msk.bf16.mxu1 %vm13859_vm0, %v18641_v5  ;;  %v16689_v35 = vsel %vm98_vm3, %v5726_v63, %v16675_v50  ;;  %v6159_v34 = vshrl.u32 %v6082_v57, 16  ;;  %v6162_v31 = vshll.u32 %v6082_v57, 16  ;;  %v5364_v49 = vsel %vm286_vm4, %v16522_v23, %v5363_v51 }
 0x505   :  { %v6070_v6 = vsel %vm98_vm3, %v6069_v13, %v16370_v41  ;;  %v6168_v56 = vor.u32 %v6167_v28, %v6166_v60  ;;  %v5689_v29 = vshrl.u32 %v16628_v38, 16  ;;  %v6174_v60 = vrot.slane %v16411_v16, 6 }
 0x506   :  { %11859 = vmatpush3.bf16.msra.mxu0 %v13653_v11  ;;  %v6147_v8 = vshrl.u32 %v6070_v6, 16  ;;  %v6150_v45 = vshll.u32 %v6070_v6, 16  ;;  %v6161_v59 = vrot.slane %v6159_v34, 6  ;;  %v6164_v11 = vrot.slane %v6162_v31, 7  ;;  %v6062_v6 = vld [vmem:[#allocation2 + $0x28] sm:$0xff] }
 0x507   :  { %11903 = vmatprep.subr.bf16.mxu0 %v13654_v22  ;;  %v6143_v22 = vrot.slane %v16348_v33, 7  ;;  %v5694_v13 = vor.u32 %v5693_v46, %v5689_v29  ;;  %v6175_v23 = vrot.slane %v16414_v15, 7  ;;  %v6178_v38 = vrot.slane %v16386_v62, 6  ;;  %v13659_v33 = vld [vmem:[%s18559_s1 + $0x8c8] sm:$0xff]  }
 0x508   :  { %v6149_v32 = vrot.slane %v6147_v8, 6  ;;  %v6152_v63 = vrot.slane %v6150_v45, 7  ;;  %v6165_v57 = vor.u32 %v6164_v11, %v6161_v59  ;;  %v6179_v47 = vrot.slane %v16388_v14, 7  ;;  %v16724_v46 = vld [vmem:[#allocation2 + $0x28] sm:$0x7f] }
 0x509   :  { %5607 = vmatmul.mubr.bf16.gmra.mrb[196].mxu0 %v5364_v49  ;;  %v16705_v28 = vor.u32 %v6143_v22, %v6142_v2  ;;  %v6170_v34 = vrot.slane %v16354_v4, 6  ;;  %v6176_v62 = vor.u32 %v6175_v23, %v6174_v60  ;;  %v6171_v15 = vrot.slane %v16352_v42, 7  ;;  %v13655_v42 = vld [vmem:[%s18559_s1 + $0x840] sm:$0xff]  }
 0x50a   :  { %5945 = vmatprep.mubr.bf16.mxu0 %v5704_v19  ;;  %v6153_v51 = vor.u32 %v6152_v63, %v6149_v32  ;;  %v16715_v16 = vsel %vm1172_vm5, %v6165_v57, %v6168_v56  ;;  %v6180_v4 = vor.u32 %v6179_v47, %v6178_v38  ;;  %v6187_v19 = vrot.slane %v16481_v12, 7 }
 0x50b   :  { %12693 = vmatmul.mubr.bf16.vlgmr.msra.gmra.mrb[60].mxu1 %v16626_v9  ;;  %v6186_v9 = vrot.slane %v16478_v21, 6  ;;  %v5695_v31 = vsel %vm98_vm3, %v5694_v13, %v16370_v41  ;;  %v16732_v8 = vsel %vm1172_vm5, %v6156_v24, %v6176_v62  ;;  %v6172_v45 = vor.u32 %v6171_v15, %v6170_v34  ;;  %v13657_v21 = vld [vmem:[%s18559_s1 + $0x888] sm:$0xff]  }
 0x50c   :  { %12696 = vmatprep.mubr.msk.bf16.mxu1 %vm13859_vm0, %v18641_v5  ;;  %12713 = vmatpush3.bf16.msra.mxu1 %v13656_v61  ;;  %v16720_v14 = vsel %vm1172_vm5, %v6153_v51, %v6156_v24  ;;  %v6190_v59 = vrot.slane %v16469_v0, 6  ;;  %v16739_v12 = vsel %vm1172_vm5, %v6168_v56, %v6180_v4  ;;  %v6191_v41 = vrot.slane %v16471_v7, 7  ;;  %v13662_v24 = vld [vmem:[%s18559_s1 + $0x8d0] sm:$0xff]  }
 0x50d   :  { %12714 = vmatprep.subr.bf16.mxu1 %v18641_v5  ;;  %v6188_v49 = vor.u32 %v6187_v19, %v6186_v9  ;;  %v6182_v29 = vrot.slane %v16363_v18, 6  ;;  %v16748_v0 = vsel %vm1172_vm5, %v16705_v28, %v6172_v45  ;;  %v6183_v61 = vrot.slane %v16359_v17, 7  ;;  %v13658_v17 = vld [vmem:[%s18559_s1 + $0x848] sm:$0xff]   ;;  %v13667_v19 = vld [vmem:[%s18559_s1 + $0x8e0] sm:$0xff]  }
 0x50e   :  { %v6072_v11 = vshll.u32 %v16724_v46, 16  ;;  %v16752_v56 = vrot.slane %v6062_v6, 1  ;;  %v6192_v7 = vor.u32 %v6191_v41, %v6190_v59  ;;  %v6194_v2 = vrot.slane %v16454_v54, 6 }
 0x50f   :  { %v16756_v18 = vsel %vm1172_vm5, %v6176_v62, %v6188_v49  ;;  %v6195_v32 = vrot.slane %v16432_v26, 7  ;;  %v6184_v63 = vor.u32 %v6183_v61, %v6182_v29  ;;  %v5106_v59 = vshrl.u32 %v16592_v37, 16  ;;  %v13671_v37 = vld [vmem:[%s18559_s1 + $0x868] sm:$0xff]  }
 0x510   :  { %12715 = vmatpush3.bf16.msra.mxu1 %v13659_v33  ;;  %v16766_v22 = vrot.slane %v6072_v11, 1  ;;  %v6084_v60 = vsel %vm151_vm2, %v16436_v27, %v16752_v56  ;;  %v16776_v26 = vsel %vm1172_vm5, %v6180_v4, %v6192_v7  ;;  %v13665_v27 = vld [vmem:[%s18559_s1 + $0x8d8] sm:$0xff]   ;;  %v13661_v33 = vld [vmem:[%s18559_s1 + $0x850] sm:$0xff]   ;;  %v5738_v41 = vshrl.u32 %v16658_v39, 16 }
 0x511   :  { %5946 = vmatmul.mubr.bf16.vlgmr.msra.gmra.mrb[200].mxu0 %v5695_v31  ;;  %12716 = vmatprep.subr.bf16.mxu1 %v18641_v5  ;;  %v6208_v54 = vshrl.u32 %v6084_v60, 16  ;;  %v6211_v13 = vshll.u32 %v6084_v60, 16  ;;  %v16778_v57 = vor.u32 %v6195_v32, %v6194_v2  ;;  %v5742_v29 = vshll.u32 %v5106_v59, 16  ;;  %v13674_v2 = vld [vmem:[%s18559_s1 + $0x870] sm:$0xff]   ;;  %v6059_v32 = vld [vmem:[#allocation2] sm:$0xc0] }
 0x512   :  { %5953 = vmatprep.mubr.bf16.mxu0 %v16603_v30  ;;  %11904 = vmatpush3.bf16.msra.mxu0 %v13655_v42  ;;  %v13660_v30 = vld [vmem:[%s18559_s1 + $0x890] sm:$0xff]   ;;  %v6075_v23 = vsel %vm98_vm3, %v16489_v1, %v16766_v22  ;;  %v13663_v1 = vld [vmem:[%s18559_s1 + $0x898] sm:$0xff]   ;;  %v5740_v61 = vor.u32 %v5738_v41, %v16675_v50 }
 0x513   :  { %12697 = vmatmul.mubr.bf16.gmra.mrb[64].mxu1 %v16606_v53  ;;  %11905 = vmatprep.subr.bf16.mxu0 %v13657_v21  ;;  %v16786_v53 = vsel %vm1172_vm5, %v6172_v45, %v6184_v63  ;;  %v6199_v38 = vshrl.u32 %v6075_v23, 16  ;;  %v6202_v51 = vshll.u32 %v6075_v23, 16  ;;  %v6210_v47 = vrot.slane %v6208_v54, 6  ;;  %v13664_v42 = vld [vmem:[%s18559_s1 + $0x858] sm:$0xff]   ;;  %v13670_v21 = vld [vmem:[%s18559_s1 + $0x8a8] sm:$0xff]  }
 0x514   :  { %12700 = vmatprep.mubr.msk.bf16.mxu1 %vm13859_vm0, %v18641_v5  ;;  %12717 = vmatpush3.bf16.msra.mxu1 %v13662_v24  ;;  %v6213_v34 = vrot.slane %v6211_v13, 7  ;;  %v16797_v62 = vsel %vm1172_vm5, %v6184_v63, %v16778_v57  ;;  %v13673_v24 = vld [vmem:[%s18559_s1 + $0x8b0] sm:$0xff]   ;;  %v6135_v63 = vshrl.u32 %v6059_v32, 16 }
 0x515   :  { %12718 = vmatprep.subr.bf16.mxu1 %v18641_v5  ;;  %v6201_v15 = vrot.slane %v6199_v38, 6  ;;  %v6204_v4 = vrot.slane %v6202_v51, 7  ;;  %v6217_v51 = vrot.slane %v6072_v11, 7 }
 0x516   :  { %11906 = vmatpush3.bf16.msra.mxu0 %v13658_v17  ;;  %v16802_v9 = vor.u32 %v6213_v34, %v6210_v47  ;;  %v13677_v17 = vld [vmem:[%s18559_s1 + $0x878] sm:$0xff]   ;;  %v6137_v60 = vrot.slane %v6135_v63, 6 }
 0x517   :  { %11907 = vmatprep.subr.bf16.mxu0 %v13660_v30  ;;  %v16809_v6 = vor.u32 %v6204_v4, %v6201_v15 }
 0x518   :  { %12719 = vmatpush3.bf16.msra.mxu1 %v13665_v27  ;;  %v16813_v31 = vsel %vm1172_vm5, %v6192_v7, %v16802_v9 }
 0x519   :  { %5954 = vmatmul.mubr.bf16.gmra.mrb[204].mxu0 %v16394_v52  ;;  %12720 = vmatprep.subr.bf16.mxu1 %v18641_v5  ;;  %v13666_v52 = vld [vmem:[%s18559_s1 + $0x8a0] sm:$0xff]   ;;  %v16825_v45 = vsel %vm1172_vm5, %v6188_v49, %v16809_v6  ;;  %v13672_v49 = vld [vmem:[%s18559_s1 + $0x8f0] sm:$0xff]  }
 0x51a   :  { %5961 = vmatprep.mubr.bf16.mxu0 %v16620_v10  ;;  %11908 = vmatpush3.bf16.msra.mxu0 %v13661_v33  ;;  %v13669_v10 = vld [vmem:[%s18559_s1 + $0x8e8] sm:$0xff]  }
 0x51b   :  { %12701 = vmatmul.mubr.bf16.gmra.mrb[68].mxu1 %v16631_v25  ;;  %11909 = vmatprep.subr.bf16.mxu0 %v13663_v1  ;;  %v13668_v25 = vld [vmem:[%s18559_s1 + $0x860] sm:$0xff]  }
 0x51c   :  { %12704 = vmatprep.mubr.msk.bf16.mxu1 %vm13859_vm0, %v18641_v5  ;;  %12721 = vmatpush3.bf16.msra.mxu1 %v13667_v19 }
 0x51d   :  { %12722 = vmatprep.subr.bf16.mxu1 %v18641_v5 }
 0x51e   :  { %11910 = vmatpush3.bf16.msra.mxu0 %v13664_v42 }
 0x51f   :  { %11911 = vmatprep.subr.bf16.mxu0 %v13666_v52 }
 0x520   :  { %12723 = vmatpush3.bf16.msra.mxu1 %v13669_v10 }
 0x521   :  { %5962 = vmatmul.mubr.bf16.gmra.mrb[208].mxu0 %v16405_v43  ;;  %12724 = vmatprep.subr.bf16.mxu1 %v18641_v5  ;;  %v5746_v43 = vshrl.u32 %v16640_v48, 16  ;;  %v5744_v48 = vrot.slane %v5742_v29, 1 }
 0x522   :  { %5969 = vmatprep.mubr.bf16.mxu0 %v16689_v35  ;;  %11912 = vmatpush3.bf16.msra.mxu0 %v13668_v25  ;;  %v5750_v35 = vshll.u32 %v5123_v58, 16 }
 0x523   :  { %12705 = vmatmul.mubr.bf16.gmra.mrb[72].mxu1 %v16679_v40  ;;  %11913 = vmatprep.subr.bf16.mxu0 %v13670_v21  ;;  %v13675_v40 = vld [vmem:[%s18559_s1 + $0x8f8] sm:$0xff]   ;;  %v5748_v7 = vor.u32 %v5746_v43, %v16664_v20  ;;  %v5745_v50 = vsel %vm98_vm3, %v5740_v61, %v5744_v48 }
 0x524   :  { %12708 = vmatprep.mubr.msk.bf16.mxu1 %vm13859_vm0, %v18641_v5  ;;  %12725 = vmatpush3.bf16.msra.mxu1 %v13672_v49  ;;  %v5752_v58 = vrot.slane %v5750_v35, 1 }
 0x525   :  { %12726 = vmatprep.subr.bf16.mxu1 %v18641_v5 }
 0x526   :  { %11914 = vmatpush3.bf16.msra.mxu0 %v13671_v37  ;;  %v5753_v20 = vsel %vm98_vm3, %v5748_v7, %v5752_v58 }
 0x527   :  { %11915 = vmatprep.subr.bf16.mxu0 %v13673_v24 }
 0x528   :  { %12727 = vmatpush3.bf16.msra.mxu1 %v13675_v40 }
 0x529   :  { %5970 = vmatmul.mubr.bf16.gmra.mrb[212].mxu0 %v16467_v55  ;;  %12748 = vmatprep.subr.bf16.mxu1 %v18641_v5  ;;  %v6138_v55 = vshll.u32 %v6059_v32, 16 }
 0x52a   :  { %5977 = vmatprep.mubr.bf16.mxu0 %v5745_v50  ;;  %11916 = vmatpush3.bf16.msra.mxu0 %v13674_v2 }
 0x52b   :  { %12709 = vmatmul.mubr.bf16.gmra.mrb[76].mxu1 %v5753_v20  ;;  %11917 = vmatprep.subr.bf16.mxu0 %v13676_v3  ;;  %v6140_v30 = vrot.slane %v6138_v55, 7  ;;  %v13678_v55 = vld [vmem:[%s18559_s1 + $0xa00] sm:$0xff]  }
 0x52c   :  { %12728 = vmatprep.mubr.msk.bf16.mxu1 %vm13859_vm0, %v18641_v5 }
 0x52d   :  { %v6141_v54 = vor.u32 %v6140_v30, %v6137_v60  ;;  %v13679_v60 = vld [vmem:[%s18559_s1 + $0x9c0] sm:$0xff]  }
 0x52e   :  { %11918 = vmatpush3.bf16.msra.mxu0 %v13677_v17  ;;  %v13680_v30 = vld [vmem:[%s18559_s1 + $0xa40] sm:$0xff]  }
 0x52f   :  { %v6145_v13 = vsel %vm1172_vm5, %v6141_v54, %v16705_v28  ;;  %v13681_v54 = vld [vmem:[%s18559_s1 + $0xa08] sm:$0xff]   ;;  %11962 = vmatprep.subr.bf16.mxu0 %v13678_v55 }
 0x531   :  { %5978 = vmatmul.mubr.bf16.gmra.mrb[216].mxu0 %v16658_v39  ;;  %v6076_v39 = vshrl.u32 %v16724_v46, 16 }
 0x532   :  { %6429 = vmatprep.mubr.bf16.mxu0 %v16720_v14 }
 0x533   :  { %12729 = vmatmul.mubr.bf16.vlgmr.msra.gmra.mrb[60].mxu1 %v16715_v16  ;;  %v6078_v16 = vor.u32 %v6076_v39, %v16766_v22  ;;  %v6216_v38 = vrot.slane %v6076_v39, 6  ;;  %v13683_v39 = vld [vmem:[%s18559_s1 + $0xa48] sm:$0xff]  }
 0x534   :  { %12732 = vmatprep.mubr.msk.bf16.mxu1 %vm13859_vm0, %v18641_v5  ;;  %12749 = vmatpush3.bf16.msra.mxu1 %v13680_v30 }
 0x535   :  { %v6221_v28 = vshrl.u32 %v6078_v16, 16  ;;  %v6224_v14 = vshll.u32 %v6078_v16, 16  ;;  %v6218_v47 = vor.u32 %v6217_v51, %v6216_v38  ;;  %12750 = vmatprep.subr.bf16.mxu1 %v18641_v5  ;;  %v13687_v38 = vld [vmem:[%s18559_s1 + $0xa18] sm:$0xff]  }
 0x537   :  { %v6223_v27 = vrot.slane %v6221_v28, 6  ;;  %v6226_v23 = vrot.slane %v6224_v14, 7  ;;  %v6219_v34 = vsel %vm1172_vm5, %v16778_v57, %v6218_v47  ;;  %v13682_v28 = vld [vmem:[%s18559_s1 + $0x9c8] sm:$0xff]   ;;  %v13688_v47 = vld [vmem:[%s18559_s1 + $0x9d8] sm:$0xff]  }
 0x538   :  { %12751 = vmatpush3.bf16.msra.mxu1 %v13683_v39 }
 0x539   :  { %6430 = vmatmul.mubr.bf16.vlgmr.msra.gmra.mrb[220].mxu0 %v6145_v13  ;;  %12752 = vmatprep.subr.bf16.mxu1 %v18641_v5 }
 0x53a   :  { %6437 = vmatprep.mubr.bf16.mxu0 %v16732_v8  ;;  %v6230_v8 = vshrl.u32 %v16752_v56, 16  ;;  %11963 = vmatpush3.bf16.msra.mxu0 %v13679_v60 }
 0x53b   :  { %12733 = vmatmul.mubr.bf16.gmra.mrb[64].mxu1 %v16739_v12  ;;  %v6233_v12 = vshll.u32 %v16752_v56, 16  ;;  %11964 = vmatprep.subr.bf16.mxu0 %v13681_v54 }
 0x53c   :  { %12736 = vmatprep.mubr.msk.bf16.mxu1 %vm13859_vm0, %v18641_v5 }
 0x53d   :  { %v6235_v22 = vrot.slane %v6233_v12, 7  ;;  %v13684_v12 = vld [vmem:[%s18559_s1 + $0xa10] sm:$0xff]  }
 0x53e   :  { %11965 = vmatpush3.bf16.msra.mxu0 %v13682_v28 }
 0x53f   :  { %11966 = vmatprep.subr.bf16.mxu0 %v13684_v12 }
 0x541   :  { %6438 = vmatmul.mubr.bf16.gmra.mrb[224].mxu0 %v16748_v0  ;;  %v6232_v0 = vrot.slane %v6230_v8, 6 }
 0x542   :  { %6445 = vmatprep.mubr.bf16.mxu0 %v16756_v18  ;;  %v6227_v18 = vor.u32 %v6226_v23, %v6223_v27 }
 0x543   :  { %12737 = vmatmul.mubr.bf16.gmra.mrb[68].mxu1 %v16776_v26  ;;  %v6236_v26 = vor.u32 %v6235_v22, %v6232_v0  ;;  %v13686_v22 = vld [vmem:[%s18559_s1 + $0xa50] sm:$0xff]  }
 0x544   :  { %12740 = vmatprep.mubr.msk.bf16.mxu1 %vm13859_vm0, %v18641_v5  ;;  %v6228_v56 = vsel %vm1172_vm5, %v16809_v6, %v6227_v18  ;;  %v13685_v18 = vld [vmem:[%s18559_s1 + $0x9d0] sm:$0xff]   ;;  %12753 = vmatpush3.bf16.msra.mxu1 %v13686_v22 }
 0x545   :  { %11967 = vmatpush3.bf16.msra.mxu0 %v13685_v18  ;;  %12754 = vmatprep.subr.bf16.mxu1 %v18641_v5 }
 0x546   :  { %11968 = vmatprep.subr.bf16.mxu0 %v13687_v38 }
 0x549   :  { %6446 = vmatmul.mubr.bf16.gmra.mrb[228].mxu0 %v16786_v53  ;;  %v6237_v53 = vsel %vm1172_vm5, %v16802_v9, %v6236_v26 }
 0x54a   :  { %6453 = vmatprep.mubr.bf16.mxu0 %v16825_v45  ;;  %11969 = vmatpush3.bf16.msra.mxu0 %v13688_v47 }
 0x54b   :  { %12741 = vmatmul.mubr.bf16.gmra.mrb[72].mxu1 %v16813_v31 }
 0x54c   :  { %12744 = vmatprep.mubr.msk.bf16.mxu1 %vm13859_vm0, %v18641_v5 }
 0x551   :  { %6454 = vmatmul.mubr.bf16.gmra.mrb[232].mxu0 %v16797_v62 }
 0x552   :  { %6461 = vmatprep.mubr.bf16.mxu0 %v6228_v56  ;;  %v13689_v56 = vld [vmem:[%s18559_s1 + $0xa58] sm:$0xff]  }
 0x553   :  { %12745 = vmatmul.mubr.bf16.gmra.mrb[76].mxu1 %v6237_v53 }
 0x554   :  { %12764 = vmatprep.mubr.msk.bf16.mxu1 %vm13859_vm0, %v18641_v5  ;;  %12755 = vmatpush3.bf16.msra.mxu1 %v13689_v56 }
 0x555   :  { %12756 = vmatprep.subr.bf16.mxu1 %v18641_v5 }
 0x559   :  { %6462 = vmatmul.mubr.bf16.gmra.mrb[236].mxu0 %v6219_v34 }
 0x5bc   :  { %v11801_v46 = vpop.f32.mrb[180].mxu0 }
 0x5bd   :  { %v11802_v11 = vpop.f32.mrb[181].mxu0 }
 0x5be   :  { %v11803_v33 = vadd.f32 %v11802_v11, %v11801_v46  ;;  %v11804_v62 = vpop.f32.mrb[182].mxu0  ;;  %v13690_v11 = vld [vmem:[%s18559_s1 + $0xa20] sm:$0xff]  }
 0x5bf   :  { %v11805_v1 = vpop.f32.mrb[183].mxu0  ;;  %11970 = vmatprep.subr.bf16.mxu0 %v13690_v11 }
 0x5c0   :  { %v11806_v15 = vadd.f32 %v11805_v1, %v11804_v62 }
 0x5c4   :  { %v11807_v4 = vpop.f32.mrb[184].mxu0 }
 0x5c5   :  { %v11808_v19 = vpop.f32.mrb[185].mxu0 }
 0x5c6   :  { %v11809_v6 = vadd.f32 %v11808_v19, %v11807_v4  ;;  %v11810_v31 = vpop.f32.mrb[186].mxu0  ;;  %v13692_v4 = vld [vmem:[%s18559_s1 + $0x9e0] sm:$0xff]  }
 0x5c7   :  { %v11811_v9 = vpop.f32.mrb[187].mxu0  ;;  %11971 = vmatpush3.bf16.msra.mxu0 %v13692_v4 }
 0x5c8   :  { %v11812_v42 = vadd.f32 %v11811_v9, %v11810_v31  ;;  %v13693_v9 = vld [vmem:[%s18559_s1 + $0xa68] sm:$0xff]  }
 0x5cc   :  { %v11813_v52 = vpop.f32.mrb[188].mxu0 }
 0x5cd   :  { %v11814_v45 = vpop.f32.mrb[189].mxu0 }
 0x5ce   :  { %v16916_v10 = vadd.f32 %v11814_v45, %v11813_v52  ;;  %v11816_v25 = vpop.f32.mrb[190].mxu0  ;;  %v13695_v52 = vld [vmem:[%s18559_s1 + $0x9e8] sm:$0xff]  }
 0x5cf   :  { %v11817_v59 = vpop.f32.mrb[191].mxu0 }
 0x5d0   :  { %v16918_v57 = vadd.f32 %v11817_v59, %v11816_v25  ;;  %v13697_v25 = vld [vmem:[%s18559_s1 + $0xa30] sm:$0xff]  }
 0x5d4   :  { %v11819_v21 = vpop.f32.mrb[192].mxu0 }
 0x5d5   :  { %v11820_v49 = vpop.f32.mrb[193].mxu0 }
 0x5d6   :  { %v16920_v37 = vadd.f32 %v11820_v49, %v11819_v21  ;;  %v11822_v41 = vpop.f32.mrb[194].mxu0  ;;  %v13696_v49 = vld [vmem:[%s18559_s1 + $0xa70] sm:$0xff]  }
 0x5d7   :  { %v11823_v29 = vpop.f32.mrb[195].mxu0 }
 0x5d8   :  { %v16922_v24 = vadd.f32 %v11823_v29, %v11822_v41  ;;  %v13698_v41 = vld [vmem:[%s18559_s1 + $0x9f0] sm:$0xff]  }
 0x5dc   :  { %v11825_v43 = vpop.f32.mrb[196].mxu0 }
 0x5dd   :  { %v11826_v35 = vpop.f32.mrb[197].mxu0 }
 0x5de   :  { %v16924_v40 = vadd.f32 %v11826_v35, %v11825_v43  ;;  %v11828_v61 = vpop.f32.mrb[198].mxu0  ;;  %v13699_v35 = vld [vmem:[%s18559_s1 + $0xa78] sm:$0xff]  }
 0x5df   :  { %v11829_v7 = vpop.f32.mrb[199].mxu0 }
 0x5e0   :  { %v16926_v2 = vadd.f32 %v11829_v7, %v11828_v61 }
 0x5e4   :  { %v11860_v48 = vpop.f32.mrb[200].mxu0 }
 0x5e5   :  { %v11861_v3 = vpop.f32.mrb[201].mxu0 }
 0x5e6   :  { %v11862_v58 = vadd.f32 %v11861_v3, %v11860_v48  ;;  %v11863_v50 = vpop.f32.mrb[202].mxu0 }
 0x5e7   :  { %v11864_v32 = vpop.f32.mrb[203].mxu0 }
 0x5e8   :  { %v16928_v20 = vadd.f32 %v11862_v58, %v11803_v33  ;;  %v11865_v17 = vadd.f32 %v11864_v32, %v11863_v50  ;;  %v13702_v58 = vld [vmem:[%s18559_s1 + $0x940] sm:$0xff]  }
 0x5ea   :  { %v16930_v63 = vadd.f32 %v11865_v17, %v11806_v15  ;;  %v13691_v15 = vld [vmem:[%s18559_s1 + $0xa60] sm:$0xff]  }
 0x5eb   :  { %12757 = vmatpush3.bf16.msra.mxu1 %v13691_v15 }
 0x5ec   :  { %v11866_v13 = vpop.f32.mrb[204].mxu0  ;;  %12758 = vmatprep.subr.bf16.mxu1 %v18641_v5 }
 0x5ed   :  { %v11867_v16 = vpop.f32.mrb[205].mxu0 }
 0x5ee   :  { %v11868_v14 = vadd.f32 %v11867_v16, %v11866_v13  ;;  %v11869_v8 = vpop.f32.mrb[206].mxu0 }
 0x5ef   :  { %v11870_v27 = vpop.f32.mrb[207].mxu0  ;;  %12759 = vmatpush3.bf16.msra.mxu1 %v13693_v9 }
 0x5f0   :  { %v16954_v23 = vadd.f32 %v11868_v14, %v11809_v6  ;;  %v11871_v0 = vadd.f32 %v11870_v27, %v11869_v8  ;;  %v13694_v6 = vld [vmem:[%s18559_s1 + $0xa28] sm:$0xff]   ;;  %12760 = vmatprep.subr.bf16.mxu1 %v18641_v5 }
 0x5f1   :  { %11972 = vmatprep.subr.bf16.mxu0 %v13694_v6 }
 0x5f2   :  { %v16963_v26 = vadd.f32 %v11871_v0, %v11812_v42  ;;  %11973 = vmatpush3.bf16.msra.mxu0 %v13695_v52 }
 0x5f3   :  { %11974 = vmatprep.subr.bf16.mxu0 %v13697_v25  ;;  %12761 = vmatpush3.bf16.msra.mxu1 %v13696_v49 }
 0x5f4   :  { %v11872_v51 = vpop.f32.mrb[208].mxu0  ;;  %12762 = vmatprep.subr.bf16.mxu1 %v18641_v5 }
 0x5f5   :  { %v11873_v53 = vpop.f32.mrb[209].mxu0 }
 0x5f6   :  { %v11874_v34 = vadd.f32 %v11873_v53, %v11872_v51  ;;  %v11875_v46 = vpop.f32.mrb[210].mxu0  ;;  %11975 = vmatpush3.bf16.msra.mxu0 %v13698_v41 }
 0x5f7   :  { %v11876_v33 = vpop.f32.mrb[211].mxu0  ;;  %12763 = vmatpush3.bf16.msra.mxu1 %v13699_v35 }
 0x5f8   :  { %v16979_v62 = vadd.f32 %v11874_v34, %v16916_v10  ;;  %v11877_v1 = vadd.f32 %v11876_v33, %v11875_v46  ;;  %12784 = vmatprep.subr.bf16.mxu1 %v18641_v5 }
 0x5fa   :  { %v16989_v19 = vadd.f32 %v11877_v1, %v16918_v57 }
 0x5fc   :  { %v11878_v31 = vpop.f32.mrb[212].mxu0 }
 0x5fd   :  { %v11879_v42 = vpop.f32.mrb[213].mxu0 }
 0x5fe   :  { %v11880_v45 = vadd.f32 %v11879_v42, %v11878_v31  ;;  %v11881_v10 = vpop.f32.mrb[214].mxu0 }
 0x5ff   :  { %v11882_v59 = vpop.f32.mrb[215].mxu0 }
 0x600   :  { %v17005_v57 = vadd.f32 %v11880_v45, %v16920_v37  ;;  %v11883_v21 = vadd.f32 %v11882_v59, %v11881_v10  ;;  %v13700_v37 = vld [vmem:[%s18559_s1 + $0xa38] sm:$0xff]  }
 0x601   :  { %11976 = vmatprep.subr.bf16.mxu0 %v13700_v37  ;;  %v18671_v59 = vld [vmem:[#allocation7_spill] sm:$0xff] }
 0x602   :  { %v17015_v29 = vadd.f32 %v11883_v21, %v16922_v24  ;;  %v13701_v24 = vld [vmem:[%s18559_s1 + $0x9f8] sm:$0xff]  }
 0x603   :  { %11977 = vmatpush3.bf16.msra.mxu0 %v13701_v24 }
 0x604   :  { %v11884_v43 = vpop.f32.mrb[216].mxu0  ;;  %12021 = vmatprep.subr.bf16.mxu0 %v13702_v58 }
 0x605   :  { %v11885_v61 = vpop.f32.mrb[217].mxu0 }
 0x606   :  { %v11886_v7 = vadd.f32 %v11885_v61, %v11884_v43  ;;  %v11887_v48 = vpop.f32.mrb[218].mxu0  ;;  %v6504_v3 = vpop.f32.mrb[60].mxu1  ;;  %v18672_v43 = vld [vmem:[#allocation15_spill] sm:$0xff] }
 0x607   :  { %v11888_v50 = vpop.f32.mrb[219].mxu0  ;;  %v12730_v32 = vpop.f32.mrb[61].mxu1 }
 0x608   :  { %v17031_v17 = vadd.f32 %v11886_v7, %v16924_v40  ;;  %v11889_v55 = vadd.f32 %v11888_v50, %v11887_v48  ;;  %v6507_v60 = vpop.f32.mrb[62].mxu1  ;;  %v18676_v50 = vld [vmem:[#allocation17_spill] sm:$0xff] }
 0x609   :  { %v12731_v30 = vpop.f32.mrb[63].mxu1 }
 0x60a   :  { %v17035_v54 = vadd.f32 %v11889_v55, %v16926_v2  ;;  %v18678_v55 = vld [vmem:[#allocation8_spill] sm:$0xff] }
 0x60c   :  { %v11919_v13 = vpop.f32.mrb[220].mxu0 }
 0x60d   :  { %v11920_v39 = vpop.f32.mrb[221].mxu0 }
 0x60e   :  { %v11921_v16 = vadd.f32 %v11920_v39, %v11919_v13  ;;  %v11922_v28 = vpop.f32.mrb[222].mxu0  ;;  %v6512_v14 = vpop.f32.mrb[64].mxu1 }
 0x60f   :  { %v11923_v8 = vpop.f32.mrb[223].mxu0  ;;  %v12734_v12 = vpop.f32.mrb[65].mxu1 }
 0x610   :  { %v13055_v40 = vadd.f32 %v16928_v20, %v11921_v16  ;;  %v11924_v27 = vadd.f32 %v11923_v8, %v11922_v28  ;;  %v6515_v0 = vpop.f32.mrb[66].mxu1  ;;  %v18679_v12 = vld [vmem:[#allocation18_spill] sm:$0xff] }
 0x611   :  { %v12735_v22 = vpop.f32.mrb[67].mxu1 }
 0x612   :  { %v13056_v18 = vadd.f32 %v13055_v40, %v6504_v3  ;;  %v13058_v38 = vadd.f32 %v16930_v63, %v11924_v27  ;;  %v18674_v3 = vld [vmem:[#allocation16_spill] sm:$0xff] }
 0x614   :  { %v13059_v51 = vadd.f32 %v13058_v38, %v6507_v60  ;;  %v11925_v56 = vpop.f32.mrb[224].mxu0  ;;  %v6553_v20 = vmax.f32 %v13056_v18, 0.0  ;;  %v18681_v18 = vld [vmem:[#allocation9_spill] sm:$0xff] }
 0x615   :  { %v11926_v2 = vpop.f32.mrb[225].mxu0 }
 0x616   :  { %v11927_v53 = vadd.f32 %v11926_v2, %v11925_v56  ;;  %v11928_v47 = vpop.f32.mrb[226].mxu0  ;;  %v6520_v34 = vpop.f32.mrb[68].mxu1  ;;  %v6554_v46 = vmax.f32 %v13059_v51, 0.0  ;;  %v6563_v10 = vmul.f32 %v6553_v20, %v14686_v44 }
 0x617   :  { %v11929_v11 = vpop.f32.mrb[227].mxu0  ;;  %v12738_v33 = vpop.f32.mrb[69].mxu1 }
 0x618   :  { %v13061_v1 = vadd.f32 %v16954_v23, %v11927_v53  ;;  %v11930_v15 = vadd.f32 %v11929_v11, %v11928_v47  ;;  %v6523_v4 = vpop.f32.mrb[70].mxu1  ;;  %v6564_v63 = vmul.f32 %v6554_v46, %v14690_v36  ;;  %v17049_v58 = vadd.f32 %v6563_v10, %v18674_v3  ;;  %v18682_v11 = vld [vmem:[#allocation19_spill] sm:$0xff]  ;;  %v18685_v10 = vld [vmem:[#allocation20_spill] sm:$0xff] }
 0x619   :  { %v12739_v6 = vpop.f32.mrb[71].mxu1 }
 0x61a   :  { %v13062_v31 = vadd.f32 %v13061_v1, %v6512_v14  ;;  %v13064_v9 = vadd.f32 %v16963_v26, %v11930_v15  ;;  %v17045_v35 = vadd.f32 %v6564_v63, %v18672_v43  ;;  %18675 = vst [vmem:[#allocation16_spill] sm:$0xff] %v17049_v58 }
 0x61c   :  { %v6555_v42 = vmax.f32 %v13062_v31, 0.0  ;;  %v13065_v52 = vadd.f32 %v13064_v9, %v6515_v0  ;;  %v11931_v45 = vpop.f32.mrb[228].mxu0  ;;  %18673 = vst [vmem:[#allocation15_spill] sm:$0xff] %v17045_v35  ;;  %v6620_v39 = vmul.f32 %v17045_v35, %v17045_v35  ;;  %v6603_v22 = vadd.f32 %v17045_v35, %v17049_v58  ;;  %v18684_v31 = vld [vmem:[#allocation10_spill] sm:$0xff] }
 0x61d   :  { %v11932_v25 = vpop.f32.mrb[229].mxu0 }
 0x61e   :  { %v6565_v21 = vmul.f32 %v6555_v42, %v18671_v59  ;;  %v6556_v49 = vmax.f32 %v13065_v52, 0.0  ;;  %v11933_v41 = vadd.f32 %v11932_v25, %v11931_v45  ;;  %v11934_v23 = vpop.f32.mrb[230].mxu0  ;;  %v6528_v37 = vpop.f32.mrb[72].mxu1 }
 0x61f   :  { %v11935_v61 = vpop.f32.mrb[231].mxu0  ;;  %v12742_v24 = vpop.f32.mrb[73].mxu1 }
 0x620   :  { %v13067_v26 = vadd.f32 %v16979_v62, %v11933_v41  ;;  %v11936_v7 = vadd.f32 %v11935_v61, %v11934_v23  ;;  %v6531_v48 = vpop.f32.mrb[74].mxu1  ;;  %v17052_v32 = vadd.f32 %v6565_v21, %v18676_v50  ;;  %v6566_v60 = vmul.f32 %v6556_v49, %v18678_v55  ;;  %v18687_v24 = vld [vmem:[#allocation11_spill] sm:$0xff] }
 0x621   :  { %v12743_v30 = vpop.f32.mrb[75].mxu1  ;;  %v6619_v62 = vmul.f32 %v17049_v58, %v17049_v58 }
 0x622   :  { %18677 = vst [vmem:[#allocation17_spill] sm:$0xff] %v17052_v32  ;;  %v13068_v13 = vadd.f32 %v13067_v26, %v6520_v34  ;;  %v13070_v16 = vadd.f32 %v16989_v19, %v11936_v7  ;;  %v6621_v8 = vmul.f32 %v17052_v32, %v17052_v32  ;;  %v17063_v40 = vadd.f32 %v6566_v60, %v18679_v12  ;;  %v18688_v30 = vld [vmem:[#allocation21_spill] sm:$0xff] }
 0x623   :  { %v6629_v2 = vadd.f32 %v6620_v39, %v6619_v62  ;;  %v6604_v46 = vadd.f32 %v6603_v22, %v17052_v32  ;;  %v18690_v39 = vld [vmem:[#allocation12_spill] sm:$0xff] }
 0x624   :  { %v6557_v28 = vmax.f32 %v13068_v13, 0.0  ;;  %v11937_v14 = vpop.f32.mrb[232].mxu0  ;;  %18680 = vst [vmem:[#allocation18_spill] sm:$0xff] %v17063_v40  ;;  %v13071_v27 = vadd.f32 %v13070_v16, %v6523_v4  ;;  %v6622_v6 = vmul.f32 %v17063_v40, %v17063_v40 }
 0x625   :  { %v11938_v0 = vpop.f32.mrb[233].mxu0  ;;  %v6630_v20 = vadd.f32 %v6629_v2, %v6621_v8  ;;  %v18691_v8 = vld [vmem:[#allocation22_spill] sm:$0xff] }
 0x626   :  { %v6567_v38 = vmul.f32 %v6557_v28, %v18681_v18  ;;  %v11939_v51 = vadd.f32 %v11938_v0, %v11937_v14  ;;  %v11940_v19 = vpop.f32.mrb[234].mxu0  ;;  %v6536_v56 = vpop.f32.mrb[76].mxu1  ;;  %v6558_v53 = vmax.f32 %v13071_v27, 0.0 }
 0x627   :  { %v11941_v47 = vpop.f32.mrb[235].mxu0  ;;  %v12746_v34 = vpop.f32.mrb[77].mxu1  ;;  %v6631_v23 = vadd.f32 %v6630_v20, %v6622_v6  ;;  %v18697_v6 = vld [vmem:[#allocation24_spill] sm:$0xff] }
 0x628   :  { %v17070_v33 = vadd.f32 %v6567_v38, %v18682_v11  ;;  %v13073_v1 = vadd.f32 %v17005_v57, %v11939_v51  ;;  %v11942_v15 = vadd.f32 %v11941_v47, %v11940_v19  ;;  %v6539_v4 = vpop.f32.mrb[78].mxu1  ;;  %v6568_v9 = vmul.f32 %v6558_v53, %v18684_v31  ;;  %v18693_v53 = vld [vmem:[#allocation13_spill] sm:$0xff]  ;;  %v18694_v11 = vld [vmem:[#allocation23_spill] sm:$0xff] }
 0x629   :  { %v12747_v63 = vpop.f32.mrb[79].mxu1  ;;  %v6605_v57 = vadd.f32 %v6604_v46, %v17063_v40 }
 0x62a   :  { %18683 = vst [vmem:[#allocation19_spill] sm:$0xff] %v17070_v33  ;;  %v13074_v42 = vadd.f32 %v13073_v1, %v6528_v37  ;;  %v13076_v52 = vadd.f32 %v17015_v29, %v11942_v15  ;;  %v6623_v45 = vmul.f32 %v17070_v33, %v17070_v33  ;;  %v17080_v25 = vadd.f32 %v6568_v9, %v18685_v10 }
 0x62b   :  { %v6606_v61 = vadd.f32 %v6605_v57, %v17070_v33 }
 0x62c   :  { %18686 = vst [vmem:[#allocation20_spill] sm:$0xff] %v17080_v25  ;;  %v6559_v21 = vmax.f32 %v13074_v42, 0.0  ;;  %v13077_v49 = vadd.f32 %v13076_v52, %v6531_v48  ;;  %v11943_v41 = vpop.f32.mrb[236].mxu0  ;;  %v6632_v3 = vadd.f32 %v6631_v23, %v6623_v45  ;;  %v6624_v50 = vmul.f32 %v17080_v25, %v17080_v25 }
 0x62d   :  { %v11944_v43 = vpop.f32.mrb[237].mxu0  ;;  %v6607_v14 = vadd.f32 %v6606_v61, %v17080_v25 }
 0x62e   :  { %v6569_v26 = vmul.f32 %v6559_v21, %v18687_v24  ;;  %v6560_v37 = vmax.f32 %v13077_v49, 0.0  ;;  %v11945_v7 = vadd.f32 %v11944_v43, %v11943_v41  ;;  %v11946_v29 = vpop.f32.mrb[238].mxu0  ;;  %v6633_v22 = vadd.f32 %v6632_v3, %v6624_v50 }
 0x62f   :  { %v11947_v60 = vpop.f32.mrb[239].mxu0 }
 0x630   :  { %v17088_v13 = vadd.f32 %v6569_v26, %v18688_v30  ;;  %v6570_v48 = vmul.f32 %v6560_v37, %v18690_v39  ;;  %v13079_v16 = vadd.f32 %v17031_v17, %v11945_v7  ;;  %v11948_v28 = vadd.f32 %v11947_v60, %v11946_v29 }
 0x632   :  { %18689 = vst [vmem:[#allocation21_spill] sm:$0xff] %v17088_v13  ;;  %v6625_v62 = vmul.f32 %v17088_v13, %v17088_v13  ;;  %v17096_v12 = vadd.f32 %v6570_v48, %v18691_v8  ;;  %v13080_v27 = vadd.f32 %v13079_v16, %v6536_v56  ;;  %v13082_v0 = vadd.f32 %v17035_v54, %v11948_v28  ;;  %v18696_v56 = vld [vmem:[#allocation14_spill] sm:$0xff] }
 0x633   :  { %v6608_v38 = vadd.f32 %v6607_v14, %v17088_v13 }
 0x634   :  { %18692 = vst [vmem:[#allocation22_spill] sm:$0xff] %v17096_v12  ;;  %v6561_v51 = vmax.f32 %v13080_v27, 0.0  ;;  %v13083_v19 = vadd.f32 %v13082_v0, %v6539_v4  ;;  %v6634_v2 = vadd.f32 %v6633_v22, %v6625_v62  ;;  %v6626_v17 = vmul.f32 %v17096_v12, %v17096_v12 }
 0x635   :  { %v6609_v46 = vadd.f32 %v6608_v38, %v17096_v12 }
 0x636   :  { %v6571_v47 = vmul.f32 %v6561_v51, %v18693_v53  ;;  %v6562_v34 = vmax.f32 %v13083_v19, 0.0  ;;  %v6635_v54 = vadd.f32 %v6634_v2, %v6626_v17 }
 0x638   :  { %v17105_v1 = vadd.f32 %v6571_v47, %v18694_v11  ;;  %v6572_v15 = vmul.f32 %v6562_v34, %v18696_v56 }
 0x63a   :  { %18695 = vst [vmem:[#allocation23_spill] sm:$0xff] %v17105_v1  ;;  %v6610_v20 = vadd.f32 %v6609_v46, %v17105_v1  ;;  %v6627_v4 = vmul.f32 %v17105_v1, %v17105_v1  ;;  %v17112_v9 = vadd.f32 %v6572_v15, %v18697_v6 }
 0x63c   :  { %18698 = vst [vmem:[#allocation24_spill] sm:$0xff] %v17112_v9  ;;  %v6636_v63 = vadd.f32 %v6635_v54, %v6627_v4  ;;  %v6611_v42 = vadd.f32 %v6610_v20, %v17112_v9  ;;  %v6628_v52 = vmul.f32 %v17112_v9, %v17112_v9 }
 0x63e   :  { %v6612_v45 = vrot.slane %v6611_v42, 4  ;;  %v6637_v10 = vadd.f32 %v6636_v63, %v6628_v52 }
 0x640   :  { %v6613_v57 = vadd.f32 %v6612_v45, %v6611_v42  ;;  %v6638_v21 = vrot.slane %v6637_v10, 4 }
 0x642   :  { %v6614_v49 = vrot.slane %v6613_v57, 2  ;;  %v6639_v41 = vadd.f32 %v6638_v21, %v6637_v10 }
 0x644   :  { %v6615_v23 = vadd.f32 %v6614_v49, %v6613_v57  ;;  %v6640_v43 = vrot.slane %v6639_v41, 2 }
 0x646   :  { %v6616_v61 = vrot.slane %v6615_v23, 1  ;;  %v6641_v26 = vadd.f32 %v6640_v43, %v6639_v41 }
 0x648   :  { %v6617_v37 = vadd.f32 %v6616_v61, %v6615_v23  ;;  %v6642_v7 = vrot.slane %v6641_v26, 1 }
 0x64a   :  { %v6618_v29 = vmul.f32 0.03125, %v6617_v37  ;;  %v6643_v3 = vadd.f32 %v6642_v7, %v6641_v26 }
 0x64c   :  { %v6644_v50 = vmul.f32 0.03125, %v6643_v3  ;;  %v6645_v60 = vmul.f32 %v6618_v29, %v6618_v29  ;;  %v6648_v28 = vsub.f32 %v17049_v58, %v6618_v29  ;;  %v6649_v14 = vsub.f32 %v17045_v35, %v6618_v29 }
 0x64d   :  { %v6650_v62 = vsub.f32 %v17052_v32, %v6618_v29  ;;  %v6651_v8 = vsub.f32 %v17063_v40, %v6618_v29  ;;  %v6652_v27 = vsub.f32 %v17070_v33, %v6618_v29  ;;  %v6653_v0 = vsub.f32 %v17080_v25, %v6618_v29 }
 0x64e   :  { %v6646_v30 = vsub.f32 %v6644_v50, %v6645_v60  ;;  %v6654_v38 = vsub.f32 %v17088_v13, %v6618_v29  ;;  %v6655_v51 = vsub.f32 %v17096_v12, %v6618_v29  ;;  %v6656_v19 = vsub.f32 %v17105_v1, %v6618_v29 }
 0x64f   :  { %v6657_v2 = vsub.f32 %v17112_v9, %v6618_v29 }
 0x650   :  { %v6647_v48 = vmax.f32 %v6646_v30, 0.0 }
 0x652   :  { %v6658_v16 = vadd.f32 1e-05, %v6647_v48 }
 0x654   :  { %13828 = vrsqrt.f32 %v6658_v16 }
 0x65e   :  { %v13829_v22 = vpop.eup %13828 }
 0x65f   :  { %v6660_v17 = vmul.f32 %v13829_v22, %v6648_v28  ;;  %v6661_v47 = vmul.f32 %v13829_v22, %v6649_v14  ;;  %v6662_v34 = vmul.f32 %v13829_v22, %v6650_v62  ;;  %v6663_v46 = vmul.f32 %v13829_v22, %v6651_v8 }
 0x660   :  { %v6664_v11 = vmul.f32 %v13829_v22, %v6652_v27  ;;  %v6665_v15 = vmul.f32 %v13829_v22, %v6653_v0  ;;  %v6666_v54 = vmul.f32 %v13829_v22, %v6654_v38  ;;  %v6667_v20 = vmul.f32 %v13829_v22, %v6655_v51 }
 0x661   :  { %v6668_v4 = vmul.f32 %v13829_v22, %v6656_v19  ;;  %v6669_v6 = vmul.f32 %v13829_v22, %v6657_v2  ;;  %v6670_v63 = vmul.f32 %v6660_v17, %v14686_v44  ;;  %v6671_v42 = vmul.f32 %v6661_v47, %v14690_v36 }
 0x662   :  { %v6672_v52 = vmul.f32 %v6662_v34, %v18671_v59  ;;  %v6673_v45 = vmul.f32 %v6663_v46, %v18678_v55  ;;  %v6674_v10 = vmul.f32 %v6664_v11, %v18681_v18  ;;  %v6675_v57 = vmul.f32 %v6665_v15, %v18684_v31 }
 0x663   :  { %v6676_v21 = vmul.f32 %v6666_v54, %v18687_v24  ;;  %v6677_v49 = vmul.f32 %v6667_v20, %v18690_v39  ;;  %v6678_v41 = vmul.f32 %v6668_v4, %v18693_v53  ;;  %v6679_v23 = vmul.f32 %v6669_v6, %v18696_v56 }
 0x664   :  { %v6680_v43 = vpack.c.bf16 %v6671_v42, %v6670_v63  ;;  %v6681_v61 = vpack.c.bf16 %v6673_v45, %v6672_v52  ;;  %v6682_v26 = vpack.c.bf16 %v6675_v57, %v6674_v10 }
 0x665   :  { %v6683_v37 = vpack.c.bf16 %v6677_v49, %v6676_v21  ;;  %v6684_v7 = vpack.c.bf16 %v6679_v23, %v6678_v41 }
 0x666   :  { %v6690_v29 = vrot.slane %v6680_v43, 4  ;;  %v6691_v3 = vrot.slane %v6681_v61, 4  ;;  %v6693_v50 = vrot.slane %v6682_v26, 4 }
 0x667   :  { %v6695_v60 = vrot.slane %v6683_v37, 4  ;;  %v6697_v30 = vrot.slane %v6684_v7, 4 }
 0x668   :  { %v6692_v48 = vsel %vm38_vm1, %v6690_v29, %v6691_v3  ;;  %v6694_v16 = vsel %vm38_vm1, %v6691_v3, %v6693_v50  ;;  %6705 = vst [vmem:[#allocation2] sm:$0xf0] %v6690_v29 }
 0x669   :  { %v17140_v28 = vsel %vm38_vm1, %v6693_v50, %v6695_v60  ;;  %6710 = vst [vmem:[#allocation2 + $0x28] sm:$0xf] %v6697_v30  ;;  %v17142_v14 = vrot.slane %v6692_v48, 1  ;;  %v6774_v62 = vrot.slane %v6694_v16, 1  ;;  %v17144_v8 = vshll.u32 %v6692_v48, 16 }
 0x66a   :  { %v17146_v27 = vshrl.u32 %v6692_v48, 16  ;;  %v17148_v0 = vshll.u32 %v6694_v16, 16  ;;  %v17152_v38 = vshrl.u32 %v6694_v16, 16  ;;  %v17155_v51 = vshll.u32 %v17140_v28, 16 }
 0x66b   :  { %v6775_v22 = vsel %vm151_vm2, %v17142_v14, %v6774_v62  ;;  %v18607_v19 = vrot.slane %v17140_v28, 1  ;;  %v17163_v47 = vrot.slane %v17144_v8, 1  ;;  %v17173_v54 = vshrl.u32 %v17140_v28, 16 }
 0x66c   :  { %v17158_v2 = vshrl.u32 %v6775_v22, 16  ;;  %v17160_v17 = vshll.u32 %v6775_v22, 16  ;;  %v6737_v34 = vrot.slane %v17148_v0, 1  ;;  %v17176_v20 = vsel %vm38_vm1, %v6695_v60, %v6697_v30 }
 0x66d   :  { %v6777_v46 = vsel %vm151_vm2, %v6774_v62, %v18607_v19  ;;  %v6733_v11 = vor.u32 %v17146_v27, %v17163_v47  ;;  %v6745_v42 = vrot.slane %v17155_v51, 1  ;;  %v6914_v30 = vrot.slane %v17146_v27, 3 }
 0x66e   :  { %v6741_v15 = vor.u32 %v17152_v38, %v6737_v34  ;;  %v6946_v6 = vrot.slane %v17158_v2, 3  ;;  %v6949_v45 = vrot.slane %v17160_v17, 4  ;;  %v17184_v57 = vshrl.u32 %v6777_v46, 16 }
 0x66f   :  { %v6833_v4 = vld [vmem:[#allocation2] sm:$0xf0]  ;;  %v17182_v10 = vsel %vm98_vm3, %v6733_v11, %v6737_v34  ;;  %v17189_v23 = vshll.u32 %v6777_v46, 16  ;;  %v6915_v48 = vrot.slane %v17144_v8, 4  ;;  %v17224_v9 = vrot.slane %v17176_v20, 1 }
 0x670   :  { %v6831_v63 = vld [vmem:[#allocation2] sm:$0xf8]  ;;  %v6853_v52 = vrot.slane %v6833_v4, 1  ;;  %v6836_v21 = vshrl.u32 %v6833_v4, 16  ;;  %v6838_v49 = vshll.u32 %v6833_v4, 16  ;;  %v17187_v41 = vshrl.u32 %v17182_v10, 16 }
 0x671   :  { %v6907_v61 = vshrl.u32 %v6831_v63, 16  ;;  %v6910_v26 = vshll.u32 %v6831_v63, 16  ;;  %v17194_v37 = vsel %vm98_vm3, %v6741_v15, %v6745_v42  ;;  %v17197_v50 = vshll.u32 %v17182_v10, 16 }
 0x672   :  { %v6854_v43 = vsel %vm151_vm2, %v6853_v52, %v17142_v14  ;;  %v6840_v3 = vrot.slane %v6838_v49, 1  ;;  %v6950_v60 = vor.u32 %v6949_v45, %v6946_v6  ;;  %v17202_v16 = vshrl.u32 %v17194_v37, 16 }
 0x673   :  { %v6936_v7 = vshrl.u32 %v6854_v43, 16  ;;  %v6939_v29 = vshll.u32 %v6854_v43, 16  ;;  %v17205_v46 = vshll.u32 %v17194_v37, 16  ;;  %v6929_v11 = vrot.slane %v17187_v41, 3 }
 0x674   :  { %v6841_v34 = vor.u32 %v6840_v3, %v6836_v21  ;;  %v6909_v15 = vrot.slane %v6907_v61, 3  ;;  %v6912_v4 = vrot.slane %v6910_v26, 4  ;;  %v6968_v63 = vrot.slane %v17184_v57, 3  ;;  %v13704_v21 = vld [vmem:[%s18559_s1 + $0x980] sm:$0xff]  }
 0x675   :  { %v6938_v62 = vrot.slane %v6936_v7, 3  ;;  %v6941_v22 = vrot.slane %v6939_v29, 4  ;;  %v6932_v45 = vrot.slane %v17197_v50, 4  ;;  %v6971_v49 = vrot.slane %v17189_v23, 4 }
 0x676   :  { %v6842_v52 = vsel %vm98_vm3, %v6841_v34, %v17163_v47  ;;  %v6959_v29 = vrot.slane %v17202_v16, 3  ;;  %v6962_v61 = vrot.slane %v17205_v46, 4  ;;  %v6749_v3 = vor.u32 %v17173_v54, %v6745_v42  ;;  %v13707_v42 = vld [vmem:[%s18559_s1 + $0x988] sm:$0xff]  }
 0x677   :  { %v6942_v6 = vor.u32 %v6941_v22, %v6938_v62  ;;  %v6919_v43 = vshrl.u32 %v6842_v52, 16  ;;  %v6922_v7 = vshll.u32 %v6842_v52, 16  ;;  %v17221_v62 = vshll.u32 %v17176_v20, 16 }
 0x678   :  { %v6913_v19 = vor.u32 %v6912_v4, %v6909_v15  ;;  %v17226_v1 = vor.u32 %v6915_v48, %v6914_v30  ;;  %v17230_v52 = vor.u32 %v6971_v49, %v6968_v63  ;;  %v17236_v15 = vor.u32 %v6962_v61, %v6959_v29  ;;  %v17243_v4 = vld [vmem:[#allocation2 + $0x28] sm:$0xf]  ;;  %v13703_v63 = vld [vmem:[%s18559_s1 + $0x900] sm:$0xff]  }
 0x679   :  { %v6951_v26 = vsel %vm286_vm4, %v6942_v6, %v6950_v60  ;;  %v6921_v22 = vrot.slane %v6919_v43, 3  ;;  %v6924_v34 = vrot.slane %v6922_v7, 4  ;;  %v6753_v6 = vrot.slane %v17221_v62, 1  ;;  %v6834_v29 = vld [vmem:[#allocation2 + $0x28] sm:$0x1f] }
 0x67a   :  { %12765 = vmatmul.mubr.bf16.vlgmr.msra.gmra.mrb[80].mxu1 %v6951_v26  ;;  %v6933_v7 = vor.u32 %v6932_v45, %v6929_v11  ;;  %v18699_v30 = vrot.slane %v17140_v28, 1  ;;  %v6952_v49 = vrot.slane %v17152_v38, 3  ;;  %v6917_v61 = vsel %vm286_vm4, %v6913_v19, %v17226_v1  ;;  %v13705_v26 = vld [vmem:[%s18559_s1 + $0x948] sm:$0xff]   ;;  %v13710_v19 = vld [vmem:[%s18559_s1 + $0x990] sm:$0xff]  }
 0x67b   :  { %12768 = vmatprep.mubr.msk.bf16.mxu1 %vm13859_vm0, %v18641_v5  ;;  %12785 = vmatpush3.bf16.msra.mxu1 %v13704_v21  ;;  %v6925_v43 = vor.u32 %v6924_v34, %v6921_v22  ;;  %v17250_v21 = vsel %vm98_vm3, %v6749_v3, %v6753_v6  ;;  %v6973_v34 = vsel %vm286_vm4, %v6950_v60, %v17230_v52  ;;  %v18700_v13 = vshll.u32 %v17243_v4, 16 }
 0x67c   :  { %12786 = vmatprep.subr.bf16.mxu1 %v18641_v5  ;;  %v6779_v48 = vsel %vm151_vm2, %v18699_v30, %v17224_v9  ;;  %v17263_v22 = vshrl.u32 %v17250_v21, 16  ;;  %v17266_v3 = vshll.u32 %v17250_v21, 16  ;;  %v6953_v30 = vrot.slane %v17148_v0, 4 }
 0x67d   :  { %v17252_v11 = vshrl.u32 %v6779_v48, 16  ;;  %v17254_v45 = vshll.u32 %v6779_v48, 16  ;;  %v6934_v28 = vsel %vm286_vm4, %v6925_v43, %v6933_v7  ;;  %v17275_v43 = vshrl.u32 %v17176_v20, 16  ;;  %v13706_v20 = vld [vmem:[%s18559_s1 + $0x908] sm:$0xff]  }
 0x67e   :  { %7231 = vmatprep.mubr.bf16.mxu0 %v6934_v28  ;;  %v6964_v12 = vsel %vm286_vm4, %v6933_v7, %v17236_v15  ;;  %v6981_v28 = vrot.slane %v17263_v22, 3  ;;  %v6984_v60 = vrot.slane %v17266_v3, 4  ;;  %v6846_v25 = vrot.slane %v18700_v13, 1  ;;  %v13713_v13 = vld [vmem:[%s18559_s1 + $0x998] sm:$0xff]  }
 0x67f   :  { %12787 = vmatpush3.bf16.msra.mxu1 %v13707_v42  ;;  %7232 = vmatmul.mubr.bf16.vlgmr.msra.gmra.mrb[240].mxu0 %v6917_v61  ;;  %v17283_v42 = vrot.slane %v6834_v29, 1  ;;  %v6990_v48 = vrot.slane %v17252_v11, 3  ;;  %v6993_v61 = vrot.slane %v17254_v45, 4  ;;  %v17291_v7 = vor.u32 %v17275_v43, %v6753_v6 }
 0x680   :  { %12788 = vmatprep.subr.bf16.mxu1 %v18641_v5  ;;  %7239 = vmatprep.mubr.bf16.mxu0 %v6964_v12  ;;  %v13708_v12 = vld [vmem:[%s18559_s1 + $0x950] sm:$0xff]   ;;  %v17301_v29 = vor.u32 %v6953_v30, %v6952_v49  ;;  %v6848_v49 = vshrl.u32 %v17243_v4, 16  ;;  %v6997_v53 = vrot.slane %v17221_v62, 4  ;;  %v18701_v39 = vshll.u32 %v17243_v4, 16 }
 0x681   :  { %12022 = vmatpush3.bf16.msra.mxu0 %v13703_v63  ;;  %v6856_v63 = vsel %vm151_vm2, %v17224_v9, %v17283_v42  ;;  %v6847_v6 = vsel %vm98_vm3, %v17291_v7, %v6846_v25  ;;  %v17314_v30 = vor.u32 %v6993_v61, %v6990_v48  ;;  %v6975_v48 = vrot.slane %v17155_v51, 4  ;;  %v13715_v61 = vld [vmem:[%s18559_s1 + $0x9a0] sm:$0xff]   ;;  %v13720_v4 = vld [vmem:[%s18559_s1 + $0x9b0] sm:$0xff]  }
 0x682   :  { %12769 = vmatmul.mubr.bf16.gmra.mrb[84].mxu1 %v6973_v34  ;;  %12023 = vmatprep.subr.bf16.mxu0 %v13705_v26  ;;  %v17310_v26 = vor.u32 %v6984_v60, %v6981_v28  ;;  %v7001_v34 = vshrl.u32 %v6847_v6, 16  ;;  %v7004_v33 = vshll.u32 %v6847_v6, 16  ;;  %v7010_v40 = vshrl.u32 %v6856_v63, 16  ;;  %v13711_v28 = vld [vmem:[%s18559_s1 + $0x958] sm:$0xff]  }
 0x683   :  { %12772 = vmatprep.mubr.msk.bf16.mxu1 %vm13859_vm0, %v18641_v5  ;;  %12789 = vmatpush3.bf16.msra.mxu1 %v13710_v19  ;;  %v13709_v19 = vld [vmem:[%s18559_s1 + $0x910] sm:$0xff]   ;;  %v7013_v32 = vshll.u32 %v6856_v63, 16  ;;  %v6850_v60 = vor.u32 %v6848_v49, %v6846_v25  ;;  %v6955_v6 = vsel %vm286_vm4, %v17226_v1, %v17301_v29  ;;  %v6717_v63 = vld [vmem:[#allocation2] sm:$0xfe]  ;;  %v6995_v1 = vsel %vm286_vm4, %v17230_v52, %v17314_v30  ;;  %v13717_v52 = vld [vmem:[%s18559_s1 + $0x9a8] sm:$0xff]  }
 0x684   :  { %12790 = vmatprep.subr.bf16.mxu1 %v18641_v5  ;;  %v7003_v25 = vrot.slane %v7001_v34, 3  ;;  %v7006_v35 = vrot.slane %v7004_v33, 4  ;;  %v7012_v58 = vrot.slane %v7010_v40, 3  ;;  %v13714_v33 = vld [vmem:[%s18559_s1 + $0x960] sm:$0xff]   ;;  %v7035_v40 = vshll.u32 %v17283_v42, 16 }
 0x685   :  { %12024 = vmatpush3.bf16.msra.mxu0 %v13706_v20  ;;  %v6974_v20 = vrot.slane %v17173_v54, 3  ;;  %v7026_v34 = vshll.u32 %v6850_v60, 16  ;;  %v7019_v24 = vrot.slane %v18701_v39, 4 }
 0x686   :  { %12025 = vmatprep.subr.bf16.mxu0 %v13708_v12  ;;  %v6986_v12 = vsel %vm286_vm4, %v17236_v15, %v17310_v26  ;;  %v7023_v15 = vshrl.u32 %v6850_v60, 16  ;;  %v6771_v60 = vrot.slane %v6717_v63, 1 }
 0x687   :  { %12791 = vmatpush3.bf16.msra.mxu1 %v13713_v13  ;;  %7240 = vmatmul.mubr.bf16.gmra.mrb[244].mxu0 %v6955_v6  ;;  %v13712_v13 = vld [vmem:[%s18559_s1 + $0x918] sm:$0xff]   ;;  %v7015_v6 = vrot.slane %v7013_v32, 4  ;;  %v6976_v56 = vor.u32 %v6975_v48, %v6974_v20  ;;  %v7032_v32 = vshrl.u32 %v17283_v42, 16  ;;  %v13716_v48 = vld [vmem:[%s18559_s1 + $0x920] sm:$0xff]  }
 0x688   :  { %12792 = vmatprep.subr.bf16.mxu1 %v18641_v5  ;;  %7247 = vmatprep.mubr.bf16.mxu0 %v6986_v12  ;;  %v6722_v12 = vshll.u32 %v6717_v63, 16  ;;  %v7025_v42 = vrot.slane %v7023_v15, 3 }
 0x689   :  { %12026 = vmatpush3.bf16.msra.mxu0 %v13709_v19  ;;  %v7007_v19 = vor.u32 %v7006_v35, %v7003_v25  ;;  %v7016_v20 = vor.u32 %v7015_v6, %v7012_v58  ;;  %v7018_v35 = vrot.slane %v6848_v49, 3  ;;  %v7028_v25 = vrot.slane %v7026_v34, 4 }
 0x68a   :  { %12773 = vmatmul.mubr.bf16.gmra.mrb[88].mxu1 %v6995_v1  ;;  %12027 = vmatprep.subr.bf16.mxu0 %v13711_v28  ;;  %v6720_v28 = vshrl.u32 %v6717_v63, 16  ;;  %v6724_v1 = vrot.slane %v6722_v12, 1  ;;  %v13718_v63 = vld [vmem:[%s18559_s1 + $0x968] sm:$0xff]   ;;  %v7034_v6 = vrot.slane %v7032_v32, 3  ;;  %v7037_v12 = vrot.slane %v7035_v40, 4  ;;  %v13721_v40 = vld [vmem:[%s18559_s1 + $0x970] sm:$0xff]  }
 0x68b   :  { %12776 = vmatprep.mubr.msk.bf16.mxu1 %vm13859_vm0, %v18641_v5  ;;  %12793 = vmatpush3.bf16.msra.mxu1 %v13715_v61  ;;  %v6996_v61 = vrot.slane %v17275_v43, 3  ;;  %v7008_v39 = vsel %vm286_vm4, %v17310_v26, %v7007_v19  ;;  %v6773_v49 = vsel %vm151_vm2, %v6771_v60, %v17142_v14  ;;  %v7360_v34 = vrot.slane %v17197_v50, 1 }
 0x68c   :  { %12794 = vmatprep.subr.bf16.mxu1 %v18641_v5  ;;  %v6725_v58 = vor.u32 %v6724_v1, %v6720_v28  ;;  %v7029_v32 = vor.u32 %v7028_v25, %v7025_v42  ;;  %v7038_v28 = vor.u32 %v7037_v12, %v7034_v6  ;;  %v13723_v1 = vld [vmem:[%s18559_s1 + $0x9b8] sm:$0xff]   ;;  %v7365_v60 = vshll.u32 %v6773_v49, 16  ;;  %v7718_v42 = vld [vmem:[#allocation2] sm:$0x80] }
 0x68d   :  { %12028 = vmatpush3.bf16.msra.mxu0 %v13712_v13  ;;  %v6977_v13 = vsel %vm286_vm4, %v17301_v29, %v6976_v56  ;;  %v7017_v29 = vsel %vm286_vm4, %v17314_v30, %v7016_v20  ;;  %v6998_v26 = vor.u32 %v6997_v53, %v6996_v61  ;;  %v6711_v30 = vld [vmem:[#allocation2] sm:$0xff]  ;;  %v7369_v53 = vrot.slane %v17160_v17, 1 }
 0x68e   :  { %12029 = vmatprep.subr.bf16.mxu0 %v13714_v33  ;;  %v13719_v33 = vld [vmem:[%s18559_s1 + $0x928] sm:$0xff]   ;;  %v6730_v15 = vsel %vm98_vm3, %v6725_v58, %v17163_v47  ;;  %v7348_v61 = vshll.u32 %v6711_v30, 16  ;;  %v7030_v58 = vsel %vm286_vm4, %v7007_v19, %v7029_v32  ;;  %v7346_v6 = vshrl.u32 %v6711_v30, 16  ;;  %v13726_v32 = vld [vmem:[%s18559_s1 + $0xac0] sm:$0xff]  }
 0x68f   :  { %12795 = vmatpush3.bf16.msra.mxu1 %v13717_v52  ;;  %7248 = vmatmul.mubr.bf16.gmra.mrb[248].mxu0 %v6977_v13  ;;  %v7020_v52 = vor.u32 %v7019_v24, %v7018_v35  ;;  %v7356_v24 = vshll.u32 %v6730_v15, 16  ;;  %v7371_v35 = vor.u32 %v7360_v34, %v17187_v41  ;;  %v6999_v25 = vsel %vm286_vm4, %v6976_v56, %v6998_v26  ;;  %v13724_v13 = vld [vmem:[%s18559_s1 + $0x978] sm:$0xff]  }
 0x690   :  { %12796 = vmatprep.subr.bf16.mxu1 %v18641_v5  ;;  %7255 = vmatprep.mubr.bf16.mxu0 %v7008_v39  ;;  %v7039_v12 = vsel %vm286_vm4, %v7016_v20, %v7038_v28  ;;  %v18622_v39 = vrot.slane %v17205_v46, 1  ;;  %v7723_v19 = vshll.u32 %v7718_v42, 16  ;;  %v13725_v20 = vld [vmem:[%s18559_s1 + $0x938] sm:$0xff]   ;;  %v7738_v30 = vrot.slane %v7718_v42, 1 }
 0x691   :  { %12030 = vmatpush3.bf16.msra.mxu0 %v13716_v48  ;;  %v13722_v48 = vld [vmem:[%s18559_s1 + $0x930] sm:$0xff]   ;;  %v7358_v56 = vrot.slane %v7356_v24, 1  ;;  %v7375_v28 = vrot.slane %v17189_v23, 1 }
 0x692   :  { %12777 = vmatmul.mubr.bf16.gmra.mrb[92].mxu1 %v7017_v29  ;;  %12031 = vmatprep.subr.bf16.mxu0 %v13718_v63  ;;  %v7021_v63 = vsel %vm286_vm4, %v6998_v26, %v7020_v52  ;;  %v7374_v29 = vor.u32 %v7369_v53, %v17158_v2  ;;  %v7811_v26 = vrot.slane %v17187_v41, 6  ;;  %v7350_v52 = vrot.slane %v7348_v61, 1 }
 0x693   :  { %12780 = vmatprep.mubr.msk.bf16.mxu1 %vm13859_vm0, %v18641_v5  ;;  %12797 = vmatpush3.bf16.msra.mxu1 %v13720_v4  ;;  %v7367_v4 = vrot.slane %v7365_v60, 1  ;;  %v7354_v41 = vshrl.u32 %v6730_v15, 16  ;;  %v7721_v60 = vshrl.u32 %v7718_v42, 16  ;;  %v7725_v24 = vrot.slane %v7723_v19, 1 }
 0x694   :  { %12798 = vmatprep.subr.bf16.mxu1 %v18641_v5  ;;  %v17429_v42 = vsel %vm98_vm3, %v7374_v29, %v7375_v28 }
 0x695   :  { %12032 = vmatpush3.bf16.msra.mxu0 %v13719_v33  ;;  %v7363_v33 = vshrl.u32 %v6773_v49, 16  ;;  %v17415_v49 = vsel %vm98_vm3, %v7371_v35, %v18622_v39  ;;  %v7739_v35 = vsel %vm151_vm2, %v7738_v30, %v17142_v14  ;;  %v7351_v39 = vor.u32 %v7350_v52, %v7346_v6  ;;  %v13728_v6 = vld [vmem:[%s18559_s1 + $0xb00] sm:$0xff]  }
 0x696   :  { %12033 = vmatprep.subr.bf16.mxu0 %v13721_v40  ;;  %v7812_v40 = vrot.slane %v17197_v50, 7  ;;  %v7816_v15 = vshrl.u32 %v7739_v35, 16  ;;  %v7831_v30 = vrot.slane %v17202_v16, 6 }
 0x697   :  { %12799 = vmatpush3.bf16.msra.mxu1 %v13723_v1  ;;  %7256 = vmatmul.mubr.bf16.gmra.mrb[252].mxu0 %v6999_v25  ;;  %v17419_v1 = vld [vmem:[#allocation2 + $0x28] sm:$0x1]  ;;  %v7823_v25 = vrot.slane %v17158_v2, 6  ;;  %v7352_v50 = vsel %vm98_vm3, %v7351_v39, %v17163_v47 }
 0x698   :  { %12820 = vmatprep.subr.bf16.mxu1 %v18641_v5  ;;  %7263 = vmatprep.mubr.bf16.mxu0 %v7030_v58  ;;  %v7813_v61 = vor.u32 %v7812_v40, %v7811_v26  ;;  %v7359_v58 = vor.u32 %v7358_v56, %v7354_v41  ;;  %v6759_v19 = vshll.u32 %v17419_v1, 16  ;;  %v7818_v2 = vrot.slane %v7816_v15, 6 }
 0x699   :  { %12034 = vmatpush3.bf16.msra.mxu0 %v13722_v48  ;;  %v7368_v48 = vor.u32 %v7367_v4, %v7363_v33  ;;  %v7824_v4 = vrot.slane %v17160_v17, 7  ;;  %v7799_v33 = vrot.slane %v17146_v27, 6  ;;  %v7800_v40 = vrot.slane %v17144_v8, 7  ;;  %v17445_v27 = vld [vmem:[#allocation2 + $0x28] sm:$0x3] }
 0x69a   :  { %12781 = vmatmul.mubr.bf16.gmra.mrb[96].mxu1 %v7039_v12  ;;  %12035 = vmatprep.subr.bf16.mxu0 %v13724_v13  ;;  %v7726_v12 = vor.u32 %v7725_v24, %v7721_v60  ;;  %v7819_v13 = vshll.u32 %v7739_v35, 16  ;;  %v7361_v17 = vsel %vm98_vm3, %v7359_v58, %v7360_v34  ;;  %v7832_v60 = vrot.slane %v17205_v46, 7 }
 0x69b   :  { %12800 = vmatprep.mubr.msk.bf16.mxu1 %vm13859_vm0, %v18641_v5  ;;  %v7370_v26 = vsel %vm98_vm3, %v7368_v48, %v7369_v53  ;;  %v7825_v52 = vor.u32 %v7824_v4, %v7823_v25  ;;  %v7835_v24 = vrot.slane %v17184_v57, 6  ;;  %v7836_v8 = vrot.slane %v17189_v23, 7  ;;  %v13731_v48 = vld [vmem:[%s18559_s1 + $0xb08] sm:$0xff]  }
 0x69c   :  { %v7727_v14 = vsel %vm98_vm3, %v7726_v12, %v17163_v47  ;;  %v7821_v56 = vrot.slane %v7819_v13, 7  ;;  %v7833_v25 = vor.u32 %v7832_v60, %v7831_v30  ;;  %v7827_v58 = vrot.slane %v17152_v38, 6  ;;  %v17468_v4 = vld [vmem:[#allocation2 + $0x28] sm:$0x7f] }
 0x69d   :  { %12036 = vmatpush3.bf16.msra.mxu0 %v13725_v20  ;;  %v7804_v29 = vshrl.u32 %v7727_v14, 16  ;;  %v7807_v20 = vshll.u32 %v7727_v14, 16  ;;  %v7828_v47 = vrot.slane %v17148_v0, 7  ;;  %v6780_v39 = vrot.slane %v17445_v27, 1  ;;  %v7719_v14 = vld [vmem:[#allocation2 + $0x28] sm:$0xff]  ;;  %v13748_v27 = vld [vmem:[%s18559_s1 + $0xaf8] sm:$0xff]  }
 0x69e   :  { %12080 = vmatprep.subr.bf16.mxu0 %v13726_v32  ;;  %v7822_v32 = vor.u32 %v7821_v56, %v7818_v2  ;;  %v7837_v12 = vor.u32 %v7836_v8, %v7835_v24  ;;  %v7843_v15 = vrot.slane %v17263_v22, 6  ;;  %v7844_v13 = vrot.slane %v17266_v3, 7  ;;  %v13727_v2 = vld [vmem:[%s18559_s1 + $0xa80] sm:$0xff]  }
 0x69f   :  { %7264 = vmatmul.mubr.bf16.gmra.mrb[0].mxu0 %v7021_v63  ;;  %v7806_v53 = vrot.slane %v7804_v29, 6  ;;  %v7809_v41 = vrot.slane %v7807_v20, 7  ;;  %v17454_v63 = vor.u32 %v7800_v40, %v7799_v33  ;;  %v17477_v0 = vsel %vm1172_vm5, %v7813_v61, %v7833_v25 }
 0x6a0   :  { %7602 = vmatprep.mubr.bf16.mxu0 %v7361_v17  ;;  %v17452_v34 = vsel %vm1172_vm5, %v7822_v32, %v7825_v52  ;;  %v7829_v56 = vor.u32 %v7828_v47, %v7827_v58  ;;  %v7847_v33 = vrot.slane %v17252_v11, 6  ;;  %v17486_v29 = vor.u32 %v7844_v13, %v7843_v15 }
 0x6a1   :  { %v7810_v35 = vor.u32 %v7809_v41, %v7806_v53  ;;  %v7848_v20 = vrot.slane %v17254_v45, 7  ;;  %v7839_v17 = vrot.slane %v17173_v54, 6  ;;  %v7840_v40 = vrot.slane %v17155_v51, 7  ;;  %v13730_v51 = vld [vmem:[%s18559_s1 + $0xa88] sm:$0xff]  }
 0x6a2   :  { %12801 = vmatmul.mubr.bf16.vlgmr.msra.gmra.mrb[80].mxu1 %v7370_v26  ;;  %v13729_v26 = vld [vmem:[%s18559_s1 + $0xac8] sm:$0xff]   ;;  %v17495_v32 = vsel %vm1172_vm5, %v17454_v63, %v7829_v56  ;;  %v17499_v30 = vrot.slane %v7719_v14, 1  ;;  %v17504_v54 = vsel %vm1172_vm5, %v7833_v25, %v17486_v29  ;;  %v7851_v41 = vrot.slane %v17275_v43, 6 }
 0x6a3   :  { %12804 = vmatprep.mubr.msk.bf16.mxu1 %vm13859_vm0, %v18641_v5  ;;  %12821 = vmatpush3.bf16.msra.mxu1 %v13728_v6  ;;  %v17474_v38 = vsel %vm1172_vm5, %v7810_v35, %v7813_v61  ;;  %v17484_v6 = vsel %vm1172_vm5, %v7825_v52, %v7837_v12  ;;  %v13734_v61 = vld [vmem:[%s18559_s1 + $0xb10] sm:$0xff]   ;;  %v7729_v52 = vshll.u32 %v17468_v4, 16  ;;  %v7849_v53 = vor.u32 %v7848_v20, %v7847_v33 }
 0x6a4   :  { %12822 = vmatprep.subr.bf16.mxu1 %v18641_v5  ;;  %v7852_v60 = vrot.slane %v17221_v62, 7  ;;  %v6761_v24 = vrot.slane %v6759_v19, 1  ;;  %v7741_v43 = vsel %vm151_vm2, %v17224_v9, %v17499_v30  ;;  %v13732_v62 = vld [vmem:[%s18559_s1 + $0xad0] sm:$0xff]   ;;  %v18702_v25 = vrot.slane %v17205_v46, 1 }
 0x6a5   :  { %v17516_v8 = vrot.slane %v7729_v52, 1  ;;  %v7865_v19 = vshrl.u32 %v7741_v43, 16  ;;  %v7378_v14 = vrot.slane %v17266_v3, 1  ;;  %v13735_v3 = vld [vmem:[%s18559_s1 + $0xad8] sm:$0xff]  }
 0x6a6   :  { %v17528_v35 = vor.u32 %v7852_v60, %v7851_v41  ;;  %v7377_v58 = vor.u32 %v18702_v25, %v17202_v16  ;;  %v17554_v33 = vsel %vm98_vm3, %v17291_v7, %v6761_v24  ;;  %v13741_v24 = vld [vmem:[%s18559_s1 + $0xb28] sm:$0xff]  }
 0x6a7   :  { %12823 = vmatpush3.bf16.msra.mxu1 %v13731_v48  ;;  %7603 = vmatmul.mubr.bf16.vlgmr.msra.gmra.mrb[4].mxu0 %v7352_v50  ;;  %v7841_v50 = vor.u32 %v7840_v40, %v7839_v17  ;;  %v7868_v48 = vshll.u32 %v7741_v43, 16  ;;  %v7867_v16 = vrot.slane %v7865_v19, 6  ;;  %v13739_v17 = vld [vmem:[%s18559_s1 + $0xb20] sm:$0xff]   ;;  %v7385_v40 = vshll.u32 %v17554_v33, 16 }
 0x6a8   :  { %12824 = vmatprep.subr.bf16.mxu1 %v18641_v5  ;;  %7610 = vmatprep.mubr.bf16.mxu0 %v17415_v49  ;;  %v17526_v49 = vsel %vm1172_vm5, %v7837_v12, %v7849_v53  ;;  %v7732_v12 = vsel %vm98_vm3, %v17291_v7, %v17516_v8  ;;  %v7381_v7 = vrot.slane %v17254_v45, 1  ;;  %v6763_v19 = vshrl.u32 %v17419_v1, 16  ;;  %v13743_v1 = vld [vmem:[%s18559_s1 + $0xaa8] sm:$0xff]  }
 0x6a9   :  { %12081 = vmatpush3.bf16.msra.mxu0 %v13727_v2  ;;  %v17539_v47 = vsel %vm1172_vm5, %v7829_v56, %v7841_v50  ;;  %v7856_v15 = vshrl.u32 %v7732_v12, 16  ;;  %v7859_v46 = vshll.u32 %v7732_v12, 16  ;;  %v7870_v13 = vrot.slane %v7868_v48, 7  ;;  %v13733_v56 = vld [vmem:[%s18559_s1 + $0xa90] sm:$0xff]   ;;  %v13742_v48 = vld [vmem:[%s18559_s1 + $0xae8] sm:$0xff]  }
 0x6aa   :  { %12805 = vmatmul.mubr.bf16.gmra.mrb[84].mxu1 %v17429_v42  ;;  %12082 = vmatprep.subr.bf16.mxu0 %v13729_v26  ;;  %v13737_v42 = vld [vmem:[%s18559_s1 + $0xb18] sm:$0xff]   ;;  %v7380_v2 = vor.u32 %v7375_v28, %v17184_v57  ;;  %v17558_v26 = vsel %vm1172_vm5, %v7841_v50, %v17528_v35  ;;  %v6781_v57 = vsel %vm151_vm2, %v17224_v9, %v6780_v39  ;;  %v7387_v50 = vrot.slane %v7385_v40, 1 }
 0x6ab   :  { %12808 = vmatprep.mubr.msk.bf16.mxu1 %vm13859_vm0, %v18641_v5  ;;  %12825 = vmatpush3.bf16.msra.mxu1 %v13734_v61  ;;  %v7858_v23 = vrot.slane %v7856_v15, 6  ;;  %v7861_v28 = vrot.slane %v7859_v46, 7  ;;  %v17567_v20 = vor.u32 %v7870_v13, %v7867_v16  ;;  %v7379_v61 = vsel %vm98_vm3, %v7377_v58, %v7378_v14  ;;  %v13744_v58 = vld [vmem:[%s18559_s1 + $0xb30] sm:$0xff]   ;;  %v13747_v16 = vld [vmem:[%s18559_s1 + $0xb38] sm:$0xff]  }
 0x6ac   :  { %12826 = vmatprep.subr.bf16.mxu1 %v18641_v5  ;;  %v7382_v45 = vsel %vm98_vm3, %v7380_v2, %v7381_v7  ;;  %v7391_v60 = vshll.u32 %v6781_v57, 16  ;;  %v7389_v25 = vor.u32 %v7381_v7, %v17252_v11  ;;  %v7395_v11 = vshrl.u32 %v17554_v33, 16  ;;  %v13746_v2 = vld [vmem:[%s18559_s1 + $0xab0] sm:$0xff]  }
 0x6ad   :  { %12083 = vmatpush3.bf16.msra.mxu0 %v13730_v51  ;;  %v17577_v9 = vor.u32 %v7861_v28, %v7858_v23  ;;  %v17581_v41 = vsel %vm1172_vm5, %v7849_v53, %v17567_v20  ;;  %v13738_v51 = vld [vmem:[%s18559_s1 + $0xae0] sm:$0xff]   ;;  %v7399_v12 = vshll.u32 %v6763_v19, 16  ;;  %v7403_v15 = vshrl.u32 %v6781_v57, 16  ;;  %v13749_v28 = vld [vmem:[%s18559_s1 + $0xab8] sm:$0xff]  }
 0x6ae   :  { %12084 = vmatprep.subr.bf16.mxu0 %v13732_v62  ;;  %v7393_v43 = vrot.slane %v7391_v60, 1  ;;  %v13740_v62 = vld [vmem:[%s18559_s1 + $0xaa0] sm:$0xff]   ;;  %v7407_v46 = vshll.u32 %v6780_v39, 16  ;;  %v7397_v13 = vor.u32 %v7395_v11, %v7387_v50 }
 0x6af   :  { %12827 = vmatpush3.bf16.msra.mxu1 %v13737_v42  ;;  %7611 = vmatmul.mubr.bf16.gmra.mrb[8].mxu0 %v17182_v10  ;;  %v13736_v10 = vld [vmem:[%s18559_s1 + $0xa98] sm:$0xff]   ;;  %v17593_v53 = vsel %vm1172_vm5, %v17486_v29, %v17577_v9  ;;  %v7383_v29 = vor.u32 %v7378_v14, %v17263_v22  ;;  %v7716_v57 = vld [vmem:[#allocation2] sm:$0xc0] }
 0x6b0   :  { %12828 = vmatprep.subr.bf16.mxu1 %v18641_v5  ;;  %7618 = vmatprep.mubr.bf16.mxu0 %v7379_v61  ;;  %v7394_v22 = vsel %vm98_vm3, %v7389_v25, %v7393_v43  ;;  %v7405_v14 = vor.u32 %v7403_v15, %v7393_v43  ;;  %v7409_v39 = vrot.slane %v7407_v46, 1  ;;  %v7792_v7 = vshrl.u32 %v7716_v57, 16 }
 0x6b1   :  { %12085 = vmatpush3.bf16.msra.mxu0 %v13733_v56  ;;  %v7388_v42 = vsel %vm98_vm3, %v7383_v29, %v7387_v50  ;;  %v7401_v56 = vrot.slane %v7399_v12, 1 }
 0x6b2   :  { %12809 = vmatmul.mubr.bf16.gmra.mrb[88].mxu1 %v7382_v45  ;;  %12086 = vmatprep.subr.bf16.mxu0 %v13735_v3  ;;  %v7410_v23 = vsel %vm98_vm3, %v7405_v14, %v7409_v39 }
 0x6b3   :  { %12812 = vmatprep.mubr.msk.bf16.mxu1 %vm13859_vm0, %v18641_v5  ;;  %12829 = vmatpush3.bf16.msra.mxu1 %v13739_v17  ;;  %v7402_v3 = vsel %vm98_vm3, %v7397_v13, %v7401_v56  ;;  %v7794_v17 = vrot.slane %v7792_v7, 6 }
 0x6b4   :  { %12830 = vmatprep.subr.bf16.mxu1 %v18641_v5 }
 0x6b5   :  { %12087 = vmatpush3.bf16.msra.mxu0 %v13736_v10 }
 0x6b6   :  { %12088 = vmatprep.subr.bf16.mxu0 %v13738_v51 }
 0x6b7   :  { %12831 = vmatpush3.bf16.msra.mxu1 %v13741_v24  ;;  %7619 = vmatmul.mubr.bf16.gmra.mrb[12].mxu0 %v17194_v37  ;;  %v13745_v37 = vld [vmem:[%s18559_s1 + $0xaf0] sm:$0xff]   ;;  %v7874_v24 = vrot.slane %v7729_v52, 7 }
 0x6b8   :  { %12832 = vmatprep.subr.bf16.mxu1 %v18641_v5  ;;  %7626 = vmatprep.mubr.bf16.mxu0 %v7388_v42 }
 0x6b9   :  { %12089 = vmatpush3.bf16.msra.mxu0 %v13740_v62 }
 0x6ba   :  { %12813 = vmatmul.mubr.bf16.gmra.mrb[92].mxu1 %v7394_v22  ;;  %12090 = vmatprep.subr.bf16.mxu0 %v13742_v48 }
 0x6bb   :  { %12816 = vmatprep.mubr.msk.bf16.mxu1 %vm13859_vm0, %v18641_v5  ;;  %12833 = vmatpush3.bf16.msra.mxu1 %v13744_v58 }
 0x6bc   :  { %12834 = vmatprep.subr.bf16.mxu1 %v18641_v5 }
 0x6bd   :  { %12091 = vmatpush3.bf16.msra.mxu0 %v13743_v1 }
 0x6be   :  { %12092 = vmatprep.subr.bf16.mxu0 %v13745_v37 }
 0x6bf   :  { %12835 = vmatpush3.bf16.msra.mxu1 %v13747_v16  ;;  %7627 = vmatmul.mubr.bf16.gmra.mrb[16].mxu0 %v17250_v21  ;;  %v7795_v21 = vshll.u32 %v7716_v57, 16 }
 0x6c0   :  { %12856 = vmatprep.subr.bf16.mxu1 %v18641_v5  ;;  %7634 = vmatprep.mubr.bf16.mxu0 %v7402_v3 }
 0x6c1   :  { %12093 = vmatpush3.bf16.msra.mxu0 %v13746_v2  ;;  %v7797_v61 = vrot.slane %v7795_v21, 7 }
 0x6c2   :  { %12817 = vmatmul.mubr.bf16.gmra.mrb[96].mxu1 %v7410_v23  ;;  %12094 = vmatprep.subr.bf16.mxu0 %v13748_v27 }
 0x6c3   :  { %12836 = vmatprep.mubr.msk.bf16.mxu1 %vm13859_vm0, %v18641_v5  ;;  %v7798_v40 = vor.u32 %v7797_v61, %v7794_v17 }
 0x6c5   :  { %12095 = vmatpush3.bf16.msra.mxu0 %v13749_v28  ;;  %v7802_v45 = vsel %vm1172_vm5, %v7798_v40, %v17454_v63  ;;  %v13750_v40 = vld [vmem:[%s18559_s1 + $0xc40] sm:$0xff]  }
 0x6c6   :  { %12139 = vmatprep.subr.bf16.mxu0 %v13750_v40 }
 0x6c7   :  { %7635 = vmatmul.mubr.bf16.gmra.mrb[20].mxu0 %v17554_v33  ;;  %v7733_v33 = vshrl.u32 %v17468_v4, 16 }
 0x6c8   :  { %8086 = vmatprep.mubr.bf16.mxu0 %v17474_v38 }
 0x6c9   :  { %v7873_v51 = vrot.slane %v7733_v33, 6 }
 0x6ca   :  { %12837 = vmatmul.mubr.bf16.vlgmr.msra.gmra.mrb[80].mxu1 %v17452_v34  ;;  %v7735_v34 = vor.u32 %v7733_v33, %v17516_v8  ;;  %v13752_v33 = vld [vmem:[%s18559_s1 + $0xc80] sm:$0xff]  }
 0x6cb   :  { %12840 = vmatprep.mubr.msk.bf16.mxu1 %vm13859_vm0, %v18641_v5  ;;  %12857 = vmatpush3.bf16.msra.mxu1 %v13752_v33 }
 0x6cc   :  { %v7878_v63 = vshrl.u32 %v7735_v34, 16  ;;  %v7881_v38 = vshll.u32 %v7735_v34, 16  ;;  %12858 = vmatprep.subr.bf16.mxu1 %v18641_v5 }
 0x6ce   :  { %v7880_v10 = vrot.slane %v7878_v63, 6  ;;  %v7883_v60 = vrot.slane %v7881_v38, 7  ;;  %v13753_v63 = vld [vmem:[%s18559_s1 + $0xc48] sm:$0xff]  }
 0x6cf   :  { %8087 = vmatmul.mubr.bf16.vlgmr.msra.gmra.mrb[24].mxu0 %v7802_v45  ;;  %v13751_v45 = vld [vmem:[%s18559_s1 + $0xc00] sm:$0xff]   ;;  %v13755_v38 = vld [vmem:[%s18559_s1 + $0xc88] sm:$0xff]  }
 0x6d0   :  { %8094 = vmatprep.mubr.bf16.mxu0 %v17477_v0  ;;  %v7887_v0 = vshrl.u32 %v17499_v30, 16  ;;  %12140 = vmatpush3.bf16.msra.mxu0 %v13751_v45 }
 0x6d1   :  { %12141 = vmatprep.subr.bf16.mxu0 %v13753_v63  ;;  %12859 = vmatpush3.bf16.msra.mxu1 %v13755_v38 }
 0x6d2   :  { %12841 = vmatmul.mubr.bf16.gmra.mrb[84].mxu1 %v17484_v6  ;;  %v7890_v6 = vshll.u32 %v17499_v30, 16  ;;  %12860 = vmatprep.subr.bf16.mxu1 %v18641_v5 }
 0x6d3   :  { %12844 = vmatprep.mubr.msk.bf16.mxu1 %vm13859_vm0, %v18641_v5 }
 0x6d4   :  { %v7892_v8 = vrot.slane %v7890_v6, 7  ;;  %v13754_v6 = vld [vmem:[%s18559_s1 + $0xc08] sm:$0xff]  }
 0x6d5   :  { %12142 = vmatpush3.bf16.msra.mxu0 %v13754_v6 }
 0x6d7   :  { %8095 = vmatmul.mubr.bf16.gmra.mrb[28].mxu0 %v17495_v32  ;;  %v7889_v32 = vrot.slane %v7887_v0, 6 }
 0x6d8   :  { %8102 = vmatprep.mubr.bf16.mxu0 %v17504_v54  ;;  %v7884_v54 = vor.u32 %v7883_v60, %v7880_v10  ;;  %v13756_v60 = vld [vmem:[%s18559_s1 + $0xc50] sm:$0xff]  }
 0x6d9   :  { %12143 = vmatprep.subr.bf16.mxu0 %v13756_v60 }
 0x6da   :  { %12845 = vmatmul.mubr.bf16.gmra.mrb[88].mxu1 %v17526_v49  ;;  %v7893_v49 = vor.u32 %v7892_v8, %v7889_v32  ;;  %v7885_v30 = vsel %vm1172_vm5, %v17577_v9, %v7884_v54 }
 0x6db   :  { %12848 = vmatprep.mubr.msk.bf16.mxu1 %vm13859_vm0, %v18641_v5 }
 0x6df   :  { %8103 = vmatmul.mubr.bf16.gmra.mrb[32].mxu0 %v17539_v47  ;;  %v7894_v47 = vsel %vm1172_vm5, %v17567_v20, %v7893_v49  ;;  %v13758_v49 = vld [vmem:[%s18559_s1 + $0xc90] sm:$0xff]  }
 0x6e0   :  { %8110 = vmatprep.mubr.bf16.mxu0 %v17593_v53  ;;  %12861 = vmatpush3.bf16.msra.mxu1 %v13758_v49 }
 0x6e1   :  { %12862 = vmatprep.subr.bf16.mxu1 %v18641_v5 }
 0x6e2   :  { %12849 = vmatmul.mubr.bf16.gmra.mrb[92].mxu1 %v17581_v41  ;;  %v7875_v41 = vor.u32 %v7874_v24, %v7873_v51 }
 0x6e3   :  { %12852 = vmatprep.mubr.msk.bf16.mxu1 %vm13859_vm0, %v18641_v5 }
 0x6e4   :  { %v7876_v53 = vsel %vm1172_vm5, %v17528_v35, %v7875_v41 }
 0x6e7   :  { %8111 = vmatmul.mubr.bf16.gmra.mrb[36].mxu0 %v17558_v26 }
 0x6e8   :  { %8118 = vmatprep.mubr.bf16.mxu0 %v7885_v30  ;;  %v13757_v30 = vld [vmem:[%s18559_s1 + $0xc10] sm:$0xff]  }
 0x6e9   :  { %12144 = vmatpush3.bf16.msra.mxu0 %v13757_v30 }
 0x6ea   :  { %12853 = vmatmul.mubr.bf16.gmra.mrb[96].mxu1 %v7894_v47  ;;  %v13759_v47 = vld [vmem:[%s18559_s1 + $0xc58] sm:$0xff]  }
 0x6eb   :  { %12872 = vmatprep.mubr.msk.bf16.mxu1 %vm13859_vm0, %v18641_v5  ;;  %12145 = vmatprep.subr.bf16.mxu0 %v13759_v47 }
 0x6ef   :  { %8119 = vmatmul.mubr.bf16.gmra.mrb[40].mxu0 %v7876_v53  ;;  %v13761_v53 = vld [vmem:[%s18559_s1 + $0xc98] sm:$0xff]  }
 0x6f0   :  { %12863 = vmatpush3.bf16.msra.mxu1 %v13761_v53 }
 0x6f1   :  { %12864 = vmatprep.subr.bf16.mxu1 %v18641_v5 }
 0x752   :  { %v11978_v4 = vpop.f32.mrb[240].mxu0 }
 0x753   :  { %v11979_v52 = vpop.f32.mrb[241].mxu0 }
 0x754   :  { %v11980_v50 = vadd.f32 %v11979_v52, %v11978_v4  ;;  %v11981_v26 = vpop.f32.mrb[242].mxu0  ;;  %v13760_v52 = vld [vmem:[%s18559_s1 + $0xc18] sm:$0xff]  }
 0x755   :  { %v11982_v43 = vpop.f32.mrb[243].mxu0  ;;  %12146 = vmatpush3.bf16.msra.mxu0 %v13760_v52 }
 0x756   :  { %v11983_v62 = vadd.f32 %v11982_v43, %v11981_v26  ;;  %v13762_v26 = vld [vmem:[%s18559_s1 + $0xc60] sm:$0xff]  }
 0x757   :  { %12147 = vmatprep.subr.bf16.mxu0 %v13762_v26 }
 0x75a   :  { %v11984_v9 = vpop.f32.mrb[244].mxu0 }
 0x75b   :  { %v11985_v29 = vpop.f32.mrb[245].mxu0 }
 0x75c   :  { %v11986_v19 = vadd.f32 %v11985_v29, %v11984_v9  ;;  %v11987_v48 = vpop.f32.mrb[246].mxu0  ;;  %v13763_v29 = vld [vmem:[%s18559_s1 + $0xca0] sm:$0xff]  }
 0x75d   :  { %v11988_v20 = vpop.f32.mrb[247].mxu0  ;;  %12865 = vmatpush3.bf16.msra.mxu1 %v13763_v29 }
 0x75e   :  { %v11989_v25 = vadd.f32 %v11988_v20, %v11987_v48  ;;  %v13764_v20 = vld [vmem:[%s18559_s1 + $0xc20] sm:$0xff]   ;;  %12866 = vmatprep.subr.bf16.mxu1 %v18641_v5 }
 0x75f   :  { %12148 = vmatpush3.bf16.msra.mxu0 %v13764_v20 }
 0x762   :  { %v11990_v58 = vpop.f32.mrb[248].mxu0 }
 0x763   :  { %v11991_v42 = vpop.f32.mrb[249].mxu0 }
 0x764   :  { %v17683_v22 = vadd.f32 %v11991_v42, %v11990_v58  ;;  %v11993_v1 = vpop.f32.mrb[250].mxu0  ;;  %v13765_v42 = vld [vmem:[%s18559_s1 + $0xca8] sm:$0xff]  }
 0x765   :  { %v11994_v11 = vpop.f32.mrb[251].mxu0  ;;  %12867 = vmatpush3.bf16.msra.mxu1 %v13765_v42 }
 0x766   :  { %v17685_v35 = vadd.f32 %v11994_v11, %v11993_v1  ;;  %v13767_v1 = vld [vmem:[%s18559_s1 + $0xc28] sm:$0xff]   ;;  %12868 = vmatprep.subr.bf16.mxu1 %v18641_v5 }
 0x76a   :  { %v11996_v12 = vpop.f32.mrb[252].mxu0 }
 0x76b   :  { %v11997_v37 = vpop.f32.mrb[253].mxu0 }
 0x76c   :  { %v17687_v15 = vadd.f32 %v11997_v37, %v11996_v12  ;;  %v11999_v46 = vpop.f32.mrb[254].mxu0 }
 0x76d   :  { %v12000_v16 = vpop.f32.mrb[255].mxu0 }
 0x76e   :  { %v17689_v13 = vadd.f32 %v12000_v16, %v11999_v46  ;;  %v13768_v16 = vld [vmem:[%s18559_s1 + $0xcb0] sm:$0xff]  }
 0x76f   :  { %12869 = vmatpush3.bf16.msra.mxu1 %v13768_v16 }
 0x770   :  { %12870 = vmatprep.subr.bf16.mxu1 %v18641_v5 }
 0x772   :  { %v12002_v14 = vpop.f32.mrb[0].mxu0 }
 0x773   :  { %v12003_v2 = vpop.f32.mrb[1].mxu0 }
 0x774   :  { %v17691_v56 = vadd.f32 %v12003_v2, %v12002_v14  ;;  %v12005_v27 = vpop.f32.mrb[2].mxu0 }
 0x775   :  { %v12006_v39 = vpop.f32.mrb[3].mxu0 }
 0x776   :  { %v17693_v3 = vadd.f32 %v12006_v39, %v12005_v27  ;;  %v13770_v27 = vld [vmem:[%s18559_s1 + $0xc30] sm:$0xff]   ;;  %v13772_v39 = vld [vmem:[%s18559_s1 + $0xc78] sm:$0xff]  }
 0x77a   :  { %v12037_v57 = vpop.f32.mrb[4].mxu0 }
 0x77b   :  { %v12038_v23 = vpop.f32.mrb[5].mxu0 }
 0x77c   :  { %v12039_v28 = vadd.f32 %v12038_v23, %v12037_v57  ;;  %v12040_v7 = vpop.f32.mrb[6].mxu0 }
 0x77d   :  { %v12041_v21 = vpop.f32.mrb[7].mxu0 }
 0x77e   :  { %v17695_v17 = vadd.f32 %v12039_v28, %v11980_v50  ;;  %v12042_v61 = vadd.f32 %v12041_v21, %v12040_v7  ;;  %v13773_v28 = vld [vmem:[%s18559_s1 + $0xc38] sm:$0xff]  }
 0x780   :  { %v17706_v34 = vadd.f32 %v12042_v61, %v11983_v62 }
 0x782   :  { %v12043_v0 = vpop.f32.mrb[8].mxu0 }
 0x783   :  { %v12044_v10 = vpop.f32.mrb[9].mxu0 }
 0x784   :  { %v12045_v32 = vadd.f32 %v12044_v10, %v12043_v0  ;;  %v12046_v8 = vpop.f32.mrb[10].mxu0 }
 0x785   :  { %v12047_v54 = vpop.f32.mrb[11].mxu0 }
 0x786   :  { %v17724_v51 = vadd.f32 %v12045_v32, %v11986_v19  ;;  %v12048_v24 = vadd.f32 %v12047_v54, %v12046_v8 }
 0x788   :  { %v17733_v41 = vadd.f32 %v12048_v24, %v11989_v25  ;;  %v13766_v25 = vld [vmem:[%s18559_s1 + $0xc68] sm:$0xff]  }
 0x789   :  { %12149 = vmatprep.subr.bf16.mxu0 %v13766_v25 }
 0x78a   :  { %v12049_v4 = vpop.f32.mrb[12].mxu0  ;;  %12150 = vmatpush3.bf16.msra.mxu0 %v13767_v1 }
 0x78b   :  { %v12050_v50 = vpop.f32.mrb[13].mxu0 }
 0x78c   :  { %v12051_v43 = vadd.f32 %v12050_v50, %v12049_v4  ;;  %v12052_v62 = vpop.f32.mrb[14].mxu0 }
 0x78d   :  { %v12053_v9 = vpop.f32.mrb[15].mxu0 }
 0x78e   :  { %v17749_v19 = vadd.f32 %v12051_v43, %v17683_v22  ;;  %v12054_v48 = vadd.f32 %v12053_v9, %v12052_v62 }
 0x790   :  { %v17759_v58 = vadd.f32 %v12054_v48, %v17685_v35  ;;  %v13769_v35 = vld [vmem:[%s18559_s1 + $0xc70] sm:$0xff]  }
 0x791   :  { %12151 = vmatprep.subr.bf16.mxu0 %v13769_v35 }
 0x792   :  { %v12055_v22 = vpop.f32.mrb[16].mxu0  ;;  %12152 = vmatpush3.bf16.msra.mxu0 %v13770_v27 }
 0x793   :  { %v12056_v11 = vpop.f32.mrb[17].mxu0  ;;  %12153 = vmatprep.subr.bf16.mxu0 %v13772_v39 }
 0x794   :  { %v12057_v12 = vadd.f32 %v12056_v11, %v12055_v22  ;;  %v12058_v37 = vpop.f32.mrb[18].mxu0 }
 0x795   :  { %v12059_v46 = vpop.f32.mrb[19].mxu0 }
 0x796   :  { %v17775_v14 = vadd.f32 %v12057_v12, %v17687_v15  ;;  %v12060_v2 = vadd.f32 %v12059_v46, %v12058_v37  ;;  %v13771_v15 = vld [vmem:[%s18559_s1 + $0xcb8] sm:$0xff]   ;;  %12154 = vmatpush3.bf16.msra.mxu0 %v13773_v28 }
 0x797   :  { %12871 = vmatpush3.bf16.msra.mxu1 %v13771_v15 }
 0x798   :  { %v17785_v57 = vadd.f32 %v12060_v2, %v17689_v13  ;;  %v13774_v13 = vld [vmem:[%s18559_s1 + $0xb80] sm:$0xff]   ;;  %12892 = vmatprep.subr.bf16.mxu1 %v18641_v5 }
 0x799   :  { %12198 = vmatprep.subr.bf16.mxu0 %v13774_v13 }
 0x79a   :  { %v12061_v23 = vpop.f32.mrb[20].mxu0 }
 0x79b   :  { %v12062_v7 = vpop.f32.mrb[21].mxu0 }
 0x79c   :  { %v12063_v21 = vadd.f32 %v12062_v7, %v12061_v23  ;;  %v12064_v61 = vpop.f32.mrb[22].mxu0 }
 0x79d   :  { %v8161_v40 = vpop.f32.mrb[80].mxu1  ;;  %v12065_v45 = vpop.f32.mrb[23].mxu0 }
 0x79e   :  { %v12838_v33 = vpop.f32.mrb[81].mxu1  ;;  %v17798_v63 = vadd.f32 %v12063_v21, %v17691_v56  ;;  %v12066_v38 = vadd.f32 %v12065_v45, %v12064_v61 }
 0x79f   :  { %v8164_v0 = vpop.f32.mrb[82].mxu1 }
 0x7a0   :  { %v12839_v6 = vpop.f32.mrb[83].mxu1  ;;  %v17802_v10 = vadd.f32 %v12066_v38, %v17693_v3 }
 0x7a2   :  { %v12096_v60 = vpop.f32.mrb[24].mxu0 }
 0x7a3   :  { %v12097_v32 = vpop.f32.mrb[25].mxu0 }
 0x7a4   :  { %v12098_v8 = vadd.f32 %v12097_v32, %v12096_v60  ;;  %v12099_v54 = vpop.f32.mrb[26].mxu0 }
 0x7a5   :  { %v8169_v49 = vpop.f32.mrb[84].mxu1  ;;  %v12100_v24 = vpop.f32.mrb[27].mxu0 }
 0x7a6   :  { %v12842_v30 = vpop.f32.mrb[85].mxu1  ;;  %v13085_v56 = vadd.f32 %v17695_v17, %v12098_v8  ;;  %v12101_v47 = vadd.f32 %v12100_v24, %v12099_v54 }
 0x7a7   :  { %v8172_v53 = vpop.f32.mrb[86].mxu1 }
 0x7a8   :  { %v12843_v4 = vpop.f32.mrb[87].mxu1  ;;  %v13086_v52 = vadd.f32 %v13085_v56, %v8161_v40  ;;  %v13088_v50 = vadd.f32 %v17706_v34, %v12101_v47 }
 0x7aa   :  { %v8210_v26 = vmax.f32 %v13086_v52, 0.0  ;;  %v13089_v43 = vadd.f32 %v13088_v50, %v8164_v0  ;;  %v12102_v62 = vpop.f32.mrb[28].mxu0 }
 0x7ab   :  { %v12103_v3 = vpop.f32.mrb[29].mxu0 }
 0x7ac   :  { %v17807_v9 = vmul.f32 %v8210_v26, %v14686_v44  ;;  %v8211_v29 = vmax.f32 %v13089_v43, 0.0  ;;  %v12104_v48 = vadd.f32 %v12103_v3, %v12102_v62  ;;  %v12105_v20 = vpop.f32.mrb[30].mxu0 }
 0x7ad   :  { %v8177_v25 = vpop.f32.mrb[88].mxu1  ;;  %v12106_v42 = vpop.f32.mrb[31].mxu0 }
 0x7ae   :  { %v12846_v22 = vpop.f32.mrb[89].mxu1  ;;  %v17810_v17 = vmul.f32 %v8211_v29, %v14690_v36  ;;  %v13091_v1 = vadd.f32 %v17724_v51, %v12104_v48  ;;  %v12107_v11 = vadd.f32 %v12106_v42, %v12105_v20  ;;  %v8246_v35 = vmul.f32 %v17807_v9, %v17807_v9 }
 0x7af   :  { %v8180_v34 = vpop.f32.mrb[90].mxu1 }
 0x7b0   :  { %v12847_v12 = vpop.f32.mrb[91].mxu1  ;;  %v8230_v37 = vadd.f32 %v17810_v17, %v17807_v9  ;;  %v8247_v46 = vmul.f32 %v17810_v17, %v17810_v17  ;;  %v13092_v16 = vadd.f32 %v13091_v1, %v8169_v49  ;;  %v13094_v2 = vadd.f32 %v17733_v41, %v12107_v11 }
 0x7b2   :  { %v8256_v27 = vadd.f32 %v8247_v46, %v8246_v35  ;;  %v8212_v39 = vmax.f32 %v13092_v16, 0.0  ;;  %v13095_v15 = vadd.f32 %v13094_v2, %v8172_v53  ;;  %v12108_v23 = vpop.f32.mrb[32].mxu0 }
 0x7b3   :  { %v12109_v51 = vpop.f32.mrb[33].mxu0 }
 0x7b4   :  { %v17821_v28 = vmul.f32 %v8212_v39, %v18671_v59  ;;  %v8213_v7 = vmax.f32 %v13095_v15, 0.0  ;;  %v12110_v13 = vadd.f32 %v12109_v51, %v12108_v23  ;;  %v12111_v21 = vpop.f32.mrb[34].mxu0  ;;  %v18703_v39 = vld [vmem:[#allocation11_spill] sm:$0xff] }
 0x7b5   :  { %v8185_v61 = vpop.f32.mrb[92].mxu1  ;;  %v12112_v40 = vpop.f32.mrb[35].mxu0 }
 0x7b6   :  { %v12850_v45 = vpop.f32.mrb[93].mxu1  ;;  %v8231_v33 = vadd.f32 %v8230_v37, %v17821_v28  ;;  %v8248_v38 = vmul.f32 %v17821_v28, %v17821_v28  ;;  %v17827_v41 = vmul.f32 %v8213_v7, %v18678_v55  ;;  %v13097_v0 = vadd.f32 %v17749_v19, %v12110_v13 }
 0x7b7   :  { %v8188_v6 = vpop.f32.mrb[94].mxu1  ;;  %v12113_v60 = vadd.f32 %v12112_v40, %v12111_v21 }
 0x7b8   :  { %v12851_v32 = vpop.f32.mrb[95].mxu1  ;;  %v8257_v8 = vadd.f32 %v8256_v27, %v8248_v38  ;;  %v8232_v54 = vadd.f32 %v8231_v33, %v17827_v41  ;;  %v8249_v49 = vmul.f32 %v17827_v41, %v17827_v41  ;;  %v13098_v24 = vadd.f32 %v13097_v0, %v8177_v25 }
 0x7b9   :  { %v13100_v30 = vadd.f32 %v17759_v58, %v12113_v60 }
 0x7ba   :  { %v8258_v56 = vadd.f32 %v8257_v8, %v8249_v49  ;;  %v8214_v47 = vmax.f32 %v13098_v24, 0.0  ;;  %v12114_v53 = vpop.f32.mrb[36].mxu0  ;;  %v18705_v24 = vld [vmem:[#allocation13_spill] sm:$0xff] }
 0x7bb   :  { %v13101_v4 = vadd.f32 %v13100_v30, %v8180_v34  ;;  %v12115_v52 = vpop.f32.mrb[37].mxu0 }
 0x7bc   :  { %v17835_v50 = vmul.f32 %v8214_v47, %v18681_v18  ;;  %v12116_v19 = vadd.f32 %v12115_v52, %v12114_v53  ;;  %v12117_v26 = vpop.f32.mrb[38].mxu0 }
 0x7bd   :  { %v8193_v43 = vpop.f32.mrb[96].mxu1  ;;  %v8215_v62 = vmax.f32 %v13101_v4, 0.0  ;;  %v12118_v3 = vpop.f32.mrb[39].mxu0  ;;  %v18706_v4 = vld [vmem:[#allocation14_spill] sm:$0xff] }
 0x7be   :  { %v12854_v29 = vpop.f32.mrb[97].mxu1  ;;  %v8233_v48 = vadd.f32 %v8232_v54, %v17835_v50  ;;  %v8250_v20 = vmul.f32 %v17835_v50, %v17835_v50  ;;  %v13103_v58 = vadd.f32 %v17775_v14, %v12116_v19  ;;  %v12119_v25 = vadd.f32 %v12118_v3, %v12117_v26 }
 0x7bf   :  { %v8196_v42 = vpop.f32.mrb[98].mxu1  ;;  %v17842_v22 = vmul.f32 %v8215_v62, %v18684_v31 }
 0x7c0   :  { %v12855_v1 = vpop.f32.mrb[99].mxu1  ;;  %v8259_v11 = vadd.f32 %v8258_v56, %v8250_v20  ;;  %v13104_v34 = vadd.f32 %v13103_v58, %v8185_v61  ;;  %v13106_v35 = vadd.f32 %v17785_v57, %v12119_v25  ;;  %v18704_v61 = vld [vmem:[#allocation12_spill] sm:$0xff] }
 0x7c1   :  { %v8234_v12 = vadd.f32 %v8233_v48, %v17842_v22  ;;  %v8251_v37 = vmul.f32 %v17842_v22, %v17842_v22 }
 0x7c2   :  { %v8216_v46 = vmax.f32 %v13104_v34, 0.0  ;;  %v13107_v16 = vadd.f32 %v13106_v35, %v8188_v6  ;;  %v12120_v2 = vpop.f32.mrb[40].mxu0 }
 0x7c3   :  { %v8260_v27 = vadd.f32 %v8259_v11, %v8251_v37  ;;  %v12121_v14 = vpop.f32.mrb[41].mxu0 }
 0x7c4   :  { %v17849_v15 = vmul.f32 %v8216_v46, %v18703_v39  ;;  %v8217_v23 = vmax.f32 %v13107_v16, 0.0  ;;  %v12122_v51 = vadd.f32 %v12121_v14, %v12120_v2  ;;  %v12123_v7 = vpop.f32.mrb[42].mxu0 }
 0x7c5   :  { %v12124_v13 = vpop.f32.mrb[43].mxu0 }
 0x7c6   :  { %v8235_v21 = vadd.f32 %v8234_v12, %v17849_v15  ;;  %v8252_v57 = vmul.f32 %v17849_v15, %v17849_v15  ;;  %v8227_v40 = vmul.f32 %v8217_v23, %v18704_v61  ;;  %v13109_v45 = vadd.f32 %v17798_v63, %v12122_v51 }
 0x7c7   :  { %v12125_v33 = vadd.f32 %v12124_v13, %v12123_v7 }
 0x7c8   :  { %v8261_v38 = vadd.f32 %v8260_v27, %v8252_v57  ;;  %v8236_v0 = vadd.f32 %v8235_v21, %v8227_v40  ;;  %v8253_v6 = vmul.f32 %v8227_v40, %v8227_v40  ;;  %v13110_v60 = vadd.f32 %v13109_v45, %v8193_v43 }
 0x7c9   :  { %v13112_v32 = vadd.f32 %v17802_v10, %v12125_v33 }
 0x7ca   :  { %v8262_v8 = vadd.f32 %v8261_v38, %v8253_v6  ;;  %v8218_v54 = vmax.f32 %v13110_v60, 0.0 }
 0x7cb   :  { %v13113_v49 = vadd.f32 %v13112_v32, %v8196_v42 }
 0x7cc   :  { %v8228_v30 = vmul.f32 %v8218_v54, %v18705_v24 }
 0x7cd   :  { %v8219_v56 = vmax.f32 %v13113_v49, 0.0 }
 0x7ce   :  { %v8237_v47 = vadd.f32 %v8236_v0, %v8228_v30  ;;  %v8254_v53 = vmul.f32 %v8228_v30, %v8228_v30 }
 0x7cf   :  { %v8229_v52 = vmul.f32 %v8219_v56, %v18706_v4 }
 0x7d0   :  { %v8263_v19 = vadd.f32 %v8262_v8, %v8254_v53 }
 0x7d1   :  { %v8238_v26 = vadd.f32 %v8237_v47, %v8229_v52  ;;  %v8255_v63 = vmul.f32 %v8229_v52, %v8229_v52 }
 0x7d3   :  { %v8239_v62 = vrot.slane %v8238_v26, 4  ;;  %v8264_v3 = vadd.f32 %v8263_v19, %v8255_v63 }
 0x7d5   :  { %v8240_v29 = vadd.f32 %v8239_v62, %v8238_v26  ;;  %v8265_v48 = vrot.slane %v8264_v3, 4 }
 0x7d7   :  { %v8241_v43 = vrot.slane %v8240_v29, 2  ;;  %v8266_v20 = vadd.f32 %v8265_v48, %v8264_v3 }
 0x7d9   :  { %v8242_v10 = vadd.f32 %v8241_v43, %v8240_v29  ;;  %v8267_v58 = vrot.slane %v8266_v20, 2 }
 0x7db   :  { %v8243_v25 = vrot.slane %v8242_v10, 1  ;;  %v8268_v42 = vadd.f32 %v8267_v58, %v8266_v20 }
 0x7dd   :  { %v8244_v1 = vadd.f32 %v8243_v25, %v8242_v10  ;;  %v8269_v11 = vrot.slane %v8268_v42, 1 }
 0x7df   :  { %v8245_v34 = vmul.f32 0.03125, %v8244_v1  ;;  %v8270_v35 = vadd.f32 %v8269_v11, %v8268_v42 }
 0x7e1   :  { %v8271_v12 = vmul.f32 0.03125, %v8270_v35  ;;  %v8272_v37 = vmul.f32 %v8245_v34, %v8245_v34  ;;  %v8275_v46 = vsub.f32 %v17807_v9, %v8245_v34  ;;  %v8276_v16 = vsub.f32 %v17810_v17, %v8245_v34 }
 0x7e2   :  { %v8277_v2 = vsub.f32 %v17821_v28, %v8245_v34  ;;  %v8278_v27 = vsub.f32 %v17827_v41, %v8245_v34  ;;  %v8279_v14 = vsub.f32 %v17835_v50, %v8245_v34  ;;  %v8280_v23 = vsub.f32 %v17842_v22, %v8245_v34 }
 0x7e3   :  { %v8273_v51 = vsub.f32 %v8271_v12, %v8272_v37  ;;  %v8281_v7 = vsub.f32 %v17849_v15, %v8245_v34  ;;  %v8282_v13 = vsub.f32 %v8227_v40, %v8245_v34  ;;  %v8283_v21 = vsub.f32 %v8228_v30, %v8245_v34 }
 0x7e4   :  { %v8284_v57 = vsub.f32 %v8229_v52, %v8245_v34 }
 0x7e5   :  { %v8274_v45 = vmax.f32 %v8273_v51, 0.0 }
 0x7e7   :  { %v8285_v33 = vadd.f32 1e-05, %v8274_v45 }
 0x7e9   :  { %13830 = vrsqrt.f32 %v8285_v33 }
 0x7f3   :  { %v13831_v9 = vpop.eup %13830 }
 0x7f4   :  { %v8287_v38 = vmul.f32 %v13831_v9, %v8275_v46  ;;  %v8288_v17 = vmul.f32 %v13831_v9, %v8276_v16  ;;  %v8289_v0 = vmul.f32 %v13831_v9, %v8277_v2  ;;  %v8290_v28 = vmul.f32 %v13831_v9, %v8278_v27 }
 0x7f5   :  { %v8291_v6 = vmul.f32 %v13831_v9, %v8279_v14  ;;  %v8292_v41 = vmul.f32 %v13831_v9, %v8280_v23  ;;  %v8293_v60 = vmul.f32 %v13831_v9, %v8281_v7  ;;  %v8294_v50 = vmul.f32 %v13831_v9, %v8282_v13 }
 0x7f6   :  { %v8295_v32 = vmul.f32 %v13831_v9, %v8283_v21  ;;  %v8296_v22 = vmul.f32 %v13831_v9, %v8284_v57  ;;  %v8297_v8 = vmul.f32 %v8287_v38, %v14686_v44  ;;  %v8298_v15 = vmul.f32 %v8288_v17, %v14690_v36 }
 0x7f7   :  { %v8299_v40 = vmul.f32 %v8289_v0, %v18671_v59  ;;  %v8300_v54 = vmul.f32 %v8290_v28, %v18678_v55  ;;  %v8301_v49 = vmul.f32 %v8291_v6, %v18681_v18  ;;  %v8302_v30 = vmul.f32 %v8292_v41, %v18684_v31 }
 0x7f8   :  { %v8303_v56 = vmul.f32 %v8293_v60, %v18703_v39  ;;  %v8304_v47 = vmul.f32 %v8294_v50, %v18704_v61  ;;  %v8305_v53 = vmul.f32 %v8295_v32, %v18705_v24  ;;  %v8306_v52 = vmul.f32 %v8296_v22, %v18706_v4 }
 0x7f9   :  { %v8307_v19 = vpack.c.bf16 %v8298_v15, %v8297_v8  ;;  %v8308_v26 = vpack.c.bf16 %v8300_v54, %v8299_v40  ;;  %v8309_v63 = vpack.c.bf16 %v8302_v30, %v8301_v49 }
 0x7fa   :  { %v8310_v62 = vpack.c.bf16 %v8304_v47, %v8303_v56  ;;  %v8311_v3 = vpack.c.bf16 %v8306_v52, %v8305_v53 }
 0x7fb   :  { %v8317_v29 = vrot.slane %v8307_v19, 4  ;;  %v8318_v48 = vrot.slane %v8308_v26, 4  ;;  %v8320_v43 = vrot.slane %v8309_v63, 4 }
 0x7fc   :  { %v8322_v20 = vrot.slane %v8310_v62, 4  ;;  %v8324_v10 = vrot.slane %v8311_v3, 4 }
 0x7fd   :  { %v8319_v58 = vsel %vm38_vm1, %v8317_v29, %v8318_v48  ;;  %v8321_v25 = vsel %vm38_vm1, %v8318_v48, %v8320_v43  ;;  %8332 = vst [vmem:[#allocation2] sm:$0xf0] %v8317_v29 }
 0x7fe   :  { %v17879_v42 = vsel %vm38_vm1, %v8320_v43, %v8322_v20  ;;  %v17882_v1 = vsel %vm38_vm1, %v8322_v20, %v8324_v10  ;;  %8337 = vst [vmem:[#allocation2 + $0x28] sm:$0xf] %v8324_v10  ;;  %v17884_v11 = vshll.u32 %v8319_v58, 16  ;;  %v17886_v34 = vrot.slane %v8319_v58, 1 }
 0x7ff   :  { %v8401_v35 = vrot.slane %v8321_v25, 1  ;;  %v17888_v12 = vshrl.u32 %v8319_v58, 16  ;;  %v17890_v37 = vshll.u32 %v8321_v25, 16  ;;  %v17892_v46 = vshrl.u32 %v8321_v25, 16 }
 0x800   :  { %v17895_v16 = vrot.slane %v17884_v11, 1  ;;  %v8542_v2 = vrot.slane %v17884_v11, 4  ;;  %v17899_v27 = vshll.u32 %v17879_v42, 16  ;;  %v8403_v14 = vrot.slane %v17879_v42, 1 }
 0x801   :  { %v8402_v23 = vsel %vm151_vm2, %v17886_v34, %v8401_v35  ;;  %v8364_v51 = vrot.slane %v17890_v37, 1  ;;  %v8541_v7 = vrot.slane %v17888_v12, 3  ;;  %v8579_v45 = vrot.slane %v17892_v46, 3 }
 0x802   :  { %v17906_v13 = vshrl.u32 %v8402_v23, 16  ;;  %v17908_v21 = vshll.u32 %v8402_v23, 16  ;;  %v8360_v57 = vor.u32 %v17888_v12, %v17895_v16  ;;  %v8372_v9 = vrot.slane %v17899_v27, 1 }
 0x803   :  { %v8368_v33 = vor.u32 %v17892_v46, %v8364_v51  ;;  %v8404_v38 = vsel %vm151_vm2, %v8401_v35, %v8403_v14  ;;  %v8580_v17 = vrot.slane %v17890_v37, 4  ;;  %v8543_v50 = vor.u32 %v8542_v2, %v8541_v7 }
 0x804   :  { %v8460_v0 = vld [vmem:[#allocation2] sm:$0xf0]  ;;  %v8573_v28 = vrot.slane %v17906_v13, 3  ;;  %v8576_v6 = vrot.slane %v17908_v21, 4  ;;  %v17922_v41 = vsel %vm98_vm3, %v8360_v57, %v8364_v51  ;;  %v17945_v25 = vshrl.u32 %v8404_v38, 16 }
 0x805   :  { %v8458_v60 = vld [vmem:[#allocation2] sm:$0xf8]  ;;  %v8480_v32 = vrot.slane %v8460_v0, 1  ;;  %v8463_v22 = vshrl.u32 %v8460_v0, 16  ;;  %v8465_v8 = vshll.u32 %v8460_v0, 16  ;;  %v17925_v15 = vshrl.u32 %v17922_v41, 16 }
 0x806   :  { %v17927_v40 = vor.u32 %v8576_v6, %v8573_v28  ;;  %v17930_v54 = vshll.u32 %v17922_v41, 16  ;;  %v8534_v49 = vshrl.u32 %v8458_v60, 16  ;;  %v8537_v30 = vshll.u32 %v8458_v60, 16  ;;  %v13776_v28 = vld [vmem:[%s18559_s1 + $0xbc0] sm:$0xff]  }
 0x807   :  { %v8481_v56 = vsel %vm151_vm2, %v8480_v32, %v17886_v34  ;;  %v8467_v47 = vrot.slane %v8465_v8, 1  ;;  %v8556_v53 = vrot.slane %v17925_v15, 3  ;;  %v17936_v52 = vsel %vm98_vm3, %v8368_v33, %v8372_v9  ;;  %v18163_v55 = vld [vmem:[#allocation2] sm:$0xff] }
 0x808   :  { %v8563_v19 = vshrl.u32 %v8481_v56, 16  ;;  %v8566_v26 = vshll.u32 %v8481_v56, 16  ;;  %v8559_v63 = vrot.slane %v17930_v54, 4  ;;  %v8536_v62 = vrot.slane %v8534_v49, 3  ;;  %v9345_v59 = vld [vmem:[#allocation2] sm:$0x80] }
 0x809   :  { %v8468_v3 = vor.u32 %v8467_v47, %v8463_v22  ;;  %v8539_v29 = vrot.slane %v8537_v30, 4  ;;  %v17940_v48 = vshrl.u32 %v17936_v52, 16  ;;  %v17943_v43 = vshll.u32 %v17936_v52, 16 }
 0x80a   :  { %v8565_v20 = vrot.slane %v8563_v19, 3  ;;  %v8568_v10 = vrot.slane %v8566_v26, 4  ;;  %v8560_v58 = vor.u32 %v8559_v63, %v8556_v53  ;;  %v8595_v0 = vrot.slane %v17945_v25, 3  ;;  %v13779_v63 = vld [vmem:[%s18559_s1 + $0xbc8] sm:$0xff]  }
 0x80b   :  { %v8469_v35 = vsel %vm98_vm3, %v8468_v3, %v17895_v16  ;;  %v8540_v2 = vor.u32 %v8539_v29, %v8536_v62  ;;  %v8586_v23 = vrot.slane %v17940_v48, 3  ;;  %v8589_v51 = vrot.slane %v17943_v43, 4  ;;  %v13775_v29 = vld [vmem:[%s18559_s1 + $0xb40] sm:$0xff]  }
 0x80c   :  { %v8569_v7 = vor.u32 %v8568_v10, %v8565_v20  ;;  %v8546_v57 = vshrl.u32 %v8469_v35, 16  ;;  %v8549_v33 = vshll.u32 %v8469_v35, 16  ;;  %v17958_v32 = vshll.u32 %v8404_v38, 16 }
 0x80d   :  { %v8544_v6 = vsel %vm286_vm4, %v8540_v2, %v8543_v50  ;;  %v17956_v60 = vor.u32 %v8589_v51, %v8586_v23  ;;  %v8581_v22 = vor.u32 %v8580_v17, %v8579_v45  ;;  %v17963_v56 = vshrl.u32 %v17879_v42, 16  ;;  %v17974_v45 = vld [vmem:[#allocation2 + $0x28] sm:$0xf] }
 0x80e   :  { %v8578_v8 = vsel %vm286_vm4, %v8569_v7, %v17927_v40  ;;  %v8548_v49 = vrot.slane %v8546_v57, 3  ;;  %v8551_v30 = vrot.slane %v8549_v33, 4  ;;  %v8598_v53 = vrot.slane %v17958_v32, 4  ;;  %v8461_v17 = vld [vmem:[#allocation2 + $0x28] sm:$0x1f] }
 0x80f   :  { %12873 = vmatmul.mubr.bf16.vlgmr.msra.gmra.mrb[100].mxu1 %v8578_v8  ;;  %v8591_v47 = vsel %vm286_vm4, %v8560_v58, %v17956_v60  ;;  %v17969_v19 = vsel %vm286_vm4, %v8543_v50, %v8581_v22  ;;  %v17972_v38 = vshll.u32 %v17882_v1, 16  ;;  %v8376_v62 = vor.u32 %v17963_v56, %v8372_v9  ;;  %v13777_v23 = vld [vmem:[%s18559_s1 + $0xb88] sm:$0xff]  }
 0x810   :  { %v8552_v26 = vor.u32 %v8551_v30, %v8548_v49  ;;  %12876 = vmatprep.mubr.msk.bf16.mxu1 %vm13859_vm0, %v18641_v5  ;;  %12893 = vmatpush3.bf16.msra.mxu1 %v13776_v28  ;;  %v17983_v50 = vrot.slane %v17882_v1, 1  ;;  %v8601_v3 = vrot.slane %v17963_v56, 3  ;;  %v8599_v20 = vor.u32 %v8598_v53, %v8595_v0  ;;  %v13782_v28 = vld [vmem:[%s18559_s1 + $0xbd0] sm:$0xff]  }
 0x811   :  { %12894 = vmatprep.subr.bf16.mxu1 %v18641_v5  ;;  %v8380_v10 = vrot.slane %v17972_v38, 1  ;;  %v8602_v35 = vrot.slane %v17899_v27, 4  ;;  %v17993_v2 = vshrl.u32 %v17882_v1, 16  ;;  %v18623_v7 = vshll.u32 %v17974_v45, 16 }
 0x812   :  { %v8561_v9 = vsel %vm286_vm4, %v8552_v26, %v8560_v58  ;;  %v8406_v51 = vsel %vm151_vm2, %v8403_v14, %v17983_v50  ;;  %v18004_v57 = vrot.slane %v8461_v17, 1  ;;  %v8600_v1 = vsel %vm286_vm4, %v17927_v40, %v8599_v20 }
 0x813   :  { %8858 = vmatprep.mubr.bf16.mxu0 %v8561_v9  ;;  %v18009_v33 = vsel %vm98_vm3, %v8376_v62, %v8380_v10  ;;  %v18011_v58 = vshrl.u32 %v8406_v51, 16  ;;  %v18013_v0 = vshll.u32 %v8406_v51, 16  ;;  %v8603_v40 = vor.u32 %v8602_v35, %v8601_v3  ;;  %v13785_v51 = vld [vmem:[%s18559_s1 + $0xbd8] sm:$0xff]  }
 0x814   :  { %8859 = vmatmul.mubr.bf16.vlgmr.msra.gmra.mrb[44].mxu0 %v8544_v6  ;;  %12895 = vmatpush3.bf16.msra.mxu1 %v13779_v63  ;;  %v18016_v42 = vshrl.u32 %v18009_v33, 16  ;;  %v18019_v14 = vshll.u32 %v18009_v33, 16  ;;  %v18025_v8 = vor.u32 %v17993_v2, %v8380_v10  ;;  %v13778_v6 = vld [vmem:[%s18559_s1 + $0xb48] sm:$0xff]   ;;  %v8473_v53 = vrot.slane %v18623_v7, 1  ;;  %v13780_v63 = vld [vmem:[%s18559_s1 + $0xb90] sm:$0xff]  }
 0x815   :  { %8866 = vmatprep.mubr.bf16.mxu0 %v8591_v47  ;;  %12199 = vmatpush3.bf16.msra.mxu0 %v13775_v29  ;;  %v8617_v49 = vrot.slane %v18011_v58, 3  ;;  %v8620_v30 = vrot.slane %v18013_v0, 4  ;;  %v8483_v17 = vsel %vm151_vm2, %v17983_v50, %v18004_v57  ;;  %v18044_v62 = vsel %vm286_vm4, %v8581_v22, %v8603_v40 }
 0x816   :  { %12200 = vmatprep.subr.bf16.mxu0 %v13777_v23  ;;  %v8608_v26 = vrot.slane %v18016_v42, 3  ;;  %v8611_v47 = vrot.slane %v18019_v14, 4  ;;  %12896 = vmatprep.subr.bf16.mxu1 %v18641_v5  ;;  %v8637_v3 = vshrl.u32 %v8483_v17, 16  ;;  %v8474_v10 = vsel %vm98_vm3, %v18025_v8, %v8473_v53 }
 0x817   :  { %12877 = vmatmul.mubr.bf16.gmra.mrb[104].mxu1 %v8600_v1  ;;  %v8621_v29 = vor.u32 %v8620_v30, %v8617_v49  ;;  %v8640_v35 = vshll.u32 %v8483_v17, 16  ;;  %v8623_v9 = vrot.slane %v17993_v2, 3  ;;  %v8628_v22 = vshrl.u32 %v8474_v10, 16  ;;  %v13781_v49 = vld [vmem:[%s18559_s1 + $0xb50] sm:$0xff]  }
 0x818   :  { %v8612_v23 = vor.u32 %v8611_v47, %v8608_v26  ;;  %12880 = vmatprep.mubr.msk.bf16.mxu1 %vm13859_vm0, %v18641_v5  ;;  %12897 = vmatpush3.bf16.msra.mxu1 %v13782_v28  ;;  %v8631_v7 = vshll.u32 %v8474_v10, 16  ;;  %v8639_v4 = vrot.slane %v8637_v3, 3  ;;  %v8624_v17 = vrot.slane %v17972_v38, 4 }
 0x819   :  { %12201 = vmatpush3.bf16.msra.mxu0 %v13778_v6  ;;  %v8622_v1 = vsel %vm286_vm4, %v8599_v20, %v8621_v29  ;;  %12898 = vmatprep.subr.bf16.mxu1 %v18641_v5  ;;  %v8642_v30 = vrot.slane %v8640_v35, 4  ;;  %v8475_v28 = vshrl.u32 %v17974_v45, 16  ;;  %v13783_v6 = vld [vmem:[%s18559_s1 + $0xb98] sm:$0xff]   ;;  %v8630_v20 = vrot.slane %v8628_v22, 3 }
 0x81a   :  { %v8613_v26 = vsel %vm286_vm4, %v17956_v60, %v8612_v23  ;;  %12202 = vmatprep.subr.bf16.mxu0 %v13780_v63  ;;  %v8633_v47 = vrot.slane %v8631_v7, 4  ;;  %v18068_v10 = vor.u32 %v8624_v17, %v8623_v9  ;;  %v13787_v60 = vld [vmem:[%s18559_s1 + $0xbe0] sm:$0xff]  }
 0x81b   :  { %v18066_v3 = vor.u32 %v8642_v30, %v8639_v4  ;;  %v8477_v24 = vor.u32 %v8475_v28, %v8473_v53  ;;  %v8344_v63 = vld [vmem:[#allocation2] sm:$0xfe]  ;;  %v13784_v4 = vld [vmem:[%s18559_s1 + $0xb58] sm:$0xff]  }
 0x81c   :  { %8867 = vmatmul.mubr.bf16.gmra.mrb[48].mxu0 %v17969_v19  ;;  %12899 = vmatpush3.bf16.msra.mxu1 %v13785_v51  ;;  %v18071_v35 = vor.u32 %v8633_v47, %v8630_v20  ;;  %v18083_v19 = vsel %vm286_vm4, %v8603_v40, %v18068_v10  ;;  %v13786_v51 = vld [vmem:[%s18559_s1 + $0xba0] sm:$0xff]   ;;  %v8349_v30 = vshll.u32 %v8344_v63, 16  ;;  %v18628_v40 = vrot.slane %v17930_v54, 1 }
 0x81d   :  { %8874 = vmatprep.mubr.bf16.mxu0 %v8613_v26  ;;  %12203 = vmatpush3.bf16.msra.mxu0 %v13781_v49  ;;  %v8644_v7 = vsel %vm286_vm4, %v8621_v29, %v18066_v3  ;;  %v8650_v53 = vshrl.u32 %v8477_v24, 16  ;;  %v8653_v22 = vshll.u32 %v8477_v24, 16  ;;  %v8659_v49 = vshrl.u32 %v18004_v57, 16  ;;  %v13788_v24 = vld [vmem:[%s18559_s1 + $0xb60] sm:$0xff]  }
 0x81e   :  { %12204 = vmatprep.subr.bf16.mxu0 %v13783_v6  ;;  %v8635_v9 = vsel %vm286_vm4, %v8612_v23, %v18071_v35  ;;  %12900 = vmatprep.subr.bf16.mxu1 %v18641_v5  ;;  %v8662_v29 = vshll.u32 %v18004_v57, 16  ;;  %v13789_v23 = vld [vmem:[%s18559_s1 + $0xbe8] sm:$0xff]   ;;  %v8398_v17 = vrot.slane %v8344_v63, 1  ;;  %v8996_v26 = vrot.slane %v17908_v21, 1 }
 0x81f   :  { %12881 = vmatmul.mubr.bf16.gmra.mrb[108].mxu1 %v8622_v1  ;;  %v18104_v57 = vrot.slane %v8475_v28, 3  ;;  %v18106_v1 = vrot.slane %v8650_v53, 3  ;;  %v8347_v6 = vshrl.u32 %v8344_v63, 16  ;;  %v8351_v20 = vrot.slane %v8349_v30, 1 }
 0x820   :  { %12884 = vmatprep.mubr.msk.bf16.mxu1 %vm13859_vm0, %v18641_v5  ;;  %12901 = vmatpush3.bf16.msra.mxu1 %v13787_v60  ;;  %v8655_v47 = vrot.slane %v8653_v22, 4  ;;  %v13790_v60 = vld [vmem:[%s18559_s1 + $0xba8] sm:$0xff]   ;;  %v8998_v61 = vor.u32 %v18628_v40, %v17925_v15  ;;  %v8999_v28 = vrot.slane %v17943_v43, 1  ;;  %v18117_v39 = vrot.slane %v8659_v49, 3  ;;  %v13792_v22 = vld [vmem:[%s18559_s1 + $0xbf0] sm:$0xff]  }
 0x821   :  { %12205 = vmatpush3.bf16.msra.mxu0 %v13784_v4  ;;  %12902 = vmatprep.subr.bf16.mxu1 %v18641_v5  ;;  %v8400_v4 = vsel %vm151_vm2, %v8398_v17, %v17886_v34  ;;  %v18119_v53 = vrot.slane %v8662_v29, 4  ;;  %v8352_v63 = vor.u32 %v8351_v20, %v8347_v6  ;;  %v9001_v40 = vor.u32 %v8996_v26, %v17906_v13  ;;  %v13791_v29 = vld [vmem:[%s18559_s1 + $0xb68] sm:$0xff]  }
 0x822   :  { %12206 = vmatprep.subr.bf16.mxu0 %v13786_v51  ;;  %v8992_v51 = vshll.u32 %v8400_v4, 16  ;;  %v8990_v30 = vshrl.u32 %v8400_v4, 16  ;;  %v18126_v17 = vsel %vm98_vm3, %v8998_v61, %v8999_v28  ;;  %v9002_v49 = vrot.slane %v17958_v32, 1  ;;  %v18137_v61 = vld [vmem:[#allocation2 + $0x28] sm:$0x1] }
 0x823   :  { %v9004_v6 = vor.u32 %v8999_v28, %v17940_v48  ;;  %v9005_v20 = vrot.slane %v18019_v14, 1  ;;  %v8656_v4 = vor.u32 %v8655_v47, %v18106_v1  ;;  %v13795_v1 = vld [vmem:[%s18559_s1 + $0xbf8] sm:$0xff]  }
 0x824   :  { %8875 = vmatmul.mubr.bf16.gmra.mrb[52].mxu0 %v18044_v62  ;;  %12903 = vmatpush3.bf16.msra.mxu1 %v13789_v23  ;;  %v8357_v62 = vsel %vm98_vm3, %v8352_v63, %v17895_v16  ;;  %v8994_v23 = vrot.slane %v8992_v51, 1  ;;  %v18149_v28 = vsel %vm98_vm3, %v9001_v40, %v9002_v49  ;;  %v18151_v51 = vld [vmem:[#allocation2 + $0x28] sm:$0x3]  ;;  %v9007_v18 = vor.u32 %v9002_v49, %v17945_v25  ;;  %v13794_v49 = vld [vmem:[%s18559_s1 + $0xb70] sm:$0xff]  }
 0x825   :  { %8882 = vmatprep.mubr.bf16.mxu0 %v8635_v9  ;;  %12207 = vmatpush3.bf16.msra.mxu0 %v13788_v24  ;;  %v13793_v9 = vld [vmem:[%s18559_s1 + $0xbb0] sm:$0xff]   ;;  %v18707_v24 = vshll.u32 %v17974_v45, 16  ;;  %v8983_v63 = vshll.u32 %v8357_v62, 16  ;;  %v9008_v45 = vrot.slane %v18013_v0, 1  ;;  %v8981_v40 = vshrl.u32 %v8357_v62, 16 }
 0x826   :  { %12208 = vmatprep.subr.bf16.mxu0 %v13790_v60  ;;  %12904 = vmatprep.subr.bf16.mxu1 %v18641_v5  ;;  %v8995_v47 = vor.u32 %v8994_v23, %v8990_v30  ;;  %v18157_v60 = vsel %vm98_vm3, %v9004_v6, %v9005_v20  ;;  %v8665_v30 = vor.u32 %v18119_v53, %v18117_v39  ;;  %v8407_v62 = vrot.slane %v18151_v51, 1  ;;  %v13796_v39 = vld [vmem:[%s18559_s1 + $0xbb8] sm:$0xff]  }
 0x827   :  { %v18146_v31 = vrot.slane %v18707_v24, 4  ;;  %12885 = vmatmul.mubr.bf16.gmra.mrb[112].mxu1 %v8644_v7  ;;  %v8985_v24 = vrot.slane %v8983_v63, 1  ;;  %v8386_v7 = vshll.u32 %v18137_v61, 16  ;;  %v8657_v63 = vsel %vm286_vm4, %v18071_v35, %v8656_v4  ;;  %v13820_v51 = vld [vmem:[%s18559_s1 + $0xd38] sm:$0xff]  }
 0x828   :  { %12888 = vmatprep.mubr.msk.bf16.mxu1 %vm13859_vm0, %v18641_v5  ;;  %12905 = vmatpush3.bf16.msra.mxu1 %v13792_v22  ;;  %v18173_v23 = vsel %vm98_vm3, %v8995_v47, %v8996_v26  ;;  %v18176_v22 = vsel %vm98_vm3, %v9007_v18, %v9008_v45  ;;  %v8975_v26 = vshll.u32 %v18163_v55, 16  ;;  %v18191_v18 = vsel %vm151_vm2, %v17983_v50, %v8407_v62 }
 0x829   :  { %12209 = vmatpush3.bf16.msra.mxu0 %v13791_v29  ;;  %12906 = vmatprep.subr.bf16.mxu1 %v18641_v5  ;;  %v8647_v29 = vor.u32 %v18146_v31, %v18104_v57  ;;  %v8986_v6 = vor.u32 %v8985_v24, %v8981_v40  ;;  %v8388_v53 = vrot.slane %v8386_v7, 1  ;;  %v18708_v31 = vrot.slane %v17930_v54, 1 }
 0x82a   :  { %12210 = vmatprep.subr.bf16.mxu0 %v13793_v9  ;;  %v9350_v9 = vshll.u32 %v9345_v59, 16  ;;  %v9018_v35 = vshll.u32 %v18191_v18, 16  ;;  %v9438_v4 = vrot.slane %v17925_v15, 6  ;;  %v8666_v40 = vsel %vm286_vm4, %v18066_v3, %v8665_v30  ;;  %v13798_v15 = vld [vmem:[%s18559_s1 + $0xd00] sm:$0xff]  }
 0x82b   :  { %v8988_v57 = vsel %vm98_vm3, %v8986_v6, %v18708_v31  ;;  %v18199_v47 = vsel %vm98_vm3, %v18025_v8, %v8388_v53  ;;  %v9016_v7 = vor.u32 %v9008_v45, %v18011_v58  ;;  %v9348_v3 = vshrl.u32 %v9345_v59, 16 }
 0x82c   :  { %8883 = vmatmul.mubr.bf16.gmra.mrb[56].mxu0 %v18083_v19  ;;  %12907 = vmatpush3.bf16.msra.mxu1 %v13795_v1  ;;  %v13797_v19 = vld [vmem:[%s18559_s1 + $0xb78] sm:$0xff]   ;;  %v9010_v1 = vor.u32 %v9005_v20, %v18016_v42  ;;  %v9012_v24 = vshll.u32 %v18199_v47, 16  ;;  %v18215_v6 = vrot.slane %v9018_v35, 1  ;;  %v9352_v30 = vrot.slane %v9350_v9, 1 }
 0x82d   :  { %8890 = vmatprep.mubr.bf16.mxu0 %v8657_v63  ;;  %12211 = vmatpush3.bf16.msra.mxu0 %v13794_v49  ;;  %v9439_v49 = vrot.slane %v17930_v54, 7  ;;  %v9365_v20 = vrot.slane %v9345_v59, 1  ;;  %v9450_v63 = vrot.slane %v17906_v13, 6  ;;  %v9451_v45 = vrot.slane %v17908_v21, 7 }
 0x82e   :  { %12212 = vmatprep.subr.bf16.mxu0 %v13796_v39  ;;  %12928 = vmatprep.subr.bf16.mxu1 %v18641_v5  ;;  %v18218_v53 = vrot.slane %v9012_v24, 1  ;;  %v18226_v39 = vsel %vm98_vm3, %v9016_v7, %v18215_v6  ;;  %v9353_v31 = vor.u32 %v9352_v30, %v9348_v3  ;;  %v8977_v9 = vrot.slane %v8975_v26, 1 }
 0x82f   :  { %12889 = vmatmul.mubr.bf16.gmra.mrb[116].mxu1 %v8666_v40  ;;  %v9440_v35 = vor.u32 %v9439_v49, %v9438_v4  ;;  %v9366_v59 = vsel %vm151_vm2, %v9365_v20, %v17886_v34  ;;  %v9452_v13 = vor.u32 %v9451_v45, %v9450_v63  ;;  %v8648_v7 = vsel %vm286_vm4, %v18068_v10, %v8647_v29  ;;  %v13800_v34 = vld [vmem:[%s18559_s1 + $0xd40] sm:$0xff]  }
 0x830   :  { %12908 = vmatprep.mubr.msk.bf16.mxu1 %vm13859_vm0, %v18641_v5  ;;  %v18230_v54 = vsel %vm98_vm3, %v9010_v1, %v18218_v53  ;;  %v9354_v21 = vsel %vm98_vm3, %v9353_v31, %v17895_v16  ;;  %v9443_v40 = vshrl.u32 %v9366_v59, 16  ;;  %v9446_v24 = vshll.u32 %v9366_v59, 16 }
 0x831   :  { %12213 = vmatpush3.bf16.msra.mxu0 %v13797_v19  ;;  %v9431_v4 = vshrl.u32 %v9354_v21, 16  ;;  %v9434_v19 = vshll.u32 %v9354_v21, 16  ;;  %v8973_v1 = vshrl.u32 %v18163_v55, 16  ;;  %v9427_v20 = vrot.slane %v17884_v11, 7  ;;  %v13803_v11 = vld [vmem:[%s18559_s1 + $0xd48] sm:$0xff]  }
 0x832   :  { %12257 = vmatprep.subr.bf16.mxu0 %v13798_v15  ;;  %v9445_v3 = vrot.slane %v9443_v40, 6  ;;  %v9448_v26 = vrot.slane %v9446_v24, 7  ;;  %v9426_v15 = vrot.slane %v17888_v12, 6  ;;  %v9458_v29 = vrot.slane %v17940_v48, 6  ;;  %v18269_v40 = vld [vmem:[#allocation2 + $0x28] sm:$0x7f] }
 0x833   :  { %v9433_v30 = vrot.slane %v9431_v4, 6  ;;  %v9436_v49 = vrot.slane %v9434_v19, 7  ;;  %v8978_v63 = vor.u32 %v8977_v9, %v8973_v1  ;;  %v9459_v45 = vrot.slane %v17943_v43, 7  ;;  %v9346_v24 = vld [vmem:[#allocation2 + $0x28] sm:$0xff] }
 0x834   :  { %8891 = vmatmul.mubr.bf16.gmra.mrb[60].mxu0 %v8648_v7  ;;  %v9449_v10 = vor.u32 %v9448_v26, %v9445_v3  ;;  %v18247_v31 = vor.u32 %v9427_v20, %v9426_v15  ;;  %v9462_v59 = vrot.slane %v17945_v25, 6  ;;  %v9463_v12 = vrot.slane %v17958_v32, 7  ;;  %v13799_v25 = vld [vmem:[%s18559_s1 + $0xcc0] sm:$0xff]   ;;  %v13801_v7 = vld [vmem:[%s18559_s1 + $0xd08] sm:$0xff]  }
 0x835   :  { %9229 = vmatprep.mubr.bf16.mxu0 %v8988_v57  ;;  %v9437_v55 = vor.u32 %v9436_v49, %v9433_v30  ;;  %v9460_v43 = vor.u32 %v9459_v45, %v9458_v29  ;;  %v9455_v9 = vrot.slane %v17890_v37, 7  ;;  %v9470_v21 = vrot.slane %v18016_v42, 6  ;;  %v13804_v30 = vld [vmem:[%s18559_s1 + $0xd10] sm:$0xff]   ;;  %v13809_v45 = vld [vmem:[%s18559_s1 + $0xd58] sm:$0xff]  }
 0x836   :  { %v18257_v48 = vsel %vm1172_vm5, %v9449_v10, %v9452_v13  ;;  %v9464_v57 = vor.u32 %v9463_v12, %v9462_v59  ;;  %v9471_v19 = vrot.slane %v18019_v14, 7  ;;  %v9474_v1 = vrot.slane %v18011_v58, 6 }
 0x837   :  { %12909 = vmatmul.mubr.bf16.vlgmr.msra.gmra.mrb[100].mxu1 %v18173_v23  ;;  %v9454_v23 = vrot.slane %v17892_v46, 6  ;;  %v18265_v32 = vsel %vm1172_vm5, %v9437_v55, %v9440_v35  ;;  %v8979_v46 = vsel %vm98_vm3, %v8978_v63, %v17895_v16  ;;  %v18277_v4 = vsel %vm1172_vm5, %v9440_v35, %v9460_v43  ;;  %v13806_v16 = vld [vmem:[%s18559_s1 + $0xd50] sm:$0xff]  }
 0x838   :  { %12912 = vmatprep.mubr.msk.bf16.mxu1 %vm13859_vm0, %v18641_v5  ;;  %12929 = vmatpush3.bf16.msra.mxu1 %v13800_v34  ;;  %v18282_v37 = vsel %vm1172_vm5, %v9452_v13, %v9464_v57  ;;  %v9475_v34 = vrot.slane %v18013_v0, 7  ;;  %v9466_v3 = vrot.slane %v17963_v56, 6  ;;  %v9472_v35 = vor.u32 %v9471_v19, %v9470_v21  ;;  %v13802_v56 = vld [vmem:[%s18559_s1 + $0xcc8] sm:$0xff]   ;;  %v13811_v21 = vld [vmem:[%s18559_s1 + $0xd60] sm:$0xff]  }
 0x839   :  { %12930 = vmatprep.subr.bf16.mxu1 %v18641_v5  ;;  %v9456_v42 = vor.u32 %v9455_v9, %v9454_v23  ;;  %v9467_v26 = vrot.slane %v17899_v27, 7  ;;  %v9356_v14 = vshll.u32 %v18269_v40, 16  ;;  %v18291_v58 = vrot.slane %v9346_v24, 1  ;;  %v13807_v23 = vld [vmem:[%s18559_s1 + $0xd18] sm:$0xff]   ;;  %v13813_v19 = vld [vmem:[%s18559_s1 + $0xd68] sm:$0xff]  }
 0x83a   :  { %v9476_v13 = vor.u32 %v9475_v34, %v9474_v1  ;;  %v9478_v15 = vrot.slane %v17993_v2, 6  ;;  %v9479_v27 = vrot.slane %v17972_v38, 7  ;;  %v13808_v24 = vld [vmem:[%s18559_s1 + $0xcd8] sm:$0xff]   ;;  %v13812_v1 = vld [vmem:[%s18559_s1 + $0xce0] sm:$0xff]   ;;  %v13816_v34 = vld [vmem:[%s18559_s1 + $0xd70] sm:$0xff]  }
 0x83b   :  { %v18299_v0 = vsel %vm1172_vm5, %v18247_v31, %v9456_v42  ;;  %v9468_v49 = vor.u32 %v9467_v26, %v9466_v3  ;;  %v18312_v20 = vrot.slane %v9356_v14, 1  ;;  %v9368_v2 = vsel %vm151_vm2, %v17983_v50, %v18291_v58  ;;  %v13815_v3 = vld [vmem:[%s18559_s1 + $0xce8] sm:$0xff]  }
 0x83c   :  { %9230 = vmatmul.mubr.bf16.vlgmr.msra.gmra.mrb[64].mxu0 %v8979_v46  ;;  %12931 = vmatpush3.bf16.msra.mxu1 %v13803_v11  ;;  %v18319_v38 = vsel %vm1172_vm5, %v9464_v57, %v9476_v13  ;;  %v9492_v63 = vshrl.u32 %v9368_v2, 16  ;;  %v9495_v10 = vshll.u32 %v9368_v2, 16  ;;  %v18321_v29 = vor.u32 %v9479_v27, %v9478_v15  ;;  %v9343_v15 = vld [vmem:[#allocation2] sm:$0xc0]  ;;  %v13821_v27 = vld [vmem:[%s18559_s1 + $0xcf8] sm:$0xff]  }
 0x83d   :  { %9237 = vmatprep.mubr.bf16.mxu0 %v18126_v17  ;;  %12258 = vmatpush3.bf16.msra.mxu0 %v13799_v25  ;;  %v18308_v17 = vsel %vm1172_vm5, %v9460_v43, %v9472_v35  ;;  %v18329_v55 = vsel %vm1172_vm5, %v9456_v42, %v9468_v49  ;;  %v9359_v50 = vsel %vm98_vm3, %v18025_v8, %v18312_v20  ;;  %v13814_v42 = vld [vmem:[%s18559_s1 + $0xd28] sm:$0xff]   ;;  %v9034_v26 = vshll.u32 %v8407_v62, 16 }
 0x83e   :  { %12259 = vmatprep.subr.bf16.mxu0 %v13801_v7  ;;  %12932 = vmatprep.subr.bf16.mxu1 %v18641_v5  ;;  %v9483_v59 = vshrl.u32 %v9359_v50, 16  ;;  %v9486_v12 = vshll.u32 %v9359_v50, 16  ;;  %v9494_v11 = vrot.slane %v9492_v63, 6  ;;  %v9497_v43 = vrot.slane %v9495_v10, 7 }
 0x83f   :  { %12913 = vmatmul.mubr.bf16.gmra.mrb[104].mxu1 %v18149_v28  ;;  %v13805_v28 = vld [vmem:[%s18559_s1 + $0xcd0] sm:$0xff]   ;;  %v18343_v25 = vsel %vm1172_vm5, %v9468_v49, %v18321_v29  ;;  %v9422_v49 = vshll.u32 %v9343_v15, 16 }
 0x840   :  { %12916 = vmatprep.mubr.msk.bf16.mxu1 %vm13859_vm0, %v18641_v5  ;;  %12933 = vmatpush3.bf16.msra.mxu1 %v13806_v16  ;;  %v9485_v8 = vrot.slane %v9483_v59, 6  ;;  %v9488_v57 = vrot.slane %v9486_v12, 7  ;;  %v18345_v9 = vor.u32 %v9497_v43, %v9494_v11  ;;  %v9501_v59 = vrot.slane %v9356_v14, 7 }
 0x841   :  { %12260 = vmatpush3.bf16.msra.mxu0 %v13802_v56  ;;  %12934 = vmatprep.subr.bf16.mxu1 %v18641_v5  ;;  %v13819_v56 = vld [vmem:[%s18559_s1 + $0xd78] sm:$0xff]   ;;  %v9424_v2 = vrot.slane %v9422_v49, 7 }
 0x842   :  { %12261 = vmatprep.subr.bf16.mxu0 %v13804_v30  ;;  %v18355_v46 = vor.u32 %v9488_v57, %v9485_v8  ;;  %v18359_v7 = vsel %vm1172_vm5, %v9476_v13, %v18345_v9  ;;  %v9419_v30 = vshrl.u32 %v9343_v15, 16 }
 0x844   :  { %9238 = vmatmul.mubr.bf16.gmra.mrb[68].mxu0 %v17922_v41  ;;  %12935 = vmatpush3.bf16.msra.mxu1 %v13809_v45  ;;  %v13810_v41 = vld [vmem:[%s18559_s1 + $0xd20] sm:$0xff]  }
 0x845   :  { %9245 = vmatprep.mubr.bf16.mxu0 %v18157_v60  ;;  %12262 = vmatpush3.bf16.msra.mxu0 %v13805_v28  ;;  %v18368_v60 = vsel %vm1172_vm5, %v9472_v35, %v18355_v46 }
 0x846   :  { %12263 = vmatprep.subr.bf16.mxu0 %v13807_v23  ;;  %12936 = vmatprep.subr.bf16.mxu1 %v18641_v5 }
 0x847   :  { %12917 = vmatmul.mubr.bf16.gmra.mrb[108].mxu1 %v18176_v22  ;;  %v8390_v22 = vshrl.u32 %v18137_v61, 16  ;;  %v9022_v61 = vshrl.u32 %v18199_v47, 16 }
 0x848   :  { %12920 = vmatprep.mubr.msk.bf16.mxu1 %vm13859_vm0, %v18641_v5  ;;  %12937 = vmatpush3.bf16.msra.mxu1 %v13811_v21 }
 0x849   :  { %12264 = vmatpush3.bf16.msra.mxu0 %v13808_v24  ;;  %12938 = vmatprep.subr.bf16.mxu1 %v18641_v5  ;;  %v9026_v16 = vshll.u32 %v8390_v22, 16  ;;  %v9024_v35 = vor.u32 %v9022_v61, %v18218_v53 }
 0x84a   :  { %12265 = vmatprep.subr.bf16.mxu0 %v13810_v41 }
 0x84b   :  { %v9028_v53 = vrot.slane %v9026_v16, 1 }
 0x84c   :  { %9246 = vmatmul.mubr.bf16.gmra.mrb[72].mxu0 %v17936_v52  ;;  %12939 = vmatpush3.bf16.msra.mxu1 %v13813_v19  ;;  %v13817_v52 = vld [vmem:[%s18559_s1 + $0xd30] sm:$0xff]  }
 0x84d   :  { %9253 = vmatprep.mubr.bf16.mxu0 %v18230_v54  ;;  %12266 = vmatpush3.bf16.msra.mxu0 %v13812_v1  ;;  %v9030_v54 = vshrl.u32 %v18191_v18, 16  ;;  %v9029_v62 = vsel %vm98_vm3, %v9024_v35, %v9028_v53  ;;  %v9036_v18 = vrot.slane %v9034_v26, 1 }
 0x84e   :  { %12267 = vmatprep.subr.bf16.mxu0 %v13814_v42  ;;  %12940 = vmatprep.subr.bf16.mxu1 %v18641_v5 }
 0x84f   :  { %12921 = vmatmul.mubr.bf16.gmra.mrb[112].mxu1 %v18226_v39  ;;  %v13818_v39 = vld [vmem:[%s18559_s1 + $0xcf0] sm:$0xff]   ;;  %v9032_v13 = vor.u32 %v9030_v54, %v18215_v6  ;;  %s13861_s1 = smov [#allocation4]  }
 0x850   :  { %12924 = vmatprep.mubr.msk.bf16.mxu1 %vm13859_vm0, %v18641_v5  ;;  %12941 = vmatpush3.bf16.msra.mxu1 %v13816_v34  ;;  %s9998_s27 = sshll.u32 %s13861_s1, 4  ;;  %s9999_s27 = int_to_ptr.vmem [resolvable:$true] %s9998_s27 }
 0x851   :  { %12268 = vmatpush3.bf16.msra.mxu0 %v13815_v3  ;;  %12942 = vmatprep.subr.bf16.mxu1 %v18641_v5  ;;  %v9037_v6 = vsel %vm98_vm3, %v9032_v13, %v9036_v18  ;;  %s13834_s28 = scalar_lea.vmem %s9999_s27, 32  ;;  %p13839_p1 = scmp.lt.s32.totalorder %s9999_s27, %s9999_s27 }
 0x852   :  { %12269 = vmatprep.subr.bf16.mxu0 %v13817_v52  ;;  %p13835_p0 = scmp.ne.s32.totalorder %s9999_s27, %s13834_s28  ;;  %p13840_p2 = scmp.lt.s32.totalorder %s13834_s28, %s13834_s28 }
 0x854   :  { %9254 = vmatmul.mubr.bf16.gmra.mrb[76].mxu0 %v18009_v33  ;;  %12943 = vmatpush3.bf16.msra.mxu1 %v13819_v56  ;;  %v9421_v33 = vrot.slane %v9419_v30, 6  ;;  %p13841_p3 = por %p13840_p2, %p13839_p1 }
 0x855   :  { %9261 = vmatprep.mubr.bf16.mxu0 %v9029_v62  ;;  %12270 = vmatpush3.bf16.msra.mxu0 %v13818_v39 }
 0x856   :  { %12271 = vmatprep.subr.bf16.mxu0 %v13820_v51  ;;  %v9425_v63 = vor.u32 %v9424_v2, %v9421_v33  ;;  %p13842_p4 = pnand %p13841_p3, %p13835_p0 }
 0x857   :  { %12925 = vmatmul.mubr.bf16.gmra.mrb[116].mxu1 %v9037_v6 }
 0x858   :  { %12944 = vmatprep.mubr.msk.bf16.mxu1 %vm13859_vm0, %v18641_v5  ;;  %v9429_v10 = vsel %vm1172_vm5, %v9425_v63, %v18247_v31 }
 0x859   :  { %12272 = vmatpush3.bf16.msra.mxu0 %v13821_v27 }
 0x85c   :  { %9262 = vmatmul.mubr.bf16.gmra.mrb[80].mxu0 %v18199_v47  ;;  %v9360_v47 = vshrl.u32 %v18269_v40, 16 }
 0x85d   :  { %9713 = vmatprep.mubr.bf16.mxu0 %v18265_v32 }
 0x85e   :  { %v9500_v28 = vrot.slane %v9360_v47, 6 }
 0x85f   :  { %12945 = vmatmul.mubr.bf16.vlgmr.msra.gmra.mrb[100].mxu1 %v18257_v48  ;;  %v9362_v48 = vor.u32 %v9360_v47, %v18312_v20 }
 0x860   :  { %12948 = vmatprep.mubr.msk.bf16.mxu1 %vm13859_vm0, %v18641_v5  ;;  %v9502_v12 = vor.u32 %v9501_v59, %v9500_v28 }
 0x861   :  { %v9505_v31 = vshrl.u32 %v9362_v48, 16  ;;  %v9508_v32 = vshll.u32 %v9362_v48, 16 }
 0x862   :  { %v9503_v11 = vsel %vm1172_vm5, %v18321_v29, %v9502_v12 }
 0x863   :  { %v9507_v45 = vrot.slane %v9505_v31, 6  ;;  %v9510_v50 = vrot.slane %v9508_v32, 7 }
 0x864   :  { %9714 = vmatmul.mubr.bf16.vlgmr.msra.gmra.mrb[84].mxu0 %v9429_v10 }
 0x865   :  { %9721 = vmatprep.mubr.bf16.mxu0 %v18277_v4  ;;  %v9514_v4 = vshrl.u32 %v18291_v58, 16 }
 0x867   :  { %12949 = vmatmul.mubr.bf16.gmra.mrb[104].mxu1 %v18282_v37  ;;  %v9517_v37 = vshll.u32 %v18291_v58, 16 }
 0x868   :  { %12952 = vmatprep.mubr.msk.bf16.mxu1 %vm13859_vm0, %v18641_v5 }
 0x869   :  { %v9519_v20 = vrot.slane %v9517_v37, 7 }
 0x86c   :  { %9722 = vmatmul.mubr.bf16.gmra.mrb[88].mxu0 %v18299_v0  ;;  %v9516_v0 = vrot.slane %v9514_v4, 6 }
 0x86d   :  { %9729 = vmatprep.mubr.bf16.mxu0 %v18308_v17  ;;  %v9511_v17 = vor.u32 %v9510_v50, %v9507_v45 }
 0x86f   :  { %12953 = vmatmul.mubr.bf16.gmra.mrb[108].mxu1 %v18319_v38  ;;  %v9520_v38 = vor.u32 %v9519_v20, %v9516_v0  ;;  %v9512_v58 = vsel %vm1172_vm5, %v18355_v46, %v9511_v17 }
 0x870   :  { %12956 = vmatprep.mubr.msk.bf16.mxu1 %vm13859_vm0, %v18641_v5 }
 0x874   :  { %9730 = vmatmul.mubr.bf16.gmra.mrb[92].mxu0 %v18329_v55  ;;  %v9521_v55 = vsel %vm1172_vm5, %v18345_v9, %v9520_v38 }
 0x875   :  { %9737 = vmatprep.mubr.bf16.mxu0 %v18368_v60 }
 0x877   :  { %12957 = vmatmul.mubr.bf16.gmra.mrb[112].mxu1 %v18359_v7 }
 0x878   :  { %12960 = vmatprep.mubr.msk.bf16.mxu1 %vm13859_vm0, %v18641_v5 }
 0x87c   :  { %9738 = vmatmul.mubr.bf16.gmra.mrb[96].mxu0 %v18343_v25 }
 0x87d   :  { %9745 = vmatprep.mubr.bf16.mxu0 %v9512_v58 }
 0x87f   :  { %12961 = vmatmul.mubr.bf16.gmra.mrb[116].mxu1 %v9521_v55 }
 0x884   :  { %9746 = vmatmul.mubr.bf16.gmra.mrb[100].mxu0 %v9503_v11 }
 0x8e7   :  { %v12155_v5 = vpop.f32.mrb[44].mxu0 }
 0x8e8   :  { %v12156_v43 = vpop.f32.mrb[45].mxu0 }
 0x8e9   :  { %v12157_v23 = vadd.f32 %v12156_v43, %v12155_v5  ;;  %v12158_v40 = vpop.f32.mrb[46].mxu0 }
 0x8ea   :  { %v12159_v14 = vpop.f32.mrb[47].mxu0 }
 0x8eb   :  { %v12160_v8 = vadd.f32 %v12159_v14, %v12158_v40 }
 0x8ef   :  { %v12161_v25 = vpop.f32.mrb[48].mxu0 }
 0x8f0   :  { %v12162_v57 = vpop.f32.mrb[49].mxu0 }
 0x8f1   :  { %v12163_v21 = vadd.f32 %v12162_v57, %v12161_v25  ;;  %v12164_v24 = vpop.f32.mrb[50].mxu0 }
 0x8f2   :  { %v12165_v46 = vpop.f32.mrb[51].mxu0 }
 0x8f3   :  { %v12166_v7 = vadd.f32 %v12165_v46, %v12164_v24 }
 0x8f7   :  { %v12167_v41 = vpop.f32.mrb[52].mxu0 }
 0x8f8   :  { %v12168_v9 = vpop.f32.mrb[53].mxu0 }
 0x8f9   :  { %v12169_v60 = vadd.f32 %v12168_v9, %v12167_v41  ;;  %v12170_v19 = vpop.f32.mrb[54].mxu0 }
 0x8fa   :  { %v12171_v1 = vpop.f32.mrb[55].mxu0 }
 0x8fb   :  { %v12172_v22 = vadd.f32 %v12171_v1, %v12170_v19 }
 0x8ff   :  { %v12173_v29 = vpop.f32.mrb[56].mxu0 }
 0x900   :  { %v12174_v42 = vpop.f32.mrb[57].mxu0 }
 0x901   :  { %v12175_v34 = vadd.f32 %v12174_v42, %v12173_v29  ;;  %v12176_v3 = vpop.f32.mrb[58].mxu0 }
 0x902   :  { %v12177_v61 = vpop.f32.mrb[59].mxu0 }
 0x903   :  { %v12178_v16 = vadd.f32 %v12177_v61, %v12176_v3 }
 0x907   :  { %v12179_v52 = vpop.f32.mrb[60].mxu0 }
 0x908   :  { %v12180_v35 = vpop.f32.mrb[61].mxu0 }
 0x909   :  { %v12181_v54 = vadd.f32 %v12180_v35, %v12179_v52  ;;  %v12182_v26 = vpop.f32.mrb[62].mxu0 }
 0x90a   :  { %v12183_v56 = vpop.f32.mrb[63].mxu0 }
 0x90b   :  { %v12184_v39 = vadd.f32 %v12183_v56, %v12182_v26 }
 0x90f   :  { %v12214_v53 = vpop.f32.mrb[64].mxu0 }
 0x910   :  { %v12215_v13 = vpop.f32.mrb[65].mxu0 }
 0x911   :  { %v12216_v51 = vadd.f32 %v12215_v13, %v12214_v53  ;;  %v12217_v62 = vpop.f32.mrb[66].mxu0 }
 0x912   :  { %v12218_v18 = vpop.f32.mrb[67].mxu0 }
 0x913   :  { %v13114_v15 = vadd.f32 %v12216_v51, %v12157_v23  ;;  %v12219_v27 = vadd.f32 %v12218_v18, %v12217_v62 }
 0x915   :  { %v13117_v6 = vadd.f32 %v12219_v27, %v12160_v8  ;;  %v18709_v27 = vld [vmem:[#allocation16_spill] sm:$0xff] }
 0x917   :  { %v12220_v30 = vpop.f32.mrb[68].mxu0 }
 0x918   :  { %v12221_v49 = vpop.f32.mrb[69].mxu0 }
 0x919   :  { %v12222_v33 = vadd.f32 %v12221_v49, %v12220_v30  ;;  %v12223_v2 = vpop.f32.mrb[70].mxu0 }
 0x91a   :  { %v12224_v63 = vpop.f32.mrb[71].mxu0 }
 0x91b   :  { %v13120_v10 = vadd.f32 %v12222_v33, %v12163_v21  ;;  %v12225_v47 = vadd.f32 %v12224_v63, %v12223_v2  ;;  %v18710_v63 = vld [vmem:[#allocation15_spill] sm:$0xff] }
 0x91d   :  { %v13123_v48 = vadd.f32 %v12225_v47, %v12166_v7 }
 0x91f   :  { %v12226_v31 = vpop.f32.mrb[72].mxu0 }
 0x920   :  { %v12227_v32 = vpop.f32.mrb[73].mxu0 }
 0x921   :  { %v12228_v4 = vadd.f32 %v12227_v32, %v12226_v31  ;;  %v12229_v37 = vpop.f32.mrb[74].mxu0 }
 0x922   :  { %v12230_v45 = vpop.f32.mrb[75].mxu0 }
 0x923   :  { %v18456_v50 = vadd.f32 %v12228_v4, %v12169_v60  ;;  %v12231_v0 = vadd.f32 %v12230_v45, %v12229_v37 }
 0x925   :  { %v18458_v20 = vadd.f32 %v12231_v0, %v12172_v22 }
 0x927   :  { %v12232_v17 = vpop.f32.mrb[76].mxu0 }
 0x928   :  { %v12233_v38 = vpop.f32.mrb[77].mxu0 }
 0x929   :  { %v12234_v28 = vadd.f32 %v12233_v38, %v12232_v17  ;;  %v12235_v59 = vpop.f32.mrb[78].mxu0 }
 0x92a   :  { %v12236_v58 = vpop.f32.mrb[79].mxu0 }
 0x92b   :  { %v18460_v55 = vadd.f32 %v12234_v28, %v12175_v34  ;;  %v12237_v12 = vadd.f32 %v12236_v58, %v12235_v59  ;;  %v18711_v58 = vld [vmem:[#allocation7_spill] sm:$0xff] }
 0x92d   :  { %v18462_v11 = vadd.f32 %v12237_v12, %v12178_v16 }
 0x92f   :  { %v12238_v5 = vpop.f32.mrb[80].mxu0 }
 0x930   :  { %v12239_v43 = vpop.f32.mrb[81].mxu0 }
 0x931   :  { %v12240_v23 = vadd.f32 %v12239_v43, %v12238_v5  ;;  %v12241_v40 = vpop.f32.mrb[82].mxu0 }
 0x932   :  { %v12242_v14 = vpop.f32.mrb[83].mxu0  ;;  %v9788_v8 = vpop.f32.mrb[100].mxu1 }
 0x933   :  { %v18464_v25 = vadd.f32 %v12240_v23, %v12181_v54  ;;  %v12243_v57 = vadd.f32 %v12242_v14, %v12241_v40  ;;  %v12946_v21 = vpop.f32.mrb[101].mxu1  ;;  %v18712_v14 = vld [vmem:[#allocation17_spill] sm:$0xff] }
 0x934   :  { %v9791_v24 = vpop.f32.mrb[102].mxu1 }
 0x935   :  { %v18466_v46 = vadd.f32 %v12243_v57, %v12184_v39  ;;  %v12947_v7 = vpop.f32.mrb[103].mxu1  ;;  %v18713_v57 = vld [vmem:[#allocation8_spill] sm:$0xff] }
 0x937   :  { %v12273_v41 = vpop.f32.mrb[84].mxu0 }
 0x938   :  { %v12274_v9 = vpop.f32.mrb[85].mxu0 }
 0x939   :  { %v12275_v60 = vadd.f32 %v12274_v9, %v12273_v41  ;;  %v12276_v19 = vpop.f32.mrb[86].mxu0 }
 0x93a   :  { %v12277_v1 = vpop.f32.mrb[87].mxu0  ;;  %v9796_v22 = vpop.f32.mrb[104].mxu1 }
 0x93b   :  { %v13115_v29 = vadd.f32 %v13114_v15, %v12275_v60  ;;  %v12278_v42 = vadd.f32 %v12277_v1, %v12276_v19  ;;  %v12950_v34 = vpop.f32.mrb[105].mxu1  ;;  %v18714_v1 = vld [vmem:[#allocation18_spill] sm:$0xff] }
 0x93c   :  { %v9799_v3 = vpop.f32.mrb[106].mxu1 }
 0x93d   :  { %v13116_v61 = vadd.f32 %v13115_v29, %v9788_v8  ;;  %v13118_v16 = vadd.f32 %v13117_v6, %v12278_v42  ;;  %v12951_v52 = vpop.f32.mrb[107].mxu1 }
 0x93f   :  { %v9837_v35 = vmax.f32 %v13116_v61, 0.0  ;;  %v13119_v54 = vadd.f32 %v13118_v16, %v9791_v24  ;;  %v12279_v26 = vpop.f32.mrb[88].mxu0 }
 0x940   :  { %v12280_v56 = vpop.f32.mrb[89].mxu0 }
 0x941   :  { %v9847_v39 = vmul.f32 %v9837_v35, %v14686_v44  ;;  %v9838_v53 = vmax.f32 %v13119_v54, 0.0  ;;  %v12281_v13 = vadd.f32 %v12280_v56, %v12279_v26  ;;  %v12282_v51 = vpop.f32.mrb[90].mxu0  ;;  %v18715_v56 = vld [vmem:[#allocation9_spill] sm:$0xff] }
 0x942   :  { %v12283_v62 = vpop.f32.mrb[91].mxu0  ;;  %v9804_v18 = vpop.f32.mrb[108].mxu1 }
 0x943   :  { %v18470_v30 = vadd.f32 %v9847_v39, %v18709_v27  ;;  %v9848_v15 = vmul.f32 %v9838_v53, %v14690_v36  ;;  %v13121_v49 = vadd.f32 %v13120_v10, %v12281_v13  ;;  %v12284_v33 = vadd.f32 %v12283_v62, %v12282_v51  ;;  %v12954_v6 = vpop.f32.mrb[109].mxu1  ;;  %v18716_v27 = vld [vmem:[#allocation19_spill] sm:$0xff] }
 0x944   :  { %v9807_v2 = vpop.f32.mrb[110].mxu1  ;;  %v18717_v6 = vld [vmem:[#allocation10_spill] sm:$0xff] }
 0x945   :  { %v18474_v47 = vadd.f32 %v9848_v15, %v18710_v63  ;;  %v13122_v31 = vadd.f32 %v13121_v49, %v9796_v22  ;;  %v13124_v32 = vadd.f32 %v13123_v48, %v12284_v33  ;;  %v12955_v4 = vpop.f32.mrb[111].mxu1  ;;  %v9903_v37 = vmul.f32 %v18470_v30, %v18470_v30 }
 0x947   :  { %v9887_v45 = vadd.f32 %v18474_v47, %v18470_v30  ;;  %v9904_v0 = vmul.f32 %v18474_v47, %v18474_v47  ;;  %v9839_v17 = vmax.f32 %v13122_v31, 0.0  ;;  %v13125_v10 = vadd.f32 %v13124_v32, %v9799_v3  ;;  %v12285_v38 = vpop.f32.mrb[92].mxu0 }
 0x948   :  { %v12286_v28 = vpop.f32.mrb[93].mxu0 }
 0x949   :  { %v9913_v59 = vadd.f32 %v9904_v0, %v9903_v37  ;;  %v9849_v12 = vmul.f32 %v9839_v17, %v18711_v58  ;;  %v9840_v5 = vmax.f32 %v13125_v10, 0.0  ;;  %v12287_v43 = vadd.f32 %v12286_v28, %v12285_v38  ;;  %v12288_v48 = vpop.f32.mrb[94].mxu0  ;;  %v18718_v0 = vld [vmem:[#allocation20_spill] sm:$0xff] }
 0x94a   :  { %v12289_v23 = vpop.f32.mrb[95].mxu0  ;;  %v9812_v40 = vpop.f32.mrb[112].mxu1 }
 0x94b   :  { %v18484_v8 = vadd.f32 %v9849_v12, %v18712_v14  ;;  %v9850_v21 = vmul.f32 %v9840_v5, %v18713_v57  ;;  %v13127_v24 = vadd.f32 %v18456_v50, %v12287_v43  ;;  %v12290_v7 = vadd.f32 %v12289_v23, %v12288_v48  ;;  %v12958_v41 = vpop.f32.mrb[113].mxu1  ;;  %v18719_v43 = vld [vmem:[#allocation11_spill] sm:$0xff] }
 0x94c   :  { %v9815_v9 = vpop.f32.mrb[114].mxu1  ;;  %v18721_v41 = vld [vmem:[#allocation12_spill] sm:$0xff] }
 0x94d   :  { %v9888_v60 = vadd.f32 %v9887_v45, %v18484_v8  ;;  %v9905_v19 = vmul.f32 %v18484_v8, %v18484_v8  ;;  %v18492_v22 = vadd.f32 %v9850_v21, %v18714_v1  ;;  %v13128_v29 = vadd.f32 %v13127_v24, %v9804_v18  ;;  %v12959_v42 = vpop.f32.mrb[115].mxu1  ;;  %v18720_v24 = vld [vmem:[#allocation21_spill] sm:$0xff] }
 0x94e   :  { %v13130_v34 = vadd.f32 %v18458_v20, %v12290_v7  ;;  %v18722_v42 = vld [vmem:[#allocation22_spill] sm:$0xff] }
 0x94f   :  { %v9914_v3 = vadd.f32 %v9913_v59, %v9905_v19  ;;  %v9889_v61 = vadd.f32 %v9888_v60, %v18492_v22  ;;  %v9906_v50 = vmul.f32 %v18492_v22, %v18492_v22  ;;  %v9841_v16 = vmax.f32 %v13128_v29, 0.0  ;;  %v12291_v52 = vpop.f32.mrb[96].mxu0 }
 0x950   :  { %v13131_v35 = vadd.f32 %v13130_v34, %v9807_v2  ;;  %v12292_v54 = vpop.f32.mrb[97].mxu0 }
 0x951   :  { %v9915_v26 = vadd.f32 %v9914_v3, %v9906_v50  ;;  %v9851_v39 = vmul.f32 %v9841_v16, %v18715_v56  ;;  %v12293_v53 = vadd.f32 %v12292_v54, %v12291_v52  ;;  %v12294_v13 = vpop.f32.mrb[98].mxu0 }
 0x952   :  { %v9842_v51 = vmax.f32 %v13131_v35, 0.0  ;;  %v12295_v62 = vpop.f32.mrb[99].mxu0  ;;  %v9820_v18 = vpop.f32.mrb[116].mxu1 }
 0x953   :  { %v18500_v20 = vadd.f32 %v9851_v39, %v18716_v27  ;;  %v13133_v15 = vadd.f32 %v18460_v55, %v12293_v53  ;;  %v12296_v49 = vadd.f32 %v12295_v62, %v12294_v13  ;;  %v12962_v33 = vpop.f32.mrb[117].mxu1  ;;  %v18723_v39 = vld [vmem:[#allocation13_spill] sm:$0xff]  ;;  %v18724_v13 = vld [vmem:[#allocation23_spill] sm:$0xff]  ;;  %v18725_v62 = vld [vmem:[#allocation14_spill] sm:$0xff] }
 0x954   :  { %v9852_v63 = vmul.f32 %v9842_v51, %v18717_v6  ;;  %v9823_v31 = vpop.f32.mrb[118].mxu1  ;;  %v18726_v33 = vld [vmem:[#allocation24_spill] sm:$0xff] }
 0x955   :  { %v9890_v2 = vadd.f32 %v9889_v61, %v18500_v20  ;;  %v9907_v32 = vmul.f32 %v18500_v20, %v18500_v20  ;;  %v13134_v4 = vadd.f32 %v13133_v15, %v9812_v40  ;;  %v13136_v37 = vadd.f32 %v18462_v11, %v12296_v49  ;;  %v12963_v45 = vpop.f32.mrb[119].mxu1 }
 0x956   :  { %v18509_v17 = vadd.f32 %v9852_v63, %v18718_v0 }
 0x957   :  { %v9916_v10 = vadd.f32 %v9915_v26, %v9907_v32  ;;  %v9843_v38 = vmax.f32 %v13134_v4, 0.0  ;;  %v13137_v55 = vadd.f32 %v13136_v37, %v9815_v9  ;;  %v12297_v28 = vpop.f32.mrb[100].mxu0 }
 0x958   :  { %v9891_v59 = vadd.f32 %v9890_v2, %v18509_v17  ;;  %v9908_v12 = vmul.f32 %v18509_v17, %v18509_v17  ;;  %v12298_v5 = vpop.f32.mrb[101].mxu0 }
 0x959   :  { %v9853_v48 = vmul.f32 %v9843_v38, %v18719_v43  ;;  %v9844_v23 = vmax.f32 %v13137_v55, 0.0  ;;  %v12299_v40 = vadd.f32 %v12298_v5, %v12297_v28  ;;  %v12300_v14 = vpop.f32.mrb[102].mxu0 }
 0x95a   :  { %v9917_v11 = vadd.f32 %v9916_v10, %v9908_v12  ;;  %v12301_v21 = vpop.f32.mrb[103].mxu0 }
 0x95b   :  { %v18516_v7 = vadd.f32 %v9853_v48, %v18720_v24  ;;  %v9854_v60 = vmul.f32 %v9844_v23, %v18721_v41  ;;  %v13139_v9 = vadd.f32 %v18464_v25, %v12299_v40  ;;  %v12302_v19 = vadd.f32 %v12301_v21, %v12300_v14 }
 0x95d   :  { %v9892_v1 = vadd.f32 %v9891_v59, %v18516_v7  ;;  %v9909_v29 = vmul.f32 %v18516_v7, %v18516_v7  ;;  %v9874_v34 = vadd.f32 %v9854_v60, %v18722_v42  ;;  %v13140_v3 = vadd.f32 %v13139_v9, %v9820_v18 }
 0x95e   :  { %v13142_v61 = vadd.f32 %v18466_v46, %v12302_v19 }
 0x95f   :  { %v9918_v50 = vadd.f32 %v9917_v11, %v9909_v29  ;;  %v9893_v16 = vadd.f32 %v9892_v1, %v9874_v34  ;;  %v9910_v52 = vmul.f32 %v9874_v34, %v9874_v34  ;;  %v9845_v35 = vmax.f32 %v13140_v3, 0.0 }
 0x960   :  { %v13143_v54 = vadd.f32 %v13142_v61, %v9823_v31 }
 0x961   :  { %v9919_v26 = vadd.f32 %v9918_v50, %v9910_v52  ;;  %v9855_v53 = vmul.f32 %v9845_v35, %v18723_v39 }
 0x962   :  { %v9846_v25 = vmax.f32 %v13143_v54, 0.0 }
 0x963   :  { %v9875_v51 = vadd.f32 %v9855_v53, %v18724_v13 }
 0x964   :  { %v9856_v27 = vmul.f32 %v9846_v25, %v18725_v62 }
 0x965   :  { %v9894_v15 = vadd.f32 %v9893_v16, %v9875_v51  ;;  %v9911_v49 = vmul.f32 %v9875_v51, %v9875_v51 }
 0x966   :  { %v9876_v63 = vadd.f32 %v9856_v27, %v18726_v33 }
 0x967   :  { %v9920_v18 = vadd.f32 %v9919_v26, %v9911_v49 }
 0x968   :  { %v9895_v2 = vadd.f32 %v9894_v15, %v9876_v63  ;;  %v9912_v46 = vmul.f32 %v9876_v63, %v9876_v63 }
 0x96a   :  { %v9896_v32 = vrot.slane %v9895_v2, 4  ;;  %v9921_v4 = vadd.f32 %v9920_v18, %v9912_v46 }
 0x96c   :  { %v9897_v37 = vadd.f32 %v9896_v32, %v9895_v2  ;;  %v9922_v45 = vrot.slane %v9921_v4, 4 }
 0x96e   :  { %v9898_v31 = vrot.slane %v9897_v37, 2  ;;  %v9923_v0 = vadd.f32 %v9922_v45, %v9921_v4 }
 0x970   :  { %v9899_v10 = vadd.f32 %v9898_v31, %v9897_v37  ;;  %v9924_v38 = vrot.slane %v9923_v0, 2 }
 0x972   :  { %v9900_v55 = vrot.slane %v9899_v10, 1  ;;  %v9925_v28 = vadd.f32 %v9924_v38, %v9923_v0 }
 0x974   :  { %v9901_v59 = vadd.f32 %v9900_v55, %v9899_v10  ;;  %v9926_v12 = vrot.slane %v9925_v28, 1 }
 0x976   :  { %v9902_v5 = vmul.f32 0.03125, %v9901_v59  ;;  %v9927_v48 = vadd.f32 %v9926_v12, %v9925_v28 }
 0x978   :  { %v9928_v23 = vmul.f32 0.03125, %v9927_v48  ;;  %v9929_v40 = vmul.f32 %v9902_v5, %v9902_v5  ;;  %v9941_v14 = vsub.f32 %v9876_v63, %v9902_v5  ;;  %v9932_v11 = vsub.f32 %v18470_v30, %v9902_v5 }
 0x979   :  { %v9933_v21 = vsub.f32 %v18474_v47, %v9902_v5  ;;  %v9934_v24 = vsub.f32 %v18484_v8, %v9902_v5  ;;  %v9935_v60 = vsub.f32 %v18492_v22, %v9902_v5  ;;  %v9936_v9 = vsub.f32 %v18500_v20, %v9902_v5 }
 0x97a   :  { %v9930_v19 = vsub.f32 %v9928_v23, %v9929_v40  ;;  %v9937_v1 = vsub.f32 %v18509_v17, %v9902_v5  ;;  %v9938_v29 = vsub.f32 %v18516_v7, %v9902_v5  ;;  %v9939_v42 = vsub.f32 %v9874_v34, %v9902_v5 }
 0x97b   :  { %v9940_v3 = vsub.f32 %v9875_v51, %v9902_v5 }
 0x97c   :  { %v9931_v61 = vmax.f32 %v9930_v19, 0.0 }
 0x97e   :  { %v9942_v50 = vadd.f32 1e-05, %v9931_v61 }
 0x980   :  { %13832 = vrsqrt.f32 %v9942_v50 }
 0x98a   :  { %v13833_v16 = vpop.eup %13832 }
 0x98b   :  { %v9953_v30 = vmul.f32 %v13833_v16, %v9941_v14  ;;  %v9944_v52 = vmul.f32 %v13833_v16, %v9932_v11  ;;  %v9945_v47 = vmul.f32 %v13833_v16, %v9933_v21  ;;  %v9946_v35 = vmul.f32 %v13833_v16, %v9934_v24 }
 0x98c   :  { %v9947_v8 = vmul.f32 %v13833_v16, %v9935_v60  ;;  %v9948_v54 = vmul.f32 %v13833_v16, %v9936_v9  ;;  %v9949_v22 = vmul.f32 %v13833_v16, %v9937_v1  ;;  %v9950_v26 = vmul.f32 %v13833_v16, %v9938_v29 }
 0x98d   :  { %v9951_v20 = vmul.f32 %v13833_v16, %v9939_v42  ;;  %v9952_v53 = vmul.f32 %v13833_v16, %v9940_v3  ;;  %v9954_v17 = vmul.f32 %v9944_v52, %v14686_v44  ;;  %v9955_v7 = vmul.f32 %v9945_v47, %v14690_v36 }
 0x98e   :  { %v9959_v34 = vmul.f32 %v9949_v22, %v18717_v6  ;;  %v9960_v25 = vmul.f32 %v9950_v26, %v18719_v43  ;;  %v9956_v13 = vmul.f32 %v9946_v35, %v18711_v58  ;;  %v9957_v49 = vmul.f32 %v9947_v8, %v18713_v57 }
 0x98f   :  { %v9964_v51 = vadd.f32 %v9955_v7, %v9954_v17  ;;  %v9961_v27 = vmul.f32 %v9951_v20, %v18721_v41  ;;  %v9962_v63 = vmul.f32 %v9952_v53, %v18723_v39  ;;  %v9958_v44 = vmul.f32 %v9948_v54, %v18715_v56 }
 0x990   :  { %v9974_v15 = vadd.f32 %v9960_v25, %v9959_v34  ;;  %v9963_v36 = vmul.f32 %v9953_v30, %v18725_v62 }
 0x991   :  { %v9965_v33 = vadd.f32 %v9964_v51, %v9956_v13 }
 0x992   :  { %v9975_v18 = vadd.f32 %v9974_v15, %v9961_v27 }
 0x993   :  { %v9966_v2 = vadd.f32 %v9965_v33, %v9957_v49 }
 0x994   :  { %v9976_v6 = vadd.f32 %v9975_v18, %v9962_v63 }
 0x995   :  { %v9967_v46 = vadd.f32 %v9966_v2, %v9958_v44 }
 0x996   :  { %v9977_v43 = vadd.f32 %v9976_v6, %v9963_v36 }
 0x997   :  { %v9968_v32 = vrot.slane %v9967_v46, 4 }
 0x998   :  { %v9978_v58 = vrot.slane %v9977_v43, 4 }
 0x999   :  { %v9969_v4 = vadd.f32 %v9968_v32, %v9967_v46 }
 0x99a   :  { %v9979_v37 = vadd.f32 %v9978_v58, %v9977_v43 }
 0x99b   :  { %v9970_v41 = vrot.slane %v9969_v4, 2 }
 0x99c   :  { %v9980_v45 = vrot.slane %v9979_v37, 2 }
 0x99d   :  { %v9971_v31 = vadd.f32 %v9970_v41, %v9969_v4 }
 0x99e   :  { %v9981_v57 = vadd.f32 %v9980_v45, %v9979_v37 }
 0x99f   :  { %v9972_v0 = vrot.slane %v9971_v31, 1 }
 0x9a0   :  { %v9982_v10 = vrot.slane %v9981_v57, 1 }
 0x9a1   :  { %v9973_v39 = vadd.f32 %v9972_v0, %v9971_v31 }
 0x9a2   :  { %v9983_v38 = vadd.f32 %v9982_v10, %v9981_v57 }
 0x9a3   :  { %v9984_v56 = vmul.f32 0.0625, %v9973_v39 }
 0x9a4   :  { %v9985_v62 = vmul.f32 0.0625, %v9983_v38 }
 0x9a6   :  { %v9989_v55 = vsel %vm9988_vm6, %v9985_v62, %v9984_v56 }
 0x9a7   :  { %9991 = vst [vmem:[#allocation4] sm:$0x3] %v9989_v55 }
 0x9a8   :  { %13845 = shalt.err (!%p13842_p4)
}
 0x9a9   :  { %s13846_s4 = scalar_lea.hbm %s18561_s3, 32 }
 0x9aa   :  { %p13847_p5 = scmp.ne.s32.totalorder %s18561_s3, %s13846_s4  ;;  %p13850_p6 = scmp.lt.u32.totalorder %s13846_s4, %s18561_s3 }
 0x9ac   :  { %p13852_p7 = pnand %p13850_p6, %p13847_p5 }
 0x9ae   :  { %13855 = shalt.err (!%p13852_p7)
}
 0x9af   :  { %10001 = dma.vmem_to_hbm [thread:$0]  %s9999_s27, 32, %s18561_s3, [#allocation5]  }
 0x9b0   :  { %13856 = dma.done.wait [#allocation5], 32  }
 0x9b1   :  { %13857 = vsyncadd [#allocation5], 4294967264 }
 0x9b2   :  { %10005 = vsyncpa [#allocation5], 1 }

</bundles_post_ra>
